<compile_context>
chip_gen: v7x
topology: tpu7x:2x2x1
jax: 0.10.0
libtpu: 0.0.40
codegen_flags: <defaults>
</compile_context>

<pallas_src>
import functools
import numpy as np

import jax
import jax.numpy as jnp
from jax.experimental import pallas as pl
from jax.experimental.pallas import tpu as pltpu

_EPS = 1e-5


def _round_up(x, m):
    return ((x + m - 1) // m) * m


def _row_tiling(m):
    """(padded rows, row tile): whole array when small, 512-row tiles else."""
    if m <= 1024:
        mp = _round_up(m, 8)
        return mp, mp
    return _round_up(m, 512), 512


# ----------------------------- Pallas kernels --------------------------------

def _matmul_stats_kernel(x_ref, w_ref, m_ref, o_ref, s_ref, q_ref):
    # conv-as-matmul (bf16 operands, f32 accumulate) + per-channel sum/sumsq
    o = jnp.dot(x_ref[...], w_ref[...], preferred_element_type=jnp.float32)
    o_ref[...] = o

    @pl.when(pl.program_id(0) == 0)
    def _():
        s_ref[...] = jnp.zeros_like(s_ref)
        q_ref[...] = jnp.zeros_like(q_ref)

    om = o * m_ref[...]                      # mask out padded rows
    s_ref[...] += jnp.sum(om, axis=0, keepdims=True)
    q_ref[...] += jnp.sum(om * om, axis=0, keepdims=True)


def _bn_relu_matmul_stats_kernel(x_ref, s_ref, b_ref, w_ref, m_ref,
                                 o_ref, os_ref, oq_ref):
    # fused BN (scale/shift) + ReLU + 1x1 conv + output stats
    h = jnp.maximum(x_ref[...] * s_ref[...] + b_ref[...], 0.0)
    o = jnp.dot(h.astype(jnp.bfloat16), w_ref[...],
                preferred_element_type=jnp.float32)
    o_ref[...] = o

    @pl.when(pl.program_id(0) == 0)
    def _():
        os_ref[...] = jnp.zeros_like(os_ref)
        oq_ref[...] = jnp.zeros_like(oq_ref)

    om = o * m_ref[...]
    os_ref[...] += jnp.sum(om, axis=0, keepdims=True)
    oq_ref[...] += jnp.sum(om * om, axis=0, keepdims=True)


def _bn_relu_kernel(x_ref, s_ref, b_ref, o_ref):
    o_ref[...] = jnp.maximum(x_ref[...] * s_ref[...] + b_ref[...], 0.0)


def _bn_relu_conv3x3_stats_kernel(x_ref, s_ref, b_ref, w_ref, mi_ref, mo_ref,
                                  o_ref, os_ref, oq_ref, h_scr,
                                  *, starts, rp8):
    # One image per grid step.  x_ref holds the raw bottleneck in a
    # zero-padded flat-spatial layout; BN+ReLU is applied once (masked so the
    # conv's zero padding stays exactly zero) and the 3x3 conv is done as
    # 9 shifted matmuls straight from VMEM scratch (im2col never hits HBM).
    h = jnp.maximum(x_ref[0] * s_ref[...] + b_ref[...], 0.0) * mi_ref[...]
    h_scr[...] = h

    cout = o_ref.shape[-1]
    acc = jnp.zeros((rp8, cout), jnp.float32)
    for t, start in enumerate(starts):
        acc += jnp.dot(h_scr[pl.ds(start, rp8), :].astype(jnp.bfloat16),
                       w_ref[t], preferred_element_type=jnp.float32)
    o_ref[0] = acc

    @pl.when(pl.program_id(0) == 0)
    def _():
        os_ref[...] = jnp.zeros_like(os_ref)
        oq_ref[...] = jnp.zeros_like(oq_ref)

    om = acc * mo_ref[...]                   # only valid output pixels
    os_ref[...] += jnp.sum(om, axis=0, keepdims=True)
    oq_ref[...] += jnp.sum(om * om, axis=0, keepdims=True)


def _maxpool_stats_kernel(a_ref, b_ref, cm_ref, o_ref, os_ref, oq_ref, scr):
    # 3x3 / stride-2 max-pool.  a_ref = padded rows (2*oh, 2*oh+1),
    # b_ref = padded rows (2*oh+2, 2*oh+3).  The kernel produces the window
    # max for every column anchor; the wrapper keeps the stride-2 anchors.
    r = jnp.maximum(jnp.maximum(a_ref[0, 0], a_ref[0, 1]), b_ref[0, 0])
    wp = r.shape[0]
    scr[...] = jnp.zeros_like(scr)
    scr[pl.ds(0, wp), :] = r
    anch = jnp.maximum(
        jnp.maximum(scr[pl.ds(0, wp), :], scr[pl.ds(1, wp), :]),
        scr[pl.ds(2, wp), :])
    o_ref[0, 0] = anch

    @pl.when((pl.program_id(0) == 0) & (pl.program_id(1) == 0))
    def _():
        os_ref[...] = jnp.zeros_like(os_ref)
        oq_ref[...] = jnp.zeros_like(oq_ref)

    am = anch * cm_ref[...]                  # only stride-2 anchors count
    os_ref[...] += jnp.sum(am, axis=0, keepdims=True)
    oq_ref[...] += jnp.sum(am * am, axis=0, keepdims=True)


def _transition_stats_kernel(x_ref, s_ref, b_ref, p_ref, w_ref,
                             o_ref, os_ref, oq_ref):
    # fused BN + ReLU + 2x2 avg-pool (pooling matmul) + 1x1 conv + stats.
    # (avg-pool commutes with the 1x1 conv, so pooling first is exact.)
    h0 = jnp.maximum(x_ref[0, 0] * s_ref[...] + b_ref[...], 0.0)
    h1 = jnp.maximum(x_ref[0, 1] * s_ref[...] + b_ref[...], 0.0)
    pooled = jnp.dot(p_ref[...], h0 + h1, preferred_element_type=jnp.float32)
    out = jnp.dot(pooled.astype(jnp.bfloat16), w_ref[...],
                  preferred_element_type=jnp.float32)
    o_ref[0, 0] = out

    @pl.when((pl.program_id(0) == 0) & (pl.program_id(1) == 0))
    def _():
        os_ref[...] = jnp.zeros_like(os_ref)
        oq_ref[...] = jnp.zeros_like(oq_ref)

    os_ref[...] += jnp.sum(out, axis=0, keepdims=True)
    oq_ref[...] += jnp.sum(out * out, axis=0, keepdims=True)


def _bn_relu_pool_linear_kernel(x_ref, s_ref, b_ref, w_ref, bias_ref, o_ref):
    # norm5 + relu + global average pool + classifier
    h = jnp.maximum(x_ref[...] * s_ref[...] + b_ref[...], 0.0)   # (N, HW, C)
    pooled = jnp.mean(h, axis=1)                                 # (N, C)
    o_ref[...] = jnp.dot(pooled.astype(jnp.bfloat16), w_ref[...],
                         preferred_element_type=jnp.float32) + bias_ref[...]


# ----------------------------- Pallas wrappers --------------------------------

def pallas_conv_matmul_stats(cols, w):
    """(M, K) bf16 patches @ (K, Cout) bf16 weight + masked channel stats."""
    m, k = cols.shape
    cout = w.shape[1]
    mp, tm = _row_tiling(m)
    cols = jnp.pad(cols, ((0, mp - m), (0, 0)))
    rmask = (jnp.arange(mp) < m).astype(jnp.float32)[:, None]
    out, s, q = pl.pallas_call(
        _matmul_stats_kernel,
        out_shape=(jax.ShapeDtypeStruct((mp, cout), jnp.float32),
                   jax.ShapeDtypeStruct((1, cout), jnp.float32),
                   jax.ShapeDtypeStruct((1, cout), jnp.float32)),
        grid=(mp // tm,),
        in_specs=[pl.BlockSpec((tm, k), lambda i: (i, 0)),
                  pl.BlockSpec((k, cout), lambda i: (0, 0)),
                  pl.BlockSpec((tm, 1), lambda i: (i, 0))],
        out_specs=(pl.BlockSpec((tm, cout), lambda i: (i, 0)),
                   pl.BlockSpec((1, cout), lambda i: (0, 0)),
                   pl.BlockSpec((1, cout), lambda i: (0, 0))),
        compiler_params=pltpu.CompilerParams(dimension_semantics=("arbitrary",)),
    )(cols, w, rmask)
    return out[:m], s[0], q[0]


def pallas_bn_relu(x2d, scale, shift):
    m, c = x2d.shape
    mp, tm = _row_tiling(m)
    xp = jnp.pad(x2d, ((0, mp - m), (0, 0)))
    out = pl.pallas_call(
        _bn_relu_kernel,
        out_shape=jax.ShapeDtypeStruct((mp, c), jnp.float32),
        grid=(mp // tm,),
        in_specs=[pl.BlockSpec((tm, c), lambda i: (i, 0)),
                  pl.BlockSpec((1, c), lambda i: (0, 0)),
                  pl.BlockSpec((1, c), lambda i: (0, 0))],
        out_specs=pl.BlockSpec((tm, c), lambda i: (i, 0)),
        compiler_params=pltpu.CompilerParams(dimension_semantics=("parallel",)),
    )(xp, scale, shift)
    return out[:m]


def pallas_bn_relu_matmul_stats(xbuf, scale, shift, w, m_true, tm):
    mp, cfin = xbuf.shape
    cmid = w.shape[1]
    rmask = (jnp.arange(mp) < m_true).astype(jnp.float32)[:, None]
    out, s, q = pl.pallas_call(
        _bn_relu_matmul_stats_kernel,
        out_shape=(jax.ShapeDtypeStruct((mp, cmid), jnp.float32),
                   jax.ShapeDtypeStruct((1, cmid), jnp.float32),
                   jax.ShapeDtypeStruct((1, cmid), jnp.float32)),
        grid=(mp // tm,),
        in_specs=[pl.BlockSpec((tm, cfin), lambda i: (i, 0)),
                  pl.BlockSpec((1, cfin), lambda i: (0, 0)),
                  pl.BlockSpec((1, cfin), lambda i: (0, 0)),
                  pl.BlockSpec((cfin, cmid), lambda i: (0, 0)),
                  pl.BlockSpec((tm, 1), lambda i: (i, 0))],
        out_specs=(pl.BlockSpec((tm, cmid), lambda i: (i, 0)),
                   pl.BlockSpec((1, cmid), lambda i: (0, 0)),
                   pl.BlockSpec((1, cmid), lambda i: (0, 0))),
        compiler_params=pltpu.CompilerParams(dimension_semantics=("arbitrary",)),
    )(xbuf, scale, shift, w, rmask)
    return out, s[0], q[0]


def _conv3x3_geometry(h, w):
    wpad = w + 2
    rp = (h + 2) * wpad
    rp8 = _round_up(rp, 8)
    halo = w + 3
    rpp = rp8 + 2 * halo
    m_in = np.zeros((rpp, 1), np.float32)
    m_out = np.zeros((rp8, 1), np.float32)
    for hp in range(h + 2):
        for wq in range(wpad):
            if 1 <= hp <= h and 1 <= wq <= w:
                qq = hp * wpad + wq
                m_in[halo + qq, 0] = 1.0
                m_out[qq, 0] = 1.0
    starts = tuple(dy * wpad + dx for dy in range(3) for dx in range(3))
    return rp, rp8, rpp, halo, starts, m_in, m_out


def pallas_bn_relu_conv3x3_stats(bott, scale, shift, w9, n, h, w):
    cmid = bott.shape[1]
    g = w9.shape[-1]
    rp, rp8, rpp, halo, starts, m_in, m_out = _conv3x3_geometry(h, w)
    # zero-padded flat-spatial layout (cheap: ~1.5x copy of a tiny tensor,
    # instead of the 9x im2col blowup).
    x4 = bott.reshape(n, h, w, cmid)
    xsp = jnp.pad(x4, ((0, 0), (1, 1), (1, 1), (0, 0)))
    xpf = jnp.pad(xsp.reshape(n, rp, cmid),
                  ((0, 0), (halo, rpp - rp - halo), (0, 0)))
    kern = functools.partial(_bn_relu_conv3x3_stats_kernel,
                             starts=starts, rp8=rp8)
    outp, s, q = pl.pallas_call(
        kern,
        out_shape=(jax.ShapeDtypeStruct((n, rp8, g), jnp.float32),
                   jax.ShapeDtypeStruct((1, g), jnp.float32),
                   jax.ShapeDtypeStruct((1, g), jnp.float32)),
        grid=(n,),
        in_specs=[pl.BlockSpec((1, rpp, cmid), lambda i: (i, 0, 0)),
                  pl.BlockSpec((1, cmid), lambda i: (0, 0)),
                  pl.BlockSpec((1, cmid), lambda i: (0, 0)),
                  pl.BlockSpec((9, cmid, g), lambda i: (0, 0, 0)),
                  pl.BlockSpec((rpp, 1), lambda i: (0, 0)),
                  pl.BlockSpec((rp8, 1), lambda i: (0, 0))],
        out_specs=(pl.BlockSpec((1, rp8, g), lambda i: (i, 0, 0)),
                   pl.BlockSpec((1, g), lambda i: (0, 0)),
                   pl.BlockSpec((1, g), lambda i: (0, 0))),
        scratch_shapes=[pltpu.VMEM((rpp, cmid), jnp.float32)],
        compiler_params=pltpu.CompilerParams(dimension_semantics=("arbitrary",)),
    )(xpf, scale, shift, w9, jnp.asarray(m_in), jnp.asarray(m_out))
    new = outp[:, :rp, :].reshape(n, h + 2, w + 2, g)[:, 1:h + 1, 1:w + 1, :]
    return new.reshape(n * h * w, g), s[0], q[0]


def pallas_maxpool_stats(x2d, n, h, w):
    """MaxPool 3x3 stride 2 pad 1 on post-ReLU features + pooled-feature stats.

    Post-ReLU values are >= 0, so zero spatial padding is equivalent to -inf.
    """
    c = x2d.shape[1]
    oh, ow = h // 2, w // 2
    wp = w + 2
    xp = jnp.pad(x2d.reshape(n, h, w, c), ((0, 0), (1, 1), (1, 1), (0, 0)))
    cmask = np.zeros((wp, 1), np.float32)
    cmask[0:2 * ow:2, 0] = 1.0
    anch, s, q = pl.pallas_call(
        _maxpool_stats_kernel,
        out_shape=(jax.ShapeDtypeStruct((n, oh, wp, c), jnp.float32),
                   jax.ShapeDtypeStruct((1, c), jnp.float32),
                   jax.ShapeDtypeStruct((1, c), jnp.float32)),
        grid=(n, oh),
        in_specs=[pl.BlockSpec((1, 2, wp, c), lambda i, j: (i, j, 0, 0)),
                  pl.BlockSpec((1, 2, wp, c), lambda i, j: (i, j + 1, 0, 0)),
                  pl.BlockSpec((wp, 1), lambda i, j: (0, 0))],
        out_specs=(pl.BlockSpec((1, 1, wp, c), lambda i, j: (i, j, 0, 0)),
                   pl.BlockSpec((1, c), lambda i, j: (0, 0)),
                   pl.BlockSpec((1, c), lambda i, j: (0, 0))),
        scratch_shapes=[pltpu.VMEM((wp + 2, c), jnp.float32)],
        compiler_params=pltpu.CompilerParams(
            dimension_semantics=("arbitrary", "arbitrary")),
    )(xp, xp, jnp.asarray(cmask))
    pooled = anch[:, :, 0:2 * ow:2, :].reshape(n * oh * ow, c)
    return pooled, s[0], q[0], oh, ow


def pallas_transition_stats(x4, scale, shift, wmat, n, h, w, cin, cout):
    oh, ow = h // 2, w // 2
    pmat = np.zeros((ow, w), np.float32)
    for j in range(ow):
        pmat[j, 2 * j] = 0.25
        pmat[j, 2 * j + 1] = 0.25
    out4, s, q = pl.pallas_call(
        _transition_stats_kernel,
        out_shape=(jax.ShapeDtypeStruct((n, oh, ow, cout), jnp.float32),
                   jax.ShapeDtypeStruct((1, cout), jnp.float32),
                   jax.ShapeDtypeStruct((1, cout), jnp.float32)),
        grid=(n, oh),
        in_specs=[pl.BlockSpec((1, 2, w, cin), lambda i, j: (i, j, 0, 0)),
                  pl.BlockSpec((1, cin), lambda i, j: (0, 0)),
                  pl.BlockSpec((1, cin), lambda i, j: (0, 0)),
                  pl.BlockSpec((ow, w), lambda i, j: (0, 0)),
                  pl.BlockSpec((cin, cout), lambda i, j: (0, 0))],
        out_specs=(pl.BlockSpec((1, 1, ow, cout), lambda i, j: (i, j, 0, 0)),
                   pl.BlockSpec((1, cout), lambda i, j: (0, 0)),
                   pl.BlockSpec((1, cout), lambda i, j: (0, 0))),
        compiler_params=pltpu.CompilerParams(
            dimension_semantics=("arbitrary", "arbitrary")),
    )(x4, scale, shift, jnp.asarray(pmat), wmat)
    return out4.reshape(n * oh * ow, cout), s[0], q[0], oh, ow


def pallas_head(x3, scale, shift, w, bias):
    # NOTE: whole-array block is fine at these sizes; tile over N / set
    # vmem_limit_bytes for very large N*H*W (v7x has 64 MiB VMEM).
    n, hw, c = x3.shape
    ncls = w.shape[1]
    return pl.pallas_call(
        _bn_relu_pool_linear_kernel,
        out_shape=jax.ShapeDtypeStruct((n, ncls), jnp.float32),
        grid=(1,),
        in_specs=[pl.BlockSpec((n, hw, c), lambda i: (0, 0, 0)),
                  pl.BlockSpec((1, c), lambda i: (0, 0)),
                  pl.BlockSpec((1, c), lambda i: (0, 0)),
                  pl.BlockSpec((c, ncls), lambda i: (0, 0)),
                  pl.BlockSpec((1, ncls), lambda i: (0, 0))],
        out_specs=pl.BlockSpec((n, ncls), lambda i: (0, 0)),
        compiler_params=pltpu.CompilerParams(dimension_semantics=("arbitrary",)),
    )(x3, scale, shift, w, bias)


# ----------------------------- plain-JAX glue ---------------------------------

def im2col_bf16(x_nhwc, kh, kw, stride, pad, k_pad):
    """Extract 7x7/s2 conv patches in bf16 -> (N*OH*OW, k_pad)."""
    n, h, w, c = x_nhwc.shape
    xp = jnp.pad(x_nhwc, ((0, 0), (pad, pad), (pad, pad), (0, 0)))
    oh = (h + 2 * pad - kh) // stride + 1
    ow = (w + 2 * pad - kw) // stride + 1
    cols = []
    for i in range(kh):
        for j in range(kw):
            cols.append(xp[:, i:i + stride * oh:stride,
                           j:j + stride * ow:stride, :])
    patches = jnp.stack(cols, axis=3).reshape(n * oh * ow, kh * kw * c)
    patches = jnp.pad(patches, ((0, 0), (0, k_pad - kh * kw * c)))
    return patches, oh, ow


def conv_w_to_2d(w):
    cout, cin, kh, kw = w.shape
    return jnp.transpose(w, (2, 3, 1, 0)).reshape(kh * kw * cin, cout)


def _bn_scale_shift(gamma, beta, csum, cssq, count):
    """Training-mode BatchNorm scale/shift from fused per-channel sums."""
    mean = csum / count
    var = jnp.maximum(cssq / count - mean * mean, 0.0)
    scale = gamma / jnp.sqrt(var + _EPS)
    shift = beta - mean * scale
    return (scale[None, :].astype(jnp.float32),
            shift[None, :].astype(jnp.float32))


# ----------------------------- model definition --------------------------------

def _kaiming_normal(key, shape):
    fan_in = int(np.prod(shape[1:]))
    return jax.random.normal(key, shape, jnp.float32) * jnp.sqrt(2.0 / fan_in)


def init_densenet_params(key, growth_rate, block_config, num_init_features,
                         bn_size, num_classes):
    keys = iter(jax.random.split(key, 256))
    params = {}
    params["conv0"] = _kaiming_normal(next(keys), (num_init_features, 3, 7, 7))
    params["bn0"] = (jnp.ones((num_init_features,), jnp.float32),
                     jnp.zeros((num_init_features,), jnp.float32))
    num_features = num_init_features
    blocks = []
    for i, num_layers in enumerate(block_config):
        layers = []
        for l in range(num_layers):
            cin = num_features + l * growth_rate
            layers.append({
                "bn1": (jnp.ones((cin,), jnp.float32), jnp.zeros((cin,), jnp.float32)),
                "conv1": _kaiming_normal(next(keys), (bn_size * growth_rate, cin, 1, 1)),
                "bn2": (jnp.ones((bn_size * growth_rate,), jnp.float32),
                        jnp.zeros((bn_size * growth_rate,), jnp.float32)),
                "conv2": _kaiming_normal(next(keys),
                                         (growth_rate, bn_size * growth_rate, 3, 3)),
            })
        block = {"layers": layers}
        num_features += growth_rate * num_layers
        if i != len(block_config) - 1:
            block["transition"] = {
                "bn": (jnp.ones((num_features,), jnp.float32),
                       jnp.zeros((num_features,), jnp.float32)),
                "conv": _kaiming_normal(next(keys),
                                        (num_features // 2, num_features, 1, 1)),
            }
            num_features //= 2
        blocks.append(block)
    params["blocks"] = blocks
    params["bn5"] = (jnp.ones((num_features,), jnp.float32),
                     jnp.zeros((num_features,), jnp.float32))
    bound = 1.0 / np.sqrt(num_features)
    params["fc_w"] = jax.random.uniform(next(keys), (num_classes, num_features),
                                        jnp.float32, minval=-bound, maxval=bound)
    params["fc_b"] = jnp.zeros((num_classes,), jnp.float32)
    return params


def prepare_params(params, growth_rate, block_config, num_init_features, bn_size):
    """Hoist weight transposes/reshapes, channel padding and bf16 casts."""
    prep = {}
    w0 = conv_w_to_2d(params["conv0"])
    k0 = w0.shape[0]
    k0p = _round_up(k0, 8)
    prep["conv0_w"] = jnp.pad(w0, ((0, k0p - k0), (0, 0))).astype(jnp.bfloat16)
    prep["bn0"] = params["bn0"]
    cmid = bn_size * growth_rate
    blocks = []
    num_features = num_init_features
    for bi, num_layers in enumerate(block_config):
        cfin = num_features + num_layers * growth_rate
        raw_block = params["blocks"][bi]
        layers = []
        for l in range(num_layers):
            lp = raw_block["layers"][l]
            cin = num_features + l * growth_rate
            g1, b1 = lp["bn1"]
            layers.append({
                # pad BN1 gamma/beta and conv1 rows to the block's final width
                # so the kernel can read the whole feature slab every layer.
                "g1": jnp.pad(g1, (0, cfin - cin)),
                "b1": jnp.pad(b1, (0, cfin - cin)),
                "w1": jnp.pad(lp["conv1"][:, :, 0, 0].T,
                              ((0, cfin - cin), (0, 0))).astype(jnp.bfloat16),
                "g2": lp["bn2"][0],
                "b2": lp["bn2"][1],
                "w2": jnp.transpose(lp["conv2"], (2, 3, 1, 0))
                         .reshape(9, cmid, growth_rate).astype(jnp.bfloat16),
            })
        blk = {"layers": layers}
        num_features = cfin
        if "transition" in raw_block:
            tp = raw_block["transition"]
            blk["transition"] = {
                "g": tp["bn"][0], "b": tp["bn"][1],
                "w": tp["conv"][:, :, 0, 0].T.astype(jnp.bfloat16),
            }
            num_features //= 2
        blocks.append(blk)
    prep["blocks"] = blocks
    prep["bn5"] = params["bn5"]
    prep["fc_w"] = params["fc_w"].T.astype(jnp.bfloat16)
    prep["fc_b"] = params["fc_b"][None, :].astype(jnp.float32)
    return prep


def densenet_forward(prep, x_nchw, *, growth_rate, num_init_features):
    n = x_nchw.shape[0]
    x = jnp.transpose(x_nchw, (0, 2, 3, 1)).astype(jnp.bfloat16)   # NHWC, bf16

    # conv0 (7x7 s2 p3) as im2col matmul, fused bn0 batch statistics
    k0p = prep["conv0_w"].shape[0]
    cols, h, w = im2col_bf16(x, 7, 7, 2, 3, k0p)
    m = n * h * w
    conv0, c0s, c0q = pallas_conv_matmul_stats(cols, prep["conv0_w"])
    g0, b0 = prep["bn0"]
    s0, t0 = _bn_scale_shift(g0, b0, c0s, c0q, m)
    h0 = pallas_bn_relu(conv0, s0, t0)

    # pool0: maxpool 3x3 s2 p1 + stats of the pooled features (feeds bn1)
    feats, fsum, fssq, h, w = pallas_maxpool_stats(h0, n, h, w)
    m = n * h * w

    num_features = num_init_features
    for blk in prep["blocks"]:
        num_layers = len(blk["layers"])
        cfin = num_features + num_layers * growth_rate
        mp, tm = _row_tiling(m)
        # one feature slab per block; layers write their growth_rate slice.
        buf = jnp.zeros((mp, cfin), jnp.float32).at[:m, :num_features].set(feats)
        csum = jnp.zeros((cfin,), jnp.float32).at[:num_features].set(fsum)
        cssq = jnp.zeros((cfin,), jnp.float32).at[:num_features].set(fssq)

        for l, lp in enumerate(blk["layers"]):
            cin = num_features + l * growth_rate
            s1, t1 = _bn_scale_shift(lp["g1"], lp["b1"], csum, cssq, m)
            bott, bs, bq = pallas_bn_relu_matmul_stats(buf, s1, t1, lp["w1"], m, tm)
            s2, t2 = _bn_scale_shift(lp["g2"], lp["b2"], bs, bq, m)
            new, ns, nq = pallas_bn_relu_conv3x3_stats(
                bott[:m], s2, t2, lp["w2"], n, h, w)
            buf = buf.at[:m, cin:cin + growth_rate].set(new)
            csum = csum.at[cin:cin + growth_rate].set(ns)
            cssq = cssq.at[cin:cin + growth_rate].set(nq)

        num_features = cfin
        if "transition" in blk:
            tp = blk["transition"]
            st, tt = _bn_scale_shift(tp["g"], tp["b"], csum, cssq, m)
            cout = num_features // 2
            x4 = buf[:m].reshape(n, h, w, num_features)
            feats, fsum, fssq, h, w = pallas_transition_stats(
                x4, st, tt, tp["w"], n, h, w, num_features, cout)
            num_features = cout
            m = n * h * w
        else:
            feats, fsum, fssq = buf[:m], csum, cssq

    # norm5 + relu + global average pool + classifier (one fused kernel)
    s5, t5 = _bn_scale_shift(prep["bn5"][0], prep["bn5"][1], fsum, fssq, m)
    logits = pallas_head(feats.reshape(n, h * w, num_features), s5, t5,
                         prep["fc_w"], prep["fc_b"])
    return logits


# ----------------------------- main --------------------------------------------

if __name__ == "__main__":
    # Small DenseNet config (same architecture family, scaled down).
    growth_rate = 8
    block_config = (2, 2)
    num_init_features = 16
    bn_size = 2
    num_classes = 10

    key = jax.random.PRNGKey(0)
    k_param, k_x = jax.random.split(key)
    params = init_densenet_params(k_param, growth_rate, block_config,
                                  num_init_features, bn_size, num_classes)
    prep = prepare_params(params, growth_rate, block_config,
                          num_init_features, bn_size)

    x = jax.random.normal(k_x, (2, 3, 32, 32), jnp.float32)   # NCHW, like PyTorch

    fwd = jax.jit(functools.partial(densenet_forward,
                                    growth_rate=growth_rate,
                                    num_init_features=num_init_features))
    out = jax.block_until_ready(fwd(prep, x))

    assert out.shape == (2, num_classes), out.shape
    assert bool(jnp.all(jnp.isfinite(out)))
    print("KERNEL_OK")
</pallas_src>

<mosaic_0001>
module attributes {stable_mosaic.version = 11 : i64} {
  func.func @_matmul_stats_kernel(%arg0: i32, %arg1: memref<512x152xbf16, #tpu.memory_space<vmem>>, %arg2: memref<152x16xbf16, #tpu.memory_space<vmem>>, %arg3: memref<512x1xf32, #tpu.memory_space<vmem>>, %arg4: memref<512x16xf32, #tpu.memory_space<vmem>>, %arg5: memref<1x16xf32, #tpu.memory_space<vmem>>, %arg6: memref<1x16xf32, #tpu.memory_space<vmem>>) attributes {dimension_semantics = [#tpu.dimension_semantics<arbitrary>], iteration_bounds = array<i64: 1>, scalar_prefetch = 0 : i64, scratch_operands = 0 : i64, tpu.core_type = #tpu.core_type<tc>, window_params = [{transform_indices = @transform_0, window_bounds = array<i64: 512, 152>}, {pipeline_mode = #tpu.pipeline_mode<synchronous>, transform_indices = @transform_1, window_bounds = array<i64: 152, 16>}, {transform_indices = @transform_2, window_bounds = array<i64: 512, 1>}, {transform_indices = @transform_3, window_bounds = array<i64: 512, 16>}, {pipeline_mode = #tpu.pipeline_mode<synchronous>, transform_indices = @transform_4, window_bounds = array<i64: 1, 16>}, {pipeline_mode = #tpu.pipeline_mode<synchronous>, transform_indices = @transform_5, window_bounds = array<i64: 1, 16>}]} {
    %c0 = arith.constant 0 : index
    %c0_0 = arith.constant 0 : index
    %0 = vector.load %arg1[%c0, %c0_0] : memref<512x152xbf16, #tpu.memory_space<vmem>>, vector<512x152xbf16>
    %c0_1 = arith.constant 0 : index
    %c0_2 = arith.constant 0 : index
    %1 = vector.load %arg2[%c0_1, %c0_2] : memref<152x16xbf16, #tpu.memory_space<vmem>>, vector<152x16xbf16>
    %cst = arith.constant dense<0.000000e+00> : vector<512x16xf32>
    %2 = tpu.matmul %0, %1, %cst {dimension_numbers = #tpu.dot_dimension_numbers<[1], [0], [0], [1], [0, 0, 1, 1], [], []>} : vector<512x152xbf16>, vector<152x16xbf16>, vector<512x16xf32> -> vector<512x16xf32>
    %c0_3 = arith.constant 0 : index
    %c0_4 = arith.constant 0 : index
    %3 = vector.load %arg4[%c0_3, %c0_4] : memref<512x16xf32, #tpu.memory_space<vmem>>, vector<512x16xf32>
    tpu.vector_store %arg4[%c0_3, %c0_4], %2 {strides = array<i32>} : memref<512x16xf32, #tpu.memory_space<vmem>>, vector<512x16xf32>,
    %c0_i32 = arith.constant 0 : i32
    %4 = arith.cmpi eq, %arg0, %c0_i32 : i32
    %5 = arith.extui %4 : i1 to i32
    %c0_i32_5 = arith.constant 0 : i32
    %6 = arith.cmpi ne, %5, %c0_i32_5 : i32
    scf.if %6 {
      %cst_18 = arith.constant 0.000000e+00 : f32
      %21 = vector.broadcast %cst_18 : f32 to vector<1x16xf32>
      %c0_19 = arith.constant 0 : index
      %c0_20 = arith.constant 0 : index
      %22 = vector.load %arg5[%c0_19, %c0_20] : memref<1x16xf32, #tpu.memory_space<vmem>>, vector<1x16xf32>
      tpu.vector_store %arg5[%c0_19, %c0_20], %21 {strides = array<i32>} : memref<1x16xf32, #tpu.memory_space<vmem>>, vector<1x16xf32>,
      %cst_21 = arith.constant 0.000000e+00 : f32
      %23 = vector.broadcast %cst_21 : f32 to vector<1x16xf32>
      %c0_22 = arith.constant 0 : index
      %c0_23 = arith.constant 0 : index
      %24 = vector.load %arg6[%c0_22, %c0_23] : memref<1x16xf32, #tpu.memory_space<vmem>>, vector<1x16xf32>
      tpu.vector_store %arg6[%c0_22, %c0_23], %23 {strides = array<i32>} : memref<1x16xf32, #tpu.memory_space<vmem>>, vector<1x16xf32>,
    } else {
    }
    %c0_6 = arith.constant 0 : index
    %c0_7 = arith.constant 0 : index
    %7 = vector.load %arg3[%c0_6, %c0_7] : memref<512x1xf32, #tpu.memory_space<vmem>>, vector<512x1xf32>
    %8 = vector.broadcast %7 : vector<512x1xf32> to vector<512x16xf32>
    %9 = arith.mulf %2, %8 : vector<512x16xf32>
    %c0_8 = arith.constant 0 : index
    %c0_9 = arith.constant 0 : index
    %10 = vector.load %arg5[%c0_8, %c0_9] : memref<1x16xf32, #tpu.memory_space<vmem>>, vector<1x16xf32>
    %cst_10 = arith.constant dense<0.000000e+00> : vector<16xf32>
    %11 = vector.multi_reduction <add>, %9, %cst_10 [0] : vector<512x16xf32> to vector<16xf32>
    %12 = vector.shape_cast %11 : vector<16xf32> to vector<1x16xf32>
    %13 = arith.addf %10, %12 : vector<1x16xf32>
    %c0_11 = arith.constant 0 : index
    %c0_12 = arith.constant 0 : index
    %14 = vector.load %arg5[%c0_11, %c0_12] : memref<1x16xf32, #tpu.memory_space<vmem>>, vector<1x16xf32>
    tpu.vector_store %arg5[%c0_11, %c0_12], %13 {strides = array<i32>} : memref<1x16xf32, #tpu.memory_space<vmem>>, vector<1x16xf32>,
    %c0_13 = arith.constant 0 : index
    %c0_14 = arith.constant 0 : index
    %15 = vector.load %arg6[%c0_13, %c0_14] : memref<1x16xf32, #tpu.memory_space<vmem>>, vector<1x16xf32>
    %16 = arith.mulf %9, %9 : vector<512x16xf32>
    %cst_15 = arith.constant dense<0.000000e+00> : vector<16xf32>
    %17 = vector.multi_reduction <add>, %16, %cst_15 [0] : vector<512x16xf32> to vector<16xf32>
    %18 = vector.shape_cast %17 : vector<16xf32> to vector<1x16xf32>
    %19 = arith.addf %15, %18 : vector<1x16xf32>
    %c0_16 = arith.constant 0 : index
    %c0_17 = arith.constant 0 : index
    %20 = vector.load %arg6[%c0_16, %c0_17] : memref<1x16xf32, #tpu.memory_space<vmem>>, vector<1x16xf32>
    tpu.vector_store %arg6[%c0_16, %c0_17], %19 {strides = array<i32>} : memref<1x16xf32, #tpu.memory_space<vmem>>, vector<1x16xf32>,
    return
  }
  func.func @transform_0(%arg0: i32) -> (i32, i32) {
    %c0_i32 = arith.constant 0 : i32
    %c0_i32_0 = arith.constant 0 : i32
    return %arg0, %c0_i32 : i32, i32
  }
  func.func @transform_1(%arg0: i32) -> (i32, i32) {
    %c0_i32 = arith.constant 0 : i32
    %c0_i32_0 = arith.constant 0 : i32
    %c0_i32_1 = arith.constant 0 : i32
    return %c0_i32, %c0_i32_0 : i32, i32
  }
  func.func @transform_2(%arg0: i32) -> (i32, i32) {
    %c0_i32 = arith.constant 0 : i32
    %c0_i32_0 = arith.constant 0 : i32
    return %arg0, %c0_i32 : i32, i32
  }
  func.func @transform_3(%arg0: i32) -> (i32, i32) {
    %c0_i32 = arith.constant 0 : i32
    %c0_i32_0 = arith.constant 0 : i32
    return %arg0, %c0_i32 : i32, i32
  }
  func.func @transform_4(%arg0: i32) -> (i32, i32) {
    %c0_i32 = arith.constant 0 : i32
    %c0_i32_0 = arith.constant 0 : i32
    %c0_i32_1 = arith.constant 0 : i32
    return %c0_i32, %c0_i32_0 : i32, i32
  }
  func.func @transform_5(%arg0: i32) -> (i32, i32) {
    %c0_i32 = arith.constant 0 : i32
    %c0_i32_0 = arith.constant 0 : i32
    %c0_i32_1 = arith.constant 0 : i32
    return %c0_i32, %c0_i32_0 : i32, i32
  }
}

module attributes {stable_mosaic.version = 11 : i64} {
  func.func @_bn_relu_kernel(%arg0: i32, %arg1: memref<512x16xf32, #tpu.memory_space<vmem>>, %arg2: memref<1x16xf32, #tpu.memory_space<vmem>>, %arg3: memref<1x16xf32, #tpu.memory_space<vmem>>, %arg4: memref<512x16xf32, #tpu.memory_space<vmem>>) attributes {dimension_semantics = [#tpu.dimension_semantics<parallel>], iteration_bounds = array<i64: 1>, scalar_prefetch = 0 : i64, scratch_operands = 0 : i64, tpu.core_type = #tpu.core_type<tc>, window_params = [{transform_indices = @transform_0, window_bounds = array<i64: 512, 16>}, {pipeline_mode = #tpu.pipeline_mode<synchronous>, transform_indices = @transform_1, window_bounds = array<i64: 1, 16>}, {pipeline_mode = #tpu.pipeline_mode<synchronous>, transform_indices = @transform_2, window_bounds = array<i64: 1, 16>}, {transform_indices = @transform_3, window_bounds = array<i64: 512, 16>}]} {
    %c0 = arith.constant 0 : index
    %c0_0 = arith.constant 0 : index
    %0 = vector.load %arg1[%c0, %c0_0] : memref<512x16xf32, #tpu.memory_space<vmem>>, vector<512x16xf32>
    %c0_1 = arith.constant 0 : index
    %c0_2 = arith.constant 0 : index
    %1 = vector.load %arg2[%c0_1, %c0_2] : memref<1x16xf32, #tpu.memory_space<vmem>>, vector<1x16xf32>
    %2 = vector.broadcast %1 : vector<1x16xf32> to vector<512x16xf32>
    %3 = arith.mulf %0, %2 : vector<512x16xf32>
    %c0_3 = arith.constant 0 : index
    %c0_4 = arith.constant 0 : index
    %4 = vector.load %arg3[%c0_3, %c0_4] : memref<1x16xf32, #tpu.memory_space<vmem>>, vector<1x16xf32>
    %5 = vector.broadcast %4 : vector<1x16xf32> to vector<512x16xf32>
    %6 = arith.addf %3, %5 : vector<512x16xf32>
    %cst = arith.constant 0.000000e+00 : f32
    %7 = vector.broadcast %cst : f32 to vector<512x16xf32>
    %8 = arith.maximumf %6, %7 : vector<512x16xf32>
    %c0_5 = arith.constant 0 : index
    %c0_6 = arith.constant 0 : index
    %9 = vector.load %arg4[%c0_5, %c0_6] : memref<512x16xf32, #tpu.memory_space<vmem>>, vector<512x16xf32>
    tpu.vector_store %arg4[%c0_5, %c0_6], %8 {strides = array<i32>} : memref<512x16xf32, #tpu.memory_space<vmem>>, vector<512x16xf32>,
    return
  }
  func.func @transform_0(%arg0: i32) -> (i32, i32) {
    %c0_i32 = arith.constant 0 : i32
    %c0_i32_0 = arith.constant 0 : i32
    return %arg0, %c0_i32 : i32, i32
  }
  func.func @transform_1(%arg0: i32) -> (i32, i32) {
    %c0_i32 = arith.constant 0 : i32
    %c0_i32_0 = arith.constant 0 : i32
    %c0_i32_1 = arith.constant 0 : i32
    return %c0_i32, %c0_i32_0 : i32, i32
  }
  func.func @transform_2(%arg0: i32) -> (i32, i32) {
    %c0_i32 = arith.constant 0 : i32
    %c0_i32_0 = arith.constant 0 : i32
    %c0_i32_1 = arith.constant 0 : i32
    return %c0_i32, %c0_i32_0 : i32, i32
  }
  func.func @transform_3(%arg0: i32) -> (i32, i32) {
    %c0_i32 = arith.constant 0 : i32
    %c0_i32_0 = arith.constant 0 : i32
    return %arg0, %c0_i32 : i32, i32
  }
}

module attributes {stable_mosaic.version = 11 : i64} {
  func.func @_maxpool_stats_kernel(%arg0: i32, %arg1: i32, %arg2: memref<1x2x18x16xf32, #tpu.memory_space<vmem>>, %arg3: memref<1x2x18x16xf32, #tpu.memory_space<vmem>>, %arg4: memref<18x1xf32, #tpu.memory_space<vmem>>, %arg5: memref<1x1x18x16xf32, #tpu.memory_space<vmem>>, %arg6: memref<1x16xf32, #tpu.memory_space<vmem>>, %arg7: memref<1x16xf32, #tpu.memory_space<vmem>>, %arg8: memref<20x16xf32, #tpu.memory_space<vmem>>) attributes {dimension_semantics = [#tpu.dimension_semantics<arbitrary>, #tpu.dimension_semantics<arbitrary>], iteration_bounds = array<i64: 2, 8>, scalar_prefetch = 0 : i64, scratch_operands = 1 : i64, tpu.core_type = #tpu.core_type<tc>, window_params = [{transform_indices = @transform_0, window_bounds = array<i64: 1, 2, 18, 16>}, {transform_indices = @transform_1, window_bounds = array<i64: 1, 2, 18, 16>}, {pipeline_mode = #tpu.pipeline_mode<synchronous>, transform_indices = @transform_2, window_bounds = array<i64: 18, 1>}, {transform_indices = @transform_3, window_bounds = array<i64: 1, 1, 18, 16>}, {pipeline_mode = #tpu.pipeline_mode<synchronous>, transform_indices = @transform_4, window_bounds = array<i64: 1, 16>}, {pipeline_mode = #tpu.pipeline_mode<synchronous>, transform_indices = @transform_5, window_bounds = array<i64: 1, 16>}]} {
    %c0 = arith.constant 0 : index
    %c0_0 = arith.constant 0 : index
    %c0_1 = arith.constant 0 : index
    %c0_2 = arith.constant 0 : index
    %0 = vector.load %arg2[%c0, %c0_0, %c0_1, %c0_2] : memref<1x2x18x16xf32, #tpu.memory_space<vmem>>, vector<1x1x18x16xf32>
    %1 = vector.shape_cast %0 : vector<1x1x18x16xf32> to vector<18x16xf32>
    %c0_3 = arith.constant 0 : index
    %c1 = arith.constant 1 : index
    %c0_4 = arith.constant 0 : index
    %c0_5 = arith.constant 0 : index
    %2 = vector.load %arg2[%c0_3, %c1, %c0_4, %c0_5] : memref<1x2x18x16xf32, #tpu.memory_space<vmem>>, vector<1x1x18x16xf32>
    %3 = vector.shape_cast %2 : vector<1x1x18x16xf32> to vector<18x16xf32>
    %4 = arith.maximumf %1, %3 : vector<18x16xf32>
    %c0_6 = arith.constant 0 : index
    %c0_7 = arith.constant 0 : index
    %c0_8 = arith.constant 0 : index
    %c0_9 = arith.constant 0 : index
    %5 = vector.load %arg3[%c0_6, %c0_7, %c0_8, %c0_9] : memref<1x2x18x16xf32, #tpu.memory_space<vmem>>, vector<1x1x18x16xf32>
    %6 = vector.shape_cast %5 : vector<1x1x18x16xf32> to vector<18x16xf32>
    %7 = arith.maximumf %4, %6 : vector<18x16xf32>
    %cst = arith.constant 0.000000e+00 : f32
    %8 = vector.broadcast %cst : f32 to vector<20x16xf32>
    %c0_10 = arith.constant 0 : index
    %c0_11 = arith.constant 0 : index
    %9 = vector.load %arg8[%c0_10, %c0_11] : memref<20x16xf32, #tpu.memory_space<vmem>>, vector<20x16xf32>
    tpu.vector_store %arg8[%c0_10, %c0_11], %8 {strides = array<i32>} : memref<20x16xf32, #tpu.memory_space<vmem>>, vector<20x16xf32>,
    %c0_12 = arith.constant 0 : index
    %c0_13 = arith.constant 0 : index
    %10 = vector.load %arg8[%c0_12, %c0_13] : memref<20x16xf32, #tpu.memory_space<vmem>>, vector<18x16xf32>
    tpu.vector_store %arg8[%c0_12, %c0_13], %7 {strides = array<i32>} : memref<20x16xf32, #tpu.memory_space<vmem>>, vector<18x16xf32>,
    %c0_14 = arith.constant 0 : index
    %c0_15 = arith.constant 0 : index
    %11 = vector.load %arg8[%c0_14, %c0_15] : memref<20x16xf32, #tpu.memory_space<vmem>>, vector<18x16xf32>
    %c1_16 = arith.constant 1 : index
    %c0_17 = arith.constant 0 : index
    %12 = vector.load %arg8[%c1_16, %c0_17] : memref<20x16xf32, #tpu.memory_space<vmem>>, vector<18x16xf32>
    %13 = arith.maximumf %11, %12 : vector<18x16xf32>
    %c2 = arith.constant 2 : index
    %c0_18 = arith.constant 0 : index
    %14 = vector.load %arg8[%c2, %c0_18] : memref<20x16xf32, #tpu.memory_space<vmem>>, vector<18x16xf32>
    %15 = arith.maximumf %13, %14 : vector<18x16xf32>
    %c0_19 = arith.constant 0 : index
    %c0_20 = arith.constant 0 : index
    %c0_21 = arith.constant 0 : index
    %c0_22 = arith.constant 0 : index
    %16 = vector.load %arg5[%c0_19, %c0_20, %c0_21, %c0_22] : memref<1x1x18x16xf32, #tpu.memory_space<vmem>>, vector<1x1x18x16xf32>
    %17 = vector.shape_cast %16 : vector<1x1x18x16xf32> to vector<18x16xf32>
    %18 = vector.shape_cast %15 : vector<18x16xf32> to vector<1x1x18x16xf32>
    tpu.vector_store %arg5[%c0_19, %c0_20, %c0_21, %c0_22], %18 {strides = array<i32>} : memref<1x1x18x16xf32, #tpu.memory_space<vmem>>, vector<1x1x18x16xf32>,
    %c0_i32 = arith.constant 0 : i32
    %19 = arith.cmpi eq, %arg0, %c0_i32 : i32
    %c0_i32_23 = arith.constant 0 : i32
    %20 = arith.cmpi eq, %arg1, %c0_i32_23 : i32
    %21 = arith.andi %19, %20 : i1
    %22 = arith.extui %21 : i1 to i32
    %c0_i32_24 = arith.constant 0 : i32
    %23 = arith.cmpi ne, %22, %c0_i32_24 : i32
    scf.if %23 {
      %cst_37 = arith.constant 0.000000e+00 : f32
      %38 = vector.broadcast %cst_37 : f32 to vector<1x16xf32>
      %c0_38 = arith.constant 0 : index
      %c0_39 = arith.constant 0 : index
      %39 = vector.load %arg6[%c0_38, %c0_39] : memref<1x16xf32, #tpu.memory_space<vmem>>, vector<1x16xf32>
      tpu.vector_store %arg6[%c0_38, %c0_39], %38 {strides = array<i32>} : memref<1x16xf32, #tpu.memory_space<vmem>>, vector<1x16xf32>,
      %cst_40 = arith.constant 0.000000e+00 : f32
      %40 = vector.broadcast %cst_40 : f32 to vector<1x16xf32>
      %c0_41 = arith.constant 0 : index
      %c0_42 = arith.constant 0 : index
      %41 = vector.load %arg7[%c0_41, %c0_42] : memref<1x16xf32, #tpu.memory_space<vmem>>, vector<1x16xf32>
      tpu.vector_store %arg7[%c0_41, %c0_42], %40 {strides = array<i32>} : memref<1x16xf32, #tpu.memory_space<vmem>>, vector<1x16xf32>,
    } else {
    }
    %c0_25 = arith.constant 0 : index
    %c0_26 = arith.constant 0 : index
    %24 = vector.load %arg4[%c0_25, %c0_26] : memref<18x1xf32, #tpu.memory_space<vmem>>, vector<18x1xf32>
    %25 = vector.broadcast %24 : vector<18x1xf32> to vector<18x16xf32>
    %26 = arith.mulf %15, %25 : vector<18x16xf32>
    %c0_27 = arith.constant 0 : index
    %c0_28 = arith.constant 0 : index
    %27 = vector.load %arg6[%c0_27, %c0_28] : memref<1x16xf32, #tpu.memory_space<vmem>>, vector<1x16xf32>
    %cst_29 = arith.constant dense<0.000000e+00> : vector<16xf32>
    %28 = vector.multi_reduction <add>, %26, %cst_29 [0] : vector<18x16xf32> to vector<16xf32>
    %29 = vector.shape_cast %28 : vector<16xf32> to vector<1x16xf32>
    %30 = arith.addf %27, %29 : vector<1x16xf32>
    %c0_30 = arith.constant 0 : index
    %c0_31 = arith.constant 0 : index
    %31 = vector.load %arg6[%c0_30, %c0_31] : memref<1x16xf32, #tpu.memory_space<vmem>>, vector<1x16xf32>
    tpu.vector_store %arg6[%c0_30, %c0_31], %30 {strides = array<i32>} : memref<1x16xf32, #tpu.memory_space<vmem>>, vector<1x16xf32>,
    %c0_32 = arith.constant 0 : index
    %c0_33 = arith.constant 0 : index
    %32 = vector.load %arg7[%c0_32, %c0_33] : memref<1x16xf32, #tpu.memory_space<vmem>>, vector<1x16xf32>
    %33 = arith.mulf %26, %26 : vector<18x16xf32>
    %cst_34 = arith.constant dense<0.000000e+00> : vector<16xf32>
    %34 = vector.multi_reduction <add>, %33, %cst_34 [0] : vector<18x16xf32> to vector<16xf32>
    %35 = vector.shape_cast %34 : vector<16xf32> to vector<1x16xf32>
    %36 = arith.addf %32, %35 : vector<1x16xf32>
    %c0_35 = arith.constant 0 : index
    %c0_36 = arith.constant 0 : index
    %37 = vector.load %arg7[%c0_35, %c0_36] : memref<1x16xf32, #tpu.memory_space<vmem>>, vector<1x16xf32>
    tpu.vector_store %arg7[%c0_35, %c0_36], %36 {strides = array<i32>} : memref<1x16xf32, #tpu.memory_space<vmem>>, vector<1x16xf32>,
    return
  }
  func.func @transform_0(%arg0: i32, %arg1: i32) -> (i32, i32, i32, i32) {
    %c0_i32 = arith.constant 0 : i32
    %c0_i32_0 = arith.constant 0 : i32
    %c0_i32_1 = arith.constant 0 : i32
    return %arg0, %arg1, %c0_i32, %c0_i32_0 : i32, i32, i32, i32
  }
  func.func @transform_1(%arg0: i32, %arg1: i32) -> (i32, i32, i32, i32) {
    %c1_i32 = arith.constant 1 : i32
    %0 = arith.addi %arg1, %c1_i32 : i32
    %c0_i32 = arith.constant 0 : i32
    %c0_i32_0 = arith.constant 0 : i32
    %c0_i32_1 = arith.constant 0 : i32
    return %arg0, %0, %c0_i32, %c0_i32_0 : i32, i32, i32, i32
  }
  func.func @transform_2(%arg0: i32, %arg1: i32) -> (i32, i32) {
    %c0_i32 = arith.constant 0 : i32
    %c0_i32_0 = arith.constant 0 : i32
    %c0_i32_1 = arith.constant 0 : i32
    return %c0_i32, %c0_i32_0 : i32, i32
  }
  func.func @transform_3(%arg0: i32, %arg1: i32) -> (i32, i32, i32, i32) {
    %c0_i32 = arith.constant 0 : i32
    %c0_i32_0 = arith.constant 0 : i32
    %c0_i32_1 = arith.constant 0 : i32
    return %arg0, %arg1, %c0_i32, %c0_i32_0 : i32, i32, i32, i32
  }
  func.func @transform_4(%arg0: i32, %arg1: i32) -> (i32, i32) {
    %c0_i32 = arith.constant 0 : i32
    %c0_i32_0 = arith.constant 0 : i32
    %c0_i32_1 = arith.constant 0 : i32
    return %c0_i32, %c0_i32_0 : i32, i32
  }
  func.func @transform_5(%arg0: i32, %arg1: i32) -> (i32, i32) {
    %c0_i32 = arith.constant 0 : i32
    %c0_i32_0 = arith.constant 0 : i32
    %c0_i32_1 = arith.constant 0 : i32
    return %c0_i32, %c0_i32_0 : i32, i32
  }
}

module attributes {stable_mosaic.version = 11 : i64} {
  func.func @_bn_relu_matmul_stats_kernel(%arg0: i32, %arg1: memref<128x32xf32, #tpu.memory_space<vmem>>, %arg2: memref<1x32xf32, #tpu.memory_space<vmem>>, %arg3: memref<1x32xf32, #tpu.memory_space<vmem>>, %arg4: memref<32x16xbf16, #tpu.memory_space<vmem>>, %arg5: memref<128x1xf32, #tpu.memory_space<vmem>>, %arg6: memref<128x16xf32, #tpu.memory_space<vmem>>, %arg7: memref<1x16xf32, #tpu.memory_space<vmem>>, %arg8: memref<1x16xf32, #tpu.memory_space<vmem>>) attributes {dimension_semantics = [#tpu.dimension_semantics<arbitrary>], iteration_bounds = array<i64: 1>, scalar_prefetch = 0 : i64, scratch_operands = 0 : i64, tpu.core_type = #tpu.core_type<tc>, window_params = [{transform_indices = @transform_0, window_bounds = array<i64: 128, 32>}, {pipeline_mode = #tpu.pipeline_mode<synchronous>, transform_indices = @transform_1, window_bounds = array<i64: 1, 32>}, {pipeline_mode = #tpu.pipeline_mode<synchronous>, transform_indices = @transform_2, window_bounds = array<i64: 1, 32>}, {pipeline_mode = #tpu.pipeline_mode<synchronous>, transform_indices = @transform_3, window_bounds = array<i64: 32, 16>}, {transform_indices = @transform_4, window_bounds = array<i64: 128, 1>}, {transform_indices = @transform_5, window_bounds = array<i64: 128, 16>}, {pipeline_mode = #tpu.pipeline_mode<synchronous>, transform_indices = @transform_6, window_bounds = array<i64: 1, 16>}, {pipeline_mode = #tpu.pipeline_mode<synchronous>, transform_indices = @transform_7, window_bounds = array<i64: 1, 16>}]} {
    %c0 = arith.constant 0 : index
    %c0_0 = arith.constant 0 : index
    %0 = vector.load %arg1[%c0, %c0_0] : memref<128x32xf32, #tpu.memory_space<vmem>>, vector<128x32xf32>
    %c0_1 = arith.constant 0 : index
    %c0_2 = arith.constant 0 : index
    %1 = vector.load %arg2[%c0_1, %c0_2] : memref<1x32xf32, #tpu.memory_space<vmem>>, vector<1x32xf32>
    %2 = vector.broadcast %1 : vector<1x32xf32> to vector<128x32xf32>
    %3 = arith.mulf %0, %2 : vector<128x32xf32>
    %c0_3 = arith.constant 0 : index
    %c0_4 = arith.constant 0 : index
    %4 = vector.load %arg3[%c0_3, %c0_4] : memref<1x32xf32, #tpu.memory_space<vmem>>, vector<1x32xf32>
    %5 = vector.broadcast %4 : vector<1x32xf32> to vector<128x32xf32>
    %6 = arith.addf %3, %5 : vector<128x32xf32>
    %cst = arith.constant 0.000000e+00 : f32
    %7 = vector.broadcast %cst : f32 to vector<128x32xf32>
    %8 = arith.maximumf %6, %7 : vector<128x32xf32>
    %9 = arith.truncf %8 : vector<128x32xf32> to vector<128x32xbf16>
    %c0_5 = arith.constant 0 : index
    %c0_6 = arith.constant 0 : index
    %10 = vector.load %arg4[%c0_5, %c0_6] : memref<32x16xbf16, #tpu.memory_space<vmem>>, vector<32x16xbf16>
    %cst_7 = arith.constant dense<0.000000e+00> : vector<128x16xf32>
    %11 = tpu.matmul %9, %10, %cst_7 {dimension_numbers = #tpu.dot_dimension_numbers<[1], [0], [0], [1], [0, 0, 1, 1], [], []>} : vector<128x32xbf16>, vector<32x16xbf16>, vector<128x16xf32> -> vector<128x16xf32>
    %c0_8 = arith.constant 0 : index
    %c0_9 = arith.constant 0 : index
    %12 = vector.load %arg6[%c0_8, %c0_9] : memref<128x16xf32, #tpu.memory_space<vmem>>, vector<128x16xf32>
    tpu.vector_store %arg6[%c0_8, %c0_9], %11 {strides = array<i32>} : memref<128x16xf32, #tpu.memory_space<vmem>>, vector<128x16xf32>,
    %c0_i32 = arith.constant 0 : i32
    %13 = arith.cmpi eq, %arg0, %c0_i32 : i32
    %14 = arith.extui %13 : i1 to i32
    %c0_i32_10 = arith.constant 0 : i32
    %15 = arith.cmpi ne, %14, %c0_i32_10 : i32
    scf.if %15 {
      %cst_23 = arith.constant 0.000000e+00 : f32
      %30 = vector.broadcast %cst_23 : f32 to vector<1x16xf32>
      %c0_24 = arith.constant 0 : index
      %c0_25 = arith.constant 0 : index
      %31 = vector.load %arg7[%c0_24, %c0_25] : memref<1x16xf32, #tpu.memory_space<vmem>>, vector<1x16xf32>
      tpu.vector_store %arg7[%c0_24, %c0_25], %30 {strides = array<i32>} : memref<1x16xf32, #tpu.memory_space<vmem>>, vector<1x16xf32>,
      %cst_26 = arith.constant 0.000000e+00 : f32
      %32 = vector.broadcast %cst_26 : f32 to vector<1x16xf32>
      %c0_27 = arith.constant 0 : index
      %c0_28 = arith.constant 0 : index
      %33 = vector.load %arg8[%c0_27, %c0_28] : memref<1x16xf32, #tpu.memory_space<vmem>>, vector<1x16xf32>
      tpu.vector_store %arg8[%c0_27, %c0_28], %32 {strides = array<i32>} : memref<1x16xf32, #tpu.memory_space<vmem>>, vector<1x16xf32>,
    } else {
    }
    %c0_11 = arith.constant 0 : index
    %c0_12 = arith.constant 0 : index
    %16 = vector.load %arg5[%c0_11, %c0_12] : memref<128x1xf32, #tpu.memory_space<vmem>>, vector<128x1xf32>
    %17 = vector.broadcast %16 : vector<128x1xf32> to vector<128x16xf32>
    %18 = arith.mulf %11, %17 : vector<128x16xf32>
    %c0_13 = arith.constant 0 : index
    %c0_14 = arith.constant 0 : index
    %19 = vector.load %arg7[%c0_13, %c0_14] : memref<1x16xf32, #tpu.memory_space<vmem>>, vector<1x16xf32>
    %cst_15 = arith.constant dense<0.000000e+00> : vector<16xf32>
    %20 = vector.multi_reduction <add>, %18, %cst_15 [0] : vector<128x16xf32> to vector<16xf32>
    %21 = vector.shape_cast %20 : vector<16xf32> to vector<1x16xf32>
    %22 = arith.addf %19, %21 : vector<1x16xf32>
    %c0_16 = arith.constant 0 : index
    %c0_17 = arith.constant 0 : index
    %23 = vector.load %arg7[%c0_16, %c0_17] : memref<1x16xf32, #tpu.memory_space<vmem>>, vector<1x16xf32>
    tpu.vector_store %arg7[%c0_16, %c0_17], %22 {strides = array<i32>} : memref<1x16xf32, #tpu.memory_space<vmem>>, vector<1x16xf32>,
    %c0_18 = arith.constant 0 : index
    %c0_19 = arith.constant 0 : index
    %24 = vector.load %arg8[%c0_18, %c0_19] : memref<1x16xf32, #tpu.memory_space<vmem>>, vector<1x16xf32>
    %25 = arith.mulf %18, %18 : vector<128x16xf32>
    %cst_20 = arith.constant dense<0.000000e+00> : vector<16xf32>
    %26 = vector.multi_reduction <add>, %25, %cst_20 [0] : vector<128x16xf32> to vector<16xf32>
    %27 = vector.shape_cast %26 : vector<16xf32> to vector<1x16xf32>
    %28 = arith.addf %24, %27 : vector<1x16xf32>
    %c0_21 = arith.constant 0 : index
    %c0_22 = arith.constant 0 : index
    %29 = vector.load %arg8[%c0_21, %c0_22] : memref<1x16xf32, #tpu.memory_space<vmem>>, vector<1x16xf32>
    tpu.vector_store %arg8[%c0_21, %c0_22], %28 {strides = array<i32>} : memref<1x16xf32, #tpu.memory_space<vmem>>, vector<1x16xf32>,
    return
  }
  func.func @transform_0(%arg0: i32) -> (i32, i32) {
    %c0_i32 = arith.constant 0 : i32
    %c0_i32_0 = arith.constant 0 : i32
    return %arg0, %c0_i32 : i32, i32
  }
  func.func @transform_1(%arg0: i32) -> (i32, i32) {
    %c0_i32 = arith.constant 0 : i32
    %c0_i32_0 = arith.constant 0 : i32
    %c0_i32_1 = arith.constant 0 : i32
    return %c0_i32, %c0_i32_0 : i32, i32
  }
  func.func @transform_2(%arg0: i32) -> (i32, i32) {
    %c0_i32 = arith.constant 0 : i32
    %c0_i32_0 = arith.constant 0 : i32
    %c0_i32_1 = arith.constant 0 : i32
    return %c0_i32, %c0_i32_0 : i32, i32
  }
  func.func @transform_3(%arg0: i32) -> (i32, i32) {
    %c0_i32 = arith.constant 0 : i32
    %c0_i32_0 = arith.constant 0 : i32
    %c0_i32_1 = arith.constant 0 : i32
    return %c0_i32, %c0_i32_0 : i32, i32
  }
  func.func @transform_4(%arg0: i32) -> (i32, i32) {
    %c0_i32 = arith.constant 0 : i32
    %c0_i32_0 = arith.constant 0 : i32
    return %arg0, %c0_i32 : i32, i32
  }
  func.func @transform_5(%arg0: i32) -> (i32, i32) {
    %c0_i32 = arith.constant 0 : i32
    %c0_i32_0 = arith.constant 0 : i32
    return %arg0, %c0_i32 : i32, i32
  }
  func.func @transform_6(%arg0: i32) -> (i32, i32) {
    %c0_i32 = arith.constant 0 : i32
    %c0_i32_0 = arith.constant 0 : i32
    %c0_i32_1 = arith.constant 0 : i32
    return %c0_i32, %c0_i32_0 : i32, i32
  }
  func.func @transform_7(%arg0: i32) -> (i32, i32) {
    %c0_i32 = arith.constant 0 : i32
    %c0_i32_0 = arith.constant 0 : i32
    %c0_i32_1 = arith.constant 0 : i32
    return %c0_i32, %c0_i32_0 : i32, i32
  }
}

module attributes {stable_mosaic.version = 11 : i64} {
  func.func @_bn_relu_conv3x3_stats_kernel(%arg0: i32, %arg1: memref<1x126x16xf32, #tpu.memory_space<vmem>>, %arg2: memref<1x16xf32, #tpu.memory_space<vmem>>, %arg3: memref<1x16xf32, #tpu.memory_space<vmem>>, %arg4: memref<9x16x8xbf16, #tpu.memory_space<vmem>>, %arg5: memref<126x1xf32, #tpu.memory_space<vmem>>, %arg6: memref<104x1xf32, #tpu.memory_space<vmem>>, %arg7: memref<1x104x8xf32, #tpu.memory_space<vmem>>, %arg8: memref<1x8xf32, #tpu.memory_space<vmem>>, %arg9: memref<1x8xf32, #tpu.memory_space<vmem>>, %arg10: memref<126x16xf32, #tpu.memory_space<vmem>>) attributes {dimension_semantics = [#tpu.dimension_semantics<arbitrary>], iteration_bounds = array<i64: 2>, scalar_prefetch = 0 : i64, scratch_operands = 1 : i64, tpu.core_type = #tpu.core_type<tc>, window_params = [{transform_indices = @transform_0, window_bounds = array<i64: 1, 126, 16>}, {pipeline_mode = #tpu.pipeline_mode<synchronous>, transform_indices = @transform_1, window_bounds = array<i64: 1, 16>}, {pipeline_mode = #tpu.pipeline_mode<synchronous>, transform_indices = @transform_2, window_bounds = array<i64: 1, 16>}, {pipeline_mode = #tpu.pipeline_mode<synchronous>, transform_indices = @transform_3, window_bounds = array<i64: 9, 16, 8>}, {pipeline_mode = #tpu.pipeline_mode<synchronous>, transform_indices = @transform_4, window_bounds = array<i64: 126, 1>}, {pipeline_mode = #tpu.pipeline_mode<synchronous>, transform_indices = @transform_5, window_bounds = array<i64: 104, 1>}, {transform_indices = @transform_6, window_bounds = array<i64: 1, 104, 8>}, {pipeline_mode = #tpu.pipeline_mode<synchronous>, transform_indices = @transform_7, window_bounds = array<i64: 1, 8>}, {pipeline_mode = #tpu.pipeline_mode<synchronous>, transform_indices = @transform_8, window_bounds = array<i64: 1, 8>}]} {
    %c0 = arith.constant 0 : index
    %c0_0 = arith.constant 0 : index
    %c0_1 = arith.constant 0 : index
    %0 = vector.load %arg1[%c0, %c0_0, %c0_1] : memref<1x126x16xf32, #tpu.memory_space<vmem>>, vector<1x126x16xf32>
    %1 = vector.shape_cast %0 : vector<1x126x16xf32> to vector<126x16xf32>
    %c0_2 = arith.constant 0 : index
    %c0_3 = arith.constant 0 : index
    %2 = vector.load %arg2[%c0_2, %c0_3] : memref<1x16xf32, #tpu.memory_space<vmem>>, vector<1x16xf32>
    %3 = vector.broadcast %2 : vector<1x16xf32> to vector<126x16xf32>
    %4 = arith.mulf %1, %3 : vector<126x16xf32>
    %c0_4 = arith.constant 0 : index
    %c0_5 = arith.constant 0 : index
    %5 = vector.load %arg3[%c0_4, %c0_5] : memref<1x16xf32, #tpu.memory_space<vmem>>, vector<1x16xf32>
    %6 = vector.broadcast %5 : vector<1x16xf32> to vector<126x16xf32>
    %7 = arith.addf %4, %6 : vector<126x16xf32>
    %cst = arith.constant 0.000000e+00 : f32
    %8 = vector.broadcast %cst : f32 to vector<126x16xf32>
    %9 = arith.maximumf %7, %8 : vector<126x16xf32>
    %c0_6 = arith.constant 0 : index
    %c0_7 = arith.constant 0 : index
    %10 = vector.load %arg5[%c0_6, %c0_7] : memref<126x1xf32, #tpu.memory_space<vmem>>, vector<126x1xf32>
    %11 = vector.broadcast %10 : vector<126x1xf32> to vector<126x16xf32>
    %12 = arith.mulf %9, %11 : vector<126x16xf32>
    %c0_8 = arith.constant 0 : index
    %c0_9 = arith.constant 0 : index
    %13 = vector.load %arg10[%c0_8, %c0_9] : memref<126x16xf32, #tpu.memory_space<vmem>>, vector<126x16xf32>
    tpu.vector_store %arg10[%c0_8, %c0_9], %12 {strides = array<i32>} : memref<126x16xf32, #tpu.memory_space<vmem>>, vector<126x16xf32>,
    %cst_10 = arith.constant 0.000000e+00 : f32
    %14 = vector.broadcast %cst_10 : f32 to vector<104x8xf32>
    %c0_11 = arith.constant 0 : index
    %c0_12 = arith.constant 0 : index
    %15 = vector.load %arg10[%c0_11, %c0_12] : memref<126x16xf32, #tpu.memory_space<vmem>>, vector<104x16xf32>
    %16 = arith.truncf %15 : vector<104x16xf32> to vector<104x16xbf16>
    %c0_13 = arith.constant 0 : index
    %c0_14 = arith.constant 0 : index
    %c0_15 = arith.constant 0 : index
    %17 = vector.load %arg4[%c0_13, %c0_14, %c0_15] : memref<9x16x8xbf16, #tpu.memory_space<vmem>>, vector<1x16x8xbf16>
    %18 = vector.shape_cast %17 : vector<1x16x8xbf16> to vector<16x8xbf16>
    %cst_16 = arith.constant dense<0.000000e+00> : vector<104x8xf32>
    %19 = tpu.matmul %16, %18, %cst_16 {dimension_numbers = #tpu.dot_dimension_numbers<[1], [0], [0], [1], [0, 0, 1, 1], [], []>} : vector<104x16xbf16>, vector<16x8xbf16>, vector<104x8xf32> -> vector<104x8xf32>
    %20 = arith.addf %14, %19 : vector<104x8xf32>
    %c1 = arith.constant 1 : index
    %c0_17 = arith.constant 0 : index
    %21 = vector.load %arg10[%c1, %c0_17] : memref<126x16xf32, #tpu.memory_space<vmem>>, vector<104x16xf32>
    %22 = arith.truncf %21 : vector<104x16xf32> to vector<104x16xbf16>
    %c1_18 = arith.constant 1 : index
    %c0_19 = arith.constant 0 : index
    %c0_20 = arith.constant 0 : index
    %23 = vector.load %arg4[%c1_18, %c0_19, %c0_20] : memref<9x16x8xbf16, #tpu.memory_space<vmem>>, vector<1x16x8xbf16>
    %24 = vector.shape_cast %23 : vector<1x16x8xbf16> to vector<16x8xbf16>
    %cst_21 = arith.constant dense<0.000000e+00> : vector<104x8xf32>
    %25 = tpu.matmul %22, %24, %cst_21 {dimension_numbers = #tpu.dot_dimension_numbers<[1], [0], [0], [1], [0, 0, 1, 1], [], []>} : vector<104x16xbf16>, vector<16x8xbf16>, vector<104x8xf32> -> vector<104x8xf32>
    %26 = arith.addf %20, %25 : vector<104x8xf32>
    %c2 = arith.constant 2 : index
    %c0_22 = arith.constant 0 : index
    %27 = vector.load %arg10[%c2, %c0_22] : memref<126x16xf32, #tpu.memory_space<vmem>>, vector<104x16xf32>
    %28 = arith.truncf %27 : vector<104x16xf32> to vector<104x16xbf16>
    %c2_23 = arith.constant 2 : index
    %c0_24 = arith.constant 0 : index
    %c0_25 = arith.constant 0 : index
    %29 = vector.load %arg4[%c2_23, %c0_24, %c0_25] : memref<9x16x8xbf16, #tpu.memory_space<vmem>>, vector<1x16x8xbf16>
    %30 = vector.shape_cast %29 : vector<1x16x8xbf16> to vector<16x8xbf16>
    %cst_26 = arith.constant dense<0.000000e+00> : vector<104x8xf32>
    %31 = tpu.matmul %28, %30, %cst_26 {dimension_numbers = #tpu.dot_dimension_numbers<[1], [0], [0], [1], [0, 0, 1, 1], [], []>} : vector<104x16xbf16>, vector<16x8xbf16>, vector<104x8xf32> -> vector<104x8xf32>
    %32 = arith.addf %26, %31 : vector<104x8xf32>
    %c10 = arith.constant 10 : index
    %c0_27 = arith.constant 0 : index
    %33 = vector.load %arg10[%c10, %c0_27] : memref<126x16xf32, #tpu.memory_space<vmem>>, vector<104x16xf32>
    %34 = arith.truncf %33 : vector<104x16xf32> to vector<104x16xbf16>
    %c3 = arith.constant 3 : index
    %c0_28 = arith.constant 0 : index
    %c0_29 = arith.constant 0 : index
    %35 = vector.load %arg4[%c3, %c0_28, %c0_29] : memref<9x16x8xbf16, #tpu.memory_space<vmem>>, vector<1x16x8xbf16>
    %36 = vector.shape_cast %35 : vector<1x16x8xbf16> to vector<16x8xbf16>
    %cst_30 = arith.constant dense<0.000000e+00> : vector<104x8xf32>
    %37 = tpu.matmul %34, %36, %cst_30 {dimension_numbers = #tpu.dot_dimension_numbers<[1], [0], [0], [1], [0, 0, 1, 1], [], []>} : vector<104x16xbf16>, vector<16x8xbf16>, vector<104x8xf32> -> vector<104x8xf32>
    %38 = arith.addf %32, %37 : vector<104x8xf32>
    %c11 = arith.constant 11 : index
    %c0_31 = arith.constant 0 : index
    %39 = vector.load %arg10[%c11, %c0_31] : memref<126x16xf32, #tpu.memory_space<vmem>>, vector<104x16xf32>
    %40 = arith.truncf %39 : vector<104x16xf32> to vector<104x16xbf16>
    %c4 = arith.constant 4 : index
    %c0_32 = arith.constant 0 : index
    %c0_33 = arith.constant 0 : index
    %41 = vector.load %arg4[%c4, %c0_32, %c0_33] : memref<9x16x8xbf16, #tpu.memory_space<vmem>>, vector<1x16x8xbf16>
    %42 = vector.shape_cast %41 : vector<1x16x8xbf16> to vector<16x8xbf16>
    %cst_34 = arith.constant dense<0.000000e+00> : vector<104x8xf32>
    %43 = tpu.matmul %40, %42, %cst_34 {dimension_numbers = #tpu.dot_dimension_numbers<[1], [0], [0], [1], [0, 0, 1, 1], [], []>} : vector<104x16xbf16>, vector<16x8xbf16>, vector<104x8xf32> -> vector<104x8xf32>
    %44 = arith.addf %38, %43 : vector<104x8xf32>
    %c12 = arith.constant 12 : index
    %c0_35 = arith.constant 0 : index
    %45 = vector.load %arg10[%c12, %c0_35] : memref<126x16xf32, #tpu.memory_space<vmem>>, vector<104x16xf32>
    %46 = arith.truncf %45 : vector<104x16xf32> to vector<104x16xbf16>
    %c5 = arith.constant 5 : index
    %c0_36 = arith.constant 0 : index
    %c0_37 = arith.constant 0 : index
    %47 = vector.load %arg4[%c5, %c0_36, %c0_37] : memref<9x16x8xbf16, #tpu.memory_space<vmem>>, vector<1x16x8xbf16>
    %48 = vector.shape_cast %47 : vector<1x16x8xbf16> to vector<16x8xbf16>
    %cst_38 = arith.constant dense<0.000000e+00> : vector<104x8xf32>
    %49 = tpu.matmul %46, %48, %cst_38 {dimension_numbers = #tpu.dot_dimension_numbers<[1], [0], [0], [1], [0, 0, 1, 1], [], []>} : vector<104x16xbf16>, vector<16x8xbf16>, vector<104x8xf32> -> vector<104x8xf32>
    %50 = arith.addf %44, %49 : vector<104x8xf32>
    %c20 = arith.constant 20 : index
    %c0_39 = arith.constant 0 : index
    %51 = vector.load %arg10[%c20, %c0_39] : memref<126x16xf32, #tpu.memory_space<vmem>>, vector<104x16xf32>
    %52 = arith.truncf %51 : vector<104x16xf32> to vector<104x16xbf16>
    %c6 = arith.constant 6 : index
    %c0_40 = arith.constant 0 : index
    %c0_41 = arith.constant 0 : index
    %53 = vector.load %arg4[%c6, %c0_40, %c0_41] : memref<9x16x8xbf16, #tpu.memory_space<vmem>>, vector<1x16x8xbf16>
    %54 = vector.shape_cast %53 : vector<1x16x8xbf16> to vector<16x8xbf16>
    %cst_42 = arith.constant dense<0.000000e+00> : vector<104x8xf32>
    %55 = tpu.matmul %52, %54, %cst_42 {dimension_numbers = #tpu.dot_dimension_numbers<[1], [0], [0], [1], [0, 0, 1, 1], [], []>} : vector<104x16xbf16>, vector<16x8xbf16>, vector<104x8xf32> -> vector<104x8xf32>
    %56 = arith.addf %50, %55 : vector<104x8xf32>
    %c21 = arith.constant 21 : index
    %c0_43 = arith.constant 0 : index
    %57 = vector.load %arg10[%c21, %c0_43] : memref<126x16xf32, #tpu.memory_space<vmem>>, vector<104x16xf32>
    %58 = arith.truncf %57 : vector<104x16xf32> to vector<104x16xbf16>
    %c7 = arith.constant 7 : index
    %c0_44 = arith.constant 0 : index
    %c0_45 = arith.constant 0 : index
    %59 = vector.load %arg4[%c7, %c0_44, %c0_45] : memref<9x16x8xbf16, #tpu.memory_space<vmem>>, vector<1x16x8xbf16>
    %60 = vector.shape_cast %59 : vector<1x16x8xbf16> to vector<16x8xbf16>
    %cst_46 = arith.constant dense<0.000000e+00> : vector<104x8xf32>
    %61 = tpu.matmul %58, %60, %cst_46 {dimension_numbers = #tpu.dot_dimension_numbers<[1], [0], [0], [1], [0, 0, 1, 1], [], []>} : vector<104x16xbf16>, vector<16x8xbf16>, vector<104x8xf32> -> vector<104x8xf32>
    %62 = arith.addf %56, %61 : vector<104x8xf32>
    %c22 = arith.constant 22 : index
    %c0_47 = arith.constant 0 : index
    %63 = vector.load %arg10[%c22, %c0_47] : memref<126x16xf32, #tpu.memory_space<vmem>>, vector<104x16xf32>
    %64 = arith.truncf %63 : vector<104x16xf32> to vector<104x16xbf16>
    %c8 = arith.constant 8 : index
    %c0_48 = arith.constant 0 : index
    %c0_49 = arith.constant 0 : index
    %65 = vector.load %arg4[%c8, %c0_48, %c0_49] : memref<9x16x8xbf16, #tpu.memory_space<vmem>>, vector<1x16x8xbf16>
    %66 = vector.shape_cast %65 : vector<1x16x8xbf16> to vector<16x8xbf16>
    %cst_50 = arith.constant dense<0.000000e+00> : vector<104x8xf32>
    %67 = tpu.matmul %64, %66, %cst_50 {dimension_numbers = #tpu.dot_dimension_numbers<[1], [0], [0], [1], [0, 0, 1, 1], [], []>} : vector<104x16xbf16>, vector<16x8xbf16>, vector<104x8xf32> -> vector<104x8xf32>
    %68 = arith.addf %62, %67 : vector<104x8xf32>
    %c0_51 = arith.constant 0 : index
    %c0_52 = arith.constant 0 : index
    %c0_53 = arith.constant 0 : index
    %69 = vector.load %arg7[%c0_51, %c0_52, %c0_53] : memref<1x104x8xf32, #tpu.memory_space<vmem>>, vector<1x104x8xf32>
    %70 = vector.shape_cast %69 : vector<1x104x8xf32> to vector<104x8xf32>
    %71 = vector.shape_cast %68 : vector<104x8xf32> to vector<1x104x8xf32>
    tpu.vector_store %arg7[%c0_51, %c0_52, %c0_53], %71 {strides = array<i32>} : memref<1x104x8xf32, #tpu.memory_space<vmem>>, vector<1x104x8xf32>,
    %c0_i32 = arith.constant 0 : i32
    %72 = arith.cmpi eq, %arg0, %c0_i32 : i32
    %73 = arith.extui %72 : i1 to i32
    %c0_i32_54 = arith.constant 0 : i32
    %74 = arith.cmpi ne, %73, %c0_i32_54 : i32
    scf.if %74 {
      %cst_67 = arith.constant 0.000000e+00 : f32
      %89 = vector.broadcast %cst_67 : f32 to vector<1x8xf32>
      %c0_68 = arith.constant 0 : index
      %c0_69 = arith.constant 0 : index
      %90 = vector.load %arg8[%c0_68, %c0_69] : memref<1x8xf32, #tpu.memory_space<vmem>>, vector<1x8xf32>
      tpu.vector_store %arg8[%c0_68, %c0_69], %89 {strides = array<i32>} : memref<1x8xf32, #tpu.memory_space<vmem>>, vector<1x8xf32>,
      %cst_70 = arith.constant 0.000000e+00 : f32
      %91 = vector.broadcast %cst_70 : f32 to vector<1x8xf32>
      %c0_71 = arith.constant 0 : index
      %c0_72 = arith.constant 0 : index
      %92 = vector.load %arg9[%c0_71, %c0_72] : memref<1x8xf32, #tpu.memory_space<vmem>>, vector<1x8xf32>
      tpu.vector_store %arg9[%c0_71, %c0_72], %91 {strides = array<i32>} : memref<1x8xf32, #tpu.memory_space<vmem>>, vector<1x8xf32>,
    } else {
    }
    %c0_55 = arith.constant 0 : index
    %c0_56 = arith.constant 0 : index
    %75 = vector.load %arg6[%c0_55, %c0_56] : memref<104x1xf32, #tpu.memory_space<vmem>>, vector<104x1xf32>
    %76 = vector.broadcast %75 : vector<104x1xf32> to vector<104x8xf32>
    %77 = arith.mulf %68, %76 : vector<104x8xf32>
    %c0_57 = arith.constant 0 : index
    %c0_58 = arith.constant 0 : index
    %78 = vector.load %arg8[%c0_57, %c0_58] : memref<1x8xf32, #tpu.memory_space<vmem>>, vector<1x8xf32>
    %cst_59 = arith.constant dense<0.000000e+00> : vector<8xf32>
    %79 = vector.multi_reduction <add>, %77, %cst_59 [0] : vector<104x8xf32> to vector<8xf32>
    %80 = vector.shape_cast %79 : vector<8xf32> to vector<1x8xf32>
    %81 = arith.addf %78, %80 : vector<1x8xf32>
    %c0_60 = arith.constant 0 : index
    %c0_61 = arith.constant 0 : index
    %82 = vector.load %arg8[%c0_60, %c0_61] : memref<1x8xf32, #tpu.memory_space<vmem>>, vector<1x8xf32>
    tpu.vector_store %arg8[%c0_60, %c0_61], %81 {strides = array<i32>} : memref<1x8xf32, #tpu.memory_space<vmem>>, vector<1x8xf32>,
    %c0_62 = arith.constant 0 : index
    %c0_63 = arith.constant 0 : index
    %83 = vector.load %arg9[%c0_62, %c0_63] : memref<1x8xf32, #tpu.memory_space<vmem>>, vector<1x8xf32>
    %84 = arith.mulf %77, %77 : vector<104x8xf32>
    %cst_64 = arith.constant dense<0.000000e+00> : vector<8xf32>
    %85 = vector.multi_reduction <add>, %84, %cst_64 [0] : vector<104x8xf32> to vector<8xf32>
    %86 = vector.shape_cast %85 : vector<8xf32> to vector<1x8xf32>
    %87 = arith.addf %83, %86 : vector<1x8xf32>
    %c0_65 = arith.constant 0 : index
    %c0_66 = arith.constant 0 : index
    %88 = vector.load %arg9[%c0_65, %c0_66] : memref<1x8xf32, #tpu.memory_space<vmem>>, vector<1x8xf32>
    tpu.vector_store %arg9[%c0_65, %c0_66], %87 {strides = array<i32>} : memref<1x8xf32, #tpu.memory_space<vmem>>, vector<1x8xf32>,
    return
  }
  func.func @transform_0(%arg0: i32) -> (i32, i32, i32) {
    %c0_i32 = arith.constant 0 : i32
    %c0_i32_0 = arith.constant 0 : i32
    %c0_i32_1 = arith.constant 0 : i32
    return %arg0, %c0_i32, %c0_i32_0 : i32, i32, i32
  }
  func.func @transform_1(%arg0: i32) -> (i32, i32) {
    %c0_i32 = arith.constant 0 : i32
    %c0_i32_0 = arith.constant 0 : i32
    %c0_i32_1 = arith.constant 0 : i32
    return %c0_i32, %c0_i32_0 : i32, i32
  }
  func.func @transform_2(%arg0: i32) -> (i32, i32) {
    %c0_i32 = arith.constant 0 : i32
    %c0_i32_0 = arith.constant 0 : i32
    %c0_i32_1 = arith.constant 0 : i32
    return %c0_i32, %c0_i32_0 : i32, i32
  }
  func.func @transform_3(%arg0: i32) -> (i32, i32, i32) {
    %c0_i32 = arith.constant 0 : i32
    %c0_i32_0 = arith.constant 0 : i32
    %c0_i32_1 = arith.constant 0 : i32
    %c0_i32_2 = arith.constant 0 : i32
    return %c0_i32, %c0_i32_0, %c0_i32_1 : i32, i32, i32
  }
  func.func @transform_4(%arg0: i32) -> (i32, i32) {
    %c0_i32 = arith.constant 0 : i32
    %c0_i32_0 = arith.constant 0 : i32
    %c0_i32_1 = arith.constant 0 : i32
    return %c0_i32, %c0_i32_0 : i32, i32
  }
  func.func @transform_5(%arg0: i32) -> (i32, i32) {
    %c0_i32 = arith.constant 0 : i32
    %c0_i32_0 = arith.constant 0 : i32
    %c0_i32_1 = arith.constant 0 : i32
    return %c0_i32, %c0_i32_0 : i32, i32
  }
  func.func @transform_6(%arg0: i32) -> (i32, i32, i32) {
    %c0_i32 = arith.constant 0 : i32
    %c0_i32_0 = arith.constant 0 : i32
    %c0_i32_1 = arith.constant 0 : i32
    return %arg0, %c0_i32, %c0_i32_0 : i32, i32, i32
  }
  func.func @transform_7(%arg0: i32) -> (i32, i32) {
    %c0_i32 = arith.constant 0 : i32
    %c0_i32_0 = arith.constant 0 : i32
    %c0_i32_1 = arith.constant 0 : i32
    return %c0_i32, %c0_i32_0 : i32, i32
  }
  func.func @transform_8(%arg0: i32) -> (i32, i32) {
    %c0_i32 = arith.constant 0 : i32
    %c0_i32_0 = arith.constant 0 : i32
    %c0_i32_1 = arith.constant 0 : i32
    return %c0_i32, %c0_i32_0 : i32, i32
  }
}

module attributes {stable_mosaic.version = 11 : i64} {
  func.func @_transition_stats_kernel(%arg0: i32, %arg1: i32, %arg2: memref<1x2x8x32xf32, #tpu.memory_space<vmem>>, %arg3: memref<1x32xf32, #tpu.memory_space<vmem>>, %arg4: memref<1x32xf32, #tpu.memory_space<vmem>>, %arg5: memref<4x8xf32, #tpu.memory_space<vmem>>, %arg6: memref<32x16xbf16, #tpu.memory_space<vmem>>, %arg7: memref<1x1x4x16xf32, #tpu.memory_space<vmem>>, %arg8: memref<1x16xf32, #tpu.memory_space<vmem>>, %arg9: memref<1x16xf32, #tpu.memory_space<vmem>>) attributes {dimension_semantics = [#tpu.dimension_semantics<arbitrary>, #tpu.dimension_semantics<arbitrary>], iteration_bounds = array<i64: 2, 4>, scalar_prefetch = 0 : i64, scratch_operands = 0 : i64, tpu.core_type = #tpu.core_type<tc>, window_params = [{transform_indices = @transform_0, window_bounds = array<i64: 1, 2, 8, 32>}, {pipeline_mode = #tpu.pipeline_mode<synchronous>, transform_indices = @transform_1, window_bounds = array<i64: 1, 32>}, {pipeline_mode = #tpu.pipeline_mode<synchronous>, transform_indices = @transform_2, window_bounds = array<i64: 1, 32>}, {pipeline_mode = #tpu.pipeline_mode<synchronous>, transform_indices = @transform_3, window_bounds = array<i64: 4, 8>}, {pipeline_mode = #tpu.pipeline_mode<synchronous>, transform_indices = @transform_4, window_bounds = array<i64: 32, 16>}, {transform_indices = @transform_5, window_bounds = array<i64: 1, 1, 4, 16>}, {pipeline_mode = #tpu.pipeline_mode<synchronous>, transform_indices = @transform_6, window_bounds = array<i64: 1, 16>}, {pipeline_mode = #tpu.pipeline_mode<synchronous>, transform_indices = @transform_7, window_bounds = array<i64: 1, 16>}]} {
    %c0 = arith.constant 0 : index
    %c0_0 = arith.constant 0 : index
    %c0_1 = arith.constant 0 : index
    %c0_2 = arith.constant 0 : index
    %0 = vector.load %arg2[%c0, %c0_0, %c0_1, %c0_2] : memref<1x2x8x32xf32, #tpu.memory_space<vmem>>, vector<1x1x8x32xf32>
    %1 = vector.shape_cast %0 : vector<1x1x8x32xf32> to vector<8x32xf32>
    %c0_3 = arith.constant 0 : index
    %c0_4 = arith.constant 0 : index
    %2 = vector.load %arg3[%c0_3, %c0_4] : memref<1x32xf32, #tpu.memory_space<vmem>>, vector<1x32xf32>
    %3 = vector.broadcast %2 : vector<1x32xf32> to vector<8x32xf32>
    %4 = arith.mulf %1, %3 : vector<8x32xf32>
    %c0_5 = arith.constant 0 : index
    %c0_6 = arith.constant 0 : index
    %5 = vector.load %arg4[%c0_5, %c0_6] : memref<1x32xf32, #tpu.memory_space<vmem>>, vector<1x32xf32>
    %6 = vector.broadcast %5 : vector<1x32xf32> to vector<8x32xf32>
    %7 = arith.addf %4, %6 : vector<8x32xf32>
    %cst = arith.constant 0.000000e+00 : f32
    %8 = vector.broadcast %cst : f32 to vector<8x32xf32>
    %9 = arith.maximumf %7, %8 : vector<8x32xf32>
    %c0_7 = arith.constant 0 : index
    %c1 = arith.constant 1 : index
    %c0_8 = arith.constant 0 : index
    %c0_9 = arith.constant 0 : index
    %10 = vector.load %arg2[%c0_7, %c1, %c0_8, %c0_9] : memref<1x2x8x32xf32, #tpu.memory_space<vmem>>, vector<1x1x8x32xf32>
    %11 = vector.shape_cast %10 : vector<1x1x8x32xf32> to vector<8x32xf32>
    %c0_10 = arith.constant 0 : index
    %c0_11 = arith.constant 0 : index
    %12 = vector.load %arg3[%c0_10, %c0_11] : memref<1x32xf32, #tpu.memory_space<vmem>>, vector<1x32xf32>
    %13 = vector.broadcast %12 : vector<1x32xf32> to vector<8x32xf32>
    %14 = arith.mulf %11, %13 : vector<8x32xf32>
    %c0_12 = arith.constant 0 : index
    %c0_13 = arith.constant 0 : index
    %15 = vector.load %arg4[%c0_12, %c0_13] : memref<1x32xf32, #tpu.memory_space<vmem>>, vector<1x32xf32>
    %16 = vector.broadcast %15 : vector<1x32xf32> to vector<8x32xf32>
    %17 = arith.addf %14, %16 : vector<8x32xf32>
    %cst_14 = arith.constant 0.000000e+00 : f32
    %18 = vector.broadcast %cst_14 : f32 to vector<8x32xf32>
    %19 = arith.maximumf %17, %18 : vector<8x32xf32>
    %c0_15 = arith.constant 0 : index
    %c0_16 = arith.constant 0 : index
    %20 = vector.load %arg5[%c0_15, %c0_16] : memref<4x8xf32, #tpu.memory_space<vmem>>, vector<4x8xf32>
    %21 = arith.addf %9, %19 : vector<8x32xf32>
    %cst_17 = arith.constant dense<0.000000e+00> : vector<4x32xf32>
    %22 = tpu.matmul %20, %21, %cst_17 {dimension_numbers = #tpu.dot_dimension_numbers<[1], [0], [0], [1], [0, 0, 1, 1], [], []>} : vector<4x8xf32>, vector<8x32xf32>, vector<4x32xf32> -> vector<4x32xf32>
    %23 = arith.truncf %22 : vector<4x32xf32> to vector<4x32xbf16>
    %c0_18 = arith.constant 0 : index
    %c0_19 = arith.constant 0 : index
    %24 = vector.load %arg6[%c0_18, %c0_19] : memref<32x16xbf16, #tpu.memory_space<vmem>>, vector<32x16xbf16>
    %cst_20 = arith.constant dense<0.000000e+00> : vector<4x16xf32>
    %25 = tpu.matmul %23, %24, %cst_20 {dimension_numbers = #tpu.dot_dimension_numbers<[1], [0], [0], [1], [0, 0, 1, 1], [], []>} : vector<4x32xbf16>, vector<32x16xbf16>, vector<4x16xf32> -> vector<4x16xf32>
    %c0_21 = arith.constant 0 : index
    %c0_22 = arith.constant 0 : index
    %c0_23 = arith.constant 0 : index
    %c0_24 = arith.constant 0 : index
    %26 = vector.load %arg7[%c0_21, %c0_22, %c0_23, %c0_24] : memref<1x1x4x16xf32, #tpu.memory_space<vmem>>, vector<1x1x4x16xf32>
    %27 = vector.shape_cast %26 : vector<1x1x4x16xf32> to vector<4x16xf32>
    %28 = vector.shape_cast %25 : vector<4x16xf32> to vector<1x1x4x16xf32>
    tpu.vector_store %arg7[%c0_21, %c0_22, %c0_23, %c0_24], %28 {strides = array<i32>} : memref<1x1x4x16xf32, #tpu.memory_space<vmem>>, vector<1x1x4x16xf32>,
    %c0_i32 = arith.constant 0 : i32
    %29 = arith.cmpi eq, %arg0, %c0_i32 : i32
    %c0_i32_25 = arith.constant 0 : i32
    %30 = arith.cmpi eq, %arg1, %c0_i32_25 : i32
    %31 = arith.andi %29, %30 : i1
    %32 = arith.extui %31 : i1 to i32
    %c0_i32_26 = arith.constant 0 : i32
    %33 = arith.cmpi ne, %32, %c0_i32_26 : i32
    scf.if %33 {
      %cst_37 = arith.constant 0.000000e+00 : f32
      %45 = vector.broadcast %cst_37 : f32 to vector<1x16xf32>
      %c0_38 = arith.constant 0 : index
      %c0_39 = arith.constant 0 : index
      %46 = vector.load %arg8[%c0_38, %c0_39] : memref<1x16xf32, #tpu.memory_space<vmem>>, vector<1x16xf32>
      tpu.vector_store %arg8[%c0_38, %c0_39], %45 {strides = array<i32>} : memref<1x16xf32, #tpu.memory_space<vmem>>, vector<1x16xf32>,
      %cst_40 = arith.constant 0.000000e+00 : f32
      %47 = vector.broadcast %cst_40 : f32 to vector<1x16xf32>
      %c0_41 = arith.constant 0 : index
      %c0_42 = arith.constant 0 : index
      %48 = vector.load %arg9[%c0_41, %c0_42] : memref<1x16xf32, #tpu.memory_space<vmem>>, vector<1x16xf32>
      tpu.vector_store %arg9[%c0_41, %c0_42], %47 {strides = array<i32>} : memref<1x16xf32, #tpu.memory_space<vmem>>, vector<1x16xf32>,
    } else {
    }
    %c0_27 = arith.constant 0 : index
    %c0_28 = arith.constant 0 : index
    %34 = vector.load %arg8[%c0_27, %c0_28] : memref<1x16xf32, #tpu.memory_space<vmem>>, vector<1x16xf32>
    %cst_29 = arith.constant dense<0.000000e+00> : vector<16xf32>
    %35 = vector.multi_reduction <add>, %25, %cst_29 [0] : vector<4x16xf32> to vector<16xf32>
    %36 = vector.shape_cast %35 : vector<16xf32> to vector<1x16xf32>
    %37 = arith.addf %34, %36 : vector<1x16xf32>
    %c0_30 = arith.constant 0 : index
    %c0_31 = arith.constant 0 : index
    %38 = vector.load %arg8[%c0_30, %c0_31] : memref<1x16xf32, #tpu.memory_space<vmem>>, vector<1x16xf32>
    tpu.vector_store %arg8[%c0_30, %c0_31], %37 {strides = array<i32>} : memref<1x16xf32, #tpu.memory_space<vmem>>, vector<1x16xf32>,
    %c0_32 = arith.constant 0 : index
    %c0_33 = arith.constant 0 : index
    %39 = vector.load %arg9[%c0_32, %c0_33] : memref<1x16xf32, #tpu.memory_space<vmem>>, vector<1x16xf32>
    %40 = arith.mulf %25, %25 : vector<4x16xf32>
    %cst_34 = arith.constant dense<0.000000e+00> : vector<16xf32>
    %41 = vector.multi_reduction <add>, %40, %cst_34 [0] : vector<4x16xf32> to vector<16xf32>
    %42 = vector.shape_cast %41 : vector<16xf32> to vector<1x16xf32>
    %43 = arith.addf %39, %42 : vector<1x16xf32>
    %c0_35 = arith.constant 0 : index
    %c0_36 = arith.constant 0 : index
    %44 = vector.load %arg9[%c0_35, %c0_36] : memref<1x16xf32, #tpu.memory_space<vmem>>, vector<1x16xf32>
    tpu.vector_store %arg9[%c0_35, %c0_36], %43 {strides = array<i32>} : memref<1x16xf32, #tpu.memory_space<vmem>>, vector<1x16xf32>,
    return
  }
  func.func @transform_0(%arg0: i32, %arg1: i32) -> (i32, i32, i32, i32) {
    %c0_i32 = arith.constant 0 : i32
    %c0_i32_0 = arith.constant 0 : i32
    %c0_i32_1 = arith.constant 0 : i32
    return %arg0, %arg1, %c0_i32, %c0_i32_0 : i32, i32, i32, i32
  }
  func.func @transform_1(%arg0: i32, %arg1: i32) -> (i32, i32) {
    %c0_i32 = arith.constant 0 : i32
    %c0_i32_0 = arith.constant 0 : i32
    %c0_i32_1 = arith.constant 0 : i32
    return %c0_i32, %c0_i32_0 : i32, i32
  }
  func.func @transform_2(%arg0: i32, %arg1: i32) -> (i32, i32) {
    %c0_i32 = arith.constant 0 : i32
    %c0_i32_0 = arith.constant 0 : i32
    %c0_i32_1 = arith.constant 0 : i32
    return %c0_i32, %c0_i32_0 : i32, i32
  }
  func.func @transform_3(%arg0: i32, %arg1: i32) -> (i32, i32) {
    %c0_i32 = arith.constant 0 : i32
    %c0_i32_0 = arith.constant 0 : i32
    %c0_i32_1 = arith.constant 0 : i32
    return %c0_i32, %c0_i32_0 : i32, i32
  }
  func.func @transform_4(%arg0: i32, %arg1: i32) -> (i32, i32) {
    %c0_i32 = arith.constant 0 : i32
    %c0_i32_0 = arith.constant 0 : i32
    %c0_i32_1 = arith.constant 0 : i32
    return %c0_i32, %c0_i32_0 : i32, i32
  }
  func.func @transform_5(%arg0: i32, %arg1: i32) -> (i32, i32, i32, i32) {
    %c0_i32 = arith.constant 0 : i32
    %c0_i32_0 = arith.constant 0 : i32
    %c0_i32_1 = arith.constant 0 : i32
    return %arg0, %arg1, %c0_i32, %c0_i32_0 : i32, i32, i32, i32
  }
  func.func @transform_6(%arg0: i32, %arg1: i32) -> (i32, i32) {
    %c0_i32 = arith.constant 0 : i32
    %c0_i32_0 = arith.constant 0 : i32
    %c0_i32_1 = arith.constant 0 : i32
    return %c0_i32, %c0_i32_0 : i32, i32
  }
  func.func @transform_7(%arg0: i32, %arg1: i32) -> (i32, i32) {
    %c0_i32 = arith.constant 0 : i32
    %c0_i32_0 = arith.constant 0 : i32
    %c0_i32_1 = arith.constant 0 : i32
    return %c0_i32, %c0_i32_0 : i32, i32
  }
}

module attributes {stable_mosaic.version = 11 : i64} {
  func.func @_bn_relu_matmul_stats_kernel(%arg0: i32, %arg1: memref<32x32xf32, #tpu.memory_space<vmem>>, %arg2: memref<1x32xf32, #tpu.memory_space<vmem>>, %arg3: memref<1x32xf32, #tpu.memory_space<vmem>>, %arg4: memref<32x16xbf16, #tpu.memory_space<vmem>>, %arg5: memref<32x1xf32, #tpu.memory_space<vmem>>, %arg6: memref<32x16xf32, #tpu.memory_space<vmem>>, %arg7: memref<1x16xf32, #tpu.memory_space<vmem>>, %arg8: memref<1x16xf32, #tpu.memory_space<vmem>>) attributes {dimension_semantics = [#tpu.dimension_semantics<arbitrary>], iteration_bounds = array<i64: 1>, scalar_prefetch = 0 : i64, scratch_operands = 0 : i64, tpu.core_type = #tpu.core_type<tc>, window_params = [{transform_indices = @transform_0, window_bounds = array<i64: 32, 32>}, {pipeline_mode = #tpu.pipeline_mode<synchronous>, transform_indices = @transform_1, window_bounds = array<i64: 1, 32>}, {pipeline_mode = #tpu.pipeline_mode<synchronous>, transform_indices = @transform_2, window_bounds = array<i64: 1, 32>}, {pipeline_mode = #tpu.pipeline_mode<synchronous>, transform_indices = @transform_3, window_bounds = array<i64: 32, 16>}, {transform_indices = @transform_4, window_bounds = array<i64: 32, 1>}, {transform_indices = @transform_5, window_bounds = array<i64: 32, 16>}, {pipeline_mode = #tpu.pipeline_mode<synchronous>, transform_indices = @transform_6, window_bounds = array<i64: 1, 16>}, {pipeline_mode = #tpu.pipeline_mode<synchronous>, transform_indices = @transform_7, window_bounds = array<i64: 1, 16>}]} {
    %c0 = arith.constant 0 : index
    %c0_0 = arith.constant 0 : index
    %0 = vector.load %arg1[%c0, %c0_0] : memref<32x32xf32, #tpu.memory_space<vmem>>, vector<32x32xf32>
    %c0_1 = arith.constant 0 : index
    %c0_2 = arith.constant 0 : index
    %1 = vector.load %arg2[%c0_1, %c0_2] : memref<1x32xf32, #tpu.memory_space<vmem>>, vector<1x32xf32>
    %2 = vector.broadcast %1 : vector<1x32xf32> to vector<32x32xf32>
    %3 = arith.mulf %0, %2 : vector<32x32xf32>
    %c0_3 = arith.constant 0 : index
    %c0_4 = arith.constant 0 : index
    %4 = vector.load %arg3[%c0_3, %c0_4] : memref<1x32xf32, #tpu.memory_space<vmem>>, vector<1x32xf32>
    %5 = vector.broadcast %4 : vector<1x32xf32> to vector<32x32xf32>
    %6 = arith.addf %3, %5 : vector<32x32xf32>
    %cst = arith.constant 0.000000e+00 : f32
    %7 = vector.broadcast %cst : f32 to vector<32x32xf32>
    %8 = arith.maximumf %6, %7 : vector<32x32xf32>
    %9 = arith.truncf %8 : vector<32x32xf32> to vector<32x32xbf16>
    %c0_5 = arith.constant 0 : index
    %c0_6 = arith.constant 0 : index
    %10 = vector.load %arg4[%c0_5, %c0_6] : memref<32x16xbf16, #tpu.memory_space<vmem>>, vector<32x16xbf16>
    %cst_7 = arith.constant dense<0.000000e+00> : vector<32x16xf32>
    %11 = tpu.matmul %9, %10, %cst_7 {dimension_numbers = #tpu.dot_dimension_numbers<[1], [0], [0], [1], [0, 0, 1, 1], [], []>} : vector<32x32xbf16>, vector<32x16xbf16>, vector<32x16xf32> -> vector<32x16xf32>
    %c0_8 = arith.constant 0 : index
    %c0_9 = arith.constant 0 : index
    %12 = vector.load %arg6[%c0_8, %c0_9] : memref<32x16xf32, #tpu.memory_space<vmem>>, vector<32x16xf32>
    tpu.vector_store %arg6[%c0_8, %c0_9], %11 {strides = array<i32>} : memref<32x16xf32, #tpu.memory_space<vmem>>, vector<32x16xf32>,
    %c0_i32 = arith.constant 0 : i32
    %13 = arith.cmpi eq, %arg0, %c0_i32 : i32
    %14 = arith.extui %13 : i1 to i32
    %c0_i32_10 = arith.constant 0 : i32
    %15 = arith.cmpi ne, %14, %c0_i32_10 : i32
    scf.if %15 {
      %cst_23 = arith.constant 0.000000e+00 : f32
      %30 = vector.broadcast %cst_23 : f32 to vector<1x16xf32>
      %c0_24 = arith.constant 0 : index
      %c0_25 = arith.constant 0 : index
      %31 = vector.load %arg7[%c0_24, %c0_25] : memref<1x16xf32, #tpu.memory_space<vmem>>, vector<1x16xf32>
      tpu.vector_store %arg7[%c0_24, %c0_25], %30 {strides = array<i32>} : memref<1x16xf32, #tpu.memory_space<vmem>>, vector<1x16xf32>,
      %cst_26 = arith.constant 0.000000e+00 : f32
      %32 = vector.broadcast %cst_26 : f32 to vector<1x16xf32>
      %c0_27 = arith.constant 0 : index
      %c0_28 = arith.constant 0 : index
      %33 = vector.load %arg8[%c0_27, %c0_28] : memref<1x16xf32, #tpu.memory_space<vmem>>, vector<1x16xf32>
      tpu.vector_store %arg8[%c0_27, %c0_28], %32 {strides = array<i32>} : memref<1x16xf32, #tpu.memory_space<vmem>>, vector<1x16xf32>,
    } else {
    }
    %c0_11 = arith.constant 0 : index
    %c0_12 = arith.constant 0 : index
    %16 = vector.load %arg5[%c0_11, %c0_12] : memref<32x1xf32, #tpu.memory_space<vmem>>, vector<32x1xf32>
    %17 = vector.broadcast %16 : vector<32x1xf32> to vector<32x16xf32>
    %18 = arith.mulf %11, %17 : vector<32x16xf32>
    %c0_13 = arith.constant 0 : index
    %c0_14 = arith.constant 0 : index
    %19 = vector.load %arg7[%c0_13, %c0_14] : memref<1x16xf32, #tpu.memory_space<vmem>>, vector<1x16xf32>
    %cst_15 = arith.constant dense<0.000000e+00> : vector<16xf32>
    %20 = vector.multi_reduction <add>, %18, %cst_15 [0] : vector<32x16xf32> to vector<16xf32>
    %21 = vector.shape_cast %20 : vector<16xf32> to vector<1x16xf32>
    %22 = arith.addf %19, %21 : vector<1x16xf32>
    %c0_16 = arith.constant 0 : index
    %c0_17 = arith.constant 0 : index
    %23 = vector.load %arg7[%c0_16, %c0_17] : memref<1x16xf32, #tpu.memory_space<vmem>>, vector<1x16xf32>
    tpu.vector_store %arg7[%c0_16, %c0_17], %22 {strides = array<i32>} : memref<1x16xf32, #tpu.memory_space<vmem>>, vector<1x16xf32>,
    %c0_18 = arith.constant 0 : index
    %c0_19 = arith.constant 0 : index
    %24 = vector.load %arg8[%c0_18, %c0_19] : memref<1x16xf32, #tpu.memory_space<vmem>>, vector<1x16xf32>
    %25 = arith.mulf %18, %18 : vector<32x16xf32>
    %cst_20 = arith.constant dense<0.000000e+00> : vector<16xf32>
    %26 = vector.multi_reduction <add>, %25, %cst_20 [0] : vector<32x16xf32> to vector<16xf32>
    %27 = vector.shape_cast %26 : vector<16xf32> to vector<1x16xf32>
    %28 = arith.addf %24, %27 : vector<1x16xf32>
    %c0_21 = arith.constant 0 : index
    %c0_22 = arith.constant 0 : index
    %29 = vector.load %arg8[%c0_21, %c0_22] : memref<1x16xf32, #tpu.memory_space<vmem>>, vector<1x16xf32>
    tpu.vector_store %arg8[%c0_21, %c0_22], %28 {strides = array<i32>} : memref<1x16xf32, #tpu.memory_space<vmem>>, vector<1x16xf32>,
    return
  }
  func.func @transform_0(%arg0: i32) -> (i32, i32) {
    %c0_i32 = arith.constant 0 : i32
    %c0_i32_0 = arith.constant 0 : i32
    return %arg0, %c0_i32 : i32, i32
  }
  func.func @transform_1(%arg0: i32) -> (i32, i32) {
    %c0_i32 = arith.constant 0 : i32
    %c0_i32_0 = arith.constant 0 : i32
    %c0_i32_1 = arith.constant 0 : i32
    return %c0_i32, %c0_i32_0 : i32, i32
  }
  func.func @transform_2(%arg0: i32) -> (i32, i32) {
    %c0_i32 = arith.constant 0 : i32
    %c0_i32_0 = arith.constant 0 : i32
    %c0_i32_1 = arith.constant 0 : i32
    return %c0_i32, %c0_i32_0 : i32, i32
  }
  func.func @transform_3(%arg0: i32) -> (i32, i32) {
    %c0_i32 = arith.constant 0 : i32
    %c0_i32_0 = arith.constant 0 : i32
    %c0_i32_1 = arith.constant 0 : i32
    return %c0_i32, %c0_i32_0 : i32, i32
  }
  func.func @transform_4(%arg0: i32) -> (i32, i32) {
    %c0_i32 = arith.constant 0 : i32
    %c0_i32_0 = arith.constant 0 : i32
    return %arg0, %c0_i32 : i32, i32
  }
  func.func @transform_5(%arg0: i32) -> (i32, i32) {
    %c0_i32 = arith.constant 0 : i32
    %c0_i32_0 = arith.constant 0 : i32
    return %arg0, %c0_i32 : i32, i32
  }
  func.func @transform_6(%arg0: i32) -> (i32, i32) {
    %c0_i32 = arith.constant 0 : i32
    %c0_i32_0 = arith.constant 0 : i32
    %c0_i32_1 = arith.constant 0 : i32
    return %c0_i32, %c0_i32_0 : i32, i32
  }
  func.func @transform_7(%arg0: i32) -> (i32, i32) {
    %c0_i32 = arith.constant 0 : i32
    %c0_i32_0 = arith.constant 0 : i32
    %c0_i32_1 = arith.constant 0 : i32
    return %c0_i32, %c0_i32_0 : i32, i32
  }
}

module attributes {stable_mosaic.version = 11 : i64} {
  func.func @_bn_relu_conv3x3_stats_kernel(%arg0: i32, %arg1: memref<1x54x16xf32, #tpu.memory_space<vmem>>, %arg2: memref<1x16xf32, #tpu.memory_space<vmem>>, %arg3: memref<1x16xf32, #tpu.memory_space<vmem>>, %arg4: memref<9x16x8xbf16, #tpu.memory_space<vmem>>, %arg5: memref<54x1xf32, #tpu.memory_space<vmem>>, %arg6: memref<40x1xf32, #tpu.memory_space<vmem>>, %arg7: memref<1x40x8xf32, #tpu.memory_space<vmem>>, %arg8: memref<1x8xf32, #tpu.memory_space<vmem>>, %arg9: memref<1x8xf32, #tpu.memory_space<vmem>>, %arg10: memref<54x16xf32, #tpu.memory_space<vmem>>) attributes {dimension_semantics = [#tpu.dimension_semantics<arbitrary>], iteration_bounds = array<i64: 2>, scalar_prefetch = 0 : i64, scratch_operands = 1 : i64, tpu.core_type = #tpu.core_type<tc>, window_params = [{transform_indices = @transform_0, window_bounds = array<i64: 1, 54, 16>}, {pipeline_mode = #tpu.pipeline_mode<synchronous>, transform_indices = @transform_1, window_bounds = array<i64: 1, 16>}, {pipeline_mode = #tpu.pipeline_mode<synchronous>, transform_indices = @transform_2, window_bounds = array<i64: 1, 16>}, {pipeline_mode = #tpu.pipeline_mode<synchronous>, transform_indices = @transform_3, window_bounds = array<i64: 9, 16, 8>}, {pipeline_mode = #tpu.pipeline_mode<synchronous>, transform_indices = @transform_4, window_bounds = array<i64: 54, 1>}, {pipeline_mode = #tpu.pipeline_mode<synchronous>, transform_indices = @transform_5, window_bounds = array<i64: 40, 1>}, {transform_indices = @transform_6, window_bounds = array<i64: 1, 40, 8>}, {pipeline_mode = #tpu.pipeline_mode<synchronous>, transform_indices = @transform_7, window_bounds = array<i64: 1, 8>}, {pipeline_mode = #tpu.pipeline_mode<synchronous>, transform_indices = @transform_8, window_bounds = array<i64: 1, 8>}]} {
    %c0 = arith.constant 0 : index
    %c0_0 = arith.constant 0 : index
    %c0_1 = arith.constant 0 : index
    %0 = vector.load %arg1[%c0, %c0_0, %c0_1] : memref<1x54x16xf32, #tpu.memory_space<vmem>>, vector<1x54x16xf32>
    %1 = vector.shape_cast %0 : vector<1x54x16xf32> to vector<54x16xf32>
    %c0_2 = arith.constant 0 : index
    %c0_3 = arith.constant 0 : index
    %2 = vector.load %arg2[%c0_2, %c0_3] : memref<1x16xf32, #tpu.memory_space<vmem>>, vector<1x16xf32>
    %3 = vector.broadcast %2 : vector<1x16xf32> to vector<54x16xf32>
    %4 = arith.mulf %1, %3 : vector<54x16xf32>
    %c0_4 = arith.constant 0 : index
    %c0_5 = arith.constant 0 : index
    %5 = vector.load %arg3[%c0_4, %c0_5] : memref<1x16xf32, #tpu.memory_space<vmem>>, vector<1x16xf32>
    %6 = vector.broadcast %5 : vector<1x16xf32> to vector<54x16xf32>
    %7 = arith.addf %4, %6 : vector<54x16xf32>
    %cst = arith.constant 0.000000e+00 : f32
    %8 = vector.broadcast %cst : f32 to vector<54x16xf32>
    %9 = arith.maximumf %7, %8 : vector<54x16xf32>
    %c0_6 = arith.constant 0 : index
    %c0_7 = arith.constant 0 : index
    %10 = vector.load %arg5[%c0_6, %c0_7] : memref<54x1xf32, #tpu.memory_space<vmem>>, vector<54x1xf32>
    %11 = vector.broadcast %10 : vector<54x1xf32> to vector<54x16xf32>
    %12 = arith.mulf %9, %11 : vector<54x16xf32>
    %c0_8 = arith.constant 0 : index
    %c0_9 = arith.constant 0 : index
    %13 = vector.load %arg10[%c0_8, %c0_9] : memref<54x16xf32, #tpu.memory_space<vmem>>, vector<54x16xf32>
    tpu.vector_store %arg10[%c0_8, %c0_9], %12 {strides = array<i32>} : memref<54x16xf32, #tpu.memory_space<vmem>>, vector<54x16xf32>,
    %cst_10 = arith.constant 0.000000e+00 : f32
    %14 = vector.broadcast %cst_10 : f32 to vector<40x8xf32>
    %c0_11 = arith.constant 0 : index
    %c0_12 = arith.constant 0 : index
    %15 = vector.load %arg10[%c0_11, %c0_12] : memref<54x16xf32, #tpu.memory_space<vmem>>, vector<40x16xf32>
    %16 = arith.truncf %15 : vector<40x16xf32> to vector<40x16xbf16>
    %c0_13 = arith.constant 0 : index
    %c0_14 = arith.constant 0 : index
    %c0_15 = arith.constant 0 : index
    %17 = vector.load %arg4[%c0_13, %c0_14, %c0_15] : memref<9x16x8xbf16, #tpu.memory_space<vmem>>, vector<1x16x8xbf16>
    %18 = vector.shape_cast %17 : vector<1x16x8xbf16> to vector<16x8xbf16>
    %cst_16 = arith.constant dense<0.000000e+00> : vector<40x8xf32>
    %19 = tpu.matmul %16, %18, %cst_16 {dimension_numbers = #tpu.dot_dimension_numbers<[1], [0], [0], [1], [0, 0, 1, 1], [], []>} : vector<40x16xbf16>, vector<16x8xbf16>, vector<40x8xf32> -> vector<40x8xf32>
    %20 = arith.addf %14, %19 : vector<40x8xf32>
    %c1 = arith.constant 1 : index
    %c0_17 = arith.constant 0 : index
    %21 = vector.load %arg10[%c1, %c0_17] : memref<54x16xf32, #tpu.memory_space<vmem>>, vector<40x16xf32>
    %22 = arith.truncf %21 : vector<40x16xf32> to vector<40x16xbf16>
    %c1_18 = arith.constant 1 : index
    %c0_19 = arith.constant 0 : index
    %c0_20 = arith.constant 0 : index
    %23 = vector.load %arg4[%c1_18, %c0_19, %c0_20] : memref<9x16x8xbf16, #tpu.memory_space<vmem>>, vector<1x16x8xbf16>
    %24 = vector.shape_cast %23 : vector<1x16x8xbf16> to vector<16x8xbf16>
    %cst_21 = arith.constant dense<0.000000e+00> : vector<40x8xf32>
    %25 = tpu.matmul %22, %24, %cst_21 {dimension_numbers = #tpu.dot_dimension_numbers<[1], [0], [0], [1], [0, 0, 1, 1], [], []>} : vector<40x16xbf16>, vector<16x8xbf16>, vector<40x8xf32> -> vector<40x8xf32>
    %26 = arith.addf %20, %25 : vector<40x8xf32>
    %c2 = arith.constant 2 : index
    %c0_22 = arith.constant 0 : index
    %27 = vector.load %arg10[%c2, %c0_22] : memref<54x16xf32, #tpu.memory_space<vmem>>, vector<40x16xf32>
    %28 = arith.truncf %27 : vector<40x16xf32> to vector<40x16xbf16>
    %c2_23 = arith.constant 2 : index
    %c0_24 = arith.constant 0 : index
    %c0_25 = arith.constant 0 : index
    %29 = vector.load %arg4[%c2_23, %c0_24, %c0_25] : memref<9x16x8xbf16, #tpu.memory_space<vmem>>, vector<1x16x8xbf16>
    %30 = vector.shape_cast %29 : vector<1x16x8xbf16> to vector<16x8xbf16>
    %cst_26 = arith.constant dense<0.000000e+00> : vector<40x8xf32>
    %31 = tpu.matmul %28, %30, %cst_26 {dimension_numbers = #tpu.dot_dimension_numbers<[1], [0], [0], [1], [0, 0, 1, 1], [], []>} : vector<40x16xbf16>, vector<16x8xbf16>, vector<40x8xf32> -> vector<40x8xf32>
    %32 = arith.addf %26, %31 : vector<40x8xf32>
    %c6 = arith.constant 6 : index
    %c0_27 = arith.constant 0 : index
    %33 = vector.load %arg10[%c6, %c0_27] : memref<54x16xf32, #tpu.memory_space<vmem>>, vector<40x16xf32>
    %34 = arith.truncf %33 : vector<40x16xf32> to vector<40x16xbf16>
    %c3 = arith.constant 3 : index
    %c0_28 = arith.constant 0 : index
    %c0_29 = arith.constant 0 : index
    %35 = vector.load %arg4[%c3, %c0_28, %c0_29] : memref<9x16x8xbf16, #tpu.memory_space<vmem>>, vector<1x16x8xbf16>
    %36 = vector.shape_cast %35 : vector<1x16x8xbf16> to vector<16x8xbf16>
    %cst_30 = arith.constant dense<0.000000e+00> : vector<40x8xf32>
    %37 = tpu.matmul %34, %36, %cst_30 {dimension_numbers = #tpu.dot_dimension_numbers<[1], [0], [0], [1], [0, 0, 1, 1], [], []>} : vector<40x16xbf16>, vector<16x8xbf16>, vector<40x8xf32> -> vector<40x8xf32>
    %38 = arith.addf %32, %37 : vector<40x8xf32>
    %c7 = arith.constant 7 : index
    %c0_31 = arith.constant 0 : index
    %39 = vector.load %arg10[%c7, %c0_31] : memref<54x16xf32, #tpu.memory_space<vmem>>, vector<40x16xf32>
    %40 = arith.truncf %39 : vector<40x16xf32> to vector<40x16xbf16>
    %c4 = arith.constant 4 : index
    %c0_32 = arith.constant 0 : index
    %c0_33 = arith.constant 0 : index
    %41 = vector.load %arg4[%c4, %c0_32, %c0_33] : memref<9x16x8xbf16, #tpu.memory_space<vmem>>, vector<1x16x8xbf16>
    %42 = vector.shape_cast %41 : vector<1x16x8xbf16> to vector<16x8xbf16>
    %cst_34 = arith.constant dense<0.000000e+00> : vector<40x8xf32>
    %43 = tpu.matmul %40, %42, %cst_34 {dimension_numbers = #tpu.dot_dimension_numbers<[1], [0], [0], [1], [0, 0, 1, 1], [], []>} : vector<40x16xbf16>, vector<16x8xbf16>, vector<40x8xf32> -> vector<40x8xf32>
    %44 = arith.addf %38, %43 : vector<40x8xf32>
    %c8 = arith.constant 8 : index
    %c0_35 = arith.constant 0 : index
    %45 = vector.load %arg10[%c8, %c0_35] : memref<54x16xf32, #tpu.memory_space<vmem>>, vector<40x16xf32>
    %46 = arith.truncf %45 : vector<40x16xf32> to vector<40x16xbf16>
    %c5 = arith.constant 5 : index
    %c0_36 = arith.constant 0 : index
    %c0_37 = arith.constant 0 : index
    %47 = vector.load %arg4[%c5, %c0_36, %c0_37] : memref<9x16x8xbf16, #tpu.memory_space<vmem>>, vector<1x16x8xbf16>
    %48 = vector.shape_cast %47 : vector<1x16x8xbf16> to vector<16x8xbf16>
    %cst_38 = arith.constant dense<0.000000e+00> : vector<40x8xf32>
    %49 = tpu.matmul %46, %48, %cst_38 {dimension_numbers = #tpu.dot_dimension_numbers<[1], [0], [0], [1], [0, 0, 1, 1], [], []>} : vector<40x16xbf16>, vector<16x8xbf16>, vector<40x8xf32> -> vector<40x8xf32>
    %50 = arith.addf %44, %49 : vector<40x8xf32>
    %c12 = arith.constant 12 : index
    %c0_39 = arith.constant 0 : index
    %51 = vector.load %arg10[%c12, %c0_39] : memref<54x16xf32, #tpu.memory_space<vmem>>, vector<40x16xf32>
    %52 = arith.truncf %51 : vector<40x16xf32> to vector<40x16xbf16>
    %c6_40 = arith.constant 6 : index
    %c0_41 = arith.constant 0 : index
    %c0_42 = arith.constant 0 : index
    %53 = vector.load %arg4[%c6_40, %c0_41, %c0_42] : memref<9x16x8xbf16, #tpu.memory_space<vmem>>, vector<1x16x8xbf16>
    %54 = vector.shape_cast %53 : vector<1x16x8xbf16> to vector<16x8xbf16>
    %cst_43 = arith.constant dense<0.000000e+00> : vector<40x8xf32>
    %55 = tpu.matmul %52, %54, %cst_43 {dimension_numbers = #tpu.dot_dimension_numbers<[1], [0], [0], [1], [0, 0, 1, 1], [], []>} : vector<40x16xbf16>, vector<16x8xbf16>, vector<40x8xf32> -> vector<40x8xf32>
    %56 = arith.addf %50, %55 : vector<40x8xf32>
    %c13 = arith.constant 13 : index
    %c0_44 = arith.constant 0 : index
    %57 = vector.load %arg10[%c13, %c0_44] : memref<54x16xf32, #tpu.memory_space<vmem>>, vector<40x16xf32>
    %58 = arith.truncf %57 : vector<40x16xf32> to vector<40x16xbf16>
    %c7_45 = arith.constant 7 : index
    %c0_46 = arith.constant 0 : index
    %c0_47 = arith.constant 0 : index
    %59 = vector.load %arg4[%c7_45, %c0_46, %c0_47] : memref<9x16x8xbf16, #tpu.memory_space<vmem>>, vector<1x16x8xbf16>
    %60 = vector.shape_cast %59 : vector<1x16x8xbf16> to vector<16x8xbf16>
    %cst_48 = arith.constant dense<0.000000e+00> : vector<40x8xf32>
    %61 = tpu.matmul %58, %60, %cst_48 {dimension_numbers = #tpu.dot_dimension_numbers<[1], [0], [0], [1], [0, 0, 1, 1], [], []>} : vector<40x16xbf16>, vector<16x8xbf16>, vector<40x8xf32> -> vector<40x8xf32>
    %62 = arith.addf %56, %61 : vector<40x8xf32>
    %c14 = arith.constant 14 : index
    %c0_49 = arith.constant 0 : index
    %63 = vector.load %arg10[%c14, %c0_49] : memref<54x16xf32, #tpu.memory_space<vmem>>, vector<40x16xf32>
    %64 = arith.truncf %63 : vector<40x16xf32> to vector<40x16xbf16>
    %c8_50 = arith.constant 8 : index
    %c0_51 = arith.constant 0 : index
    %c0_52 = arith.constant 0 : index
    %65 = vector.load %arg4[%c8_50, %c0_51, %c0_52] : memref<9x16x8xbf16, #tpu.memory_space<vmem>>, vector<1x16x8xbf16>
    %66 = vector.shape_cast %65 : vector<1x16x8xbf16> to vector<16x8xbf16>
    %cst_53 = arith.constant dense<0.000000e+00> : vector<40x8xf32>
    %67 = tpu.matmul %64, %66, %cst_53 {dimension_numbers = #tpu.dot_dimension_numbers<[1], [0], [0], [1], [0, 0, 1, 1], [], []>} : vector<40x16xbf16>, vector<16x8xbf16>, vector<40x8xf32> -> vector<40x8xf32>
    %68 = arith.addf %62, %67 : vector<40x8xf32>
    %c0_54 = arith.constant 0 : index
    %c0_55 = arith.constant 0 : index
    %c0_56 = arith.constant 0 : index
    %69 = vector.load %arg7[%c0_54, %c0_55, %c0_56] : memref<1x40x8xf32, #tpu.memory_space<vmem>>, vector<1x40x8xf32>
    %70 = vector.shape_cast %69 : vector<1x40x8xf32> to vector<40x8xf32>
    %71 = vector.shape_cast %68 : vector<40x8xf32> to vector<1x40x8xf32>
    tpu.vector_store %arg7[%c0_54, %c0_55, %c0_56], %71 {strides = array<i32>} : memref<1x40x8xf32, #tpu.memory_space<vmem>>, vector<1x40x8xf32>,
    %c0_i32 = arith.constant 0 : i32
    %72 = arith.cmpi eq, %arg0, %c0_i32 : i32
    %73 = arith.extui %72 : i1 to i32
    %c0_i32_57 = arith.constant 0 : i32
    %74 = arith.cmpi ne, %73, %c0_i32_57 : i32
    scf.if %74 {
      %cst_70 = arith.constant 0.000000e+00 : f32
      %89 = vector.broadcast %cst_70 : f32 to vector<1x8xf32>
      %c0_71 = arith.constant 0 : index
      %c0_72 = arith.constant 0 : index
      %90 = vector.load %arg8[%c0_71, %c0_72] : memref<1x8xf32, #tpu.memory_space<vmem>>, vector<1x8xf32>
      tpu.vector_store %arg8[%c0_71, %c0_72], %89 {strides = array<i32>} : memref<1x8xf32, #tpu.memory_space<vmem>>, vector<1x8xf32>,
      %cst_73 = arith.constant 0.000000e+00 : f32
      %91 = vector.broadcast %cst_73 : f32 to vector<1x8xf32>
      %c0_74 = arith.constant 0 : index
      %c0_75 = arith.constant 0 : index
      %92 = vector.load %arg9[%c0_74, %c0_75] : memref<1x8xf32, #tpu.memory_space<vmem>>, vector<1x8xf32>
      tpu.vector_store %arg9[%c0_74, %c0_75], %91 {strides = array<i32>} : memref<1x8xf32, #tpu.memory_space<vmem>>, vector<1x8xf32>,
    } else {
    }
    %c0_58 = arith.constant 0 : index
    %c0_59 = arith.constant 0 : index
    %75 = vector.load %arg6[%c0_58, %c0_59] : memref<40x1xf32, #tpu.memory_space<vmem>>, vector<40x1xf32>
    %76 = vector.broadcast %75 : vector<40x1xf32> to vector<40x8xf32>
    %77 = arith.mulf %68, %76 : vector<40x8xf32>
    %c0_60 = arith.constant 0 : index
    %c0_61 = arith.constant 0 : index
    %78 = vector.load %arg8[%c0_60, %c0_61] : memref<1x8xf32, #tpu.memory_space<vmem>>, vector<1x8xf32>
    %cst_62 = arith.constant dense<0.000000e+00> : vector<8xf32>
    %79 = vector.multi_reduction <add>, %77, %cst_62 [0] : vector<40x8xf32> to vector<8xf32>
    %80 = vector.shape_cast %79 : vector<8xf32> to vector<1x8xf32>
    %81 = arith.addf %78, %80 : vector<1x8xf32>
    %c0_63 = arith.constant 0 : index
    %c0_64 = arith.constant 0 : index
    %82 = vector.load %arg8[%c0_63, %c0_64] : memref<1x8xf32, #tpu.memory_space<vmem>>, vector<1x8xf32>
    tpu.vector_store %arg8[%c0_63, %c0_64], %81 {strides = array<i32>} : memref<1x8xf32, #tpu.memory_space<vmem>>, vector<1x8xf32>,
    %c0_65 = arith.constant 0 : index
    %c0_66 = arith.constant 0 : index
    %83 = vector.load %arg9[%c0_65, %c0_66] : memref<1x8xf32, #tpu.memory_space<vmem>>, vector<1x8xf32>
    %84 = arith.mulf %77, %77 : vector<40x8xf32>
    %cst_67 = arith.constant dense<0.000000e+00> : vector<8xf32>
    %85 = vector.multi_reduction <add>, %84, %cst_67 [0] : vector<40x8xf32> to vector<8xf32>
    %86 = vector.shape_cast %85 : vector<8xf32> to vector<1x8xf32>
    %87 = arith.addf %83, %86 : vector<1x8xf32>
    %c0_68 = arith.constant 0 : index
    %c0_69 = arith.constant 0 : index
    %88 = vector.load %arg9[%c0_68, %c0_69] : memref<1x8xf32, #tpu.memory_space<vmem>>, vector<1x8xf32>
    tpu.vector_store %arg9[%c0_68, %c0_69], %87 {strides = array<i32>} : memref<1x8xf32, #tpu.memory_space<vmem>>, vector<1x8xf32>,
    return
  }
  func.func @transform_0(%arg0: i32) -> (i32, i32, i32) {
    %c0_i32 = arith.constant 0 : i32
    %c0_i32_0 = arith.constant 0 : i32
    %c0_i32_1 = arith.constant 0 : i32
    return %arg0, %c0_i32, %c0_i32_0 : i32, i32, i32
  }
  func.func @transform_1(%arg0: i32) -> (i32, i32) {
    %c0_i32 = arith.constant 0 : i32
    %c0_i32_0 = arith.constant 0 : i32
    %c0_i32_1 = arith.constant 0 : i32
    return %c0_i32, %c0_i32_0 : i32, i32
  }
  func.func @transform_2(%arg0: i32) -> (i32, i32) {
    %c0_i32 = arith.constant 0 : i32
    %c0_i32_0 = arith.constant 0 : i32
    %c0_i32_1 = arith.constant 0 : i32
    return %c0_i32, %c0_i32_0 : i32, i32
  }
  func.func @transform_3(%arg0: i32) -> (i32, i32, i32) {
    %c0_i32 = arith.constant 0 : i32
    %c0_i32_0 = arith.constant 0 : i32
    %c0_i32_1 = arith.constant 0 : i32
    %c0_i32_2 = arith.constant 0 : i32
    return %c0_i32, %c0_i32_0, %c0_i32_1 : i32, i32, i32
  }
  func.func @transform_4(%arg0: i32) -> (i32, i32) {
    %c0_i32 = arith.constant 0 : i32
    %c0_i32_0 = arith.constant 0 : i32
    %c0_i32_1 = arith.constant 0 : i32
    return %c0_i32, %c0_i32_0 : i32, i32
  }
  func.func @transform_5(%arg0: i32) -> (i32, i32) {
    %c0_i32 = arith.constant 0 : i32
    %c0_i32_0 = arith.constant 0 : i32
    %c0_i32_1 = arith.constant 0 : i32
    return %c0_i32, %c0_i32_0 : i32, i32
  }
  func.func @transform_6(%arg0: i32) -> (i32, i32, i32) {
    %c0_i32 = arith.constant 0 : i32
    %c0_i32_0 = arith.constant 0 : i32
    %c0_i32_1 = arith.constant 0 : i32
    return %arg0, %c0_i32, %c0_i32_0 : i32, i32, i32
  }
  func.func @transform_7(%arg0: i32) -> (i32, i32) {
    %c0_i32 = arith.constant 0 : i32
    %c0_i32_0 = arith.constant 0 : i32
    %c0_i32_1 = arith.constant 0 : i32
    return %c0_i32, %c0_i32_0 : i32, i32
  }
  func.func @transform_8(%arg0: i32) -> (i32, i32) {
    %c0_i32 = arith.constant 0 : i32
    %c0_i32_0 = arith.constant 0 : i32
    %c0_i32_1 = arith.constant 0 : i32
    return %c0_i32, %c0_i32_0 : i32, i32
  }
}

module attributes {stable_mosaic.version = 11 : i64} {
  func.func @_bn_relu_pool_linear_kernel(%arg0: i32, %arg1: memref<2x16x32xf32, #tpu.memory_space<vmem>>, %arg2: memref<1x32xf32, #tpu.memory_space<vmem>>, %arg3: memref<1x32xf32, #tpu.memory_space<vmem>>, %arg4: memref<32x10xbf16, #tpu.memory_space<vmem>>, %arg5: memref<1x10xf32, #tpu.memory_space<vmem>>, %arg6: memref<2x10xf32, #tpu.memory_space<vmem>>) attributes {dimension_semantics = [#tpu.dimension_semantics<arbitrary>], iteration_bounds = array<i64: 1>, scalar_prefetch = 0 : i64, scratch_operands = 0 : i64, tpu.core_type = #tpu.core_type<tc>, window_params = [{pipeline_mode = #tpu.pipeline_mode<synchronous>, transform_indices = @transform_0, window_bounds = array<i64: 2, 16, 32>}, {pipeline_mode = #tpu.pipeline_mode<synchronous>, transform_indices = @transform_1, window_bounds = array<i64: 1, 32>}, {pipeline_mode = #tpu.pipeline_mode<synchronous>, transform_indices = @transform_2, window_bounds = array<i64: 1, 32>}, {pipeline_mode = #tpu.pipeline_mode<synchronous>, transform_indices = @transform_3, window_bounds = array<i64: 32, 10>}, {pipeline_mode = #tpu.pipeline_mode<synchronous>, transform_indices = @transform_4, window_bounds = array<i64: 1, 10>}, {pipeline_mode = #tpu.pipeline_mode<synchronous>, transform_indices = @transform_5, window_bounds = array<i64: 2, 10>}]} {
    %c0 = arith.constant 0 : index
    %c0_0 = arith.constant 0 : index
    %c0_1 = arith.constant 0 : index
    %0 = vector.load %arg1[%c0, %c0_0, %c0_1] : memref<2x16x32xf32, #tpu.memory_space<vmem>>, vector<2x16x32xf32>
    %c0_2 = arith.constant 0 : index
    %c0_3 = arith.constant 0 : index
    %1 = vector.load %arg2[%c0_2, %c0_3] : memref<1x32xf32, #tpu.memory_space<vmem>>, vector<1x32xf32>
    %2 = vector.shape_cast %1 : vector<1x32xf32> to vector<1x1x32xf32>
    %3 = vector.broadcast %2 : vector<1x1x32xf32> to vector<2x16x32xf32>
    %4 = arith.mulf %0, %3 : vector<2x16x32xf32>
    %c0_4 = arith.constant 0 : index
    %c0_5 = arith.constant 0 : index
    %5 = vector.load %arg3[%c0_4, %c0_5] : memref<1x32xf32, #tpu.memory_space<vmem>>, vector<1x32xf32>
    %6 = vector.shape_cast %5 : vector<1x32xf32> to vector<1x1x32xf32>
    %7 = vector.broadcast %6 : vector<1x1x32xf32> to vector<2x16x32xf32>
    %8 = arith.addf %4, %7 : vector<2x16x32xf32>
    %cst = arith.constant 0.000000e+00 : f32
    %9 = vector.broadcast %cst : f32 to vector<2x16x32xf32>
    %10 = arith.maximumf %8, %9 : vector<2x16x32xf32>
    %cst_6 = arith.constant dense<0.000000e+00> : vector<2x32xf32>
    %11 = vector.multi_reduction <add>, %10, %cst_6 [1] : vector<2x16x32xf32> to vector<2x32xf32>
    %cst_7 = arith.constant 1.600000e+01 : f32
    %12 = vector.broadcast %cst_7 : f32 to vector<2x32xf32>
    %13 = arith.divf %11, %12 : vector<2x32xf32>
    %14 = arith.truncf %13 : vector<2x32xf32> to vector<2x32xbf16>
    %c0_8 = arith.constant 0 : index
    %c0_9 = arith.constant 0 : index
    %15 = vector.load %arg4[%c0_8, %c0_9] : memref<32x10xbf16, #tpu.memory_space<vmem>>, vector<32x10xbf16>
    %cst_10 = arith.constant dense<0.000000e+00> : vector<2x10xf32>
    %16 = tpu.matmul %14, %15, %cst_10 {dimension_numbers = #tpu.dot_dimension_numbers<[1], [0], [0], [1], [0, 0, 1, 1], [], []>} : vector<2x32xbf16>, vector<32x10xbf16>, vector<2x10xf32> -> vector<2x10xf32>
    %c0_11 = arith.constant 0 : index
    %c0_12 = arith.constant 0 : index
    %17 = vector.load %arg5[%c0_11, %c0_12] : memref<1x10xf32, #tpu.memory_space<vmem>>, vector<1x10xf32>
    %18 = vector.broadcast %17 : vector<1x10xf32> to vector<2x10xf32>
    %19 = arith.addf %16, %18 : vector<2x10xf32>
    %c0_13 = arith.constant 0 : index
    %c0_14 = arith.constant 0 : index
    %20 = vector.load %arg6[%c0_13, %c0_14] : memref<2x10xf32, #tpu.memory_space<vmem>>, vector<2x10xf32>
    tpu.vector_store %arg6[%c0_13, %c0_14], %19 {strides = array<i32>} : memref<2x10xf32, #tpu.memory_space<vmem>>, vector<2x10xf32>,
    return
  }
  func.func @transform_0(%arg0: i32) -> (i32, i32, i32) {
    %c0_i32 = arith.constant 0 : i32
    %c0_i32_0 = arith.constant 0 : i32
    %c0_i32_1 = arith.constant 0 : i32
    %c0_i32_2 = arith.constant 0 : i32
    return %c0_i32, %c0_i32_0, %c0_i32_1 : i32, i32, i32
  }
  func.func @transform_1(%arg0: i32) -> (i32, i32) {
    %c0_i32 = arith.constant 0 : i32
    %c0_i32_0 = arith.constant 0 : i32
    %c0_i32_1 = arith.constant 0 : i32
    return %c0_i32, %c0_i32_0 : i32, i32
  }
  func.func @transform_2(%arg0: i32) -> (i32, i32) {
    %c0_i32 = arith.constant 0 : i32
    %c0_i32_0 = arith.constant 0 : i32
    %c0_i32_1 = arith.constant 0 : i32
    return %c0_i32, %c0_i32_0 : i32, i32
  }
  func.func @transform_3(%arg0: i32) -> (i32, i32) {
    %c0_i32 = arith.constant 0 : i32
    %c0_i32_0 = arith.constant 0 : i32
    %c0_i32_1 = arith.constant 0 : i32
    return %c0_i32, %c0_i32_0 : i32, i32
  }
  func.func @transform_4(%arg0: i32) -> (i32, i32) {
    %c0_i32 = arith.constant 0 : i32
    %c0_i32_0 = arith.constant 0 : i32
    %c0_i32_1 = arith.constant 0 : i32
    return %c0_i32, %c0_i32_0 : i32, i32
  }
  func.func @transform_5(%arg0: i32) -> (i32, i32) {
    %c0_i32 = arith.constant 0 : i32
    %c0_i32_0 = arith.constant 0 : i32
    %c0_i32_1 = arith.constant 0 : i32
    return %c0_i32, %c0_i32_0 : i32, i32
  }
}

</mosaic_0001>

<bundles_post_ra>
// kernel: densenet_forward.14
= control target key start
LH: loop header
LB: loop body
LE: loop exit
PB: predicated region body
PF: predicated region fallthrough
CT: control target
= control target key end

     0   :  { %vm284_vm0 = vcmask 130048   ;;  %s961_s0 = inlined_call_operand.vmem [shape: f32[512,16], index: 0, kind: input, shape index: {}]   ;;  %s962_s1 = inlined_call_operand.vmem [shape: f32[1,16], index: 1, kind: input, shape index: {}]   ;;  %s963_s2 = inlined_call_operand.vmem [shape: f32[1,16], index: 2, kind: input, shape index: {}]   ;;  %s964_s3 = inlined_call_operand.vmem [shape: f32[512,16], index: 3, kind: output, shape index: {}]  }
   0x1   :  { %v14_v0 = vld [vmem:[%s961_s0] sm:$0xff]  ;;  %v15_v4 = vld [vmem:[%s961_s0 + $0x8] sm:$0xff]  ;;  %v16_v5 = vld [vmem:[%s961_s0 + $0x10] sm:$0xff] }
   0x2   :  { %v381_v1 = vld [vmem:[%s962_s1] ss:$0 sm:$0xff]  ;;  %v17_v6 = vld [vmem:[%s961_s0 + $0x18] sm:$0xff]  ;;  %v19_v11 = vld [vmem:[%s961_s0 + $0x28] sm:$0xff] }
   0x3   :  { %v386_v2 = vld [vmem:[%s963_s2] ss:$0 sm:$0xff]  ;;  %v85_v3 = vmul.f32 %v381_v1, %v14_v0  ;;  %v86_v7 = vmul.f32 %v381_v1, %v15_v4  ;;  %v87_v8 = vmul.f32 %v381_v1, %v16_v5  ;;  %v88_v9 = vmul.f32 %v381_v1, %v17_v6  ;;  %v20_v12 = vld [vmem:[%s961_s0 + $0x30] sm:$0xff]  ;;  %v21_v17 = vld [vmem:[%s961_s0 + $0x38] sm:$0xff] }
   0x4   :  { %v18_v10 = vld [vmem:[%s961_s0 + $0x20] sm:$0xff]  ;;  %v90_v15 = vmul.f32 %v381_v1, %v19_v11  ;;  %v91_v16 = vmul.f32 %v381_v1, %v20_v12  ;;  %v92_v21 = vmul.f32 %v381_v1, %v21_v17  ;;  %v23_v27 = vld [vmem:[%s961_s0 + $0x48] sm:$0xff]  ;;  %v24_v28 = vld [vmem:[%s961_s0 + $0x50] sm:$0xff] }
   0x5   :  { %v156_v13 = vadd.f32 %v386_v2, %v85_v3  ;;  %v89_v14 = vmul.f32 %v381_v1, %v18_v10  ;;  %v157_v18 = vadd.f32 %v386_v2, %v86_v7  ;;  %v158_v19 = vadd.f32 %v386_v2, %v87_v8  ;;  %v22_v22 = vld [vmem:[%s961_s0 + $0x40] sm:$0xff]  ;;  %v25_v29 = vld [vmem:[%s961_s0 + $0x58] sm:$0xff]  ;;  %v27_v35 = vld [vmem:[%s961_s0 + $0x68] sm:$0xff] }
   0x6   :  { %v159_v20 = vadd.f32 %v386_v2, %v88_v9  ;;  %v161_v25 = vadd.f32 %v386_v2, %v90_v15  ;;  %v162_v26 = vadd.f32 %v386_v2, %v91_v16  ;;  %v163_v33 = vadd.f32 %v386_v2, %v92_v21  ;;  %v26_v34 = vld [vmem:[%s961_s0 + $0x60] sm:$0xff]  ;;  %v28_v36 = vld [vmem:[%s961_s0 + $0x70] sm:$0xff]  ;;  %v29_v41 = vld [vmem:[%s961_s0 + $0x78] sm:$0xff] }
   0x7   :  { %v220_v23 = vmax.f32 %v156_v13, 0.0  ;;  %v160_v24 = vadd.f32 %v386_v2, %v89_v14  ;;  %v221_v30 = vmax.f32 %v157_v18, 0.0  ;;  %v222_v31 = vmax.f32 %v158_v19, 0.0  ;;  %v30_v54 = vld [vmem:[%s961_s0 + $0x80] sm:$0xff]  ;;  %v31_v59 = vld [vmem:[%s961_s0 + $0x88] sm:$0xff]  ;;  %v32_v60 = vld [vmem:[%s961_s0 + $0x90] sm:$0xff] }
   0x8   :  { %v223_v32 = vmax.f32 %v159_v20, 0.0  ;;  %v225_v38 = vmax.f32 %v161_v25, 0.0  ;;  %v226_v39 = vmax.f32 %v162_v26, 0.0  ;;  %v93_v40 = vmul.f32 %v381_v1, %v22_v22  ;;  %v33_v61 = vld [vmem:[%s961_s0 + $0x98] sm:$0xff]  ;;  %v34_v4 = vld [vmem:[%s961_s0 + $0xa0] sm:$0xff]  ;;  %v35_v5 = vld [vmem:[%s961_s0 + $0xa8] sm:$0xff] }
   0x9   :  { %285 = vst.msk [vmem:[%s964_s3] sm:$0xff] %vm284_vm0, %v220_v23  ;;  %v224_v37 = vmax.f32 %v160_v24, 0.0  ;;  %286 = vst.msk [vmem:[%s964_s3 + $0x8] sm:$0xff] %vm284_vm0, %v221_v30  ;;  %v227_v42 = vmax.f32 %v163_v33, 0.0  ;;  %v94_v43 = vmul.f32 %v381_v1, %v23_v27  ;;  %v95_v44 = vmul.f32 %v381_v1, %v24_v28  ;;  %v36_v6 = vld [vmem:[%s961_s0 + $0xb0] sm:$0xff]  ;;  %v37_v11 = vld [vmem:[%s961_s0 + $0xb8] sm:$0xff] }
   0xa   :  { %287 = vst.msk [vmem:[%s964_s3 + $0x10] sm:$0xff] %vm284_vm0, %v222_v31  ;;  %288 = vst.msk [vmem:[%s964_s3 + $0x18] sm:$0xff] %vm284_vm0, %v223_v32  ;;  %v96_v45 = vmul.f32 %v381_v1, %v25_v29  ;;  %v164_v46 = vadd.f32 %v386_v2, %v93_v40  ;;  %v97_v47 = vmul.f32 %v381_v1, %v26_v34  ;;  %v38_v24 = vld [vmem:[%s961_s0 + $0xc0] sm:$0xff]  ;;  %v39_v29 = vld [vmem:[%s961_s0 + $0xc8] sm:$0xff] }
   0xb   :  { %289 = vst.msk [vmem:[%s964_s3 + $0x20] sm:$0xff] %vm284_vm0, %v224_v37  ;;  %290 = vst.msk [vmem:[%s964_s3 + $0x28] sm:$0xff] %vm284_vm0, %v225_v38  ;;  %v98_v48 = vmul.f32 %v381_v1, %v27_v35  ;;  %v99_v49 = vmul.f32 %v381_v1, %v28_v36  ;;  %v165_v50 = vadd.f32 %v386_v2, %v94_v43  ;;  %v40_v30 = vld [vmem:[%s961_s0 + $0xd0] sm:$0xff]  ;;  %v41_v31 = vld [vmem:[%s961_s0 + $0xd8] sm:$0xff] }
   0xc   :  { %291 = vst.msk [vmem:[%s964_s3 + $0x30] sm:$0xff] %vm284_vm0, %v226_v39  ;;  %292 = vst.msk [vmem:[%s964_s3 + $0x38] sm:$0xff] %vm284_vm0, %v227_v42  ;;  %v166_v51 = vadd.f32 %v386_v2, %v95_v44  ;;  %v167_v52 = vadd.f32 %v386_v2, %v96_v45  ;;  %v100_v53 = vmul.f32 %v381_v1, %v29_v41  ;;  %v228_v55 = vmax.f32 %v164_v46, 0.0  ;;  %v42_v36 = vld [vmem:[%s961_s0 + $0xe0] sm:$0xff]  ;;  %v43_v37 = vld [vmem:[%s961_s0 + $0xe8] sm:$0xff] }
   0xd   :  { %v168_v56 = vadd.f32 %v386_v2, %v97_v47  ;;  %v169_v57 = vadd.f32 %v386_v2, %v98_v48  ;;  %v170_v58 = vadd.f32 %v386_v2, %v99_v49  ;;  %v229_v62 = vmax.f32 %v165_v50, 0.0  ;;  %v44_v38 = vld [vmem:[%s961_s0 + $0xf0] sm:$0xff]  ;;  %v45_v43 = vld [vmem:[%s961_s0 + $0xf8] sm:$0xff] }
   0xe   :  { %v230_v63 = vmax.f32 %v166_v51, 0.0  ;;  %v231_v0 = vmax.f32 %v167_v52, 0.0  ;;  %v171_v3 = vadd.f32 %v386_v2, %v100_v53  ;;  %293 = vst.msk [vmem:[%s964_s3 + $0x40] sm:$0xff] %vm284_vm0, %v228_v55  ;;  %v101_v10 = vmul.f32 %v381_v1, %v30_v54 }
   0xf   :  { %v232_v7 = vmax.f32 %v168_v56, 0.0  ;;  %v233_v8 = vmax.f32 %v169_v57, 0.0  ;;  %v234_v9 = vmax.f32 %v170_v58, 0.0  ;;  %294 = vst.msk [vmem:[%s964_s3 + $0x48] sm:$0xff] %vm284_vm0, %v229_v62  ;;  %v102_v13 = vmul.f32 %v381_v1, %v31_v59  ;;  %v46_v56 = vld [vmem:[%s961_s0 + $0x100] sm:$0xff]  ;;  %v48_v62 = vld [vmem:[%s961_s0 + $0x110] sm:$0xff] }
  0x10   :  { %295 = vst.msk [vmem:[%s964_s3 + $0x50] sm:$0xff] %vm284_vm0, %v230_v63  ;;  %296 = vst.msk [vmem:[%s964_s3 + $0x58] sm:$0xff] %vm284_vm0, %v231_v0  ;;  %v235_v12 = vmax.f32 %v171_v3, 0.0  ;;  %v103_v14 = vmul.f32 %v381_v1, %v32_v60  ;;  %v104_v15 = vmul.f32 %v381_v1, %v33_v61  ;;  %v172_v16 = vadd.f32 %v386_v2, %v101_v10  ;;  %v47_v61 = vld [vmem:[%s961_s0 + $0x108] sm:$0xff]  ;;  %v49_v63 = vld [vmem:[%s961_s0 + $0x118] sm:$0xff] }
  0x11   :  { %297 = vst.msk [vmem:[%s964_s3 + $0x60] sm:$0xff] %vm284_vm0, %v232_v7  ;;  %298 = vst.msk [vmem:[%s964_s3 + $0x68] sm:$0xff] %vm284_vm0, %v233_v8  ;;  %v105_v17 = vmul.f32 %v381_v1, %v34_v4  ;;  %v106_v18 = vmul.f32 %v381_v1, %v35_v5  ;;  %v107_v19 = vmul.f32 %v381_v1, %v36_v6  ;;  %v50_v6 = vld [vmem:[%s961_s0 + $0x120] sm:$0xff]  ;;  %v51_v7 = vld [vmem:[%s961_s0 + $0x128] sm:$0xff] }
  0x12   :  { %299 = vst.msk [vmem:[%s964_s3 + $0x70] sm:$0xff] %vm284_vm0, %v234_v9  ;;  %300 = vst.msk [vmem:[%s964_s3 + $0x78] sm:$0xff] %vm284_vm0, %v235_v12  ;;  %v173_v20 = vadd.f32 %v386_v2, %v102_v13  ;;  %v174_v21 = vadd.f32 %v386_v2, %v103_v14  ;;  %v175_v22 = vadd.f32 %v386_v2, %v104_v15  ;;  %v236_v25 = vmax.f32 %v172_v16, 0.0  ;;  %v52_v8 = vld [vmem:[%s961_s0 + $0x130] sm:$0xff]  ;;  %v53_v13 = vld [vmem:[%s961_s0 + $0x138] sm:$0xff] }
  0x13   :  { %v108_v23 = vmul.f32 %v381_v1, %v37_v11  ;;  %v176_v26 = vadd.f32 %v386_v2, %v105_v17  ;;  %v177_v27 = vadd.f32 %v386_v2, %v106_v18  ;;  %v178_v28 = vadd.f32 %v386_v2, %v107_v19 }
  0x14   :  { %v237_v32 = vmax.f32 %v173_v20, 0.0  ;;  %v238_v33 = vmax.f32 %v174_v21, 0.0  ;;  %v239_v34 = vmax.f32 %v175_v22, 0.0  ;;  %301 = vst.msk [vmem:[%s964_s3 + $0x80] sm:$0xff] %vm284_vm0, %v236_v25  ;;  %v109_v42 = vmul.f32 %v381_v1, %v38_v24 }
  0x15   :  { %v179_v35 = vadd.f32 %v386_v2, %v108_v23  ;;  %v240_v39 = vmax.f32 %v176_v26, 0.0  ;;  %v241_v40 = vmax.f32 %v177_v27, 0.0  ;;  %v242_v41 = vmax.f32 %v178_v28, 0.0  ;;  %v54_v26 = vld [vmem:[%s961_s0 + $0x140] sm:$0xff] }
  0x16   :  { %302 = vst.msk [vmem:[%s964_s3 + $0x88] sm:$0xff] %vm284_vm0, %v237_v32  ;;  %303 = vst.msk [vmem:[%s964_s3 + $0x90] sm:$0xff] %vm284_vm0, %v238_v33  ;;  %v110_v45 = vmul.f32 %v381_v1, %v39_v29  ;;  %v111_v46 = vmul.f32 %v381_v1, %v40_v30  ;;  %v112_v47 = vmul.f32 %v381_v1, %v41_v31  ;;  %v55_v31 = vld [vmem:[%s961_s0 + $0x148] sm:$0xff]  ;;  %v56_v32 = vld [vmem:[%s961_s0 + $0x150] sm:$0xff] }
  0x17   :  { %304 = vst.msk [vmem:[%s964_s3 + $0x98] sm:$0xff] %vm284_vm0, %v239_v34  ;;  %v243_v44 = vmax.f32 %v179_v35, 0.0  ;;  %305 = vst.msk [vmem:[%s964_s3 + $0xa0] sm:$0xff] %vm284_vm0, %v240_v39  ;;  %v180_v48 = vadd.f32 %v386_v2, %v109_v42  ;;  %v113_v49 = vmul.f32 %v381_v1, %v42_v36  ;;  %v114_v50 = vmul.f32 %v381_v1, %v43_v37  ;;  %v57_v33 = vld [vmem:[%s961_s0 + $0x158] sm:$0xff]  ;;  %v59_v39 = vld [vmem:[%s961_s0 + $0x168] sm:$0xff] }
  0x18   :  { %306 = vst.msk [vmem:[%s964_s3 + $0xa8] sm:$0xff] %vm284_vm0, %v241_v40  ;;  %307 = vst.msk [vmem:[%s964_s3 + $0xb0] sm:$0xff] %vm284_vm0, %v242_v41  ;;  %v115_v51 = vmul.f32 %v381_v1, %v44_v38  ;;  %v181_v52 = vadd.f32 %v386_v2, %v110_v45  ;;  %v182_v53 = vadd.f32 %v386_v2, %v111_v46  ;;  %v58_v38 = vld [vmem:[%s961_s0 + $0x160] sm:$0xff]  ;;  %v60_v40 = vld [vmem:[%s961_s0 + $0x170] sm:$0xff] }
  0x19   :  { %308 = vst.msk [vmem:[%s964_s3 + $0xb8] sm:$0xff] %vm284_vm0, %v243_v44  ;;  %v183_v54 = vadd.f32 %v386_v2, %v112_v47  ;;  %v116_v55 = vmul.f32 %v381_v1, %v45_v43  ;;  %v244_v57 = vmax.f32 %v180_v48, 0.0  ;;  %v184_v58 = vadd.f32 %v386_v2, %v113_v49  ;;  %v61_v45 = vld [vmem:[%s961_s0 + $0x178] sm:$0xff] }
  0x1a   :  { %v185_v59 = vadd.f32 %v386_v2, %v114_v50  ;;  %v186_v60 = vadd.f32 %v386_v2, %v115_v51  ;;  %v245_v0 = vmax.f32 %v181_v52, 0.0  ;;  %v246_v3 = vmax.f32 %v182_v53, 0.0 }
  0x1b   :  { %v247_v4 = vmax.f32 %v183_v54, 0.0  ;;  %v187_v5 = vadd.f32 %v386_v2, %v116_v55  ;;  %309 = vst.msk [vmem:[%s964_s3 + $0xc0] sm:$0xff] %vm284_vm0, %v244_v57  ;;  %v248_v9 = vmax.f32 %v184_v58, 0.0  ;;  %v117_v12 = vmul.f32 %v381_v1, %v46_v56  ;;  %v62_v58 = vld [vmem:[%s961_s0 + $0x180] sm:$0xff] }
  0x1c   :  { %v249_v10 = vmax.f32 %v185_v59, 0.0  ;;  %v250_v11 = vmax.f32 %v186_v60, 0.0  ;;  %310 = vst.msk [vmem:[%s964_s3 + $0xc8] sm:$0xff] %vm284_vm0, %v245_v0  ;;  %311 = vst.msk [vmem:[%s964_s3 + $0xd0] sm:$0xff] %vm284_vm0, %v246_v3  ;;  %v118_v15 = vmul.f32 %v381_v1, %v47_v61  ;;  %v119_v16 = vmul.f32 %v381_v1, %v48_v62  ;;  %v64_v0 = vld [vmem:[%s961_s0 + $0x190] sm:$0xff]  ;;  %v65_v3 = vld [vmem:[%s961_s0 + $0x198] sm:$0xff] }
  0x1d   :  { %312 = vst.msk [vmem:[%s964_s3 + $0xd8] sm:$0xff] %vm284_vm0, %v247_v4  ;;  %v251_v14 = vmax.f32 %v187_v5, 0.0  ;;  %v120_v17 = vmul.f32 %v381_v1, %v49_v63  ;;  %313 = vst.msk [vmem:[%s964_s3 + $0xe0] sm:$0xff] %vm284_vm0, %v248_v9  ;;  %v188_v18 = vadd.f32 %v386_v2, %v117_v12  ;;  %v121_v19 = vmul.f32 %v381_v1, %v50_v6  ;;  %v63_v63 = vld [vmem:[%s961_s0 + $0x188] sm:$0xff] }
  0x1e   :  { %314 = vst.msk [vmem:[%s964_s3 + $0xe8] sm:$0xff] %vm284_vm0, %v249_v10  ;;  %315 = vst.msk [vmem:[%s964_s3 + $0xf0] sm:$0xff] %vm284_vm0, %v250_v11  ;;  %v122_v20 = vmul.f32 %v381_v1, %v51_v7  ;;  %v123_v21 = vmul.f32 %v381_v1, %v52_v8  ;;  %v189_v22 = vadd.f32 %v386_v2, %v118_v15  ;;  %v66_v8 = vld [vmem:[%s961_s0 + $0x1a0] sm:$0xff]  ;;  %v67_v9 = vld [vmem:[%s961_s0 + $0x1a8] sm:$0xff] }
  0x1f   :  { %316 = vst.msk [vmem:[%s964_s3 + $0xf8] sm:$0xff] %vm284_vm0, %v251_v14  ;;  %v190_v23 = vadd.f32 %v386_v2, %v119_v16  ;;  %v191_v24 = vadd.f32 %v386_v2, %v120_v17  ;;  %v124_v25 = vmul.f32 %v381_v1, %v53_v13  ;;  %v252_v27 = vmax.f32 %v188_v18, 0.0  ;;  %v68_v10 = vld [vmem:[%s961_s0 + $0x1b0] sm:$0xff]  ;;  %v69_v15 = vld [vmem:[%s961_s0 + $0x1b8] sm:$0xff] }
  0x20   :  { %v192_v28 = vadd.f32 %v386_v2, %v121_v19  ;;  %v193_v29 = vadd.f32 %v386_v2, %v122_v20  ;;  %v194_v30 = vadd.f32 %v386_v2, %v123_v21  ;;  %v253_v34 = vmax.f32 %v189_v22, 0.0 }
  0x21   :  { %v254_v35 = vmax.f32 %v190_v23, 0.0  ;;  %v255_v36 = vmax.f32 %v191_v24, 0.0  ;;  %v195_v37 = vadd.f32 %v386_v2, %v124_v25  ;;  %317 = vst.msk [vmem:[%s964_s3 + $0x100] sm:$0xff] %vm284_vm0, %v252_v27  ;;  %v125_v44 = vmul.f32 %v381_v1, %v54_v26 }
  0x22   :  { %v256_v41 = vmax.f32 %v192_v28, 0.0  ;;  %v257_v42 = vmax.f32 %v193_v29, 0.0  ;;  %v258_v43 = vmax.f32 %v194_v30, 0.0  ;;  %318 = vst.msk [vmem:[%s964_s3 + $0x108] sm:$0xff] %vm284_vm0, %v253_v34  ;;  %v126_v47 = vmul.f32 %v381_v1, %v55_v31  ;;  %v70_v28 = vld [vmem:[%s961_s0 + $0x1c0] sm:$0xff]  ;;  %v72_v34 = vld [vmem:[%s961_s0 + $0x1d0] sm:$0xff] }
  0x23   :  { %319 = vst.msk [vmem:[%s964_s3 + $0x110] sm:$0xff] %vm284_vm0, %v254_v35  ;;  %320 = vst.msk [vmem:[%s964_s3 + $0x118] sm:$0xff] %vm284_vm0, %v255_v36  ;;  %v259_v46 = vmax.f32 %v195_v37, 0.0  ;;  %v127_v48 = vmul.f32 %v381_v1, %v56_v32  ;;  %v128_v49 = vmul.f32 %v381_v1, %v57_v33  ;;  %v196_v50 = vadd.f32 %v386_v2, %v125_v44  ;;  %v71_v33 = vld [vmem:[%s961_s0 + $0x1c8] sm:$0xff]  ;;  %v73_v35 = vld [vmem:[%s961_s0 + $0x1d8] sm:$0xff] }
  0x24   :  { %321 = vst.msk [vmem:[%s964_s3 + $0x120] sm:$0xff] %vm284_vm0, %v256_v41  ;;  %322 = vst.msk [vmem:[%s964_s3 + $0x128] sm:$0xff] %vm284_vm0, %v257_v42  ;;  %v129_v51 = vmul.f32 %v381_v1, %v58_v38  ;;  %v130_v52 = vmul.f32 %v381_v1, %v59_v39  ;;  %v131_v53 = vmul.f32 %v381_v1, %v60_v40  ;;  %v74_v40 = vld [vmem:[%s961_s0 + $0x1e0] sm:$0xff]  ;;  %v75_v41 = vld [vmem:[%s961_s0 + $0x1e8] sm:$0xff] }
  0x25   :  { %323 = vst.msk [vmem:[%s964_s3 + $0x130] sm:$0xff] %vm284_vm0, %v258_v43  ;;  %324 = vst.msk [vmem:[%s964_s3 + $0x138] sm:$0xff] %vm284_vm0, %v259_v46  ;;  %v197_v54 = vadd.f32 %v386_v2, %v126_v47  ;;  %v198_v55 = vadd.f32 %v386_v2, %v127_v48  ;;  %v199_v56 = vadd.f32 %v386_v2, %v128_v49  ;;  %v260_v59 = vmax.f32 %v196_v50, 0.0  ;;  %v76_v42 = vld [vmem:[%s961_s0 + $0x1f0] sm:$0xff]  ;;  %v77_v47 = vld [vmem:[%s961_s0 + $0x1f8] sm:$0xff] }
  0x26   :  { %v132_v57 = vmul.f32 %v381_v1, %v61_v45  ;;  %v200_v60 = vadd.f32 %v386_v2, %v129_v51  ;;  %v201_v61 = vadd.f32 %v386_v2, %v130_v52  ;;  %v202_v62 = vadd.f32 %v386_v2, %v131_v53 }
  0x27   :  { %v261_v4 = vmax.f32 %v197_v54, 0.0  ;;  %v262_v5 = vmax.f32 %v198_v55, 0.0  ;;  %v263_v6 = vmax.f32 %v199_v56, 0.0  ;;  %325 = vst.msk [vmem:[%s964_s3 + $0x140] sm:$0xff] %vm284_vm0, %v260_v59  ;;  %v133_v14 = vmul.f32 %v381_v1, %v62_v58 }
  0x28   :  { %v203_v7 = vadd.f32 %v386_v2, %v132_v57  ;;  %v264_v11 = vmax.f32 %v200_v60, 0.0  ;;  %v265_v12 = vmax.f32 %v201_v61, 0.0  ;;  %v266_v13 = vmax.f32 %v202_v62, 0.0 }
  0x29   :  { %326 = vst.msk [vmem:[%s964_s3 + $0x148] sm:$0xff] %vm284_vm0, %v261_v4  ;;  %327 = vst.msk [vmem:[%s964_s3 + $0x150] sm:$0xff] %vm284_vm0, %v262_v5  ;;  %v134_v17 = vmul.f32 %v381_v1, %v63_v63  ;;  %v135_v18 = vmul.f32 %v381_v1, %v64_v0  ;;  %v136_v19 = vmul.f32 %v381_v1, %v65_v3 }
  0x2a   :  { %328 = vst.msk [vmem:[%s964_s3 + $0x158] sm:$0xff] %vm284_vm0, %v263_v6  ;;  %v267_v16 = vmax.f32 %v203_v7, 0.0  ;;  %329 = vst.msk [vmem:[%s964_s3 + $0x160] sm:$0xff] %vm284_vm0, %v264_v11  ;;  %v204_v20 = vadd.f32 %v386_v2, %v133_v14  ;;  %v137_v21 = vmul.f32 %v381_v1, %v66_v8  ;;  %v138_v22 = vmul.f32 %v381_v1, %v67_v9 }
  0x2b   :  { %330 = vst.msk [vmem:[%s964_s3 + $0x168] sm:$0xff] %vm284_vm0, %v265_v12  ;;  %331 = vst.msk [vmem:[%s964_s3 + $0x170] sm:$0xff] %vm284_vm0, %v266_v13  ;;  %v139_v23 = vmul.f32 %v381_v1, %v68_v10  ;;  %v205_v24 = vadd.f32 %v386_v2, %v134_v17  ;;  %v206_v25 = vadd.f32 %v386_v2, %v135_v18 }
  0x2c   :  { %332 = vst.msk [vmem:[%s964_s3 + $0x178] sm:$0xff] %vm284_vm0, %v267_v16  ;;  %v207_v26 = vadd.f32 %v386_v2, %v136_v19  ;;  %v140_v27 = vmul.f32 %v381_v1, %v69_v15  ;;  %v268_v29 = vmax.f32 %v204_v20, 0.0  ;;  %v208_v30 = vadd.f32 %v386_v2, %v137_v21 }
  0x2d   :  { %v209_v31 = vadd.f32 %v386_v2, %v138_v22  ;;  %v210_v32 = vadd.f32 %v386_v2, %v139_v23  ;;  %v269_v36 = vmax.f32 %v205_v24, 0.0  ;;  %v270_v37 = vmax.f32 %v206_v25, 0.0 }
  0x2e   :  { %v271_v38 = vmax.f32 %v207_v26, 0.0  ;;  %v211_v39 = vadd.f32 %v386_v2, %v140_v27  ;;  %333 = vst.msk [vmem:[%s964_s3 + $0x180] sm:$0xff] %vm284_vm0, %v268_v29  ;;  %v272_v43 = vmax.f32 %v208_v30, 0.0  ;;  %v141_v46 = vmul.f32 %v381_v1, %v70_v28 }
  0x2f   :  { %v273_v44 = vmax.f32 %v209_v31, 0.0  ;;  %v274_v45 = vmax.f32 %v210_v32, 0.0  ;;  %334 = vst.msk [vmem:[%s964_s3 + $0x188] sm:$0xff] %vm284_vm0, %v269_v36  ;;  %335 = vst.msk [vmem:[%s964_s3 + $0x190] sm:$0xff] %vm284_vm0, %v270_v37  ;;  %v142_v49 = vmul.f32 %v381_v1, %v71_v33  ;;  %v143_v50 = vmul.f32 %v381_v1, %v72_v34 }
  0x30   :  { %336 = vst.msk [vmem:[%s964_s3 + $0x198] sm:$0xff] %vm284_vm0, %v271_v38  ;;  %v275_v48 = vmax.f32 %v211_v39, 0.0  ;;  %v144_v51 = vmul.f32 %v381_v1, %v73_v35  ;;  %337 = vst.msk [vmem:[%s964_s3 + $0x1a0] sm:$0xff] %vm284_vm0, %v272_v43  ;;  %v212_v52 = vadd.f32 %v386_v2, %v141_v46  ;;  %v145_v53 = vmul.f32 %v381_v1, %v74_v40 }
  0x31   :  { %338 = vst.msk [vmem:[%s964_s3 + $0x1a8] sm:$0xff] %vm284_vm0, %v273_v44  ;;  %339 = vst.msk [vmem:[%s964_s3 + $0x1b0] sm:$0xff] %vm284_vm0, %v274_v45  ;;  %v146_v54 = vmul.f32 %v381_v1, %v75_v41  ;;  %v147_v55 = vmul.f32 %v381_v1, %v76_v42  ;;  %v213_v56 = vadd.f32 %v386_v2, %v142_v49 }
  0x32   :  { %340 = vst.msk [vmem:[%s964_s3 + $0x1b8] sm:$0xff] %vm284_vm0, %v275_v48  ;;  %v214_v57 = vadd.f32 %v386_v2, %v143_v50  ;;  %v215_v58 = vadd.f32 %v386_v2, %v144_v51  ;;  %v148_v59 = vmul.f32 %v381_v1, %v77_v47  ;;  %v276_v60 = vmax.f32 %v212_v52, 0.0 }
  0x33   :  { %v216_v61 = vadd.f32 %v386_v2, %v145_v53  ;;  %v217_v62 = vadd.f32 %v386_v2, %v146_v54  ;;  %v218_v63 = vadd.f32 %v386_v2, %v147_v55  ;;  %v277_v0 = vmax.f32 %v213_v56, 0.0 }
  0x34   :  { %v278_v3 = vmax.f32 %v214_v57, 0.0  ;;  %v279_v4 = vmax.f32 %v215_v58, 0.0  ;;  %v219_v5 = vadd.f32 %v386_v2, %v148_v59  ;;  %341 = vst.msk [vmem:[%s964_s3 + $0x1c0] sm:$0xff] %vm284_vm0, %v276_v60 }
  0x35   :  { %v280_v6 = vmax.f32 %v216_v61, 0.0  ;;  %v281_v7 = vmax.f32 %v217_v62, 0.0  ;;  %v282_v1 = vmax.f32 %v218_v63, 0.0  ;;  %342 = vst.msk [vmem:[%s964_s3 + $0x1c8] sm:$0xff] %vm284_vm0, %v277_v0 }
  0x36   :  { %343 = vst.msk [vmem:[%s964_s3 + $0x1d0] sm:$0xff] %vm284_vm0, %v278_v3  ;;  %344 = vst.msk [vmem:[%s964_s3 + $0x1d8] sm:$0xff] %vm284_vm0, %v279_v4  ;;  %v283_v2 = vmax.f32 %v219_v5, 0.0 }
  0x37   :  { %345 = vst.msk [vmem:[%s964_s3 + $0x1e0] sm:$0xff] %vm284_vm0, %v280_v6  ;;  %346 = vst.msk [vmem:[%s964_s3 + $0x1e8] sm:$0xff] %vm284_vm0, %v281_v7 }
  0x38   :  { %347 = vst.msk [vmem:[%s964_s3 + $0x1f0] sm:$0xff] %vm284_vm0, %v282_v1  ;;  %348 = vst.msk [vmem:[%s964_s3 + $0x1f8] sm:$0xff] %vm284_vm0, %v283_v2 }

// kernel: densenet_forward.15
= control target key start
LH: loop header
LB: loop body
LE: loop exit
PB: predicated region body
PF: predicated region fallthrough
CT: control target
= control target key end

     0   :  { %s680_s18 = smov 0   ;;  %s682_s19 = smov 0   ;;  %s791_s0 = inlined_call_operand.vmem [shape: f32[2,18,18,16], index: 0, kind: input, shape index: {}, may-alias: {0,1}]   ;;  %s792_s1 = inlined_call_operand.vmem [shape: f32[2,18,18,16], index: 1, kind: input, shape index: {}, may-alias: {0,1}]   ;;  %s793_s2 = inlined_call_operand.vmem [shape: f32[18,1], index: 2, kind: input, shape index: {}]   ;;  %s794_s3 = inlined_call_operand.vmem [shape: f32[2,8,18,16], index: 3, kind: output, shape index: {0}]   ;;  %s795_s4 = inlined_call_operand.vmem [shape: f32[1,16], index: 4, kind: output, shape index: {1}]   ;;  %s796_s5 = inlined_call_operand.vmem [shape: f32[1,16], index: 5, kind: output, shape index: {2}]  }
   0x1   :  { %s684_s20 = smov 0   ;;  %s686_s21 = smov 0  }
   0x2   :  { %s688_s22 = smov 0  }
   0x3 LB: > { %s25_s23 = sadd.s32 1, %s637_s20  ;;  %s28_s24 = sadd.s32 1, %s641_s21  ;;  %s645_s22 = sphi %s688_s22, %s16_s22   ;;  %s641_s21 = sphi %s686_s21, %s801_s21   ;;  %s637_s20 = sphi %s684_s20, %s800_s20   ;;  %s633_s19 = sphi %s682_s19, %s799_s19   ;;  %s629_s18 = sphi %s680_s18, %s798_s18  }
   0x4   : > { %p26_p0 = scmp.ge.s32.totalorder %s25_s23, 8  ;;  %p544_p1 = scmp.ge.s32.totalorder %s645_s22, 1 }
   0x5   : > { %p226_p2 = scmp.lt.s32.totalorder %s645_s22, 17 }
   0x6   : > { %s803_s23 = smov (%p26_p0, %s25_s23), 0  ;;  %s805_s24 = smov (!%p26_p0, %s28_s24), %s641_s21 }
   0x7   : > { %p227_p3 = pnand %p544_p1, %p226_p2  ;;  %p30_p4 = scmp.ge.s32.totalorder %s805_s24, 2 }
   0x8   : > { %vm323_vm0 = vcmask (!%p227_p3), 130048   ;;  %p350_p5 = scmp.eq.s32.totalorder (!%p227_p3), %s633_s19, 0  ;;  %p351_p6 = scmp.eq.s32.totalorder (!%p227_p3), %s629_s18, 0  ;;  %vm326_vm1 = vcmask (!%p227_p3), 125952   ;;  %v647_v0 = vmov (!%p227_p3), 0.0   ;;  %vm330_vm2 = vcmask (!%p227_p3), 123904  }
   0x9   : > { %s807_s24 = smov (%p30_p4, %s805_s24), 0  ;;  %230 = sbr.rel (%p227_p3) target bundleno = 204 (0xcc), region = 32 }
   0xa   : > { %324 = vst.msk [vmem:[#allocation2] sm:$0xff] (!%p227_p3), %vm323_vm0, %v647_v0  ;;  %325 = vst.msk [vmem:[#allocation2 + $0x8] sm:$0xff] (!%p227_p3), %vm323_vm0, %v647_v0  ;;  %s545_s25 = sshll.u32 (!%p227_p3), %s629_s18, 1  ;;  %p275_p7 = scmp.lt.s32.totalorder (!%p227_p3), %s633_s19, 1 }
   0xb   : > { %327 = vst.msk [vmem:[#allocation2 + $0x10] sm:$0xf] (!%p227_p3), %vm326_vm1, %v647_v0  ;;  %p716_p8 = pnand (!%p227_p3), %p351_p6, %p350_p5  ;;  %p277_p9 = scmp.lt.s32.totalorder (!%p227_p3), %s545_s25, 17 }
   0xc   : > { %s556_s29 = sadd.s32 (!%p227_p3), 2, %s545_s25  ;;  %p300_p11 = scmp.lt.s32.totalorder (!%p227_p3), %s629_s18, 7 }
   0xd   : > { %p289_p10 = scmp.lt.s32.totalorder (!%p227_p3), %s556_s29, 17 }
  0x10   : > { %s809_s19 = smov (!%p275_p7, %s633_s19), 1  ;;  %s811_s29 = smov (!%p289_p10, %s556_s29), 17 }
  0x11   : > { %s278_s27 = scalar_select %p277_p9, %s545_s25, 17 }
  0x12   : > { %s558_s28 = smul.u32 54, %s809_s19  ;;  %s813_s18 = smov (!%p300_p11, %s629_s18), 7  ;;  %v343_v29 = vld [vmem:[#allocation2 + $0x12] sm:$0x3]  ;;  %vm356_vm3 = vcmask (!%p716_p8), 122880   ;;  %v648_v31 = vmov (!%p716_p8), 0.0  }
  0x13   : > { %s557_s30 = smul.u32 3, %s278_s27  ;;  %357 = vst.msk [vmem:[%s795_s4] sm:$0x1] (!%p716_p8), %vm356_vm3, %v648_v31  ;;  %358 = vst.msk [vmem:[%s796_s5] sm:$0x1] (!%p716_p8), %vm356_vm3, %v648_v31 }
  0x14   : > { %s559_s11 = smul.u32 3, %s811_s29 }
  0x15   : > { %s281_s6 = sadd.s32 %s558_s28, %s557_s30  ;;  %s561_s17 = smul.u32 24, %s809_s19 }
  0x16   : > { %s546_s7 = sshll.u32 %s281_s6, 3  ;;  %s293_s12 = sadd.s32 %s559_s11, %s558_s28 }
  0x17   : > { %s283_s10 = scalar_lea.vmem %s791_s0, %s546_s7  ;;  %s548_s13 = sshll.u32 %s293_s12, 3 }
  0x18   : > { %v307_v1 = vld [vmem:[%s283_s10] sm:$0xff]  ;;  %v550_v2 = vld [vmem:[%s283_s10 + $0x18] sm:$0xff]  ;;  %v308_v3 = vld [vmem:[%s283_s10 + $0x8] sm:$0xff]  ;;  %s295_s16 = scalar_lea.vmem %s792_s1, %s548_s13  ;;  %s560_s25 = smul.u32 3, %s813_s18 }
  0x19   : > { %v551_v4 = vld [vmem:[%s283_s10 + $0x20] sm:$0xff]  ;;  %v309_v5 = vld [vmem:[%s283_s10 + $0x10] sm:$0x3]  ;;  %v552_v6 = vld [vmem:[%s283_s10 + $0x28] sm:$0x3]  ;;  %v314_v7 = vmax.f32 %v307_v1, %v550_v2 }
  0x1a   : > { %v315_v8 = vmax.f32 %v308_v3, %v551_v4  ;;  %v316_v9 = vmax.f32 %v309_v5, %v552_v6  ;;  %v317_v10 = vld [vmem:[%s295_s16] sm:$0xff]  ;;  %v318_v11 = vld [vmem:[%s295_s16 + $0x8] sm:$0xff]  ;;  %v319_v12 = vld [vmem:[%s295_s16 + $0x10] sm:$0x3]  ;;  %s304_s27 = sadd.s32 %s561_s17, %s560_s25 }
  0x1b   : > { %v320_v13 = vmax.f32 %v314_v7, %v317_v10  ;;  %s549_s28 = sshll.u32 %s304_s27, 3 }
  0x1c   : > { %v321_v14 = vmax.f32 %v315_v8, %v318_v11  ;;  %v322_v15 = vmax.f32 %v316_v9, %v319_v12  ;;  %s306_s6 = scalar_lea.vmem %s794_s3, %s549_s28 }
  0x1d   : > { %328 = vst.msk [vmem:[#allocation2] sm:$0xff] %vm323_vm0, %v320_v13 }
  0x1e   : > { %329 = vst.msk [vmem:[#allocation2 + $0x8] sm:$0xff] %vm323_vm0, %v321_v14 }
  0x1f   : > { %331 = vst.msk [vmem:[#allocation2 + $0x10] sm:$0x3] %vm330_vm2, %v322_v15 }
  0x24   : > { %v332_v16 = vld [vmem:[#allocation2] sm:$0xff] }
  0x25   : > { %v335_v17 = vld [vmem:[#allocation2 + $0x1] sm:$0xff] }
  0x26   : > { %v338_v18 = vmax.f32 %v332_v16, %v335_v17  ;;  %v333_v19 = vld [vmem:[#allocation2 + $0x8] sm:$0xff]  ;;  %v334_v23 = vld [vmem:[#allocation2 + $0x10] sm:$0x3] }
  0x27   : > { %v336_v20 = vld [vmem:[#allocation2 + $0x9] sm:$0xff]  ;;  %v337_v24 = vld [vmem:[#allocation2 + $0x11] sm:$0x3]  ;;  %355 = sbr.rel (%p716_p8) target bundleno = 46 (0x2e), region = 36 }
  0x28   : > { %v341_v21 = vld [vmem:[#allocation2 + $0x2] sm:$0xff]  ;;  %v339_v22 = vmax.f32 %v333_v19, %v336_v20  ;;  %v342_v26 = vld [vmem:[#allocation2 + $0xa] sm:$0xff]  ;;  %v340_v27 = vmax.f32 %v334_v23, %v337_v24 }
  0x29   : > { %v344_v25 = vmax.f32 %v338_v18, %v341_v21 }
  0x2a   : > { %v345_v28 = vmax.f32 %v339_v22, %v342_v26  ;;  %v346_v30 = vmax.f32 %v340_v27, %v343_v29 }
  0x2b   : > { %347 = vst.msk [vmem:[%s306_s6] sm:$0xff] %vm323_vm0, %v344_v25 }
  0x2c   : > { %348 = vst.msk [vmem:[%s306_s6 + $0x8] sm:$0xff] %vm323_vm0, %v345_v28 }
  0x2d   : > { %349 = vst.msk [vmem:[%s306_s6 + $0x10] sm:$0x3] %vm330_vm2, %v346_v30 }
  0x2e PF: > { %v359_v32 = vld [vmem:[%s793_s2] sm:$0xff]  ;;  %v361_v33 = vld [vmem:[%s793_s2 + $0x10] sm:$0x3]  ;;  %v649_v34 = vmov 0   ;;  %v360_v35 = vld [vmem:[%s793_s2 + $0x8] sm:$0xff]  ;;  %vm393_vm4 = vcmask 122880  }
  0x2f   : > { %605 = vset.pattern.permute.xlu0 %v649_v34  ;;  %606 = vset.pattern.permute.xlu1 %v649_v34  ;;  %v380_v0 = vld [vmem:[%s795_s4] sm:$0x1] }
  0x30   : > { %364 = vperm.xlu0 %605, %v359_v32   ;;  %374 = vperm.xlu1 %606, %v361_v33   ;;  %v395_v3 = vld [vmem:[%s796_s5] sm:$0x1] }
  0x34   : > { %369 = vperm.xlu0 %605, %v360_v35  }
  0xaf   : > { %v365_v36 = vpop.permute.xlu0 %364  ;;  %v375_v37 = vpop.permute.xlu1 %374 }
  0xb0   : > { %v377_v38 = vmul.f32 %v365_v36, %v344_v25  ;;  %v379_v39 = vmul.f32 %v375_v37, %v346_v30 }
  0xb2   : > { %v396_v41 = vmul.f32 %v377_v38, %v377_v38  ;;  %v398_v43 = vmul.f32 %v379_v39, %v379_v39  ;;  %v381_v44 = vsel %vm323_vm0, %v377_v38, 0.0  ;;  %v384_v47 = vsel %vm330_vm2, %v379_v39, 0.0 }
  0xb3   : > { %v370_v40 = vpop.permute.xlu0 %369 }
  0xb4   : > { %v378_v42 = vmul.f32 %v370_v40, %v345_v28  ;;  %v399_v49 = vsel %vm323_vm0, %v396_v41, 0.0  ;;  %v402_v51 = vsel %vm330_vm2, %v398_v43, 0.0 }
  0xb6   : > { %v382_v45 = vsel %vm323_vm0, %v378_v42, 0.0  ;;  %v397_v46 = vmul.f32 %v378_v42, %v378_v42 }
  0xb7   : > { %v383_v48 = vadd.f32 %v382_v45, %v381_v44 }
  0xb8   : > { %v400_v50 = vsel %vm323_vm0, %v397_v46, 0.0 }
  0xb9   : > { %v401_v52 = vadd.f32 %v400_v50, %v399_v49  ;;  %v385_v53 = vadd.f32 %v384_v47, %v383_v48 }
  0xbb   : > { %v386_v54 = vrot.slane %v385_v53, 4  ;;  %v403_v55 = vadd.f32 %v402_v51, %v401_v52 }
  0xbd   : > { %v387_v56 = vadd.f32 %v386_v54, %v385_v53  ;;  %v404_v57 = vrot.slane %v403_v55, 4 }
  0xbf   : > { %v388_v58 = vrot.slane %v387_v56, 2  ;;  %v405_v59 = vadd.f32 %v404_v57, %v403_v55 }
  0xc1   : > { %v389_v60 = vadd.f32 %v388_v58, %v387_v56  ;;  %v406_v61 = vrot.slane %v405_v59, 2 }
  0xc3   : > { %v390_v62 = vrot.slane %v389_v60, 1  ;;  %v407_v63 = vadd.f32 %v406_v61, %v405_v59 }
  0xc5   : > { %v391_v1 = vadd.f32 %v390_v62, %v389_v60  ;;  %v408_v2 = vrot.slane %v407_v63, 1 }
  0xc7   : > { %v392_v4 = vadd.f32 %v391_v1, %v380_v0  ;;  %v409_v5 = vadd.f32 %v408_v2, %v407_v63 }
  0xc9   : > { %394 = vst.msk [vmem:[%s795_s4] sm:$0x1] %vm393_vm4, %v392_v4  ;;  %v410_v6 = vadd.f32 %v409_v5, %v395_v3 }
  0xcb   : > { %411 = vst.msk [vmem:[%s796_s5] sm:$0x1] %vm393_vm4, %v410_v6 }
  0xcc PF: > { %s16_s22 = sadd.s32 1, %s645_s22   ;;  %s798_s18 = smov %s637_s20 }
  0xcd   : > { %p13_p12 = scmp.ge.s32.totalorder %s16_s22, 18   ;;  %s799_s19 = smov %s641_s21 }
  0xce   : > { %s800_s20 = smov %s803_s23  ;;  %s801_s21 = smov %s807_s24 }
  0xcf   :  { %15 = sbr.rel (!%p13_p12) target bundleno = 3 (0x3), region = 86 }

// kernel: densenet_forward.13
= control target key start
LH: loop header
LB: loop body
LE: loop exit
PB: predicated region body
PF: predicated region fallthrough
CT: control target
= control target key end

     0   :  { %v1941_v0 = vmov 0   ;;  %vm446_vm0 = vcmask 195584   ;;  %vm543_vm1 = vcmask 1043456   ;;  %vm836_vm2 = vcmask 130048   ;;  %s3101_s1 = inlined_call_operand.vmem [shape: bf16[152,16], index: 1, kind: input, shape index: {}]   ;;  %s3102_s0 = inlined_call_operand.vmem [shape: bf16[512,152], index: 0, kind: input, shape index: {}]   ;;  %s3103_s2 = inlined_call_operand.vmem [shape: f32[512,1], index: 2, kind: input, shape index: {}]   ;;  %s3104_s3 = inlined_call_operand.vmem [shape: f32[512,16], index: 3, kind: output, shape index: {0}]   ;;  %s3105_s4 = inlined_call_operand.vmem [shape: f32[1,16], index: 4, kind: output, shape index: {1}]   ;;  %s3106_s5 = inlined_call_operand.vmem [shape: f32[1,16], index: 5, kind: output, shape index: {2}]  }
   0x1   :  { %547 = vmatprep.subr.bf16.mxu0 %v1941_v0  ;;  %1811 = vmatprep.subr.bf16.mxu1 %v1941_v0  ;;  %v1835_v1 = vld [vmem:[%s3101_s1] sm:$0xff]   ;;  %v1836_v2 = vld [vmem:[%s3101_s1 + $0x8] sm:$0xff]   ;;  %v1837_v3 = vld [vmem:[%s3101_s1 + $0x10] sm:$0xff]   ;;  %vm905_vm3 = vcmask 122880  }
   0x2   :  { %1833 = vset.pattern.permute.xlu0 %v1941_v0  ;;  %1834 = vset.pattern.permute.xlu1 %v1941_v0  ;;  %v1838_v4 = vld [vmem:[%s3101_s1 + $0x18] sm:$0xff]   ;;  %v1847_v5 = vld [vmem:[%s3102_s0 + $0x4] ss:$8 sps:$4 sm:$0xff]   ;;  %v910_v10 = vld [vmem:[%s3103_s2 + $0x10] sm:$0xff] }
   0x3   :  { %548 = vmatpush1.bf16.msra.mxu0 %v1835_v1  ;;  %1821 = vmatpush1.bf16.msra.mxu1 %v1835_v1  ;;  %v1850_v6 = vld [vmem:[%s3102_s0 + $0x104] ss:$8 sps:$4 sm:$0xff]   ;;  %v911_v12 = vld [vmem:[%s3103_s2 + $0x18] sm:$0xff]  ;;  %v1841_v13 = vld [vmem:[%s3101_s1 + $0x30] sm:$0xff]  }
   0x4   :  { %549 = vmatprep.subr.bf16.mxu0 %v1941_v0  ;;  %1812 = vmatprep.subr.bf16.mxu1 %v1941_v0  ;;  %v1839_v7 = vld [vmem:[%s3101_s1 + $0x20] sm:$0xff]   ;;  %v1840_v9 = vld [vmem:[%s3101_s1 + $0x28] sm:$0xff]   ;;  %v1842_v16 = vld [vmem:[%s3101_s1 + $0x38] sm:$0xff]  }
   0x5   :  { %1779 = vmatprep.mubr.msk.bf16.mxu0 %vm446_vm0, %v1847_v5  ;;  %1795 = vmatprep.mubr.msk.bf16.mxu1 %vm446_vm0, %v1850_v6  ;;  %v908_v8 = vld [vmem:[%s3103_s2] sm:$0xff]  ;;  %v909_v11 = vld [vmem:[%s3103_s2 + $0x8] sm:$0xff]  ;;  %v914_v17 = vld [vmem:[%s3103_s2 + $0x30] sm:$0xff] }
   0x6   :  { %974 = vperm.xlu0 %1833, %v908_v8   ;;  %984 = vperm.xlu1 %1834, %v910_v10   ;;  %v912_v14 = vld [vmem:[%s3103_s2 + $0x20] sm:$0xff]  ;;  %v913_v15 = vld [vmem:[%s3103_s2 + $0x28] sm:$0xff]  ;;  %v915_v18 = vld [vmem:[%s3103_s2 + $0x38] sm:$0xff] }
   0x7   :  { %550 = vmatpush1.bf16.msra.mxu0 %v1836_v2  ;;  %1822 = vmatpush1.bf16.msra.mxu1 %v1836_v2  ;;  %v1843_v19 = vld [vmem:[%s3101_s1 + $0x40] sm:$0xff]   ;;  %v1844_v20 = vld [vmem:[%s3101_s1 + $0x48] ss:$0 sps:$4 sm:$0xff]   ;;  %v918_v26 = vld [vmem:[%s3103_s2 + $0x50] sm:$0xff] }
   0x8   :  { %551 = vmatprep.subr.bf16.mxu0 %v1941_v0  ;;  %1813 = vmatprep.subr.bf16.mxu1 %v1941_v0  ;;  %v916_v21 = vld [vmem:[%s3103_s2 + $0x40] sm:$0xff]  ;;  %v917_v22 = vld [vmem:[%s3103_s2 + $0x48] sm:$0xff]  ;;  %v545_v23 = vsel %vm543_vm1, %v1844_v20, 0  ;;  %v919_v27 = vld [vmem:[%s3103_s2 + $0x58] sm:$0xff] }
   0x9   :  { %v1845_v24 = vld [vmem:[%s3102_s0] ss:$8 sps:$4 sm:$0xff]   ;;  %v1851_v28 = vld [vmem:[%s3102_s0 + $0x14] ss:$8 sps:$4 sm:$0xff]   ;;  %v1855_v32 = vld [vmem:[%s3102_s0 + $0x10] ss:$8 sps:$4 sm:$0xff]  }
   0xa   :  { %979 = vperm.xlu0 %1833, %v909_v11   ;;  %989 = vperm.xlu1 %1834, %v911_v12   ;;  %v1848_v25 = vld [vmem:[%s3102_s0 + $0x100] ss:$8 sps:$4 sm:$0xff]   ;;  %v1853_v29 = vld [vmem:[%s3102_s0 + $0x114] ss:$8 sps:$4 sm:$0xff]   ;;  %v1856_v33 = vld [vmem:[%s3102_s0 + $0x110] ss:$8 sps:$4 sm:$0xff]  }
   0xb   :  { %552 = vmatpush1.bf16.msra.mxu0 %v1837_v3  ;;  %1823 = vmatpush1.bf16.msra.mxu1 %v1837_v3  ;;  %v920_v30 = vld [vmem:[%s3103_s2 + $0x60] sm:$0xff]  ;;  %v921_v31 = vld [vmem:[%s3103_s2 + $0x68] sm:$0xff]  ;;  %v922_v34 = vld [vmem:[%s3103_s2 + $0x70] sm:$0xff] }
   0xc   :  { %553 = vmatprep.subr.bf16.mxu0 %v1941_v0  ;;  %1814 = vmatprep.subr.bf16.mxu1 %v1941_v0  ;;  %v923_v35 = vld [vmem:[%s3103_s2 + $0x78] sm:$0xff]  ;;  %v1857_v36 = vld [vmem:[%s3102_s0 + $0x24] ss:$8 sps:$4 sm:$0xff]   ;;  %v1861_v40 = vld [vmem:[%s3102_s0 + $0x20] ss:$8 sps:$4 sm:$0xff]  }
   0xd   :  { %v1859_v37 = vld [vmem:[%s3102_s0 + $0x124] ss:$8 sps:$4 sm:$0xff]   ;;  %v1862_v41 = vld [vmem:[%s3102_s0 + $0x120] ss:$8 sps:$4 sm:$0xff]   ;;  %v926_v42 = vld [vmem:[%s3103_s2 + $0x90] sm:$0xff] }
   0xe   :  { %994 = vperm.xlu0 %1833, %v912_v14   ;;  %999 = vperm.xlu1 %1834, %v913_v15   ;;  %v924_v38 = vld [vmem:[%s3103_s2 + $0x80] sm:$0xff]  ;;  %v925_v39 = vld [vmem:[%s3103_s2 + $0x88] sm:$0xff]  ;;  %v927_v43 = vld [vmem:[%s3103_s2 + $0x98] sm:$0xff] }
   0xf   :  { %554 = vmatpush1.bf16.msra.mxu0 %v1838_v4  ;;  %1824 = vmatpush1.bf16.msra.mxu1 %v1838_v4  ;;  %v1863_v44 = vld [vmem:[%s3102_s0 + $0x34] ss:$8 sps:$4 sm:$0xff]   ;;  %v928_v46 = vld [vmem:[%s3103_s2 + $0xa0] sm:$0xff]  ;;  %v929_v47 = vld [vmem:[%s3103_s2 + $0xa8] sm:$0xff] }
  0x10   :  { %555 = vmatprep.subr.bf16.mxu0 %v1941_v0  ;;  %1815 = vmatprep.subr.bf16.mxu1 %v1941_v0  ;;  %v1865_v45 = vld [vmem:[%s3102_s0 + $0x134] ss:$8 sps:$4 sm:$0xff]   ;;  %v1867_v48 = vld [vmem:[%s3102_s0 + $0x30] ss:$8 sps:$4 sm:$0xff]   ;;  %v1869_v52 = vld [vmem:[%s3102_s0 + $0x44] ss:$8 sps:$4 sm:$0xff]  }
  0x11   :  { %v1868_v49 = vld [vmem:[%s3102_s0 + $0x130] ss:$8 sps:$4 sm:$0xff]   ;;  %v1871_v53 = vld [vmem:[%s3102_s0 + $0x144] ss:$8 sps:$4 sm:$0xff]   ;;  %v1873_v56 = vld [vmem:[%s3102_s0 + $0x40] ss:$8 sps:$4 sm:$0xff]  }
  0x12   :  { %1004 = vperm.xlu0 %1833, %v914_v17   ;;  %1009 = vperm.xlu1 %1834, %v915_v18   ;;  %v930_v50 = vld [vmem:[%s3103_s2 + $0xb0] sm:$0xff]  ;;  %v931_v51 = vld [vmem:[%s3103_s2 + $0xb8] sm:$0xff]  ;;  %v932_v54 = vld [vmem:[%s3103_s2 + $0xc0] sm:$0xff] }
  0x13   :  { %556 = vmatpush1.bf16.msra.mxu0 %v1839_v7  ;;  %1825 = vmatpush1.bf16.msra.mxu1 %v1839_v7  ;;  %v933_v55 = vld [vmem:[%s3103_s2 + $0xc8] sm:$0xff]  ;;  %v934_v58 = vld [vmem:[%s3103_s2 + $0xd0] sm:$0xff]  ;;  %v935_v59 = vld [vmem:[%s3103_s2 + $0xd8] sm:$0xff] }
  0x14   :  { %557 = vmatprep.subr.bf16.mxu0 %v1941_v0  ;;  %1816 = vmatprep.subr.bf16.mxu1 %v1941_v0  ;;  %v1874_v57 = vld [vmem:[%s3102_s0 + $0x140] ss:$8 sps:$4 sm:$0xff]   ;;  %v1875_v60 = vld [vmem:[%s3102_s0 + $0x54] ss:$8 sps:$4 sm:$0xff]   ;;  %v1880_v1 = vld [vmem:[%s3102_s0 + $0x150] ss:$8 sps:$4 sm:$0xff]  }
  0x15   :  { %v1877_v61 = vld [vmem:[%s3102_s0 + $0x154] ss:$8 sps:$4 sm:$0xff]   ;;  %v936_v62 = vld [vmem:[%s3103_s2 + $0xe0] sm:$0xff]  ;;  %v937_v63 = vld [vmem:[%s3103_s2 + $0xe8] sm:$0xff] }
  0x16   :  { %1014 = vperm.xlu0 %1833, %v916_v21   ;;  %1019 = vperm.xlu1 %1834, %v917_v22   ;;  %v938_v2 = vld [vmem:[%s3103_s2 + $0xf0] sm:$0xff]  ;;  %v939_v3 = vld [vmem:[%s3103_s2 + $0xf8] sm:$0xff]  ;;  %v1881_v4 = vld [vmem:[%s3102_s0 + $0x64] ss:$8 sps:$4 sm:$0xff]  }
  0x17   :  { %558 = vmatpush1.bf16.msra.mxu0 %v1840_v9  ;;  %1826 = vmatpush1.bf16.msra.mxu1 %v1840_v9  ;;  %v1883_v5 = vld [vmem:[%s3102_s0 + $0x164] ss:$8 sps:$4 sm:$0xff]   ;;  %v1885_v8 = vld [vmem:[%s3102_s0 + $0x60] ss:$8 sps:$4 sm:$0xff]   ;;  %v942_v10 = vld [vmem:[%s3103_s2 + $0x110] sm:$0xff] }
  0x18   :  { %559 = vmatprep.subr.bf16.mxu0 %v1941_v0  ;;  %1817 = vmatprep.subr.bf16.mxu1 %v1941_v0  ;;  %v940_v6 = vld [vmem:[%s3103_s2 + $0x100] sm:$0xff]  ;;  %v941_v7 = vld [vmem:[%s3103_s2 + $0x108] sm:$0xff]  ;;  %v943_v11 = vld [vmem:[%s3103_s2 + $0x118] sm:$0xff] }
  0x19   :  { %v1886_v9 = vld [vmem:[%s3102_s0 + $0x160] ss:$8 sps:$4 sm:$0xff]   ;;  %v1887_v12 = vld [vmem:[%s3102_s0 + $0x74] ss:$8 sps:$4 sm:$0xff]   ;;  %v1892_v17 = vld [vmem:[%s3102_s0 + $0x170] ss:$8 sps:$4 sm:$0xff]  }
  0x1a   :  { %1024 = vperm.xlu0 %1833, %v918_v26   ;;  %1029 = vperm.xlu1 %1834, %v919_v27   ;;  %v944_v14 = vld [vmem:[%s3103_s2 + $0x120] sm:$0xff]  ;;  %v945_v15 = vld [vmem:[%s3103_s2 + $0x128] sm:$0xff]  ;;  %v946_v18 = vld [vmem:[%s3103_s2 + $0x130] sm:$0xff] }
  0x1b   :  { %560 = vmatpush1.bf16.msra.mxu0 %v1841_v13  ;;  %1827 = vmatpush1.bf16.msra.mxu1 %v1841_v13  ;;  %v1889_v13 = vld [vmem:[%s3102_s0 + $0x174] ss:$8 sps:$4 sm:$0xff]   ;;  %v1893_v20 = vld [vmem:[%s3102_s0 + $0x84] ss:$8 sps:$4 sm:$0xff]  }
  0x1c   :  { %561 = vmatprep.subr.bf16.mxu0 %v1941_v0  ;;  %1818 = vmatprep.subr.bf16.mxu1 %v1941_v0  ;;  %v1895_v21 = vld [vmem:[%s3102_s0 + $0x184] ss:$8 sps:$4 sm:$0xff]   ;;  %v950_v26 = vld [vmem:[%s3103_s2 + $0x150] sm:$0xff]  ;;  %v951_v27 = vld [vmem:[%s3103_s2 + $0x158] sm:$0xff] }
  0x1d   :  { %v948_v22 = vld [vmem:[%s3103_s2 + $0x140] sm:$0xff] }
  0x1e   :  { %1034 = vperm.xlu0 %1833, %v920_v30   ;;  %1039 = vperm.xlu1 %1834, %v921_v31   ;;  %v952_v30 = vld [vmem:[%s3103_s2 + $0x160] sm:$0xff]  ;;  %v953_v31 = vld [vmem:[%s3103_s2 + $0x168] sm:$0xff] }
  0x1f   :  { %562 = vmatpush1.bf16.msra.mxu0 %v1842_v16  ;;  %1828 = vmatpush1.bf16.msra.mxu1 %v1842_v16  ;;  %v1891_v16 = vld [vmem:[%s3102_s0 + $0x70] ss:$8 sps:$4 sm:$0xff]  }
  0x20   :  { %563 = vmatprep.subr.bf16.mxu0 %v1941_v0  ;;  %1819 = vmatprep.subr.bf16.mxu1 %v1941_v0 }
  0x22   :  { %1044 = vperm.xlu0 %1833, %v922_v34   ;;  %1049 = vperm.xlu1 %1834, %v923_v35   ;;  %v954_v34 = vld [vmem:[%s3103_s2 + $0x170] sm:$0xff]  ;;  %v955_v35 = vld [vmem:[%s3103_s2 + $0x178] sm:$0xff] }
  0x23   :  { %564 = vmatpush1.bf16.msra.mxu0 %v1843_v19  ;;  %1829 = vmatpush1.bf16.msra.mxu1 %v1843_v19  ;;  %v947_v19 = vld [vmem:[%s3103_s2 + $0x138] sm:$0xff] }
  0x24   :  { %565 = vmatprep.subr.bf16.mxu0 %v1941_v0  ;;  %1820 = vmatprep.subr.bf16.mxu1 %v1941_v0  ;;  %v1879_v0 = vld [vmem:[%s3102_s0 + $0x50] ss:$8 sps:$4 sm:$0xff]  }
  0x26   :  { %1054 = vperm.xlu0 %1833, %v924_v38   ;;  %1059 = vperm.xlu1 %1834, %v925_v39   ;;  %v956_v38 = vld [vmem:[%s3103_s2 + $0x180] sm:$0xff]  ;;  %v957_v39 = vld [vmem:[%s3103_s2 + $0x188] sm:$0xff] }
  0x27   :  { %566 = vmatpush1.bf16.msra.mxu0 %v545_v23  ;;  %1830 = vmatpush1.bf16.msra.mxu1 %v545_v23  ;;  %v949_v23 = vld [vmem:[%s3103_s2 + $0x148] sm:$0xff] }
  0x2a   :  { %580 = vmatmul.mubr.bf16.vlgmr.msra.gmra.mrb[0].mxu0 %v1845_v24  ;;  %708 = vmatmul.mubr.bf16.vlgmr.msra.gmra.mrb[0].mxu1 %v1848_v25  ;;  %v1897_v24 = vld [vmem:[%s3102_s0 + $0x80] ss:$8 sps:$4 sm:$0xff]  }
  0x2b   :  { %1780 = vmatprep.mubr.msk.bf16.mxu0 %vm446_vm0, %v1851_v28  ;;  %1796 = vmatprep.mubr.msk.bf16.mxu1 %vm446_vm0, %v1853_v29  ;;  %v1898_v25 = vld [vmem:[%s3102_s0 + $0x180] ss:$8 sps:$4 sm:$0xff]   ;;  %v1899_v28 = vld [vmem:[%s3102_s0 + $0x94] ss:$8 sps:$4 sm:$0xff]  }
  0x2c   :  { %1064 = vperm.xlu0 %1833, %v926_v42   ;;  %1069 = vperm.xlu1 %1834, %v927_v43   ;;  %v1901_v29 = vld [vmem:[%s3102_s0 + $0x194] ss:$8 sps:$4 sm:$0xff]  }
  0x2d   :  { %v958_v42 = vld [vmem:[%s3103_s2 + $0x190] sm:$0xff]  ;;  %v959_v43 = vld [vmem:[%s3103_s2 + $0x198] sm:$0xff] }
  0x30   :  { %1074 = vperm.xlu0 %1833, %v928_v46   ;;  %1079 = vperm.xlu1 %1834, %v929_v47   ;;  %v960_v46 = vld [vmem:[%s3103_s2 + $0x1a0] sm:$0xff]  ;;  %v961_v47 = vld [vmem:[%s3103_s2 + $0x1a8] sm:$0xff] }
  0x32   :  { %588 = vmatmul.mubr.bf16.gmra.mrb[4].mxu0 %v1855_v32  ;;  %716 = vmatmul.mubr.bf16.gmra.mrb[4].mxu1 %v1856_v33  ;;  %v1903_v32 = vld [vmem:[%s3102_s0 + $0x90] ss:$8 sps:$4 sm:$0xff]  }
  0x33   :  { %1781 = vmatprep.mubr.msk.bf16.mxu0 %vm446_vm0, %v1857_v36  ;;  %1797 = vmatprep.mubr.msk.bf16.mxu1 %vm446_vm0, %v1859_v37  ;;  %v1904_v33 = vld [vmem:[%s3102_s0 + $0x190] ss:$8 sps:$4 sm:$0xff]   ;;  %v1905_v36 = vld [vmem:[%s3102_s0 + $0xa4] ss:$8 sps:$4 sm:$0xff]  }
  0x34   :  { %1084 = vperm.xlu0 %1833, %v930_v50   ;;  %1089 = vperm.xlu1 %1834, %v931_v51   ;;  %v1907_v37 = vld [vmem:[%s3102_s0 + $0x1a4] ss:$8 sps:$4 sm:$0xff]   ;;  %v962_v50 = vld [vmem:[%s3103_s2 + $0x1b0] sm:$0xff]  ;;  %v963_v51 = vld [vmem:[%s3103_s2 + $0x1b8] sm:$0xff] }
  0x38   :  { %1094 = vperm.xlu0 %1833, %v932_v54   ;;  %1099 = vperm.xlu1 %1834, %v933_v55   ;;  %v964_v54 = vld [vmem:[%s3103_s2 + $0x1c0] sm:$0xff]  ;;  %v965_v55 = vld [vmem:[%s3103_s2 + $0x1c8] sm:$0xff] }
  0x3a   :  { %596 = vmatmul.mubr.bf16.gmra.mrb[8].mxu0 %v1861_v40  ;;  %724 = vmatmul.mubr.bf16.gmra.mrb[8].mxu1 %v1862_v41  ;;  %v1909_v40 = vld [vmem:[%s3102_s0 + $0xa0] ss:$8 sps:$4 sm:$0xff]  }
  0x3b   :  { %1782 = vmatprep.mubr.msk.bf16.mxu0 %vm446_vm0, %v1863_v44  ;;  %1798 = vmatprep.mubr.msk.bf16.mxu1 %vm446_vm0, %v1865_v45  ;;  %v1910_v41 = vld [vmem:[%s3102_s0 + $0x1a0] ss:$8 sps:$4 sm:$0xff]   ;;  %v1911_v44 = vld [vmem:[%s3102_s0 + $0xb4] ss:$8 sps:$4 sm:$0xff]  }
  0x3c   :  { %1104 = vperm.xlu0 %1833, %v934_v58   ;;  %1109 = vperm.xlu1 %1834, %v935_v59   ;;  %v1913_v45 = vld [vmem:[%s3102_s0 + $0x1b4] ss:$8 sps:$4 sm:$0xff]  }
  0x3d   :  { %v966_v58 = vld [vmem:[%s3103_s2 + $0x1d0] sm:$0xff]  ;;  %v967_v59 = vld [vmem:[%s3103_s2 + $0x1d8] sm:$0xff] }
  0x40   :  { %1114 = vperm.xlu0 %1833, %v936_v62   ;;  %1119 = vperm.xlu1 %1834, %v937_v63   ;;  %v968_v62 = vld [vmem:[%s3103_s2 + $0x1e0] sm:$0xff]  ;;  %v969_v63 = vld [vmem:[%s3103_s2 + $0x1e8] sm:$0xff] }
  0x42   :  { %604 = vmatmul.mubr.bf16.gmra.mrb[12].mxu0 %v1867_v48  ;;  %732 = vmatmul.mubr.bf16.gmra.mrb[12].mxu1 %v1868_v49  ;;  %v1915_v48 = vld [vmem:[%s3102_s0 + $0xb0] ss:$8 sps:$4 sm:$0xff]  }
  0x43   :  { %1783 = vmatprep.mubr.msk.bf16.mxu0 %vm446_vm0, %v1869_v52  ;;  %1799 = vmatprep.mubr.msk.bf16.mxu1 %vm446_vm0, %v1871_v53  ;;  %v1916_v49 = vld [vmem:[%s3102_s0 + $0x1b0] ss:$8 sps:$4 sm:$0xff]   ;;  %v1917_v52 = vld [vmem:[%s3102_s0 + $0xc4] ss:$8 sps:$4 sm:$0xff]  }
  0x44   :  { %1124 = vperm.xlu0 %1833, %v938_v2   ;;  %1129 = vperm.xlu1 %1834, %v939_v3   ;;  %v1919_v53 = vld [vmem:[%s3102_s0 + $0x1c4] ss:$8 sps:$4 sm:$0xff]   ;;  %v970_v2 = vld [vmem:[%s3103_s2 + $0x1f0] sm:$0xff]  ;;  %v971_v3 = vld [vmem:[%s3103_s2 + $0x1f8] sm:$0xff] }
  0x48   :  { %1134 = vperm.xlu0 %1833, %v940_v6   ;;  %1139 = vperm.xlu1 %1834, %v941_v7   ;;  %v1933_v6 = vld [vmem:[%s3102_s0 + $0xe0] ss:$8 sps:$4 sm:$0xff]  }
  0x49   :  { %v1934_v7 = vld [vmem:[%s3102_s0 + $0x1e0] ss:$8 sps:$4 sm:$0xff]  }
  0x4a   :  { %612 = vmatmul.mubr.bf16.gmra.mrb[16].mxu0 %v1873_v56  ;;  %740 = vmatmul.mubr.bf16.gmra.mrb[16].mxu1 %v1874_v57  ;;  %v1921_v56 = vld [vmem:[%s3102_s0 + $0xc0] ss:$8 sps:$4 sm:$0xff]  }
  0x4b   :  { %1784 = vmatprep.mubr.msk.bf16.mxu0 %vm446_vm0, %v1875_v60  ;;  %1800 = vmatprep.mubr.msk.bf16.mxu1 %vm446_vm0, %v1877_v61  ;;  %v1922_v57 = vld [vmem:[%s3102_s0 + $0x1c0] ss:$8 sps:$4 sm:$0xff]   ;;  %v1923_v60 = vld [vmem:[%s3102_s0 + $0xd4] ss:$8 sps:$4 sm:$0xff]  }
  0x4c   :  { %1144 = vperm.xlu0 %1833, %v942_v10   ;;  %1149 = vperm.xlu1 %1834, %v943_v11   ;;  %v1925_v61 = vld [vmem:[%s3102_s0 + $0x1d4] ss:$8 sps:$4 sm:$0xff]   ;;  %v1939_v10 = vld [vmem:[%s3102_s0 + $0xf0] ss:$8 sps:$4 sm:$0xff]  }
  0x4d   :  { %v1940_v11 = vld [vmem:[%s3102_s0 + $0x1f0] ss:$8 sps:$4 sm:$0xff]  }
  0x50   :  { %1154 = vperm.xlu0 %1833, %v944_v14   ;;  %1159 = vperm.xlu1 %1834, %v945_v15  }
  0x52   :  { %620 = vmatmul.mubr.bf16.gmra.mrb[20].mxu0 %v1879_v0  ;;  %748 = vmatmul.mubr.bf16.gmra.mrb[20].mxu1 %v1880_v1  ;;  %v1927_v0 = vld [vmem:[%s3102_s0 + $0xd0] ss:$8 sps:$4 sm:$0xff]  }
  0x53   :  { %1785 = vmatprep.mubr.msk.bf16.mxu0 %vm446_vm0, %v1881_v4  ;;  %1801 = vmatprep.mubr.msk.bf16.mxu1 %vm446_vm0, %v1883_v5  ;;  %v1928_v1 = vld [vmem:[%s3102_s0 + $0x1d0] ss:$8 sps:$4 sm:$0xff]   ;;  %v1929_v4 = vld [vmem:[%s3102_s0 + $0xe4] ss:$8 sps:$4 sm:$0xff]  }
  0x54   :  { %1164 = vperm.xlu0 %1833, %v946_v18   ;;  %1169 = vperm.xlu1 %1834, %v947_v19   ;;  %v1931_v5 = vld [vmem:[%s3102_s0 + $0x1e4] ss:$8 sps:$4 sm:$0xff]  }
  0x58   :  { %1174 = vperm.xlu0 %1833, %v948_v22   ;;  %1179 = vperm.xlu1 %1834, %v949_v23  }
  0x5a   :  { %628 = vmatmul.mubr.bf16.gmra.mrb[24].mxu0 %v1885_v8  ;;  %756 = vmatmul.mubr.bf16.gmra.mrb[24].mxu1 %v1886_v9  ;;  %v1935_v8 = vld [vmem:[%s3102_s0 + $0xf4] ss:$8 sps:$4 sm:$0xff]  }
  0x5b   :  { %1786 = vmatprep.mubr.msk.bf16.mxu0 %vm446_vm0, %v1887_v12  ;;  %1802 = vmatprep.mubr.msk.bf16.mxu1 %vm446_vm0, %v1889_v13  ;;  %v1937_v9 = vld [vmem:[%s3102_s0 + $0x1f4] ss:$8 sps:$4 sm:$0xff]  }
  0x5c   :  { %1184 = vperm.xlu0 %1833, %v950_v26   ;;  %1189 = vperm.xlu1 %1834, %v951_v27  }
  0x60   :  { %1194 = vperm.xlu0 %1833, %v952_v30   ;;  %1199 = vperm.xlu1 %1834, %v953_v31  }
  0x62   :  { %636 = vmatmul.mubr.bf16.gmra.mrb[28].mxu0 %v1891_v16  ;;  %764 = vmatmul.mubr.bf16.gmra.mrb[28].mxu1 %v1892_v17 }
  0x63   :  { %1787 = vmatprep.mubr.msk.bf16.mxu0 %vm446_vm0, %v1893_v20  ;;  %1803 = vmatprep.mubr.msk.bf16.mxu1 %vm446_vm0, %v1895_v21 }
  0x64   :  { %1204 = vperm.xlu0 %1833, %v954_v34   ;;  %1209 = vperm.xlu1 %1834, %v955_v35  }
  0x68   :  { %1214 = vperm.xlu0 %1833, %v956_v38   ;;  %1219 = vperm.xlu1 %1834, %v957_v39  }
  0x6a   :  { %644 = vmatmul.mubr.bf16.gmra.mrb[32].mxu0 %v1897_v24  ;;  %772 = vmatmul.mubr.bf16.gmra.mrb[32].mxu1 %v1898_v25 }
  0x6b   :  { %1788 = vmatprep.mubr.msk.bf16.mxu0 %vm446_vm0, %v1899_v28  ;;  %1804 = vmatprep.mubr.msk.bf16.mxu1 %vm446_vm0, %v1901_v29 }
  0x6c   :  { %1224 = vperm.xlu0 %1833, %v958_v42   ;;  %1229 = vperm.xlu1 %1834, %v959_v43  }
  0x70   :  { %1234 = vperm.xlu0 %1833, %v960_v46   ;;  %1239 = vperm.xlu1 %1834, %v961_v47  }
  0x72   :  { %652 = vmatmul.mubr.bf16.gmra.mrb[36].mxu0 %v1903_v32  ;;  %780 = vmatmul.mubr.bf16.gmra.mrb[36].mxu1 %v1904_v33 }
  0x73   :  { %1789 = vmatprep.mubr.msk.bf16.mxu0 %vm446_vm0, %v1905_v36  ;;  %1805 = vmatprep.mubr.msk.bf16.mxu1 %vm446_vm0, %v1907_v37 }
  0x74   :  { %1244 = vperm.xlu0 %1833, %v962_v50   ;;  %1249 = vperm.xlu1 %1834, %v963_v51  }
  0x78   :  { %1254 = vperm.xlu0 %1833, %v964_v54   ;;  %1259 = vperm.xlu1 %1834, %v965_v55  }
  0x7a   :  { %660 = vmatmul.mubr.bf16.gmra.mrb[40].mxu0 %v1909_v40  ;;  %788 = vmatmul.mubr.bf16.gmra.mrb[40].mxu1 %v1910_v41 }
  0x7b   :  { %1790 = vmatprep.mubr.msk.bf16.mxu0 %vm446_vm0, %v1911_v44  ;;  %1806 = vmatprep.mubr.msk.bf16.mxu1 %vm446_vm0, %v1913_v45 }
  0x7c   :  { %1264 = vperm.xlu0 %1833, %v966_v58   ;;  %1269 = vperm.xlu1 %1834, %v967_v59  }
  0x80   :  { %1274 = vperm.xlu0 %1833, %v968_v62   ;;  %1279 = vperm.xlu1 %1834, %v969_v63  }
  0x82   :  { %668 = vmatmul.mubr.bf16.gmra.mrb[44].mxu0 %v1915_v48  ;;  %796 = vmatmul.mubr.bf16.gmra.mrb[44].mxu1 %v1916_v49 }
  0x83   :  { %1791 = vmatprep.mubr.msk.bf16.mxu0 %vm446_vm0, %v1917_v52  ;;  %1807 = vmatprep.mubr.msk.bf16.mxu1 %vm446_vm0, %v1919_v53 }
  0x84   :  { %1284 = vperm.xlu0 %1833, %v970_v2   ;;  %1289 = vperm.xlu1 %1834, %v971_v3  }
  0x85   :  { %v975_v12 = vpop.permute.xlu0 %974  ;;  %v985_v13 = vpop.permute.xlu1 %984 }
  0x89   :  { %v980_v14 = vpop.permute.xlu0 %979  ;;  %v990_v15 = vpop.permute.xlu1 %989 }
  0x8a   :  { %676 = vmatmul.mubr.bf16.gmra.mrb[48].mxu0 %v1921_v56  ;;  %804 = vmatmul.mubr.bf16.gmra.mrb[48].mxu1 %v1922_v57 }
  0x8b   :  { %1792 = vmatprep.mubr.msk.bf16.mxu0 %vm446_vm0, %v1923_v60  ;;  %1808 = vmatprep.mubr.msk.bf16.mxu1 %vm446_vm0, %v1925_v61 }
  0x8d   :  { %v2441_v16 = vpop.permute.xlu0 %994  ;;  %v2443_v17 = vpop.permute.xlu1 %999 }
  0x91   :  { %v2445_v18 = vpop.permute.xlu0 %1004  ;;  %v2447_v19 = vpop.permute.xlu1 %1009 }
  0x92   :  { %684 = vmatmul.mubr.bf16.gmra.mrb[52].mxu0 %v1927_v0  ;;  %812 = vmatmul.mubr.bf16.gmra.mrb[52].mxu1 %v1928_v1 }
  0x93   :  { %1793 = vmatprep.mubr.msk.bf16.mxu0 %vm446_vm0, %v1929_v4  ;;  %1809 = vmatprep.mubr.msk.bf16.mxu1 %vm446_vm0, %v1931_v5 }
  0x95   :  { %v2449_v20 = vpop.permute.xlu0 %1014  ;;  %v2451_v21 = vpop.permute.xlu1 %1019 }
  0x99   :  { %v2453_v22 = vpop.permute.xlu0 %1024  ;;  %v2455_v23 = vpop.permute.xlu1 %1029 }
  0x9a   :  { %692 = vmatmul.mubr.bf16.gmra.mrb[56].mxu0 %v1933_v6  ;;  %820 = vmatmul.mubr.bf16.gmra.mrb[56].mxu1 %v1934_v7 }
  0x9b   :  { %1794 = vmatprep.mubr.msk.bf16.mxu0 %vm446_vm0, %v1935_v8  ;;  %1810 = vmatprep.mubr.msk.bf16.mxu1 %vm446_vm0, %v1937_v9 }
  0x9d   :  { %v2457_v24 = vpop.permute.xlu0 %1034  ;;  %v2459_v25 = vpop.permute.xlu1 %1039 }
  0xa1   :  { %v2485_v41 = vpop.permute.xlu0 %1044  ;;  %v2487_v42 = vpop.permute.xlu1 %1049 }
  0xa2   :  { %700 = vmatmul.mubr.bf16.gmra.mrb[60].mxu0 %v1939_v10  ;;  %828 = vmatmul.mubr.bf16.gmra.mrb[60].mxu1 %v1940_v11 }
  0xa5   :  { %v2516_v0 = vpop.permute.xlu0 %1054  ;;  %v2518_v1 = vpop.permute.xlu1 %1059 }
  0xfd   :  { %v581_v26 = vpop.f32.mrb[0].mxu0  ;;  %v2461_v27 = vpop.f32.mrb[0].mxu1 }
  0xfe   :  { %837 = vst.msk [vmem:[%s3104_s3] sm:$0xff] %vm836_vm2, %v581_v26  ;;  %v1292_v28 = vmul.f32 %v975_v12, %v581_v26  ;;  %v583_v29 = vpop.f32.mrb[1].mxu0  ;;  %869 = vst.msk [vmem:[%s3104_s3 + $0x100] sm:$0xff] %vm836_vm2, %v2461_v27  ;;  %v711_v30 = vpop.f32.mrb[1].mxu1 }
  0xff   :  { %v584_v31 = vpop.f32.mrb[2].mxu0  ;;  %v2472_v32 = vpop.f32.mrb[2].mxu1 }
 0x100   :  { %v1494_v33 = vmul.f32 %v1292_v28, %v1292_v28  ;;  %838 = vst.msk [vmem:[%s3104_s3 + $0x8] sm:$0xff] %vm836_vm2, %v584_v31  ;;  %v1293_v34 = vmul.f32 %v980_v14, %v584_v31  ;;  %v586_v35 = vpop.f32.mrb[3].mxu0  ;;  %870 = vst.msk [vmem:[%s3104_s3 + $0x108] sm:$0xff] %vm836_vm2, %v2472_v32  ;;  %v714_v36 = vpop.f32.mrb[3].mxu1  ;;  %v1357_v37 = vsel %vm836_vm2, %v1292_v28, 0.0 }
 0x102   :  { %v1358_v38 = vsel %vm836_vm2, %v1293_v34, 0.0  ;;  %v1495_v39 = vmul.f32 %v1293_v34, %v1293_v34  ;;  %v1558_v43 = vsel %vm836_vm2, %v1494_v33, 0.0  ;;  %v2548_v33 = vpop.permute.xlu0 %1064  ;;  %v2550_v34 = vpop.permute.xlu1 %1069 }
 0x103   :  { %v1359_v40 = vadd.f32 %v1358_v38, %v1357_v37 }
 0x104   :  { %v1559_v44 = vsel %vm836_vm2, %v1495_v39, 0.0 }
 0x105   :  { %v1560_v45 = vadd.f32 %v1559_v44, %v1558_v43  ;;  %v589_v46 = vpop.f32.mrb[4].mxu0  ;;  %v2491_v47 = vpop.f32.mrb[4].mxu1 }
 0x106   :  { %839 = vst.msk [vmem:[%s3104_s3 + $0x10] sm:$0xff] %vm836_vm2, %v589_v46  ;;  %v1294_v48 = vmul.f32 %v985_v13, %v589_v46  ;;  %v591_v49 = vpop.f32.mrb[5].mxu0  ;;  %871 = vst.msk [vmem:[%s3104_s3 + $0x110] sm:$0xff] %vm836_vm2, %v2491_v47  ;;  %v719_v50 = vpop.f32.mrb[5].mxu1 }
 0x107   :  { %v592_v51 = vpop.f32.mrb[6].mxu0  ;;  %v2502_v52 = vpop.f32.mrb[6].mxu1 }
 0x108   :  { %v1360_v53 = vsel %vm836_vm2, %v1294_v48, 0.0  ;;  %v1496_v54 = vmul.f32 %v1294_v48, %v1294_v48  ;;  %840 = vst.msk [vmem:[%s3104_s3 + $0x18] sm:$0xff] %vm836_vm2, %v592_v51  ;;  %v1295_v55 = vmul.f32 %v990_v15, %v592_v51  ;;  %v594_v56 = vpop.f32.mrb[7].mxu0  ;;  %872 = vst.msk [vmem:[%s3104_s3 + $0x118] sm:$0xff] %vm836_vm2, %v2502_v52  ;;  %v722_v57 = vpop.f32.mrb[7].mxu1 }
 0x109   :  { %v1361_v58 = vadd.f32 %v1360_v53, %v1359_v40  ;;  %v2580_v57 = vpop.permute.xlu0 %1074 }
 0x10a   :  { %v1561_v59 = vsel %vm836_vm2, %v1496_v54, 0.0  ;;  %v1362_v60 = vsel %vm836_vm2, %v1295_v55, 0.0  ;;  %v1497_v61 = vmul.f32 %v1295_v55, %v1295_v55 }
 0x10b   :  { %v1562_v62 = vadd.f32 %v1561_v59, %v1560_v45  ;;  %v1363_v63 = vadd.f32 %v1362_v60, %v1361_v58  ;;  %v2582_v58 = vpop.permute.xlu1 %1079 }
 0x10c   :  { %v1563_v2 = vsel %vm836_vm2, %v1497_v61, 0.0 }
 0x10d   :  { %v1564_v3 = vadd.f32 %v1563_v2, %v1562_v62  ;;  %v597_v4 = vpop.f32.mrb[8].mxu0  ;;  %v2521_v5 = vpop.f32.mrb[8].mxu1  ;;  %v1942_v62 = vmov 0.0  }
 0x10e   :  { %841 = vst.msk [vmem:[%s3104_s3 + $0x20] sm:$0xff] %vm836_vm2, %v597_v4  ;;  %v1296_v6 = vmul.f32 %v2441_v16, %v597_v4  ;;  %v599_v7 = vpop.f32.mrb[9].mxu0  ;;  %873 = vst.msk [vmem:[%s3104_s3 + $0x120] sm:$0xff] %vm836_vm2, %v2521_v5  ;;  %v727_v8 = vpop.f32.mrb[9].mxu1 }
 0x10f   :  { %v600_v9 = vpop.f32.mrb[10].mxu0  ;;  %v2533_v10 = vpop.f32.mrb[10].mxu1  ;;  %906 = vst.msk [vmem:[%s3105_s4] sm:$0x1] %vm905_vm3, %v1942_v62  ;;  %907 = vst.msk [vmem:[%s3106_s5] sm:$0x1] %vm905_vm3, %v1942_v62 }
 0x110   :  { %v1364_v11 = vsel %vm836_vm2, %v1296_v6, 0.0  ;;  %v1498_v12 = vmul.f32 %v1296_v6, %v1296_v6  ;;  %842 = vst.msk [vmem:[%s3104_s3 + $0x28] sm:$0xff] %vm836_vm2, %v600_v9  ;;  %v1297_v13 = vmul.f32 %v2443_v17, %v600_v9  ;;  %v602_v14 = vpop.f32.mrb[11].mxu0  ;;  %874 = vst.msk [vmem:[%s3104_s3 + $0x128] sm:$0xff] %vm836_vm2, %v2533_v10  ;;  %v730_v15 = vpop.f32.mrb[11].mxu1 }
 0x111   :  { %v1365_v16 = vadd.f32 %v1364_v11, %v1363_v63 }
 0x112   :  { %v1565_v26 = vsel %vm836_vm2, %v1498_v12, 0.0  ;;  %v1366_v28 = vsel %vm836_vm2, %v1297_v13, 0.0  ;;  %v1499_v29 = vmul.f32 %v1297_v13, %v1297_v13 }
 0x113   :  { %v1566_v30 = vadd.f32 %v1565_v26, %v1564_v3  ;;  %v1367_v31 = vadd.f32 %v1366_v28, %v1365_v16  ;;  %v2620_v28 = vpop.permute.xlu0 %1084 }
 0x114   :  { %v1567_v17 = vsel %vm836_vm2, %v1499_v29, 0.0  ;;  %v2622_v29 = vpop.permute.xlu1 %1089 }
 0x115   :  { %v1568_v35 = vadd.f32 %v1567_v17, %v1566_v30  ;;  %v605_v36 = vpop.f32.mrb[12].mxu0  ;;  %v2553_v37 = vpop.f32.mrb[12].mxu1 }
 0x116   :  { %843 = vst.msk [vmem:[%s3104_s3 + $0x30] sm:$0xff] %vm836_vm2, %v605_v36  ;;  %v1298_v38 = vmul.f32 %v2445_v18, %v605_v36  ;;  %v607_v39 = vpop.f32.mrb[13].mxu0  ;;  %875 = vst.msk [vmem:[%s3104_s3 + $0x130] sm:$0xff] %vm836_vm2, %v2553_v37  ;;  %v735_v40 = vpop.f32.mrb[13].mxu1 }
 0x117   :  { %v608_v43 = vpop.f32.mrb[14].mxu0  ;;  %v2565_v44 = vpop.f32.mrb[14].mxu1 }
 0x118   :  { %v1368_v45 = vsel %vm836_vm2, %v1298_v38, 0.0  ;;  %v1500_v46 = vmul.f32 %v1298_v38, %v1298_v38  ;;  %844 = vst.msk [vmem:[%s3104_s3 + $0x38] sm:$0xff] %vm836_vm2, %v608_v43  ;;  %v1299_v18 = vmul.f32 %v2447_v19, %v608_v43  ;;  %v610_v48 = vpop.f32.mrb[15].mxu0  ;;  %876 = vst.msk [vmem:[%s3104_s3 + $0x138] sm:$0xff] %vm836_vm2, %v2565_v44  ;;  %v738_v49 = vpop.f32.mrb[15].mxu1 }
 0x119   :  { %v1369_v50 = vadd.f32 %v1368_v45, %v1367_v31 }
 0x11a   :  { %v1569_v51 = vsel %vm836_vm2, %v1500_v46, 0.0  ;;  %v1370_v53 = vsel %vm836_vm2, %v1299_v18, 0.0  ;;  %v1501_v54 = vmul.f32 %v1299_v18, %v1299_v18 }
 0x11b   :  { %v1570_v55 = vadd.f32 %v1569_v51, %v1568_v35  ;;  %v1371_v56 = vadd.f32 %v1370_v53, %v1369_v50 }
 0x11c   :  { %v1571_v19 = vsel %vm836_vm2, %v1501_v54, 0.0 }
 0x11d   :  { %v1572_v59 = vadd.f32 %v1571_v19, %v1570_v55  ;;  %v613_v60 = vpop.f32.mrb[16].mxu0  ;;  %v2585_v61 = vpop.f32.mrb[16].mxu1 }
 0x11e   :  { %845 = vst.msk [vmem:[%s3104_s3 + $0x40] sm:$0xff] %vm836_vm2, %v613_v60  ;;  %v1300_v63 = vmul.f32 %v2449_v20, %v613_v60  ;;  %v615_v2 = vpop.f32.mrb[17].mxu0  ;;  %877 = vst.msk [vmem:[%s3104_s3 + $0x140] sm:$0xff] %vm836_vm2, %v2585_v61  ;;  %v743_v3 = vpop.f32.mrb[17].mxu1 }
 0x11f   :  { %v616_v4 = vpop.f32.mrb[18].mxu0  ;;  %v2605_v6 = vpop.f32.mrb[18].mxu1 }
 0x120   :  { %v1372_v7 = vsel %vm836_vm2, %v1300_v63, 0.0  ;;  %v1502_v8 = vmul.f32 %v1300_v63, %v1300_v63  ;;  %846 = vst.msk [vmem:[%s3104_s3 + $0x48] sm:$0xff] %vm836_vm2, %v616_v4  ;;  %v1301_v20 = vmul.f32 %v2451_v21, %v616_v4  ;;  %v618_v9 = vpop.f32.mrb[19].mxu0  ;;  %878 = vst.msk [vmem:[%s3104_s3 + $0x148] sm:$0xff] %vm836_vm2, %v2605_v6  ;;  %v746_v11 = vpop.f32.mrb[19].mxu1 }
 0x121   :  { %v1373_v12 = vadd.f32 %v1372_v7, %v1371_v56  ;;  %v2652_v55 = vpop.permute.xlu0 %1094  ;;  %v2654_v56 = vpop.permute.xlu1 %1099 }
 0x122   :  { %v1573_v13 = vsel %vm836_vm2, %v1502_v8, 0.0  ;;  %v1374_v14 = vsel %vm836_vm2, %v1301_v20, 0.0  ;;  %v1503_v15 = vmul.f32 %v1301_v20, %v1301_v20 }
 0x123   :  { %v1574_v16 = vadd.f32 %v1573_v13, %v1572_v59  ;;  %v1375_v26 = vadd.f32 %v1374_v14, %v1373_v12 }
 0x124   :  { %v1575_v21 = vsel %vm836_vm2, %v1503_v15, 0.0 }
 0x125   :  { %v1576_v30 = vadd.f32 %v1575_v21, %v1574_v16  ;;  %v621_v31 = vpop.f32.mrb[20].mxu0  ;;  %v2625_v17 = vpop.f32.mrb[20].mxu1 }
 0x126   :  { %847 = vst.msk [vmem:[%s3104_s3 + $0x50] sm:$0xff] %vm836_vm2, %v621_v31  ;;  %v1302_v35 = vmul.f32 %v2453_v22, %v621_v31  ;;  %v623_v36 = vpop.f32.mrb[21].mxu0  ;;  %879 = vst.msk [vmem:[%s3104_s3 + $0x150] sm:$0xff] %vm836_vm2, %v2625_v17  ;;  %v751_v38 = vpop.f32.mrb[21].mxu1 }
 0x127   :  { %v624_v39 = vpop.f32.mrb[22].mxu0  ;;  %v2637_v40 = vpop.f32.mrb[22].mxu1 }
 0x128   :  { %v1376_v43 = vsel %vm836_vm2, %v1302_v35, 0.0  ;;  %v1504_v45 = vmul.f32 %v1302_v35, %v1302_v35  ;;  %848 = vst.msk [vmem:[%s3104_s3 + $0x58] sm:$0xff] %vm836_vm2, %v624_v39  ;;  %v1303_v22 = vmul.f32 %v2455_v23, %v624_v39  ;;  %v626_v46 = vpop.f32.mrb[23].mxu0  ;;  %880 = vst.msk [vmem:[%s3104_s3 + $0x158] sm:$0xff] %vm836_vm2, %v2637_v40  ;;  %v754_v18 = vpop.f32.mrb[23].mxu1 }
 0x129   :  { %v1377_v48 = vadd.f32 %v1376_v43, %v1375_v26  ;;  %v2684_v26 = vpop.permute.xlu0 %1104  ;;  %v2686_v21 = vpop.permute.xlu1 %1109 }
 0x12a   :  { %v1577_v49 = vsel %vm836_vm2, %v1504_v45, 0.0  ;;  %v1378_v50 = vsel %vm836_vm2, %v1303_v22, 0.0  ;;  %v1505_v51 = vmul.f32 %v1303_v22, %v1303_v22 }
 0x12b   :  { %v1578_v53 = vadd.f32 %v1577_v49, %v1576_v30  ;;  %v1379_v54 = vadd.f32 %v1378_v50, %v1377_v48 }
 0x12c   :  { %v1579_v23 = vsel %vm836_vm2, %v1505_v51, 0.0 }
 0x12d   :  { %v1580_v19 = vadd.f32 %v1579_v23, %v1578_v53  ;;  %v629_v59 = vpop.f32.mrb[24].mxu0  ;;  %v2657_v60 = vpop.f32.mrb[24].mxu1 }
 0x12e   :  { %849 = vst.msk [vmem:[%s3104_s3 + $0x60] sm:$0xff] %vm836_vm2, %v629_v59  ;;  %v1304_v62 = vmul.f32 %v2457_v24, %v629_v59  ;;  %v631_v63 = vpop.f32.mrb[25].mxu0  ;;  %881 = vst.msk [vmem:[%s3104_s3 + $0x160] sm:$0xff] %vm836_vm2, %v2657_v60  ;;  %v759_v2 = vpop.f32.mrb[25].mxu1 }
 0x12f   :  { %v632_v3 = vpop.f32.mrb[26].mxu0  ;;  %v2669_v4 = vpop.f32.mrb[26].mxu1 }
 0x130   :  { %v1380_v7 = vsel %vm836_vm2, %v1304_v62, 0.0  ;;  %v1506_v8 = vmul.f32 %v1304_v62, %v1304_v62  ;;  %850 = vst.msk [vmem:[%s3104_s3 + $0x68] sm:$0xff] %vm836_vm2, %v632_v3  ;;  %v1305_v24 = vmul.f32 %v2459_v25, %v632_v3  ;;  %v634_v20 = vpop.f32.mrb[27].mxu0  ;;  %882 = vst.msk [vmem:[%s3104_s3 + $0x168] sm:$0xff] %vm836_vm2, %v2669_v4  ;;  %v762_v9 = vpop.f32.mrb[27].mxu1 }
 0x131   :  { %v1381_v11 = vadd.f32 %v1380_v7, %v1379_v54  ;;  %v2718_v59 = vpop.permute.xlu1 %1119 }
 0x132   :  { %v1581_v12 = vsel %vm836_vm2, %v1506_v8, 0.0  ;;  %v1382_v13 = vsel %vm836_vm2, %v1305_v24, 0.0  ;;  %v1507_v14 = vmul.f32 %v1305_v24, %v1305_v24 }
 0x133   :  { %v1582_v15 = vadd.f32 %v1581_v12, %v1580_v19  ;;  %v1383_v16 = vadd.f32 %v1382_v13, %v1381_v11  ;;  %v2716_v19 = vpop.permute.xlu0 %1114 }
 0x134   :  { %v1583_v25 = vsel %vm836_vm2, %v1507_v14, 0.0 }
 0x135   :  { %v1584_v30 = vadd.f32 %v1583_v25, %v1582_v15  ;;  %v637_v31 = vpop.f32.mrb[28].mxu0  ;;  %v2689_v35 = vpop.f32.mrb[28].mxu1 }
 0x136   :  { %851 = vst.msk [vmem:[%s3104_s3 + $0x70] sm:$0xff] %vm836_vm2, %v637_v31  ;;  %v1306_v36 = vmul.f32 %v2485_v41, %v637_v31  ;;  %v639_v38 = vpop.f32.mrb[29].mxu0  ;;  %883 = vst.msk [vmem:[%s3104_s3 + $0x170] sm:$0xff] %vm836_vm2, %v2689_v35  ;;  %v767_v39 = vpop.f32.mrb[29].mxu1 }
 0x137   :  { %v640_v43 = vpop.f32.mrb[30].mxu0  ;;  %v2701_v45 = vpop.f32.mrb[30].mxu1 }
 0x138   :  { %v1384_v22 = vsel %vm836_vm2, %v1306_v36, 0.0  ;;  %v1508_v46 = vmul.f32 %v1306_v36, %v1306_v36  ;;  %852 = vst.msk [vmem:[%s3104_s3 + $0x78] sm:$0xff] %vm836_vm2, %v640_v43  ;;  %v1307_v41 = vmul.f32 %v2487_v42, %v640_v43  ;;  %v642_v18 = vpop.f32.mrb[31].mxu0  ;;  %884 = vst.msk [vmem:[%s3104_s3 + $0x178] sm:$0xff] %vm836_vm2, %v2701_v45  ;;  %v770_v48 = vpop.f32.mrb[31].mxu1 }
 0x139   :  { %v1385_v49 = vadd.f32 %v1384_v22, %v1383_v16  ;;  %v2748_v31 = vpop.permute.xlu0 %1124  ;;  %v2750_v36 = vpop.permute.xlu1 %1129 }
 0x13a   :  { %v1585_v50 = vsel %vm836_vm2, %v1508_v46, 0.0  ;;  %v1386_v51 = vsel %vm836_vm2, %v1307_v41, 0.0  ;;  %v1509_v53 = vmul.f32 %v1307_v41, %v1307_v41 }
 0x13b   :  { %v1586_v54 = vadd.f32 %v1585_v50, %v1584_v30  ;;  %v1387_v23 = vadd.f32 %v1386_v51, %v1385_v49 }
 0x13c   :  { %v1587_v42 = vsel %vm836_vm2, %v1509_v53, 0.0 }
 0x13d   :  { %v1588_v62 = vadd.f32 %v1587_v42, %v1586_v54  ;;  %v645_v63 = vpop.f32.mrb[32].mxu0  ;;  %v2721_v2 = vpop.f32.mrb[32].mxu1 }
 0x13e   :  { %853 = vst.msk [vmem:[%s3104_s3 + $0x80] sm:$0xff] %vm836_vm2, %v645_v63  ;;  %v1308_v3 = vmul.f32 %v2516_v0, %v645_v63  ;;  %885 = vst.msk [vmem:[%s3104_s3 + $0x180] sm:$0xff] %vm836_vm2, %v2721_v2  ;;  %v647_v7 = vpop.f32.mrb[33].mxu0  ;;  %v775_v8 = vpop.f32.mrb[33].mxu1 }
 0x13f   :  { %v648_v24 = vpop.f32.mrb[34].mxu0  ;;  %v2733_v20 = vpop.f32.mrb[34].mxu1 }
 0x140   :  { %v1388_v9 = vsel %vm836_vm2, %v1308_v3, 0.0  ;;  %v1510_v11 = vmul.f32 %v1308_v3, %v1308_v3  ;;  %854 = vst.msk [vmem:[%s3104_s3 + $0x88] sm:$0xff] %vm836_vm2, %v648_v24  ;;  %886 = vst.msk [vmem:[%s3104_s3 + $0x188] sm:$0xff] %vm836_vm2, %v2733_v20  ;;  %v650_v0 = vpop.f32.mrb[35].mxu0  ;;  %v778_v12 = vpop.f32.mrb[35].mxu1  ;;  %v1309_v14 = vmul.f32 %v2518_v1, %v648_v24 }
 0x141   :  { %v1389_v13 = vadd.f32 %v1388_v9, %v1387_v23  ;;  %v2780_v7 = vpop.permute.xlu0 %1134  ;;  %v2782_v8 = vpop.permute.xlu1 %1139 }
 0x142   :  { %v1589_v15 = vsel %vm836_vm2, %v1510_v11, 0.0  ;;  %v1390_v25 = vsel %vm836_vm2, %v1309_v14, 0.0  ;;  %v1511_v30 = vmul.f32 %v1309_v14, %v1309_v14 }
 0x143   :  { %v1590_v16 = vadd.f32 %v1589_v15, %v1588_v62  ;;  %v1391_v38 = vadd.f32 %v1390_v25, %v1389_v13 }
 0x144   :  { %v1591_v39 = vsel %vm836_vm2, %v1511_v30, 0.0 }
 0x145   :  { %v653_v43 = vpop.f32.mrb[36].mxu0  ;;  %v2753_v22 = vpop.f32.mrb[36].mxu1  ;;  %v1592_v46 = vadd.f32 %v1591_v39, %v1590_v16 }
 0x146   :  { %855 = vst.msk [vmem:[%s3104_s3 + $0x90] sm:$0xff] %vm836_vm2, %v653_v43  ;;  %v1310_v1 = vmul.f32 %v2548_v33, %v653_v43  ;;  %887 = vst.msk [vmem:[%s3104_s3 + $0x190] sm:$0xff] %vm836_vm2, %v2753_v22  ;;  %v655_v41 = vpop.f32.mrb[37].mxu0  ;;  %v783_v18 = vpop.f32.mrb[37].mxu1 }
 0x147   :  { %v656_v48 = vpop.f32.mrb[38].mxu0  ;;  %v2765_v49 = vpop.f32.mrb[38].mxu1 }
 0x148   :  { %v1392_v50 = vsel %vm836_vm2, %v1310_v1, 0.0  ;;  %v1512_v51 = vmul.f32 %v1310_v1, %v1310_v1  ;;  %856 = vst.msk [vmem:[%s3104_s3 + $0x98] sm:$0xff] %vm836_vm2, %v656_v48  ;;  %888 = vst.msk [vmem:[%s3104_s3 + $0x198] sm:$0xff] %vm836_vm2, %v2765_v49  ;;  %v658_v33 = vpop.f32.mrb[39].mxu0  ;;  %v786_v53 = vpop.f32.mrb[39].mxu1  ;;  %v1311_v23 = vmul.f32 %v2550_v34, %v656_v48 }
 0x149   :  { %v1393_v54 = vadd.f32 %v1392_v50, %v1391_v38  ;;  %v2812_v48 = vpop.permute.xlu0 %1144  ;;  %v2814_v50 = vpop.permute.xlu1 %1149 }
 0x14a   :  { %v1593_v42 = vsel %vm836_vm2, %v1512_v51, 0.0  ;;  %v1394_v63 = vsel %vm836_vm2, %v1311_v23, 0.0  ;;  %v1513_v3 = vmul.f32 %v1311_v23, %v1311_v23 }
 0x14b   :  { %v1594_v62 = vadd.f32 %v1593_v42, %v1592_v46  ;;  %v1395_v24 = vadd.f32 %v1394_v63, %v1393_v54 }
 0x14c   :  { %v1595_v9 = vsel %vm836_vm2, %v1513_v3, 0.0 }
 0x14d   :  { %v661_v11 = vpop.f32.mrb[40].mxu0  ;;  %v2785_v0 = vpop.f32.mrb[40].mxu1  ;;  %v1596_v12 = vadd.f32 %v1595_v9, %v1594_v62 }
 0x14e   :  { %857 = vst.msk [vmem:[%s3104_s3 + $0xa0] sm:$0xff] %vm836_vm2, %v661_v11  ;;  %v1312_v34 = vmul.f32 %v2580_v57, %v661_v11  ;;  %889 = vst.msk [vmem:[%s3104_s3 + $0x1a0] sm:$0xff] %vm836_vm2, %v2785_v0  ;;  %v663_v13 = vpop.f32.mrb[41].mxu0  ;;  %v791_v14 = vpop.f32.mrb[41].mxu1 }
 0x14f   :  { %v664_v15 = vpop.f32.mrb[42].mxu0  ;;  %v2797_v16 = vpop.f32.mrb[42].mxu1 }
 0x150   :  { %v1396_v25 = vsel %vm836_vm2, %v1312_v34, 0.0  ;;  %v1514_v30 = vmul.f32 %v1312_v34, %v1312_v34  ;;  %858 = vst.msk [vmem:[%s3104_s3 + $0xa8] sm:$0xff] %vm836_vm2, %v664_v15  ;;  %890 = vst.msk [vmem:[%s3104_s3 + $0x1a8] sm:$0xff] %vm836_vm2, %v2797_v16  ;;  %v666_v57 = vpop.f32.mrb[43].mxu0  ;;  %v794_v38 = vpop.f32.mrb[43].mxu1  ;;  %v1313_v43 = vmul.f32 %v2582_v58, %v664_v15 }
 0x151   :  { %v1397_v39 = vadd.f32 %v1396_v25, %v1395_v24  ;;  %v2846_v57 = vpop.permute.xlu1 %1159 }
 0x152   :  { %v1597_v46 = vsel %vm836_vm2, %v1514_v30, 0.0  ;;  %v1398_v41 = vsel %vm836_vm2, %v1313_v43, 0.0  ;;  %v1515_v18 = vmul.f32 %v1313_v43, %v1313_v43  ;;  %v2844_v30 = vpop.permute.xlu0 %1154 }
 0x153   :  { %v1598_v1 = vadd.f32 %v1597_v46, %v1596_v12  ;;  %v1399_v51 = vadd.f32 %v1398_v41, %v1397_v39 }
 0x154   :  { %v1599_v33 = vsel %vm836_vm2, %v1515_v18, 0.0 }
 0x155   :  { %v669_v53 = vpop.f32.mrb[44].mxu0  ;;  %v2817_v54 = vpop.f32.mrb[44].mxu1  ;;  %v1600_v23 = vadd.f32 %v1599_v33, %v1598_v1 }
 0x156   :  { %859 = vst.msk [vmem:[%s3104_s3 + $0xb0] sm:$0xff] %vm836_vm2, %v669_v53  ;;  %v1314_v58 = vmul.f32 %v2620_v28, %v669_v53  ;;  %891 = vst.msk [vmem:[%s3104_s3 + $0x1b0] sm:$0xff] %vm836_vm2, %v2817_v54  ;;  %v671_v42 = vpop.f32.mrb[45].mxu0  ;;  %v799_v62 = vpop.f32.mrb[45].mxu1 }
 0x157   :  { %v672_v63 = vpop.f32.mrb[46].mxu0  ;;  %v2829_v3 = vpop.f32.mrb[46].mxu1 }
 0x158   :  { %v1400_v24 = vsel %vm836_vm2, %v1314_v58, 0.0  ;;  %v1516_v9 = vmul.f32 %v1314_v58, %v1314_v58  ;;  %860 = vst.msk [vmem:[%s3104_s3 + $0xb8] sm:$0xff] %vm836_vm2, %v672_v63  ;;  %892 = vst.msk [vmem:[%s3104_s3 + $0x1b8] sm:$0xff] %vm836_vm2, %v2829_v3  ;;  %v674_v28 = vpop.f32.mrb[47].mxu0  ;;  %v802_v11 = vpop.f32.mrb[47].mxu1  ;;  %v1315_v34 = vmul.f32 %v2622_v29, %v672_v63 }
 0x159   :  { %v1401_v12 = vadd.f32 %v1400_v24, %v1399_v51  ;;  %v2876_v11 = vpop.permute.xlu0 %1164 }
 0x15a   :  { %v1601_v13 = vsel %vm836_vm2, %v1516_v9, 0.0  ;;  %v1402_v15 = vsel %vm836_vm2, %v1315_v34, 0.0  ;;  %v1517_v25 = vmul.f32 %v1315_v34, %v1315_v34 }
 0x15b   :  { %v1602_v14 = vadd.f32 %v1601_v13, %v1600_v23  ;;  %v1403_v38 = vadd.f32 %v1402_v15, %v1401_v12  ;;  %v2878_v12 = vpop.permute.xlu1 %1169 }
 0x15c   :  { %v1603_v39 = vsel %vm836_vm2, %v1517_v25, 0.0 }
 0x15d   :  { %v677_v43 = vpop.f32.mrb[48].mxu0  ;;  %v2849_v46 = vpop.f32.mrb[48].mxu1  ;;  %v1604_v1 = vadd.f32 %v1603_v39, %v1602_v14 }
 0x15e   :  { %861 = vst.msk [vmem:[%s3104_s3 + $0xc0] sm:$0xff] %vm836_vm2, %v677_v43  ;;  %v1316_v29 = vmul.f32 %v2652_v55, %v677_v43  ;;  %893 = vst.msk [vmem:[%s3104_s3 + $0x1c0] sm:$0xff] %vm836_vm2, %v2849_v46  ;;  %v679_v41 = vpop.f32.mrb[49].mxu0  ;;  %v807_v18 = vpop.f32.mrb[49].mxu1 }
 0x15f   :  { %v680_v51 = vpop.f32.mrb[50].mxu0  ;;  %v2861_v33 = vpop.f32.mrb[50].mxu1 }
 0x160   :  { %v1404_v53 = vsel %vm836_vm2, %v1316_v29, 0.0  ;;  %v1518_v23 = vmul.f32 %v1316_v29, %v1316_v29  ;;  %862 = vst.msk [vmem:[%s3104_s3 + $0xc8] sm:$0xff] %vm836_vm2, %v680_v51  ;;  %894 = vst.msk [vmem:[%s3104_s3 + $0x1c8] sm:$0xff] %vm836_vm2, %v2861_v33  ;;  %v682_v55 = vpop.f32.mrb[51].mxu0  ;;  %v810_v58 = vpop.f32.mrb[51].mxu1  ;;  %v1317_v62 = vmul.f32 %v2654_v56, %v680_v51 }
 0x161   :  { %v1405_v42 = vadd.f32 %v1404_v53, %v1403_v38 }
 0x162   :  { %v1605_v63 = vsel %vm836_vm2, %v1518_v23, 0.0  ;;  %v1406_v9 = vsel %vm836_vm2, %v1317_v62, 0.0  ;;  %v1519_v28 = vmul.f32 %v1317_v62, %v1317_v62  ;;  %v2908_v62 = vpop.permute.xlu0 %1174 }
 0x163   :  { %v1606_v24 = vadd.f32 %v1605_v63, %v1604_v1  ;;  %v1407_v34 = vadd.f32 %v1406_v9, %v1405_v42  ;;  %v2910_v63 = vpop.permute.xlu1 %1179 }
 0x164   :  { %v1607_v13 = vsel %vm836_vm2, %v1519_v28, 0.0 }
 0x165   :  { %v685_v14 = vpop.f32.mrb[52].mxu0  ;;  %v2881_v15 = vpop.f32.mrb[52].mxu1  ;;  %v1608_v25 = vadd.f32 %v1607_v13, %v1606_v24 }
 0x166   :  { %863 = vst.msk [vmem:[%s3104_s3 + $0xd0] sm:$0xff] %vm836_vm2, %v685_v14  ;;  %v1318_v56 = vmul.f32 %v2684_v26, %v685_v14  ;;  %895 = vst.msk [vmem:[%s3104_s3 + $0x1d0] sm:$0xff] %vm836_vm2, %v2881_v15  ;;  %v687_v38 = vpop.f32.mrb[53].mxu0  ;;  %v815_v39 = vpop.f32.mrb[53].mxu1 }
 0x167   :  { %v688_v43 = vpop.f32.mrb[54].mxu0  ;;  %v2893_v1 = vpop.f32.mrb[54].mxu1 }
 0x168   :  { %v1408_v29 = vsel %vm836_vm2, %v1318_v56, 0.0  ;;  %v1520_v41 = vmul.f32 %v1318_v56, %v1318_v56  ;;  %864 = vst.msk [vmem:[%s3104_s3 + $0xd8] sm:$0xff] %vm836_vm2, %v688_v43  ;;  %896 = vst.msk [vmem:[%s3104_s3 + $0x1d8] sm:$0xff] %vm836_vm2, %v2893_v1  ;;  %v690_v26 = vpop.f32.mrb[55].mxu0  ;;  %v818_v18 = vpop.f32.mrb[55].mxu1  ;;  %v1319_v53 = vmul.f32 %v2686_v21, %v688_v43 }
 0x169   :  { %v1409_v51 = vadd.f32 %v1408_v29, %v1407_v34 }
 0x16a   :  { %v1609_v23 = vsel %vm836_vm2, %v1520_v41, 0.0  ;;  %v1410_v58 = vsel %vm836_vm2, %v1319_v53, 0.0  ;;  %v1521_v42 = vmul.f32 %v1319_v53, %v1319_v53 }
 0x16b   :  { %v1610_v55 = vadd.f32 %v1609_v23, %v1608_v25  ;;  %v1411_v24 = vadd.f32 %v1410_v58, %v1409_v51  ;;  %v2942_v58 = vpop.permute.xlu1 %1189 }
 0x16c   :  { %v1611_v9 = vsel %vm836_vm2, %v1521_v42, 0.0 }
 0x16d   :  { %v693_v28 = vpop.f32.mrb[56].mxu0  ;;  %v2913_v13 = vpop.f32.mrb[56].mxu1  ;;  %v1612_v14 = vadd.f32 %v1611_v9, %v1610_v55 }
 0x16e   :  { %865 = vst.msk [vmem:[%s3104_s3 + $0xe0] sm:$0xff] %vm836_vm2, %v693_v28  ;;  %v1320_v21 = vmul.f32 %v2716_v19, %v693_v28  ;;  %897 = vst.msk [vmem:[%s3104_s3 + $0x1e0] sm:$0xff] %vm836_vm2, %v2913_v13  ;;  %v695_v34 = vpop.f32.mrb[57].mxu0  ;;  %v823_v25 = vpop.f32.mrb[57].mxu1 }
 0x16f   :  { %v696_v56 = vpop.f32.mrb[58].mxu0  ;;  %v2925_v38 = vpop.f32.mrb[58].mxu1 }
 0x170   :  { %v1412_v39 = vsel %vm836_vm2, %v1320_v21, 0.0  ;;  %v1522_v43 = vmul.f32 %v1320_v21, %v1320_v21  ;;  %866 = vst.msk [vmem:[%s3104_s3 + $0xe8] sm:$0xff] %vm836_vm2, %v696_v56  ;;  %898 = vst.msk [vmem:[%s3104_s3 + $0x1e8] sm:$0xff] %vm836_vm2, %v2925_v38  ;;  %v698_v19 = vpop.f32.mrb[59].mxu0  ;;  %v826_v29 = vpop.f32.mrb[59].mxu1  ;;  %v1321_v26 = vmul.f32 %v2718_v59, %v696_v56 }
 0x171   :  { %v1413_v41 = vadd.f32 %v1412_v39, %v1411_v24  ;;  %v2940_v55 = vpop.permute.xlu0 %1184  ;;  %v1324_v24 = vmul.f32 %v2780_v7, %v2461_v27  ;;  %v1325_v19 = vmul.f32 %v2782_v8, %v2472_v32  ;;  %v1327_v32 = vmul.f32 %v2814_v50, %v2502_v52  ;;  %v2984_v8 = vpop.permute.xlu1 %1199 }
 0x172   :  { %v1613_v18 = vsel %vm836_vm2, %v1522_v43, 0.0  ;;  %v1414_v53 = vsel %vm836_vm2, %v1321_v26, 0.0  ;;  %v1523_v23 = vmul.f32 %v1321_v26, %v1321_v26 }
 0x173   :  { %v1614_v51 = vadd.f32 %v1613_v18, %v1612_v14  ;;  %v1415_v42 = vadd.f32 %v1414_v53, %v1413_v41  ;;  %v1526_v26 = vmul.f32 %v1324_v24, %v1324_v24  ;;  %v1529_v50 = vmul.f32 %v1327_v32, %v1327_v32 }
 0x174   :  { %v1615_v9 = vsel %vm836_vm2, %v1523_v23, 0.0 }
 0x175   :  { %v701_v28 = vpop.f32.mrb[60].mxu0  ;;  %v2945_v21 = vpop.f32.mrb[60].mxu1  ;;  %v1616_v59 = vadd.f32 %v1615_v9, %v1614_v51  ;;  %v1326_v51 = vmul.f32 %v2812_v48, %v2491_v47  ;;  %v1621_v47 = vsel %vm836_vm2, %v1526_v26, 0.0  ;;  %v1422_v48 = vsel %vm836_vm2, %v1325_v19, 0.0 }
 0x176   :  { %867 = vst.msk [vmem:[%s3104_s3 + $0xf0] sm:$0xff] %vm836_vm2, %v701_v28  ;;  %v1322_v14 = vmul.f32 %v2748_v31, %v701_v28  ;;  %899 = vst.msk [vmem:[%s3104_s3 + $0x1f0] sm:$0xff] %vm836_vm2, %v2945_v21  ;;  %v703_v34 = vpop.f32.mrb[61].mxu0  ;;  %v831_v25 = vpop.f32.mrb[61].mxu1 }
 0x177   :  { %v704_v56 = vpop.f32.mrb[62].mxu0  ;;  %v2959_v39 = vpop.f32.mrb[62].mxu1  ;;  %v1420_v34 = vsel %vm836_vm2, %v1324_v24, 0.0  ;;  %v1527_v25 = vmul.f32 %v1325_v19, %v1325_v19  ;;  %v1424_v52 = vsel %vm836_vm2, %v1326_v51, 0.0  ;;  %v1426_v19 = vsel %vm836_vm2, %v1327_v32, 0.0 }
 0x178   :  { %v1416_v27 = vsel %vm836_vm2, %v1322_v14, 0.0  ;;  %v1524_v7 = vmul.f32 %v1322_v14, %v1322_v14  ;;  %868 = vst.msk [vmem:[%s3104_s3 + $0xf8] sm:$0xff] %vm836_vm2, %v704_v56  ;;  %900 = vst.msk [vmem:[%s3104_s3 + $0x1f8] sm:$0xff] %vm836_vm2, %v2959_v39  ;;  %v706_v31 = vpop.f32.mrb[63].mxu0  ;;  %v834_v43 = vpop.f32.mrb[63].mxu1  ;;  %v1323_v41 = vmul.f32 %v2750_v36, %v704_v56 }
 0x179   :  { %v1417_v29 = vadd.f32 %v1416_v27, %v1415_v42  ;;  %v2978_v28 = vpop.permute.xlu0 %1194  ;;  %v1328_v27 = vmul.f32 %v2844_v30, %v2521_v5  ;;  %v1623_v31 = vsel %vm836_vm2, %v1527_v25, 0.0  ;;  %v1329_v43 = vmul.f32 %v2846_v57, %v2533_v10  ;;  %v1210_v30 = vpop.permute.xlu1 %1209 }
 0x17a   :  { %v1617_v18 = vsel %vm836_vm2, %v1524_v7, 0.0  ;;  %v1418_v23 = vsel %vm836_vm2, %v1323_v41, 0.0  ;;  %v1525_v9 = vmul.f32 %v1323_v41, %v1323_v41  ;;  %v1330_v5 = vmul.f32 %v2876_v11, %v2553_v37 }
 0x17b   :  { %v1618_v53 = vadd.f32 %v1617_v18, %v1616_v59  ;;  %v1419_v14 = vadd.f32 %v1418_v23, %v1417_v29  ;;  %v1528_v59 = vmul.f32 %v1326_v51, %v1326_v51  ;;  %v1627_v51 = vsel %vm836_vm2, %v1529_v50, 0.0 }
 0x17c   :  { %v1619_v36 = vsel %vm836_vm2, %v1525_v9, 0.0  ;;  %v1331_v10 = vmul.f32 %v2878_v12, %v2565_v44  ;;  %v1430_v32 = vsel %vm836_vm2, %v1329_v43, 0.0  ;;  %v1332_v37 = vmul.f32 %v2908_v62, %v2585_v61 }
 0x17d   :  { %v1421_v42 = vadd.f32 %v1420_v34, %v1419_v14  ;;  %v1620_v56 = vadd.f32 %v1619_v36, %v1618_v53  ;;  %v1205_v29 = vpop.permute.xlu0 %1204  ;;  %v1625_v26 = vsel %vm836_vm2, %v1528_v59, 0.0  ;;  %v1530_v53 = vmul.f32 %v1328_v27, %v1328_v27  ;;  %v1220_v12 = vpop.permute.xlu1 %1219 }
 0x17e   :  { %v1428_v14 = vsel %vm836_vm2, %v1328_v27, 0.0  ;;  %v1531_v34 = vmul.f32 %v1329_v43, %v1329_v43  ;;  %v1432_v59 = vsel %vm836_vm2, %v1330_v5, 0.0  ;;  %v1533_v27 = vmul.f32 %v1331_v10, %v1331_v10 }
 0x17f   :  { %v1423_v7 = vadd.f32 %v1422_v48, %v1421_v42  ;;  %v1622_v24 = vadd.f32 %v1621_v47, %v1620_v56  ;;  %v1629_v36 = vsel %vm836_vm2, %v1530_v53, 0.0  ;;  %v1532_v42 = vmul.f32 %v1330_v5, %v1330_v5 }
 0x180   :  { %v1631_v48 = vsel %vm836_vm2, %v1531_v34, 0.0  ;;  %v1333_v44 = vmul.f32 %v2910_v63, %v2605_v6  ;;  %v1534_v50 = vmul.f32 %v1332_v37, %v1332_v37  ;;  %v1334_v61 = vmul.f32 %v2940_v55, %v2625_v17 }
 0x181   :  { %v1425_v41 = vadd.f32 %v1424_v52, %v1423_v7  ;;  %v1624_v18 = vadd.f32 %v1623_v31, %v1622_v24  ;;  %v1215_v11 = vpop.permute.xlu0 %1214  ;;  %v1633_v31 = vsel %vm836_vm2, %v1532_v42, 0.0  ;;  %v1434_v52 = vsel %vm836_vm2, %v1331_v10, 0.0  ;;  %v1230_v55 = vpop.permute.xlu1 %1229 }
 0x182   :  { %v1335_v6 = vmul.f32 %v2942_v58, %v2637_v40  ;;  %v1637_v5 = vsel %vm836_vm2, %v1534_v50, 0.0  ;;  %v1336_v17 = vmul.f32 %v2978_v28, %v2657_v60  ;;  %v1440_v10 = vsel %vm836_vm2, %v1334_v61, 0.0 }
 0x183   :  { %v1427_v23 = vadd.f32 %v1426_v19, %v1425_v41  ;;  %v1626_v9 = vadd.f32 %v1625_v26, %v1624_v18  ;;  %v1635_v41 = vsel %vm836_vm2, %v1533_v27, 0.0  ;;  %v1436_v18 = vsel %vm836_vm2, %v1332_v37, 0.0 }
 0x184   :  { %v1535_v26 = vmul.f32 %v1333_v44, %v1333_v44  ;;  %v1337_v40 = vmul.f32 %v2984_v8, %v2669_v4  ;;  %v1538_v42 = vmul.f32 %v1336_v17, %v1336_v17  ;;  %v1338_v60 = vmul.f32 %v1205_v29, %v2689_v35 }
 0x185   :  { %v1429_v57 = vadd.f32 %v1428_v14, %v1427_v23  ;;  %v1628_v25 = vadd.f32 %v1627_v51, %v1626_v9  ;;  %v1225_v63 = vpop.permute.xlu0 %1224  ;;  %v1438_v23 = vsel %vm836_vm2, %v1333_v44, 0.0  ;;  %v1536_v9 = vmul.f32 %v1334_v61, %v1334_v61  ;;  %v1240_v4 = vpop.permute.xlu1 %1239 }
 0x186   :  { %v1639_v34 = vsel %vm836_vm2, %v1535_v26, 0.0  ;;  %v1339_v27 = vmul.f32 %v1210_v30, %v2701_v45  ;;  %v1340_v35 = vmul.f32 %v1215_v11, %v2721_v2  ;;  %v1448_v61 = vsel %vm836_vm2, %v1338_v60, 0.0 }
 0x187   :  { %v1431_v56 = vadd.f32 %v1430_v32, %v1429_v57  ;;  %v1630_v47 = vadd.f32 %v1629_v36, %v1628_v25  ;;  %v1537_v57 = vmul.f32 %v1335_v6, %v1335_v6  ;;  %v1641_v36 = vsel %vm836_vm2, %v1536_v9, 0.0 }
 0x188   :  { %v1442_v32 = vsel %vm836_vm2, %v1335_v6, 0.0  ;;  %v1450_v26 = vsel %vm836_vm2, %v1339_v27, 0.0  ;;  %v1542_v6 = vmul.f32 %v1340_v35, %v1340_v35 }
 0x189   :  { %v1433_v7 = vadd.f32 %v1432_v59, %v1431_v56  ;;  %v1632_v24 = vadd.f32 %v1631_v48, %v1630_v47  ;;  %v1235_v28 = vpop.permute.xlu0 %1234  ;;  %v1643_v47 = vsel %vm836_vm2, %v1537_v57, 0.0  ;;  %v1444_v48 = vsel %vm836_vm2, %v1336_v17, 0.0  ;;  %v1250_v2 = vpop.permute.xlu1 %1249 }
 0x18a   :  { %v1539_v59 = vmul.f32 %v1337_v40, %v1337_v40 }
 0x18b   :  { %v1435_v62 = vadd.f32 %v1434_v52, %v1433_v7  ;;  %v1634_v43 = vadd.f32 %v1633_v31, %v1632_v24  ;;  %v1645_v7 = vsel %vm836_vm2, %v1538_v42, 0.0  ;;  %v1446_v24 = vsel %vm836_vm2, %v1337_v40, 0.0 }
 0x18c   :  { %v1540_v31 = vmul.f32 %v1338_v60, %v1338_v60  ;;  %v1647_v50 = vsel %vm836_vm2, %v1539_v59, 0.0 }
 0x18d   :  { %v1437_v19 = vadd.f32 %v1436_v18, %v1435_v62  ;;  %v1636_v53 = vadd.f32 %v1635_v41, %v1634_v43  ;;  %v1541_v62 = vmul.f32 %v1339_v27, %v1339_v27  ;;  %v1341_v43 = vmul.f32 %v1220_v12, %v2733_v20  ;;  %v1245_v45 = vpop.permute.xlu0 %1244 }
 0x18e   :  { %v1649_v18 = vsel %vm836_vm2, %v1540_v31, 0.0  ;;  %v1343_v20 = vmul.f32 %v1230_v55, %v2765_v49  ;;  %v1260_v49 = vpop.permute.xlu1 %1259  ;;  %v1347_v27 = vmul.f32 %v1250_v2, %v2829_v3 }
 0x18f   :  { %v1439_v51 = vadd.f32 %v1438_v23, %v1437_v19  ;;  %v1638_v14 = vadd.f32 %v1637_v5, %v1636_v53  ;;  %v1342_v19 = vmul.f32 %v1225_v63, %v2753_v22  ;;  %v1651_v5 = vsel %vm836_vm2, %v1541_v62, 0.0 }
 0x190   :  { %v1452_v23 = vsel %vm836_vm2, %v1340_v35, 0.0  ;;  %v1543_v9 = vmul.f32 %v1341_v43, %v1341_v43  ;;  %v1458_v60 = vsel %vm836_vm2, %v1343_v20, 0.0  ;;  %v1349_v3 = vmul.f32 %v1260_v49, %v2861_v33 }
 0x191   :  { %v1441_v58 = vadd.f32 %v1440_v10, %v1439_v51  ;;  %v1640_v25 = vadd.f32 %v1639_v34, %v1638_v14  ;;  %v1653_v51 = vsel %vm836_vm2, %v1542_v6, 0.0  ;;  %v1454_v14 = vsel %vm836_vm2, %v1341_v43, 0.0  ;;  %v1255_v22 = vpop.permute.xlu0 %1254 }
 0x192   :  { %v1544_v34 = vmul.f32 %v1342_v19, %v1342_v19  ;;  %v1344_v10 = vmul.f32 %v1235_v28, %v2785_v0  ;;  %v1655_v40 = vsel %vm836_vm2, %v1543_v9, 0.0  ;;  %v1346_v0 = vmul.f32 %v1245_v45, %v2817_v54  ;;  %v1270_v54 = vpop.permute.xlu1 %1269 }
 0x193   :  { %v1443_v37 = vadd.f32 %v1442_v32, %v1441_v58  ;;  %v1642_v56 = vadd.f32 %v1641_v36, %v1640_v25  ;;  %v1456_v58 = vsel %vm836_vm2, %v1342_v19, 0.0  ;;  %v1545_v25 = vmul.f32 %v1343_v20, %v1343_v20 }
 0x194   :  { %v1345_v36 = vmul.f32 %v1240_v4, %v2797_v16  ;;  %v1657_v42 = vsel %vm836_vm2, %v1544_v34, 0.0  ;;  %v1348_v31 = vmul.f32 %v1255_v22, %v2849_v46  ;;  %v1470_v20 = vsel %vm836_vm2, %v1349_v3, 0.0 }
 0x195   :  { %v1445_v8 = vadd.f32 %v1444_v48, %v1443_v37  ;;  %v1644_v44 = vadd.f32 %v1643_v47, %v1642_v56  ;;  %v1546_v37 = vmul.f32 %v1344_v10, %v1344_v10  ;;  %v1659_v47 = vsel %vm836_vm2, %v1545_v25, 0.0  ;;  %v1265_v16 = vpop.permute.xlu0 %1264 }
 0x196   :  { %v1460_v48 = vsel %vm836_vm2, %v1344_v10, 0.0  ;;  %v1547_v59 = vmul.f32 %v1345_v36, %v1345_v36  ;;  %v1468_v2 = vsel %vm836_vm2, %v1348_v31, 0.0  ;;  %v1280_v33 = vpop.permute.xlu1 %1279 }
 0x197   :  { %v1447_v29 = vadd.f32 %v1446_v24, %v1445_v8  ;;  %v1646_v52 = vadd.f32 %v1645_v7, %v1644_v44  ;;  %v1661_v44 = vsel %vm836_vm2, %v1546_v37, 0.0  ;;  %v1462_v7 = vsel %vm836_vm2, %v1345_v36, 0.0 }
 0x198   :  { %v1548_v24 = vmul.f32 %v1346_v0, %v1346_v0  ;;  %v1353_v22 = vmul.f32 %v1280_v33, %v2925_v38 }
 0x199   :  { %v1449_v30 = vadd.f32 %v1448_v61, %v1447_v29  ;;  %v1648_v41 = vadd.f32 %v1647_v50, %v1646_v52  ;;  %v1663_v52 = vsel %vm836_vm2, %v1547_v59, 0.0  ;;  %v1464_v50 = vsel %vm836_vm2, %v1346_v0, 0.0  ;;  %v1275_v46 = vpop.permute.xlu0 %1274 }
 0x19a   :  { %v1549_v61 = vmul.f32 %v1347_v27, %v1347_v27  ;;  %v1665_v45 = vsel %vm836_vm2, %v1548_v24, 0.0 }
 0x19b   :  { %v1650_v11 = vadd.f32 %v1649_v18, %v1648_v41  ;;  %v1451_v53 = vadd.f32 %v1450_v26, %v1449_v30  ;;  %v1466_v30 = vsel %vm836_vm2, %v1347_v27, 0.0  ;;  %v1550_v41 = vmul.f32 %v1348_v31, %v1348_v31 }
 0x19c   :  { %v1350_v18 = vmul.f32 %v1265_v16, %v2881_v15  ;;  %v1667_v19 = vsel %vm836_vm2, %v1549_v61, 0.0  ;;  %v1352_v15 = vmul.f32 %v1275_v46, %v2913_v13  ;;  %v1290_v13 = vpop.permute.xlu1 %1289  ;;  %v1493_v46 = vld [vmem:[%s3106_s5] sm:$0x1] }
 0x19d   :  { %v1453_v12 = vadd.f32 %v1452_v23, %v1451_v53  ;;  %v1652_v17 = vadd.f32 %v1651_v5, %v1650_v11  ;;  %v1551_v11 = vmul.f32 %v1349_v3, %v1349_v3  ;;  %v1351_v53 = vmul.f32 %v1270_v54, %v2893_v1  ;;  %v1285_v1 = vpop.permute.xlu0 %1284 }
 0x19e   :  { %v1669_v9 = vsel %vm836_vm2, %v1550_v41, 0.0  ;;  %v1472_v34 = vsel %vm836_vm2, %v1350_v18, 0.0  ;;  %v1554_v25 = vmul.f32 %v1352_v15, %v1352_v15  ;;  %v1354_v36 = vmul.f32 %v1285_v1, %v2945_v21 }
 0x19f   :  { %v1455_v63 = vadd.f32 %v1454_v14, %v1453_v12  ;;  %v1654_v57 = vadd.f32 %v1653_v51, %v1652_v17  ;;  %v1552_v12 = vmul.f32 %v1350_v18, %v1350_v18  ;;  %v1671_v14 = vsel %vm836_vm2, %v1551_v11, 0.0 }
 0x1a0   :  { %v1553_v10 = vmul.f32 %v1351_v53, %v1351_v53  ;;  %v1355_v38 = vmul.f32 %v1290_v13, %v2959_v39  ;;  %v1480_v27 = vsel %vm836_vm2, %v1354_v36, 0.0 }
 0x1a1   :  { %v1457_v55 = vadd.f32 %v1456_v58, %v1455_v63  ;;  %v1656_v32 = vadd.f32 %v1655_v40, %v1654_v57  ;;  %v1673_v40 = vsel %vm836_vm2, %v1552_v12, 0.0  ;;  %v1474_v58 = vsel %vm836_vm2, %v1351_v53, 0.0 }
 0x1a2   :  { %v1557_v16 = vmul.f32 %v1355_v38, %v1355_v38  ;;  %v1482_v39 = vsel %vm836_vm2, %v1355_v38, 0.0 }
 0x1a3   :  { %v1459_v28 = vadd.f32 %v1458_v60, %v1457_v55  ;;  %v1658_v56 = vadd.f32 %v1657_v42, %v1656_v32  ;;  %v1675_v32 = vsel %vm836_vm2, %v1553_v10, 0.0  ;;  %v1476_v42 = vsel %vm836_vm2, %v1352_v15, 0.0 }
 0x1a4   :  { %v1555_v60 = vmul.f32 %v1353_v22, %v1353_v22  ;;  %v1683_v31 = vsel %vm836_vm2, %v1557_v16, 0.0 }
 0x1a5   :  { %v1461_v4 = vadd.f32 %v1460_v48, %v1459_v28  ;;  %v1660_v8 = vadd.f32 %v1659_v47, %v1658_v56  ;;  %v1677_v28 = vsel %vm836_vm2, %v1554_v25, 0.0  ;;  %v1478_v56 = vsel %vm836_vm2, %v1353_v22, 0.0 }
 0x1a6   :  { %v1556_v47 = vmul.f32 %v1354_v36, %v1354_v36  ;;  %v1679_v21 = vsel %vm836_vm2, %v1555_v60, 0.0 }
 0x1a7   :  { %v1463_v35 = vadd.f32 %v1462_v7, %v1461_v4  ;;  %v1662_v29 = vadd.f32 %v1661_v44, %v1660_v8 }
 0x1a8   :  { %v1681_v44 = vsel %vm836_vm2, %v1556_v47, 0.0 }
 0x1a9   :  { %v1465_v62 = vadd.f32 %v1464_v50, %v1463_v35  ;;  %v1664_v43 = vadd.f32 %v1663_v52, %v1662_v29 }
 0x1ab   :  { %v1467_v26 = vadd.f32 %v1466_v30, %v1465_v62  ;;  %v1666_v6 = vadd.f32 %v1665_v45, %v1664_v43  ;;  %v1356_v30 = vld [vmem:[%s3105_s4] sm:$0x1] }
 0x1ad   :  { %v1469_v5 = vadd.f32 %v1468_v2, %v1467_v26  ;;  %v1668_v23 = vadd.f32 %v1667_v19, %v1666_v6 }
 0x1af   :  { %v1471_v17 = vadd.f32 %v1470_v20, %v1469_v5  ;;  %v1670_v51 = vadd.f32 %v1669_v9, %v1668_v23 }
 0x1b1   :  { %v1473_v63 = vadd.f32 %v1472_v34, %v1471_v17  ;;  %v1672_v57 = vadd.f32 %v1671_v14, %v1670_v51 }
 0x1b3   :  { %v1475_v49 = vadd.f32 %v1474_v58, %v1473_v63  ;;  %v1674_v55 = vadd.f32 %v1673_v40, %v1672_v57 }
 0x1b5   :  { %v1477_v37 = vadd.f32 %v1476_v42, %v1475_v49  ;;  %v1676_v0 = vadd.f32 %v1675_v32, %v1674_v55 }
 0x1b7   :  { %v1479_v48 = vadd.f32 %v1478_v56, %v1477_v37  ;;  %v1678_v59 = vadd.f32 %v1677_v28, %v1676_v0 }
 0x1b9   :  { %v1481_v4 = vadd.f32 %v1480_v27, %v1479_v48  ;;  %v1680_v8 = vadd.f32 %v1679_v21, %v1678_v59 }
 0x1bb   :  { %v1483_v7 = vadd.f32 %v1482_v39, %v1481_v4  ;;  %v1682_v24 = vadd.f32 %v1681_v44, %v1680_v8 }
 0x1bd   :  { %v1484_v54 = vrot.slane %v1483_v7, 4  ;;  %v1684_v35 = vadd.f32 %v1683_v31, %v1682_v24 }
 0x1bf   :  { %v1485_v29 = vadd.f32 %v1484_v54, %v1483_v7  ;;  %v1685_v52 = vrot.slane %v1684_v35, 4 }
 0x1c1   :  { %v1486_v50 = vrot.slane %v1485_v29, 2  ;;  %v1686_v61 = vadd.f32 %v1685_v52, %v1684_v35 }
 0x1c3   :  { %v1487_v3 = vadd.f32 %v1486_v50, %v1485_v29  ;;  %v1687_v62 = vrot.slane %v1686_v61, 2 }
 0x1c5   :  { %v1488_v43 = vrot.slane %v1487_v3, 1  ;;  %v1688_v45 = vadd.f32 %v1687_v62, %v1686_v61 }
 0x1c7   :  { %v1489_v41 = vadd.f32 %v1488_v43, %v1487_v3  ;;  %v1689_v18 = vrot.slane %v1688_v45, 1 }
 0x1c9   :  { %v1490_v26 = vadd.f32 %v1489_v41, %v1356_v30  ;;  %v1690_v6 = vadd.f32 %v1689_v18, %v1688_v45 }
 0x1cb   :  { %1492 = vst.msk [vmem:[%s3105_s4] sm:$0x1] %vm905_vm3, %v1490_v26  ;;  %v1691_v19 = vadd.f32 %v1690_v6, %v1493_v46 }
 0x1cd   :  { %1692 = vst.msk [vmem:[%s3106_s5] sm:$0x1] %vm905_vm3, %v1691_v19 }

// kernel: densenet_forward.16
= control target key start
LH: loop header
LB: loop body
LE: loop exit
PB: predicated region body
PF: predicated region fallthrough
CT: control target
= control target key end

     0   :  { %v545_v1 = vmov 0   ;;  %vm126_vm0 = vcmask 261120   ;;  %vm269_vm1 = vcmask 122880   ;;  %vm248_vm2 = vcmask 130048   ;;  %s880_s3 = inlined_call_operand.vmem [shape: bf16[32,16], index: 3, kind: input, shape index: {}]   ;;  %s881_s0 = inlined_call_operand.vmem [shape: f32[128,32], index: 0, kind: input, shape index: {}]   ;;  %s882_s1 = inlined_call_operand.vmem [shape: f32[1,32], index: 1, kind: input, shape index: {}]   ;;  %s883_s2 = inlined_call_operand.vmem [shape: f32[1,32], index: 2, kind: input, shape index: {}]   ;;  %s884_s4 = inlined_call_operand.vmem [shape: f32[128,1], index: 4, kind: input, shape index: {}]   ;;  %s885_s6 = inlined_call_operand.vmem [shape: f32[1,16], index: 6, kind: output, shape index: {1}]   ;;  %s886_s7 = inlined_call_operand.vmem [shape: f32[1,16], index: 7, kind: output, shape index: {2}]   ;;  %s887_s5 = inlined_call_operand.vmem [shape: f32[128,16], index: 5, kind: output, shape index: {0}]  }
   0x1   :  { %v543_v0 = vld [vmem:[%s880_s3] sm:$0xff]   ;;  %541 = vset.pattern.permute.xlu0 %v545_v1  ;;  %542 = vset.pattern.permute.xlu1 %v545_v1  ;;  %v544_v2 = vld [vmem:[%s880_s3 + $0x8] sm:$0xff]   ;;  %v26_v13 = vld [vmem:[%s881_s0 + $0x10] sm:$0xff] }
   0x2   :  { %515 = vmatprep.subr.bf16.mxu0 %v543_v0  ;;  %535 = vmatprep.subr.bf16.mxu1 %v543_v0  ;;  %v24_v3 = vld [vmem:[%s881_s0] sm:$0xff]  ;;  %v25_v4 = vld [vmem:[%s881_s0 + $0x8] sm:$0xff]  ;;  %v27_v14 = vld [vmem:[%s881_s0 + $0x18] sm:$0xff] }
   0x3   :  { %v602_v5 = vld [vmem:[%s882_s1] ss:$0 sm:$0xff]  ;;  %516 = vmatpush3.bf16.msra.mxu0 %v543_v0  ;;  %537 = vmatpush3.bf16.msra.mxu1 %v543_v0  ;;  %v33_v10 = vld [vmem:[%s881_s0 + $0x48] sm:$0xff]  ;;  %v34_v15 = vld [vmem:[%s881_s0 + $0x50] sm:$0xff] }
   0x4   :  { %v47_v6 = vmul.f32 %v602_v5, %v24_v3  ;;  %v48_v7 = vmul.f32 %v602_v5, %v25_v4  ;;  %v609_v8 = vld [vmem:[%s883_s2] ss:$0 sm:$0xff]  ;;  %517 = vmatprep.subr.bf16.mxu0 %v544_v2  ;;  %536 = vmatprep.subr.bf16.mxu1 %v544_v2  ;;  %v56_v12 = vmul.f32 %v602_v5, %v33_v10  ;;  %v35_v20 = vld [vmem:[%s881_s0 + $0x58] sm:$0xff]  ;;  %v29_v30 = vld [vmem:[%s881_s0 + $0x28] sm:$0xff] }
   0x5   :  { %v32_v9 = vld [vmem:[%s881_s0 + $0x40] sm:$0xff]  ;;  %v49_v18 = vmul.f32 %v602_v5, %v26_v13  ;;  %v50_v19 = vmul.f32 %v602_v5, %v27_v14  ;;  %v57_v23 = vmul.f32 %v602_v5, %v34_v15  ;;  %v58_v24 = vmul.f32 %v602_v5, %v35_v20  ;;  %v37_v36 = vld [vmem:[%s881_s0 + $0x68] sm:$0xff]  ;;  %v274_v38 = vld [vmem:[%s884_s4 + $0x10] sm:$0xff] }
   0x6   :  { %v55_v11 = vmul.f32 %v602_v5, %v32_v9  ;;  %v70_v16 = vadd.f32 %v609_v8, %v47_v6  ;;  %v71_v17 = vadd.f32 %v609_v8, %v48_v7  ;;  %v79_v22 = vadd.f32 %v609_v8, %v56_v12  ;;  %v28_v25 = vld [vmem:[%s881_s0 + $0x20] sm:$0xff]  ;;  %v30_v43 = vld [vmem:[%s881_s0 + $0x30] sm:$0xff]  ;;  %v31_v44 = vld [vmem:[%s881_s0 + $0x38] sm:$0xff]  ;;  %300 = vperm.xlu1 %542, %v274_v38  }
   0x7   :  { %518 = vmatpush3.bf16.msra.mxu0 %v544_v2  ;;  %538 = vmatpush3.bf16.msra.mxu1 %v544_v2  ;;  %v72_v28 = vadd.f32 %v609_v8, %v49_v18  ;;  %v73_v29 = vadd.f32 %v609_v8, %v50_v19  ;;  %v36_v31 = vld [vmem:[%s881_s0 + $0x60] sm:$0xff]  ;;  %v80_v34 = vadd.f32 %v609_v8, %v57_v23  ;;  %v38_v49 = vld [vmem:[%s881_s0 + $0x70] sm:$0xff]  ;;  %v273_v50 = vld [vmem:[%s884_s4 + $0x8] sm:$0xff] }
   0x8   :  { %v78_v21 = vadd.f32 %v609_v8, %v55_v11  ;;  %v86_v26 = vmax.f32 %v70_v16, 0.0  ;;  %v87_v27 = vmax.f32 %v71_v17, 0.0  ;;  %v95_v33 = vmax.f32 %v79_v22, 0.0  ;;  %v272_v37 = vld [vmem:[%s884_s4] sm:$0xff]  ;;  %v39_v55 = vld [vmem:[%s881_s0 + $0x78] sm:$0xff]  ;;  %v277_v11 = vld [vmem:[%s884_s4 + $0x28] sm:$0xff] }
   0x9   :  { %v81_v35 = vadd.f32 %v609_v8, %v58_v24  ;;  %v88_v40 = vmax.f32 %v72_v28, 0.0  ;;  %v89_v41 = vmax.f32 %v73_v29, 0.0  ;;  %v51_v42 = vmul.f32 %v602_v5, %v28_v25  ;;  %290 = vperm.xlu0 %541, %v272_v37   ;;  %v275_v56 = vld [vmem:[%s884_s4 + $0x18] sm:$0xff]  ;;  %v276_v6 = vld [vmem:[%s884_s4 + $0x20] sm:$0xff]  ;;  %v278_v19 = vld [vmem:[%s884_s4 + $0x30] sm:$0xff] }
   0xa   :  { %v94_v32 = vmax.f32 %v78_v21, 0.0  ;;  %v102_v39 = vpack.c.bf16 %v87_v27, %v86_v26  ;;  %v96_v46 = vmax.f32 %v80_v34, 0.0  ;;  %v52_v48 = vmul.f32 %v602_v5, %v29_v30  ;;  %305 = vperm.xlu1 %542, %v275_v56   ;;  %v279_v20 = vld [vmem:[%s884_s4 + $0x38] sm:$0xff]  ;;  %v281_v22 = vld [vmem:[%s884_s4 + $0x48] sm:$0xff]  ;;  %v282_v23 = vld [vmem:[%s884_s4 + $0x50] sm:$0xff] }
   0xb   :  { %v97_v47 = vmax.f32 %v81_v35, 0.0  ;;  %v103_v51 = vpack.c.bf16 %v89_v41, %v88_v40  ;;  %v74_v52 = vadd.f32 %v609_v8, %v51_v42  ;;  %v59_v53 = vmul.f32 %v602_v5, %v36_v31  ;;  %v283_v24 = vld [vmem:[%s884_s4 + $0x58] sm:$0xff]  ;;  %v284_v25 = vld [vmem:[%s884_s4 + $0x60] sm:$0xff]  ;;  %v285_v26 = vld [vmem:[%s884_s4 + $0x68] sm:$0xff] }
   0xc   :  { %v106_v45 = vpack.c.bf16 %v95_v33, %v94_v32  ;;  %519 = vmatprep.mubr.msk.bf16.mxu0 %vm126_vm0, %v102_v39  ;;  %v60_v54 = vmul.f32 %v602_v5, %v37_v36  ;;  %v75_v58 = vadd.f32 %v609_v8, %v52_v48  ;;  %v53_v59 = vmul.f32 %v602_v5, %v30_v43  ;;  %v286_v27 = vld [vmem:[%s884_s4 + $0x70] sm:$0xff]  ;;  %v287_v28 = vld [vmem:[%s884_s4 + $0x78] sm:$0xff] }
   0xd   :  { %v107_v57 = vpack.c.bf16 %v97_v47, %v96_v46  ;;  %v54_v60 = vmul.f32 %v602_v5, %v31_v44  ;;  %520 = vmatmul.mubr.msk.bf16.vlgmr.msra.gmra.mrb[0].mxu0 %vm126_vm0, %v103_v51  ;;  %v90_v61 = vmax.f32 %v74_v52, 0.0  ;;  %v82_v62 = vadd.f32 %v609_v8, %v59_v53  ;;  %295 = vperm.xlu0 %541, %v273_v50  }
   0xe   :  { %527 = vmatprep.mubr.msk.bf16.mxu1 %vm126_vm0, %v106_v45  ;;  %v83_v63 = vadd.f32 %v609_v8, %v60_v54  ;;  %v61_v0 = vmul.f32 %v602_v5, %v38_v49  ;;  %v91_v1 = vmax.f32 %v75_v58, 0.0  ;;  %v76_v2 = vadd.f32 %v609_v8, %v53_v59  ;;  %315 = vperm.xlu1 %542, %v277_v11  }
   0xf   :  { %528 = vmatmul.mubr.msk.bf16.vlgmr.msra.gmra.mrb[0].mxu1 %vm126_vm0, %v107_v57  ;;  %v77_v3 = vadd.f32 %v609_v8, %v54_v60  ;;  %v62_v4 = vmul.f32 %v602_v5, %v39_v55  ;;  %v98_v7 = vmax.f32 %v82_v62, 0.0  ;;  %v546_v29 = vmov 0.0  }
  0x10   :  { %v99_v9 = vmax.f32 %v83_v63, 0.0  ;;  %v84_v10 = vadd.f32 %v609_v8, %v61_v0  ;;  %v104_v12 = vpack.c.bf16 %v91_v1, %v90_v61  ;;  %v92_v13 = vmax.f32 %v76_v2, 0.0  ;;  %270 = vst.msk [vmem:[%s885_s6] sm:$0x1] %vm269_vm1, %v546_v29  ;;  %271 = vst.msk [vmem:[%s886_s7] sm:$0x1] %vm269_vm1, %v546_v29 }
  0x11   :  { %v93_v14 = vmax.f32 %v77_v3, 0.0  ;;  %v85_v15 = vadd.f32 %v609_v8, %v62_v4  ;;  %310 = vperm.xlu0 %541, %v276_v6   ;;  %v280_v8 = vld [vmem:[%s884_s4 + $0x40] sm:$0xff] }
  0x12   :  { %v108_v16 = vpack.c.bf16 %v99_v9, %v98_v7  ;;  %v100_v5 = vmax.f32 %v84_v10, 0.0  ;;  %523 = vmatprep.mubr.msk.bf16.mxu0 %vm126_vm0, %v104_v12  ;;  %325 = vperm.xlu1 %542, %v279_v20  }
  0x13   :  { %v105_v17 = vpack.c.bf16 %v93_v14, %v92_v13  ;;  %v101_v18 = vmax.f32 %v85_v15, 0.0 }
  0x14   :  { %531 = vmatprep.mubr.msk.bf16.mxu1 %vm126_vm0, %v108_v16 }
  0x15   :  { %v109_v21 = vpack.c.bf16 %v101_v18, %v100_v5  ;;  %524 = vmatmul.mubr.msk.bf16.gmra.mrb[4].mxu0 %vm126_vm0, %v105_v17  ;;  %320 = vperm.xlu0 %541, %v278_v19  }
  0x16   :  { %335 = vperm.xlu1 %542, %v281_v22  }
  0x17   :  { %532 = vmatmul.mubr.msk.bf16.gmra.mrb[4].mxu1 %vm126_vm0, %v109_v21 }
  0x19   :  { %330 = vperm.xlu0 %541, %v280_v8  }
  0x1a   :  { %345 = vperm.xlu1 %542, %v283_v24  }
  0x1d   :  { %340 = vperm.xlu0 %541, %v282_v23  }
  0x1e   :  { %355 = vperm.xlu1 %542, %v285_v26  }
  0x21   :  { %350 = vperm.xlu0 %541, %v284_v25  }
  0x22   :  { %365 = vperm.xlu1 %542, %v287_v28  }
  0x25   :  { %360 = vperm.xlu0 %541, %v286_v27  }
  0x85   :  { %v301_v31 = vpop.permute.xlu1 %300 }
  0x88   :  { %v291_v30 = vpop.permute.xlu0 %290 }
  0x89   :  { %v306_v33 = vpop.permute.xlu1 %305 }
  0x8c   :  { %v296_v32 = vpop.permute.xlu0 %295 }
  0x8d   :  { %v747_v35 = vpop.permute.xlu1 %315 }
  0x90   :  { %v311_v34 = vpop.permute.xlu0 %310 }
  0x91   :  { %v326_v50 = vpop.permute.xlu1 %325 }
  0x94   :  { %v321_v46 = vpop.permute.xlu0 %320 }
  0x95   :  { %v336_v14 = vpop.permute.xlu1 %335 }
  0x98   :  { %v331_v4 = vpop.permute.xlu0 %330 }
  0x99   :  { %v346_v29 = vpop.permute.xlu1 %345 }
  0x9c   :  { %v341_v22 = vpop.permute.xlu0 %340 }
  0xe0   :  { %v521_v36 = vpop.f32.mrb[0].mxu0 }
  0xe1   :  { %251 = vst.msk [vmem:[%s887_s5 + $0x10] sm:$0xff] %vm248_vm2, %v521_v36  ;;  %v185_v38 = vpop.f32.mrb[1].mxu0  ;;  %v370_v45 = vmul.f32 %v521_v36, %v301_v31 }
  0xe2   :  { %v753_v37 = vpop.f32.mrb[0].mxu1  ;;  %249 = vst.msk [vmem:[%s887_s5] sm:$0xff] %vm248_vm2, %v185_v38  ;;  %v522_v40 = vpop.f32.mrb[2].mxu0  ;;  %v368_v41 = vmul.f32 %v291_v30, %v185_v38 }
  0xe3   :  { %259 = vst.msk [vmem:[%s887_s5 + $0x50] sm:$0xff] %vm248_vm2, %v753_v37  ;;  %v764_v39 = vpop.f32.mrb[1].mxu1  ;;  %252 = vst.msk [vmem:[%s887_s5 + $0x18] sm:$0xff] %vm248_vm2, %v522_v40  ;;  %v188_v43 = vpop.f32.mrb[3].mxu0  ;;  %v371_v48 = vmul.f32 %v522_v40, %v306_v33  ;;  %v428_v52 = vmul.f32 %v370_v45, %v370_v45  ;;  %v388_v58 = vsel %vm248_vm2, %v370_v45, 0.0  ;;  %v378_v38 = vmul.f32 %v753_v37, %v341_v22 }
  0xe4   :  { %257 = vst.msk [vmem:[%s887_s5 + $0x40] sm:$0xff] %vm248_vm2, %v764_v39  ;;  %v775_v42 = vpop.f32.mrb[2].mxu1  ;;  %250 = vst.msk [vmem:[%s887_s5 + $0x8] sm:$0xff] %vm248_vm2, %v188_v43  ;;  %v426_v47 = vmul.f32 %v368_v41, %v368_v41  ;;  %v369_v49 = vmul.f32 %v296_v32, %v188_v43  ;;  %v385_v53 = vsel %vm248_vm2, %v368_v41, 0.0  ;;  %v376_v25 = vmul.f32 %v331_v4, %v764_v39  ;;  %v351_v43 = vpop.permute.xlu0 %350 }
  0xe5   :  { %260 = vst.msk [vmem:[%s887_s5 + $0x58] sm:$0xff] %vm248_vm2, %v775_v42  ;;  %v220_v44 = vpop.f32.mrb[3].mxu1  ;;  %v429_v63 = vmul.f32 %v371_v48, %v371_v48  ;;  %v445_v10 = vsel %vm248_vm2, %v428_v52, 0.0  ;;  %v390_v11 = vsel %vm248_vm2, %v371_v48, 0.0 }
  0xe6   :  { %258 = vst.msk [vmem:[%s887_s5 + $0x48] sm:$0xff] %vm248_vm2, %v220_v44  ;;  %v386_v54 = vsel %vm248_vm2, %v369_v49, 0.0  ;;  %v427_v55 = vmul.f32 %v369_v49, %v369_v49  ;;  %v442_v62 = vsel %vm248_vm2, %v426_v47, 0.0  ;;  %v377_v31 = vmul.f32 %v336_v14, %v220_v44 }
  0xe7   :  { %v387_v59 = vadd.f32 %v386_v54, %v385_v53  ;;  %v447_v5 = vsel %vm248_vm2, %v429_v63, 0.0  ;;  %v434_v40 = vmul.f32 %v376_v25, %v376_v25  ;;  %v400_v45 = vsel %vm248_vm2, %v376_v25, 0.0 }
  0xe8   :  { %v525_v51 = vpop.f32.mrb[4].mxu0  ;;  %v443_v0 = vsel %vm248_vm2, %v427_v55, 0.0  ;;  %v379_v47 = vmul.f32 %v775_v42, %v346_v29  ;;  %v435_v44 = vmul.f32 %v377_v31, %v377_v31  ;;  %v436_v53 = vmul.f32 %v378_v38, %v378_v38  ;;  %v361_v63 = vpop.permute.xlu0 %360 }
  0xe9   :  { %255 = vst.msk [vmem:[%s887_s5 + $0x30] sm:$0xff] %vm248_vm2, %v525_v51  ;;  %v201_v57 = vpop.f32.mrb[5].mxu0  ;;  %v389_v6 = vadd.f32 %v388_v58, %v387_v59  ;;  %v444_v7 = vadd.f32 %v443_v0, %v442_v62  ;;  %v374_v17 = vmul.f32 %v525_v51, %v321_v46  ;;  %v402_v51 = vsel %vm248_vm2, %v377_v31, 0.0 }
  0xea   :  { %v796_v56 = vpop.f32.mrb[4].mxu1  ;;  %253 = vst.msk [vmem:[%s887_s5 + $0x20] sm:$0xff] %vm248_vm2, %v201_v57  ;;  %v526_v61 = vpop.f32.mrb[6].mxu0  ;;  %v372_v1 = vmul.f32 %v311_v34, %v201_v57  ;;  %v457_v37 = vsel %vm248_vm2, %v434_v40, 0.0  ;;  %v404_v57 = vsel %vm248_vm2, %v378_v38, 0.0  ;;  %v437_v59 = vmul.f32 %v379_v47, %v379_v47 }
  0xeb   :  { %263 = vst.msk [vmem:[%s887_s5 + $0x70] sm:$0xff] %vm248_vm2, %v796_v56  ;;  %v233_v60 = vpop.f32.mrb[5].mxu1  ;;  %256 = vst.msk [vmem:[%s887_s5 + $0x38] sm:$0xff] %vm248_vm2, %v526_v61  ;;  %v204_v3 = vpop.f32.mrb[7].mxu0  ;;  %v446_v15 = vadd.f32 %v445_v10, %v444_v7  ;;  %v391_v16 = vadd.f32 %v390_v11, %v389_v6  ;;  %v375_v8 = vmul.f32 %v526_v61, %v326_v50  ;;  %v396_v30 = vsel %vm248_vm2, %v374_v17, 0.0 }
  0xec   :  { %261 = vst.msk [vmem:[%s887_s5 + $0x60] sm:$0xff] %vm248_vm2, %v233_v60  ;;  %v818_v2 = vpop.f32.mrb[6].mxu1  ;;  %254 = vst.msk [vmem:[%s887_s5 + $0x28] sm:$0xff] %vm248_vm2, %v204_v3  ;;  %v392_v12 = vsel %vm248_vm2, %v372_v1, 0.0  ;;  %v430_v13 = vmul.f32 %v372_v1, %v372_v1  ;;  %v373_v21 = vmul.f32 %v747_v35, %v204_v3  ;;  %v432_v26 = vmul.f32 %v374_v17, %v374_v17  ;;  %v356_v50 = vpop.permute.xlu1 %355 }
  0xed   :  { %264 = vst.msk [vmem:[%s887_s5 + $0x78] sm:$0xff] %vm248_vm2, %v818_v2  ;;  %v236_v9 = vpop.f32.mrb[7].mxu1  ;;  %v393_v19 = vadd.f32 %v392_v12, %v391_v16  ;;  %v448_v20 = vadd.f32 %v447_v5, %v446_v15  ;;  %v433_v32 = vmul.f32 %v375_v8, %v375_v8  ;;  %v398_v35 = vsel %vm248_vm2, %v375_v8, 0.0 }
  0xee   :  { %262 = vst.msk [vmem:[%s887_s5 + $0x68] sm:$0xff] %vm248_vm2, %v236_v9  ;;  %v449_v18 = vsel %vm248_vm2, %v430_v13, 0.0  ;;  %v394_v24 = vsel %vm248_vm2, %v373_v21, 0.0  ;;  %v431_v28 = vmul.f32 %v373_v21, %v373_v21  ;;  %v453_v41 = vsel %vm248_vm2, %v432_v26, 0.0 }
  0xef   :  { %v450_v23 = vadd.f32 %v449_v18, %v448_v20  ;;  %v395_v27 = vadd.f32 %v394_v24, %v393_v19  ;;  %v455_v48 = vsel %vm248_vm2, %v433_v32, 0.0  ;;  %v380_v54 = vmul.f32 %v351_v43, %v233_v60  ;;  %v425_v43 = vld [vmem:[%s886_s7] sm:$0x1] }
  0xf0   :  { %v451_v34 = vsel %vm248_vm2, %v431_v28, 0.0  ;;  %v459_v61 = vsel %vm248_vm2, %v435_v44, 0.0  ;;  %v381_v42 = vmul.f32 %v356_v50, %v236_v9  ;;  %v406_v0 = vsel %vm248_vm2, %v379_v47, 0.0  ;;  %v366_v60 = vpop.permute.xlu1 %365 }
  0xf1   :  { %v397_v33 = vadd.f32 %v396_v30, %v395_v27  ;;  %v452_v36 = vadd.f32 %v451_v34, %v450_v23  ;;  %v461_v3 = vsel %vm248_vm2, %v436_v53, 0.0  ;;  %v382_v4 = vmul.f32 %v796_v56, %v361_v63 }
  0xf2   :  { %v438_v6 = vmul.f32 %v380_v54, %v380_v54  ;;  %v408_v10 = vsel %vm248_vm2, %v380_v54, 0.0  ;;  %v463_v12 = vsel %vm248_vm2, %v437_v59, 0.0  ;;  %v383_v13 = vmul.f32 %v818_v2, %v366_v60 }
  0xf3   :  { %v399_v39 = vadd.f32 %v398_v35, %v397_v33  ;;  %v454_v46 = vadd.f32 %v453_v41, %v452_v36  ;;  %v439_v14 = vmul.f32 %v381_v42, %v381_v42  ;;  %v410_v15 = vsel %vm248_vm2, %v381_v42, 0.0  ;;  %v384_v36 = vld [vmem:[%s885_s6] sm:$0x1] }
  0xf4   :  { %v440_v5 = vmul.f32 %v382_v4, %v382_v4  ;;  %v465_v17 = vsel %vm248_vm2, %v438_v6, 0.0  ;;  %v412_v56 = vsel %vm248_vm2, %v382_v4, 0.0  ;;  %v441_v20 = vmul.f32 %v383_v13, %v383_v13 }
  0xf5   :  { %v401_v49 = vadd.f32 %v400_v45, %v399_v39  ;;  %v456_v52 = vadd.f32 %v455_v48, %v454_v46  ;;  %v467_v8 = vsel %vm248_vm2, %v439_v14, 0.0  ;;  %v414_v22 = vsel %vm248_vm2, %v383_v13, 0.0 }
  0xf6   :  { %v469_v2 = vsel %vm248_vm2, %v440_v5, 0.0  ;;  %v471_v26 = vsel %vm248_vm2, %v441_v20, 0.0 }
  0xf7   :  { %v403_v55 = vadd.f32 %v402_v51, %v401_v49  ;;  %v458_v58 = vadd.f32 %v457_v37, %v456_v52 }
  0xf9   :  { %v405_v62 = vadd.f32 %v404_v57, %v403_v55  ;;  %v460_v1 = vadd.f32 %v459_v61, %v458_v58 }
  0xfb   :  { %v407_v7 = vadd.f32 %v406_v0, %v405_v62  ;;  %v462_v11 = vadd.f32 %v461_v3, %v460_v1 }
  0xfd   :  { %v409_v9 = vadd.f32 %v408_v10, %v407_v7  ;;  %v464_v16 = vadd.f32 %v463_v12, %v462_v11 }
  0xff   :  { %v411_v18 = vadd.f32 %v410_v15, %v409_v9  ;;  %v466_v19 = vadd.f32 %v465_v17, %v464_v16 }
 0x101   :  { %v413_v21 = vadd.f32 %v412_v56, %v411_v18  ;;  %v468_v23 = vadd.f32 %v467_v8, %v466_v19 }
 0x103   :  { %v415_v24 = vadd.f32 %v414_v22, %v413_v21  ;;  %v470_v25 = vadd.f32 %v469_v2, %v468_v23 }
 0x105   :  { %v416_v27 = vrot.slane %v415_v24, 4  ;;  %v472_v28 = vadd.f32 %v471_v26, %v470_v25 }
 0x107   :  { %v417_v29 = vadd.f32 %v416_v27, %v415_v24  ;;  %v473_v30 = vrot.slane %v472_v28, 4 }
 0x109   :  { %v418_v31 = vrot.slane %v417_v29, 2  ;;  %v474_v32 = vadd.f32 %v473_v30, %v472_v28 }
 0x10b   :  { %v419_v33 = vadd.f32 %v418_v31, %v417_v29  ;;  %v475_v34 = vrot.slane %v474_v32, 2 }
 0x10d   :  { %v420_v35 = vrot.slane %v419_v33, 1  ;;  %v476_v38 = vadd.f32 %v475_v34, %v474_v32 }
 0x10f   :  { %v421_v40 = vadd.f32 %v420_v35, %v419_v33  ;;  %v477_v41 = vrot.slane %v476_v38, 1 }
 0x111   :  { %v422_v39 = vadd.f32 %v421_v40, %v384_v36  ;;  %v478_v45 = vadd.f32 %v477_v41, %v476_v38 }
 0x113   :  { %424 = vst.msk [vmem:[%s885_s6] sm:$0x1] %vm269_vm1, %v422_v39  ;;  %v479_v46 = vadd.f32 %v478_v45, %v425_v43 }
 0x115   :  { %480 = vst.msk [vmem:[%s886_s7] sm:$0x1] %vm269_vm1, %v479_v46 }

// kernel: densenet_forward.17
= control target key start
LH: loop header
LB: loop body
LE: loop exit
PB: predicated region body
PF: predicated region fallthrough
CT: control target
= control target key end

     0   :  { %s2841_s27 = smov 0   ;;  %s3447_s0 = inlined_call_operand.vmem [shape: f32[2,126,16], index: 0, kind: input, shape index: {}]   ;;  %s3448_s1 = inlined_call_operand.vmem [shape: f32[1,16], index: 1, kind: input, shape index: {}]   ;;  %s3449_s2 = inlined_call_operand.vmem [shape: f32[1,16], index: 2, kind: input, shape index: {}]   ;;  %s3450_s3 = inlined_call_operand.vmem [shape: bf16[9,16,8], index: 3, kind: input, shape index: {}]   ;;  %s3451_s4 = inlined_call_operand.vmem [shape: f32[126,1], index: 4, kind: input, shape index: {}]   ;;  %s3452_s5 = inlined_call_operand.vmem [shape: f32[104,1], index: 5, kind: input, shape index: {}]   ;;  %s3453_s6 = inlined_call_operand.vmem [shape: f32[2,104,8], index: 6, kind: output, shape index: {0}]   ;;  %s3454_s7 = inlined_call_operand.vmem [shape: f32[1,8], index: 7, kind: output, shape index: {1}]   ;;  %s3455_s8 = inlined_call_operand.vmem [shape: f32[1,8], index: 8, kind: output, shape index: {2}]  }
   0x1 LB: > { %s2847_s28 = sadd.s32 4294967295, %s2790_s27   ;;  %p2107_p0 = scmp.ge.s32.totalorder %s2790_s27, 1  ;;  %s2790_s27 = sphi %s2841_s27, %s19_s27  }
   0x2   : > { %p257_p1 = scmp.lt.s32.totalorder %s2790_s27, 3 }
   0x4   : > { %p258_p2 = pnand %p2107_p0, %p257_p1 }
   0x5   : > { %v383_v0 = vld [vmem:[%s3451_s4 + $0x18] sm:$0xff] (!%p258_p2)  ;;  %v381_v1 = vld [vmem:[%s3451_s4 + $0x8] sm:$0xff] (!%p258_p2)  ;;  %v2792_v2 = vmov (!%p258_p2), 0   ;;  %v382_v3 = vld [vmem:[%s3451_s4 + $0x10] sm:$0xff] (!%p258_p2)  ;;  %v2793_v11 = vmov (!%p258_p2), 0.0   ;;  %vm2794_vm0 = vmmov (!%p258_p2), 0  }
   0x6   : > { %261 = sbr.rel (%p258_p2) target bundleno = 792 (0x318), region = 44  ;;  %2772 = vset.pattern.permute.xlu1 (!%p258_p2), %v2792_v2  ;;  %2771 = vset.pattern.permute.xlu0 (!%p258_p2), %v2792_v2  ;;  %v380_v4 = vld [vmem:[%s3451_s4] sm:$0xff] (!%p258_p2)  ;;  %v385_v6 = vld [vmem:[%s3451_s4 + $0x28] sm:$0xff] (!%p258_p2)  ;;  %v386_v7 = vld [vmem:[%s3451_s4 + $0x30] sm:$0xff] (!%p258_p2)  ;;  %p291_p3 = scmp.lt.s32.totalorder (!%p258_p2), %s2847_s28, 1  ;;  %vm492_vm1 = vcmask (!%p258_p2), 130048  }
   0x7   : > { %413 = vperm.xlu1 (!%p258_p2), %2772, %v383_v0   ;;  %403 = vperm.xlu0 (!%p258_p2), %2771, %v381_v1   ;;  %v384_v5 = vld [vmem:[%s3451_s4 + $0x20] sm:$0xff] (!%p258_p2)  ;;  %v387_v8 = vld [vmem:[%s3451_s4 + $0x38] sm:$0xff] (!%p258_p2)  ;;  %v389_v10 = vld [vmem:[%s3451_s4 + $0x48] sm:$0xff] (!%p258_p2)  ;;  %vm508_vm2 = vcmask (!%p258_p2), 128000   ;;  %vm1842_vm3 = vcmask (!%p258_p2), 64512   ;;  %p2201_p4 = scmp.ne.s32.totalorder (!%p258_p2), %s2847_s28, 0 }
   0x8   : > { %v388_v9 = vld [vmem:[%s3451_s4 + $0x40] sm:$0xff] (!%p258_p2)  ;;  %2397 = vmatprep.subr.bf16.mxu0 (!%p258_p2), %v2793_v11  ;;  %2277 = vmatprep.subr.bf16.mxu1 (!%p258_p2), %v2793_v11  ;;  %v2774_v13 = vld [vmem:[%s3450_s3 + $0x8] sm:$0xff] (!%p258_p2)   ;;  %v390_v14 = vld [vmem:[%s3451_s4 + $0x50] sm:$0xff] (!%p258_p2) }
   0x9   : > { %v2888_v12 = vld [vmem:[%s3450_s3 + $0x20] sm:$0xff] (!%p258_p2)   ;;  %2278 = vmatpush3.bf16.msra.mxu1 (!%p258_p2), %v2774_v13  ;;  %2279 = vmatprep.mubr.msk.bf16.mxu1 (!%p258_p2), %vm2794_vm0, %v2793_v11  ;;  %v391_v15 = vld [vmem:[%s3451_s4 + $0x58] sm:$0xff] (!%p258_p2)  ;;  %v393_v17 = vld [vmem:[%s3451_s4 + $0x68] sm:$0xff] (!%p258_p2) }
   0xa   : > { %2398 = vmatpush3.bf16.msra.mxu0 (!%p258_p2), %v2888_v12  ;;  %2307 = vmatprep.subr.bf16.mxu1 (!%p258_p2), %v2793_v11  ;;  %v392_v16 = vld [vmem:[%s3451_s4 + $0x60] sm:$0xff] (!%p258_p2)  ;;  %v394_v18 = vld [vmem:[%s3451_s4 + $0x70] sm:$0xff] (!%p258_p2)  ;;  %v395_v19 = vld [vmem:[%s3451_s4 + $0x78] sm:$0x3f] (!%p258_p2) }
   0xb   : > { %408 = vperm.xlu0 (!%p258_p2), %2771, %v382_v3   ;;  %398 = vperm.xlu1 (!%p258_p2), %2772, %v380_v4   ;;  %v2932_v21 = vld [vmem:[%s3448_s1] ss:$0 sm:$0xff] (!%p258_p2) }
   0xc   : > { %2427 = vmatprep.subr.bf16.mxu0 (!%p258_p2), %v2793_v11  ;;  %2399 = vmatprep.mubr.msk.bf16.mxu0 (!%p258_p2), %vm2794_vm0, %v2793_v11  ;;  %v2941_v26 = vld [vmem:[%s3449_s2] ss:$0 sm:$0xff] (!%p258_p2) }
   0xd   : > { %s2920_s23 = scalar_select %p291_p3, %s2847_s28, 1 }
   0xe   : > { %vm1860_vm4 = vcmask (!%p2201_p4), 57344  }
   0xf   : > { %418 = vperm.xlu0 %2771, %v384_v5   ;;  %423 = vperm.xlu1 %2772, %v385_v6   ;;  %s2204_s24 = sshll.u32 %s2920_s23, 7 }
  0x10   : > { %s2926_s29 = scalar_lea.vmem %s3447_s0, %s2204_s24 }
  0x11   : > { %v305_v20 = vld [vmem:[%s2926_s29 + $0x18] sm:$0xff]  ;;  %v303_v22 = vld [vmem:[%s2926_s29 + $0x8] sm:$0xff]  ;;  %v304_v25 = vld [vmem:[%s2926_s29 + $0x10] sm:$0xff] }
  0x12   : > { %v328_v23 = vmul.f32 %v2932_v21, %v305_v20  ;;  %v326_v24 = vmul.f32 %v2932_v21, %v303_v22  ;;  %v302_v27 = vld [vmem:[%s2926_s29] sm:$0xff]  ;;  %v327_v28 = vmul.f32 %v2932_v21, %v304_v25  ;;  %v307_v33 = vld [vmem:[%s2926_s29 + $0x28] sm:$0xff]  ;;  %v308_v40 = vld [vmem:[%s2926_s29 + $0x30] sm:$0xff] }
  0x13   : > { %428 = vperm.xlu0 %2771, %v386_v7   ;;  %433 = vperm.xlu1 %2772, %v387_v8   ;;  %v325_v31 = vmul.f32 %v2932_v21, %v302_v27  ;;  %v306_v32 = vld [vmem:[%s2926_s29 + $0x20] sm:$0xff]  ;;  %v330_v36 = vmul.f32 %v2932_v21, %v307_v33  ;;  %v309_v41 = vld [vmem:[%s2926_s29 + $0x38] sm:$0xff]  ;;  %v331_v47 = vmul.f32 %v2932_v21, %v308_v40  ;;  %v311_v53 = vld [vmem:[%s2926_s29 + $0x48] sm:$0xff] }
  0x14   : > { %v351_v29 = vadd.f32 %v2941_v26, %v328_v23  ;;  %v349_v30 = vadd.f32 %v2941_v26, %v326_v24  ;;  %v350_v34 = vadd.f32 %v2941_v26, %v327_v28  ;;  %v329_v35 = vmul.f32 %v2932_v21, %v306_v32  ;;  %v310_v52 = vld [vmem:[%s2926_s29 + $0x40] sm:$0xff]  ;;  %v312_v60 = vld [vmem:[%s2926_s29 + $0x50] sm:$0xff]  ;;  %v313_v1 = vld [vmem:[%s2926_s29 + $0x58] sm:$0xff] }
  0x15   : > { %v348_v39 = vadd.f32 %v2941_v26, %v325_v31  ;;  %v353_v46 = vadd.f32 %v2941_v26, %v330_v36  ;;  %v332_v51 = vmul.f32 %v2932_v21, %v309_v41  ;;  %v354_v58 = vadd.f32 %v2941_v26, %v331_v47  ;;  %v2775_v36 = vld [vmem:[%s3450_s3 + $0x28] sm:$0xff]  }
  0x16   : > { %v367_v37 = vmax.f32 %v351_v29, 0.0  ;;  %v365_v38 = vmax.f32 %v349_v30, 0.0  ;;  %v366_v44 = vmax.f32 %v350_v34, 0.0  ;;  %v352_v45 = vadd.f32 %v2941_v26, %v329_v35  ;;  %v316_v29 = vld [vmem:[%s2926_s29 + $0x70] sm:$0xff]  ;;  %v317_v30 = vld [vmem:[%s2926_s29 + $0x78] sm:$0x3f] }
  0x17   : > { %438 = vperm.xlu0 %2771, %v388_v9   ;;  %443 = vperm.xlu1 %2772, %v389_v10   ;;  %v364_v50 = vmax.f32 %v348_v39, 0.0  ;;  %v369_v57 = vmax.f32 %v353_v46, 0.0  ;;  %v333_v59 = vmul.f32 %v2932_v21, %v310_v52  ;;  %v355_v63 = vadd.f32 %v2941_v26, %v332_v51 }
  0x18   : > { %v368_v56 = vmax.f32 %v352_v45, 0.0  ;;  %v334_v0 = vmul.f32 %v2932_v21, %v311_v53  ;;  %v335_v3 = vmul.f32 %v2932_v21, %v312_v60  ;;  %v370_v6 = vmax.f32 %v354_v58, 0.0 }
  0x19   : > { %v356_v7 = vadd.f32 %v2941_v26, %v333_v59  ;;  %v336_v8 = vmul.f32 %v2932_v21, %v313_v1  ;;  %v371_v13 = vmax.f32 %v355_v63, 0.0  ;;  %v339_v47 = vmul.f32 %v2932_v21, %v316_v29  ;;  %v2777_v29 = vld [vmem:[%s3450_s3 + $0x30] sm:$0xff]  }
  0x1b   : > { %448 = vperm.xlu0 %2771, %v390_v14   ;;  %453 = vperm.xlu1 %2772, %v391_v15   ;;  %v357_v14 = vadd.f32 %v2941_v26, %v334_v0  ;;  %v314_v15 = vld [vmem:[%s2926_s29 + $0x60] sm:$0xff]  ;;  %v359_v20 = vadd.f32 %v2941_v26, %v336_v8  ;;  %v372_v27 = vmax.f32 %v356_v7, 0.0 }
  0x1c   : > { %v337_v22 = vmul.f32 %v2932_v21, %v314_v15 }
  0x1d   : > { %v373_v28 = vmax.f32 %v357_v14, 0.0  ;;  %v375_v41 = vmax.f32 %v359_v20, 0.0 }
  0x1f   : > { %458 = vperm.xlu0 %2771, %v392_v16   ;;  %463 = vperm.xlu1 %2772, %v393_v17   ;;  %v315_v16 = vld [vmem:[%s2926_s29 + $0x68] sm:$0xff]  ;;  %v358_v17 = vadd.f32 %v2941_v26, %v335_v3  ;;  %s2758_s29 = smul.u32 104, %s2920_s23 }
  0x20   : > { %v338_v23 = vmul.f32 %v2932_v21, %v315_v16 }
  0x21   : > { %s3278_s10 = scalar_lea.vmem %s3453_s6, %s2758_s29 }
  0x23   : > { %468 = vperm.xlu0 %2771, %v394_v18   ;;  %473 = vperm.xlu1 %2772, %v395_v19  }
  0x86   : > { %v414_v42 = vpop.permute.xlu1 %413  ;;  %v404_v43 = vpop.permute.xlu0 %403 }
  0x87   : > { %v479_v48 = vmul.f32 %v414_v42, %v367_v37  ;;  %v477_v49 = vmul.f32 %v404_v43, %v365_v38  ;;  %v374_v37 = vmax.f32 %v358_v17, 0.0  ;;  %v360_v42 = vadd.f32 %v2941_v26, %v337_v22 }
  0x88   : > { %v361_v43 = vadd.f32 %v2941_v26, %v338_v23 }
  0x89   : > { %496 = vst.msk [vmem:[#allocation2 + $0x18] sm:$0xff] %vm492_vm1, %v479_v48  ;;  %494 = vst.msk [vmem:[#allocation2 + $0x8] sm:$0xff] %vm492_vm1, %v477_v49  ;;  %v340_v48 = vmul.f32 %v2932_v21, %v317_v30  ;;  %v376_v51 = vmax.f32 %v360_v42, 0.0 }
  0x8a   : > { %v409_v54 = vpop.permute.xlu0 %408  ;;  %v399_v55 = vpop.permute.xlu1 %398  ;;  %v377_v52 = vmax.f32 %v361_v43, 0.0 }
  0x8b   : > { %v478_v61 = vmul.f32 %v409_v54, %v366_v44  ;;  %v476_v62 = vmul.f32 %v399_v55, %v364_v50  ;;  %v2776_v44 = vld [vmem:[%s3450_s3] sm:$0xff]   ;;  %v363_v58 = vadd.f32 %v2941_v26, %v340_v48 }
  0x8d   : > { %495 = vst.msk [vmem:[#allocation2 + $0x10] sm:$0xff] %vm492_vm1, %v478_v61  ;;  %493 = vst.msk [vmem:[#allocation2] sm:$0xff] %vm492_vm1, %v476_v62 }
  0x8e   : > { %v419_v4 = vpop.permute.xlu0 %418  ;;  %v424_v5 = vpop.permute.xlu1 %423 }
  0x8f   : > { %v480_v9 = vmul.f32 %v419_v4, %v368_v56  ;;  %v481_v10 = vmul.f32 %v424_v5, %v369_v57  ;;  %v362_v57 = vadd.f32 %v2941_v26, %v339_v47  ;;  %v379_v4 = vmax.f32 %v363_v58, 0.0  ;;  %v2778_v47 = vld [vmem:[%s3450_s3 + $0x10] sm:$0xff]  }
  0x91   : > { %497 = vst.msk [vmem:[#allocation2 + $0x20] sm:$0xff] %vm492_vm1, %v480_v9  ;;  %498 = vst.msk [vmem:[#allocation2 + $0x28] sm:$0xff] %vm492_vm1, %v481_v10  ;;  %v378_v3 = vmax.f32 %v362_v57, 0.0 }
  0x92   : > { %v429_v18 = vpop.permute.xlu0 %428  ;;  %v434_v19 = vpop.permute.xlu1 %433 }
  0x93   : > { %v482_v24 = vmul.f32 %v429_v18, %v370_v6  ;;  %v483_v25 = vmul.f32 %v434_v19, %v371_v13 }
  0x94   : > { %v532_v31 = vld [vmem:[#allocation2 + $0x1] sm:$0xff]  ;;  %v533_v32 = vld [vmem:[#allocation2 + $0x9] sm:$0xff]  ;;  %v1088_v35 = vld [vmem:[#allocation2 + $0x13] sm:$0xff] }
  0x95   : > { %v1087_v33 = vld [vmem:[#allocation2 + $0xb] sm:$0xff]  ;;  %499 = vst.msk [vmem:[#allocation2 + $0x30] sm:$0xff] %vm492_vm1, %v482_v24  ;;  %500 = vst.msk [vmem:[#allocation2 + $0x38] sm:$0xff] %vm492_vm1, %v483_v25  ;;  %v545_v34 = vpack.c.bf16 %v533_v32, %v532_v31  ;;  %v3033_v25 = vld [vmem:[#allocation2 + $0x14] sm:$0xff] }
  0x96   : > { %v439_v38 = vpop.permute.xlu0 %438  ;;  %v444_v39 = vpop.permute.xlu1 %443  ;;  %v1100_v40 = vpack.c.bf16 %v1088_v35, %v1087_v33  ;;  %v534_v59 = vld [vmem:[#allocation2 + $0x11] sm:$0xff]  ;;  %v510_v42 = vld [vmem:[#allocation2] sm:$0xff] }
  0x97   : > { %v484_v45 = vmul.f32 %v439_v38, %v372_v27  ;;  %v485_v46 = vmul.f32 %v444_v39, %v373_v28  ;;  %2280 = vmatmul.mubr.msk.bf16.vlgmr.msra.gmra.mrb[0].mxu1 %vm492_vm1, %v545_v34  ;;  %v1238_v24 = vld [vmem:[#allocation2 + $0xc] sm:$0xff] }
  0x98   : > { %2400 = vmatmul.mubr.msk.bf16.vlgmr.msra.gmra.mrb[0].mxu0 %vm492_vm1, %v1100_v40  ;;  %2283 = vmatprep.mubr.msk.bf16.mxu1 %vm2794_vm0, %v2793_v11  ;;  %v535_v53 = vld [vmem:[#allocation2 + $0x19] sm:$0xff]  ;;  %v1090_v56 = vld [vmem:[#allocation2 + $0x23] sm:$0xff]  ;;  %v1251_v30 = vpack.c.bf16 %v3033_v25, %v1238_v24 }
  0x99   : > { %501 = vst.msk [vmem:[#allocation2 + $0x40] sm:$0xff] %vm492_vm1, %v484_v45  ;;  %502 = vst.msk [vmem:[#allocation2 + $0x48] sm:$0xff] %vm492_vm1, %v485_v46  ;;  %2428 = vmatpush3.bf16.msra.mxu0 %v2775_v36  ;;  %2403 = vmatprep.mubr.msk.bf16.mxu0 %vm2794_vm0, %v2793_v11  ;;  %v1089_v55 = vld [vmem:[#allocation2 + $0x1b] sm:$0xff]  ;;  %v546_v60 = vpack.c.bf16 %v535_v53, %v534_v59  ;;  %v3048_v33 = vld [vmem:[#allocation2 + $0x24] sm:$0xff] }
  0x9a   : > { %v449_v49 = vpop.permute.xlu0 %448  ;;  %v454_v50 = vpop.permute.xlu1 %453  ;;  %2308 = vmatpush3.bf16.msra.mxu1 %v2776_v44  ;;  %2457 = vmatprep.subr.bf16.mxu0 %v2793_v11  ;;  %v1101_v63 = vpack.c.bf16 %v1090_v56, %v1089_v55  ;;  %v536_v13 = vld [vmem:[#allocation2 + $0x21] sm:$0xff] }
  0x9b   : > { %v486_v21 = vmul.f32 %v449_v49, %v374_v37  ;;  %v487_v54 = vmul.f32 %v454_v50, %v375_v41  ;;  %2337 = vmatprep.subr.bf16.mxu1 %v2793_v11  ;;  %v3046_v32 = vld [vmem:[#allocation2 + $0x1c] sm:$0xff]  ;;  %v511_v45 = vld [vmem:[#allocation2 + $0x8] sm:$0xff]  ;;  %v512_v49 = vld [vmem:[#allocation2 + $0x10] sm:$0xff] }
  0x9c   : > { %v537_v6 = vld [vmem:[#allocation2 + $0x29] sm:$0xff]  ;;  %v1092_v10 = vld [vmem:[#allocation2 + $0x33] sm:$0xff]  ;;  %v1252_v36 = vpack.c.bf16 %v3048_v33, %v3046_v32  ;;  %v523_v46 = vpack.c.bf16 %v511_v45, %v510_v42 }
  0x9d   : > { %503 = vst.msk [vmem:[#allocation2 + $0x50] sm:$0xff] %vm492_vm1, %v486_v21  ;;  %504 = vst.msk [vmem:[#allocation2 + $0x58] sm:$0xff] %vm492_vm1, %v487_v54  ;;  %v1091_v9 = vld [vmem:[#allocation2 + $0x2b] sm:$0xff]  ;;  %v547_v14 = vpack.c.bf16 %v537_v6, %v536_v13  ;;  %v3060_v39 = vld [vmem:[#allocation2 + $0x34] sm:$0xff] }
  0x9e   : > { %v459_v61 = vpop.permute.xlu0 %458  ;;  %v464_v62 = vpop.permute.xlu1 %463  ;;  %v1102_v15 = vpack.c.bf16 %v1092_v10, %v1091_v9  ;;  %v538_v19 = vld [vmem:[#allocation2 + $0x31] sm:$0xff]  ;;  %v514_v54 = vld [vmem:[#allocation2 + $0x20] sm:$0xff]  ;;  %v515_v55 = vld [vmem:[#allocation2 + $0x28] sm:$0xff] }
  0x9f   : > { %v488_v0 = vmul.f32 %v459_v61, %v376_v51  ;;  %v489_v1 = vmul.f32 %v464_v62, %v377_v52  ;;  %2284 = vmatmul.mubr.msk.bf16.gmra.mrb[4].mxu1 %vm492_vm1, %v546_v60  ;;  %v3058_v38 = vld [vmem:[#allocation2 + $0x2c] sm:$0xff]  ;;  %v513_v50 = vld [vmem:[#allocation2 + $0x18] sm:$0xff]  ;;  %v525_v58 = vpack.c.bf16 %v515_v55, %v514_v54 }
  0xa0   : > { %2404 = vmatmul.mubr.msk.bf16.gmra.mrb[4].mxu0 %vm492_vm1, %v1101_v63  ;;  %2287 = vmatprep.mubr.msk.bf16.mxu1 %vm2794_vm0, %v2793_v11  ;;  %v539_v16 = vld [vmem:[#allocation2 + $0x39] sm:$0xff]  ;;  %v1094_v18 = vld [vmem:[#allocation2 + $0x43] sm:$0xff]  ;;  %v1253_v41 = vpack.c.bf16 %v3060_v39, %v3058_v38  ;;  %v524_v53 = vpack.c.bf16 %v513_v50, %v512_v49  ;;  %v516_v60 = vld [vmem:[#allocation2 + $0x30] sm:$0xff]  ;;  %v1403_v9 = vpack.c.bf16 %v3058_v38, %v3048_v33 }
  0xa1   : > { %505 = vst.msk [vmem:[#allocation2 + $0x60] sm:$0xff] %vm492_vm1, %v488_v0  ;;  %506 = vst.msk [vmem:[#allocation2 + $0x68] sm:$0xff] %vm492_vm1, %v489_v1  ;;  %2407 = vmatprep.mubr.msk.bf16.mxu0 %vm2794_vm0, %v2793_v11  ;;  %v1093_v17 = vld [vmem:[#allocation2 + $0x3b] sm:$0xff]  ;;  %v548_v20 = vpack.c.bf16 %v539_v16, %v538_v19  ;;  %v3072_v44 = vld [vmem:[#allocation2 + $0x44] sm:$0xff] }
  0xa2   : > { %v469_v26 = vpop.permute.xlu0 %468  ;;  %v474_v5 = vpop.permute.xlu1 %473  ;;  %v1103_v22 = vpack.c.bf16 %v1094_v18, %v1093_v17  ;;  %v540_v27 = vld [vmem:[#allocation2 + $0x41] sm:$0xff]  ;;  %v517_v61 = vld [vmem:[#allocation2 + $0x38] sm:$0xff]  ;;  %v3138_v16 = vld [vmem:[#allocation2 + $0xa] sm:$0xff] }
  0xa3   : > { %v490_v7 = vmul.f32 %v469_v26, %v378_v3  ;;  %v491_v8 = vmul.f32 %v474_v5, %v379_v4  ;;  %v3070_v43 = vld [vmem:[#allocation2 + $0x3c] sm:$0xff]  ;;  %v526_v63 = vpack.c.bf16 %v517_v61, %v516_v60  ;;  %v519_v3 = vld [vmem:[#allocation2 + $0x48] sm:$0xff]  ;;  %v1402_v5 = vpack.c.bf16 %v3046_v32, %v3033_v25  ;;  %v791_v32 = vld [vmem:[#allocation2 + $0x32] sm:$0xff] }
  0xa4   : > { %v541_v23 = vld [vmem:[#allocation2 + $0x49] sm:$0xff]  ;;  %v542_v34 = vld [vmem:[#allocation2 + $0x51] sm:$0xff]  ;;  %v1254_v48 = vpack.c.bf16 %v3072_v44, %v3070_v43  ;;  %v518_v1 = vld [vmem:[#allocation2 + $0x40] sm:$0xff] }
  0xa5   : > { %507 = vst.msk [vmem:[#allocation2 + $0x70] sm:$0xff] %vm492_vm1, %v490_v7  ;;  %v549_v28 = vpack.c.bf16 %v541_v23, %v540_v27  ;;  %v1246_v51 = vld [vmem:[#allocation2 + $0x4c] sm:$0xff]  ;;  %v3086_v52 = vld [vmem:[#allocation2 + $0x54] sm:$0xff]  ;;  %v527_v4 = vpack.c.bf16 %v519_v3, %v518_v1  ;;  %v789_v27 = vld [vmem:[#allocation2 + $0x22] sm:$0xff] }
  0xa6   : > { %509 = vst.msk [vmem:[#allocation2 + $0x78] sm:$0x3f] %vm508_vm2, %v491_v8  ;;  %v1255_v21 = vpack.c.bf16 %v3086_v52, %v1246_v51  ;;  %v2779_v26 = vld [vmem:[%s3450_s3 + $0x38] sm:$0xff]   ;;  %v520_v6 = vld [vmem:[#allocation2 + $0x50] sm:$0xff]  ;;  %v1405_v19 = vpack.c.bf16 %v1246_v51, %v3072_v44  ;;  %v1546_v54 = vld [vmem:[#allocation2 + $0x45] sm:$0xff] }
  0xa7   : > { %2288 = vmatmul.mubr.msk.bf16.gmra.mrb[8].mxu1 %vm492_vm1, %v547_v14  ;;  %v521_v7 = vld [vmem:[#allocation2 + $0x58] sm:$0xff]  ;;  %v1404_v14 = vpack.c.bf16 %v3070_v43, %v3060_v39  ;;  %v3162_v25 = vld [vmem:[#allocation2 + $0x2a] sm:$0xff] }
  0xa8   : > { %2408 = vmatmul.mubr.msk.bf16.gmra.mrb[8].mxu0 %vm492_vm1, %v1102_v15  ;;  %2291 = vmatprep.mubr.msk.bf16.mxu1 %vm2794_vm0, %v2793_v11  ;;  %v543_v31 = vld [vmem:[#allocation2 + $0x59] sm:$0xff]  ;;  %v544_v37 = vld [vmem:[#allocation2 + $0x61] sm:$0xff]  ;;  %v528_v8 = vpack.c.bf16 %v521_v7, %v520_v6  ;;  %v1543_v43 = vld [vmem:[#allocation2 + $0x2d] sm:$0xff]  ;;  %v951_v61 = vpack.c.bf16 %v791_v32, %v3162_v25 }
  0xa9   : > { %2411 = vmatprep.mubr.msk.bf16.mxu0 %vm2794_vm0, %v2793_v11  ;;  %v550_v35 = vpack.c.bf16 %v543_v31, %v542_v34  ;;  %v551_v40 = vpack.c.bf16 %v544_v37, %v544_v37  ;;  %v1248_v56 = vld [vmem:[#allocation2 + $0x5c] sm:$0xff]  ;;  %v3095_v57 = vld [vmem:[#allocation2 + $0x64] sm:$0xff]  ;;  %v795_v44 = vld [vmem:[#allocation2 + $0x52] sm:$0xff] }
  0xaa   : > { %v1256_v59 = vpack.c.bf16 %v3095_v57, %v1248_v56  ;;  %v522_v10 = vld [vmem:[#allocation2 + $0x60] sm:$0xff]  ;;  %v2780_v18 = vld [vmem:[%s3450_s3 + $0x18] sm:$0xff]   ;;  %v1406_v24 = vpack.c.bf16 %v1248_v56, %v3086_v52  ;;  %v1694_v6 = vld [vmem:[#allocation2 + $0x2e] sm:$0xff] }
  0xab   : > { %v529_v13 = vpack.c.bf16 %v522_v10, %v522_v10  ;;  %v785_v15 = vld [vmem:[#allocation2 + $0x2] sm:$0xff]  ;;  %v1540_v39 = vld [vmem:[#allocation2 + $0x15] sm:$0xff] }
  0xac   : > { %v1250_v62 = vld [vmem:[#allocation2 + $0x6c] sm:$0xff]  ;;  %v798_v17 = vpack.c.bf16 %v3138_v16, %v785_v15  ;;  %v793_v37 = vld [vmem:[#allocation2 + $0x42] sm:$0xff]  ;;  %v3193_v42 = vld [vmem:[#allocation2 + $0x5a] sm:$0xff] }
  0xad   : > { %v1257_v0 = vpack.c.bf16 %v1250_v62, %v1250_v62  ;;  %v1401_v31 = vld [vmem:[#allocation2 + $0x74] sm:$0xff]  ;;  %v803_v45 = vpack.c.bf16 %v3193_v42, %v795_v44  ;;  %v1545_v49 = vld [vmem:[#allocation2 + $0x3d] sm:$0xff]  ;;  %v948_v10 = vld [vmem:[#allocation2 + $0x6a] sm:$0xff] }
  0xae   : > { %v1408_v34 = vpack.c.bf16 %v1401_v31, %v1401_v31  ;;  %v1544_v51 = vld [vmem:[#allocation2 + $0x35] sm:$0xff]  ;;  %v1549_v56 = vld [vmem:[#allocation2 + $0x5d] sm:$0xff]  ;;  %v1551_v60 = vld [vmem:[#allocation2 + $0x6d] sm:$0xff] }
  0xaf   : > { %2292 = vmatmul.mubr.msk.bf16.gmra.mrb[12].mxu1 %vm492_vm1, %v548_v20  ;;  %v3151_v20 = vld [vmem:[#allocation2 + $0x1a] sm:$0xff]  ;;  %v1555_v52 = vpack.c.bf16 %v1545_v49, %v1544_v51  ;;  %v1099_v31 = vld [vmem:[#allocation2 + $0x6b] sm:$0xff] }
  0xb0   : > { %2412 = vmatmul.mubr.msk.bf16.gmra.mrb[12].mxu0 %vm492_vm1, %v1103_v22  ;;  %2295 = vmatprep.mubr.msk.bf16.mxu1 %vm2794_vm0, %v2793_v11  ;;  %v787_v22 = vld [vmem:[#allocation2 + $0x12] sm:$0xff]  ;;  %v1692_v3 = vld [vmem:[#allocation2 + $0x1e] sm:$0xff] }
  0xb1   : > { %2429 = vmatprep.mubr.msk.bf16.mxu0 %vm2794_vm0, %v2793_v11  ;;  %v799_v23 = vpack.c.bf16 %v3151_v20, %v787_v22  ;;  %v1695_v15 = vld [vmem:[#allocation2 + $0x36] sm:$0xff] }
  0xb7   : > { %2296 = vmatmul.mubr.msk.bf16.gmra.mrb[16].mxu1 %vm492_vm1, %v549_v28  ;;  %v800_v28 = vpack.c.bf16 %v3162_v25, %v789_v27  ;;  %v1098_v25 = vld [vmem:[#allocation2 + $0x63] sm:$0xff] }
  0xb8   : > { %2430 = vmatmul.mubr.msk.bf16.vlgmr.msra.gmra.mrb[0].mxu0 %vm492_vm1, %v1251_v30  ;;  %2299 = vmatprep.mubr.msk.bf16.mxu1 %vm2794_vm0, %v2793_v11  ;;  %v3172_v30 = vld [vmem:[#allocation2 + $0x3a] sm:$0xff] }
  0xb9   : > { %2458 = vmatpush3.bf16.msra.mxu0 %v2777_v29  ;;  %2433 = vmatprep.mubr.msk.bf16.mxu0 %vm2794_vm0, %v2793_v11  ;;  %v1407_v29 = vpack.c.bf16 %v1250_v62, %v3095_v57  ;;  %v801_v33 = vpack.c.bf16 %v3172_v30, %v791_v32  ;;  %v950_v57 = vpack.c.bf16 %v789_v27, %v3151_v20  ;;  %v1550_v62 = vld [vmem:[#allocation2 + $0x65] sm:$0xff]  ;;  %v1702_v32 = vld [vmem:[#allocation2 + $0x6e] sm:$0xff] }
  0xba   : > { %2487 = vmatprep.subr.bf16.mxu0 %v2793_v11  ;;  %v1700_v27 = vld [vmem:[#allocation2 + $0x5e] sm:$0xff] }
  0xbf   : > { %2300 = vmatmul.mubr.msk.bf16.gmra.mrb[20].mxu1 %vm492_vm1, %v550_v35  ;;  %v3181_v35 = vld [vmem:[#allocation2 + $0x4a] sm:$0xff] }
  0xc0   : > { %2434 = vmatmul.mubr.msk.bf16.gmra.mrb[4].mxu0 %vm492_vm1, %v1252_v36  ;;  %2303 = vmatprep.mubr.msk.bf16.mxu1 %vm2794_vm0, %v2793_v11  ;;  %v1541_v36 = vld [vmem:[#allocation2 + $0x1d] sm:$0xff]  ;;  %v802_v38 = vpack.c.bf16 %v3181_v35, %v793_v37 }
  0xc1   : > { %2437 = vmatprep.mubr.msk.bf16.mxu0 %vm2794_vm0, %v2793_v11 }
  0xc7   : > { %2304 = vmatmul.mubr.msk.bf16.gmra.mrb[24].mxu1 %vm492_vm1, %v551_v40  ;;  %v2781_v40 = vld [vmem:[%s3450_s3 + $0x40] sm:$0xff]  }
  0xc8   : > { %2438 = vmatmul.mubr.msk.bf16.gmra.mrb[8].mxu0 %vm492_vm1, %v1253_v41  ;;  %2309 = vmatprep.mubr.msk.bf16.mxu1 %vm2794_vm0, %v2793_v11  ;;  %v1553_v41 = vpack.c.bf16 %v1541_v36, %v1540_v39  ;;  %v1703_v36 = vld [vmem:[#allocation2 + $0x76] sm:$0xff] }
  0xc9   : > { %2441 = vmatprep.mubr.msk.bf16.mxu0 %vm2794_vm0, %v2793_v11 }
  0xcf   : > { %2310 = vmatmul.mubr.msk.bf16.vlgmr.msra.gmra.mrb[0].mxu1 %vm492_vm1, %v523_v46  ;;  %v1542_v46 = vld [vmem:[#allocation2 + $0x25] sm:$0xff] }
  0xd0   : > { %2442 = vmatmul.mubr.msk.bf16.gmra.mrb[12].mxu0 %vm492_vm1, %v1254_v48  ;;  %2313 = vmatprep.mubr.msk.bf16.mxu1 %vm2794_vm0, %v2793_v11  ;;  %v797_v48 = vld [vmem:[#allocation2 + $0x62] sm:$0xff] }
  0xd1   : > { %2445 = vmatprep.mubr.msk.bf16.mxu0 %vm2794_vm0, %v2793_v11  ;;  %2338 = vmatpush3.bf16.msra.mxu1 %v2778_v47  ;;  %v1554_v47 = vpack.c.bf16 %v1543_v43, %v1542_v46  ;;  %v804_v50 = vpack.c.bf16 %v797_v48, %v797_v48  ;;  %v954_v7 = vpack.c.bf16 %v797_v48, %v3193_v42 }
  0xd2   : > { %2367 = vmatprep.subr.bf16.mxu1 %v2793_v11 }
  0xd7   : > { %2314 = vmatmul.mubr.msk.bf16.gmra.mrb[4].mxu1 %vm492_vm1, %v524_v53  ;;  %v1547_v53 = vld [vmem:[#allocation2 + $0x4d] sm:$0xff] }
  0xd8   : > { %2446 = vmatmul.mubr.msk.bf16.gmra.mrb[16].mxu0 %vm492_vm1, %v1255_v21  ;;  %2317 = vmatprep.mubr.msk.bf16.mxu1 %vm2794_vm0, %v2793_v11  ;;  %v949_v21 = vpack.c.bf16 %v787_v22, %v3138_v16  ;;  %v1556_v55 = vpack.c.bf16 %v1547_v53, %v1546_v54  ;;  %v1697_v22 = vld [vmem:[#allocation2 + $0x46] sm:$0xff] }
  0xd9   : > { %2449 = vmatprep.mubr.msk.bf16.mxu0 %vm2794_vm0, %v2793_v11 }
  0xdf   : > { %2318 = vmatmul.mubr.msk.bf16.gmra.mrb[8].mxu1 %vm492_vm1, %v525_v58  ;;  %v1548_v58 = vld [vmem:[#allocation2 + $0x55] sm:$0xff] }
  0xe0   : > { %2450 = vmatmul.mubr.msk.bf16.gmra.mrb[20].mxu0 %vm492_vm1, %v1256_v59  ;;  %2321 = vmatprep.mubr.msk.bf16.mxu1 %vm2794_vm0, %v2793_v11  ;;  %v1557_v59 = vpack.c.bf16 %v1549_v56, %v1548_v58 }
  0xe1   : > { %2453 = vmatprep.mubr.msk.bf16.mxu0 %vm2794_vm0, %v2793_v11 }
  0xe7   : > { %2322 = vmatmul.mubr.msk.bf16.gmra.mrb[12].mxu1 %vm492_vm1, %v526_v63  ;;  %v1552_v63 = vld [vmem:[#allocation2 + $0x75] sm:$0xff] }
  0xe8   : > { %2454 = vmatmul.mubr.msk.bf16.gmra.mrb[24].mxu0 %vm492_vm1, %v1257_v0  ;;  %2325 = vmatprep.mubr.msk.bf16.mxu1 %vm2794_vm0, %v2793_v11  ;;  %v952_v0 = vpack.c.bf16 %v793_v37, %v3172_v30  ;;  %v1559_v1 = vpack.c.bf16 %v1552_v63, %v1552_v63  ;;  %v1710_v37 = vpack.c.bf16 %v1703_v36, %v1703_v36 }
  0xe9   : > { %2459 = vmatprep.mubr.msk.bf16.mxu0 %vm2794_vm0, %v2793_v11 }
  0xef   : > { %2326 = vmatmul.mubr.msk.bf16.gmra.mrb[16].mxu1 %vm492_vm1, %v527_v4  ;;  %v953_v4 = vpack.c.bf16 %v795_v44, %v3181_v35 }
  0xf0   : > { %2460 = vmatmul.mubr.msk.bf16.vlgmr.msra.gmra.mrb[0].mxu0 %vm492_vm1, %v1402_v5  ;;  %2329 = vmatprep.mubr.msk.bf16.mxu1 %vm2794_vm0, %v2793_v11 }
  0xf1   : > { %2488 = vmatpush3.bf16.msra.mxu0 %v2779_v26  ;;  %2463 = vmatprep.mubr.msk.bf16.mxu0 %vm2794_vm0, %v2793_v11  ;;  %v1691_v26 = vld [vmem:[#allocation2 + $0x16] sm:$0xff] }
  0xf2   : > { %2517 = vmatprep.subr.bf16.mxu0 %v2793_v11  ;;  %v1704_v5 = vpack.c.bf16 %v1692_v3, %v1691_v26 }
  0xf7   : > { %2330 = vmatmul.mubr.msk.bf16.gmra.mrb[20].mxu1 %vm492_vm1, %v528_v8  ;;  %v1693_v8 = vld [vmem:[#allocation2 + $0x26] sm:$0xff] }
  0xf8   : > { %2464 = vmatmul.mubr.msk.bf16.gmra.mrb[4].mxu0 %vm492_vm1, %v1403_v9  ;;  %2333 = vmatprep.mubr.msk.bf16.mxu1 %vm2794_vm0, %v2793_v11  ;;  %v1705_v9 = vpack.c.bf16 %v1694_v6, %v1693_v8 }
  0xf9   : > { %2467 = vmatprep.mubr.msk.bf16.mxu0 %vm2794_vm0, %v2793_v11 }
  0xff   : > { %2334 = vmatmul.mubr.msk.bf16.gmra.mrb[24].mxu1 %vm492_vm1, %v529_v13  ;;  %v1696_v13 = vld [vmem:[#allocation2 + $0x3e] sm:$0xff] }
 0x100   : > { %2468 = vmatmul.mubr.msk.bf16.gmra.mrb[8].mxu0 %vm492_vm1, %v1404_v14  ;;  %2339 = vmatprep.mubr.msk.bf16.mxu1 %vm2794_vm0, %v2793_v11  ;;  %v955_v14 = vpack.c.bf16 %v948_v10, %v948_v10  ;;  %v1706_v16 = vpack.c.bf16 %v1696_v13, %v1695_v15 }
 0x101   : > { %2471 = vmatprep.mubr.msk.bf16.mxu0 %vm2794_vm0, %v2793_v11 }
 0x107   : > { %2340 = vmatmul.mubr.msk.bf16.vlgmr.msra.gmra.mrb[0].mxu1 %vm492_vm1, %v798_v17  ;;  %v1095_v17 = vld [vmem:[#allocation2 + $0x4b] sm:$0xff] }
 0x108   : > { %2472 = vmatmul.mubr.msk.bf16.gmra.mrb[12].mxu0 %vm492_vm1, %v1405_v19  ;;  %2343 = vmatprep.mubr.msk.bf16.mxu1 %vm2794_vm0, %v2793_v11  ;;  %v1698_v19 = vld [vmem:[#allocation2 + $0x4e] sm:$0xff] }
 0x109   : > { %2475 = vmatprep.mubr.msk.bf16.mxu0 %vm2794_vm0, %v2793_v11  ;;  %2368 = vmatpush3.bf16.msra.mxu1 %v2780_v18  ;;  %v1096_v18 = vld [vmem:[#allocation2 + $0x53] sm:$0xff] }
 0x10a   : > { %2547 = vmatprep.subr.bf16.mxu1 %v2793_v11  ;;  %v1104_v20 = vpack.c.bf16 %v1096_v18, %v1095_v17 }
 0x10f   : > { %2344 = vmatmul.mubr.msk.bf16.gmra.mrb[4].mxu1 %vm492_vm1, %v799_v23  ;;  %v1707_v23 = vpack.c.bf16 %v1698_v19, %v1697_v22 }
 0x110   : > { %2476 = vmatmul.mubr.msk.bf16.gmra.mrb[16].mxu0 %vm492_vm1, %v1406_v24  ;;  %2347 = vmatprep.mubr.msk.bf16.mxu1 %vm2794_vm0, %v2793_v11  ;;  %v1097_v24 = vld [vmem:[#allocation2 + $0x5b] sm:$0xff] }
 0x111   : > { %2479 = vmatprep.mubr.msk.bf16.mxu0 %vm2794_vm0, %v2793_v11 }
 0x117   : > { %2348 = vmatmul.mubr.msk.bf16.gmra.mrb[8].mxu1 %vm492_vm1, %v800_v28  ;;  %v1105_v28 = vpack.c.bf16 %v1098_v25, %v1097_v24 }
 0x118   : > { %2480 = vmatmul.mubr.msk.bf16.gmra.mrb[20].mxu0 %vm492_vm1, %v1407_v29  ;;  %2351 = vmatprep.mubr.msk.bf16.mxu1 %vm2794_vm0, %v2793_v11  ;;  %v1699_v29 = vld [vmem:[#allocation2 + $0x56] sm:$0xff] }
 0x119   : > { %2483 = vmatprep.mubr.msk.bf16.mxu0 %vm2794_vm0, %v2793_v11  ;;  %v1708_v30 = vpack.c.bf16 %v1700_v27, %v1699_v29 }
 0x11f   : > { %2352 = vmatmul.mubr.msk.bf16.gmra.mrb[12].mxu1 %vm492_vm1, %v801_v33  ;;  %v1106_v33 = vpack.c.bf16 %v1099_v31, %v1099_v31 }
 0x120   : > { %2484 = vmatmul.mubr.msk.bf16.gmra.mrb[24].mxu0 %vm492_vm1, %v1408_v34  ;;  %2355 = vmatprep.mubr.msk.bf16.mxu1 %vm2794_vm0, %v2793_v11  ;;  %v1701_v34 = vld [vmem:[#allocation2 + $0x66] sm:$0xff] }
 0x121   : > { %2489 = vmatprep.mubr.msk.bf16.mxu0 %vm2794_vm0, %v2793_v11  ;;  %v1709_v35 = vpack.c.bf16 %v1702_v32, %v1701_v34 }
 0x127   : > { %2356 = vmatmul.mubr.msk.bf16.gmra.mrb[16].mxu1 %vm492_vm1, %v802_v38 }
 0x128   : > { %2490 = vmatmul.mubr.msk.bf16.vlgmr.msra.gmra.mrb[0].mxu0 %vm492_vm1, %v1553_v41  ;;  %2359 = vmatprep.mubr.msk.bf16.mxu1 %vm2794_vm0, %v2793_v11 }
 0x129   : > { %2518 = vmatpush3.bf16.msra.mxu0 %v2781_v40  ;;  %2493 = vmatprep.mubr.msk.bf16.mxu0 %vm2794_vm0, %v2793_v11 }
 0x12f   : > { %2360 = vmatmul.mubr.msk.bf16.gmra.mrb[20].mxu1 %vm492_vm1, %v803_v45 }
 0x130   : > { %2494 = vmatmul.mubr.msk.bf16.gmra.mrb[4].mxu0 %vm492_vm1, %v1554_v47  ;;  %2363 = vmatprep.mubr.msk.bf16.mxu1 %vm2794_vm0, %v2793_v11 }
 0x131   : > { %2497 = vmatprep.mubr.msk.bf16.mxu0 %vm2794_vm0, %v2793_v11 }
 0x137   : > { %2364 = vmatmul.mubr.msk.bf16.gmra.mrb[24].mxu1 %vm492_vm1, %v804_v50 }
 0x138   : > { %2498 = vmatmul.mubr.msk.bf16.gmra.mrb[8].mxu0 %vm492_vm1, %v1555_v52  ;;  %2369 = vmatprep.mubr.msk.bf16.mxu1 %vm2794_vm0, %v2793_v11 }
 0x139   : > { %2501 = vmatprep.mubr.msk.bf16.mxu0 %vm2794_vm0, %v2793_v11 }
 0x13f   : > { %2370 = vmatmul.mubr.msk.bf16.vlgmr.msra.gmra.mrb[0].mxu1 %vm492_vm1, %v949_v21 }
 0x140   : > { %2502 = vmatmul.mubr.msk.bf16.gmra.mrb[12].mxu0 %vm492_vm1, %v1556_v55  ;;  %2373 = vmatprep.mubr.msk.bf16.mxu1 %vm2794_vm0, %v2793_v11 }
 0x141   : > { %2505 = vmatprep.mubr.msk.bf16.mxu0 %vm2794_vm0, %v2793_v11  ;;  %2548 = vmatpush3.bf16.msra.mxu1 %v2888_v12  ;;  %v1558_v12 = vpack.c.bf16 %v1551_v60, %v1550_v62 }
 0x147   : > { %2374 = vmatmul.mubr.msk.bf16.gmra.mrb[4].mxu1 %vm492_vm1, %v950_v57 }
 0x148   : > { %2506 = vmatmul.mubr.msk.bf16.gmra.mrb[16].mxu0 %vm492_vm1, %v1557_v59  ;;  %2377 = vmatprep.mubr.msk.bf16.mxu1 %vm2794_vm0, %v2793_v11 }
 0x149   : > { %2509 = vmatprep.mubr.msk.bf16.mxu0 %vm2794_vm0, %v2793_v11 }
 0x14f   : > { %2378 = vmatmul.mubr.msk.bf16.gmra.mrb[8].mxu1 %vm492_vm1, %v951_v61 }
 0x150   : > { %2510 = vmatmul.mubr.msk.bf16.gmra.mrb[20].mxu0 %vm492_vm1, %v1558_v12  ;;  %2381 = vmatprep.mubr.msk.bf16.mxu1 %vm2794_vm0, %v2793_v11 }
 0x151   : > { %2513 = vmatprep.mubr.msk.bf16.mxu0 %vm2794_vm0, %v2793_v11 }
 0x157   : > { %2382 = vmatmul.mubr.msk.bf16.gmra.mrb[12].mxu1 %vm492_vm1, %v952_v0 }
 0x158   : > { %2514 = vmatmul.mubr.msk.bf16.gmra.mrb[24].mxu0 %vm492_vm1, %v1559_v1  ;;  %2385 = vmatprep.mubr.msk.bf16.mxu1 %vm2794_vm0, %v2793_v11 }
 0x159   : > { %2519 = vmatprep.mubr.msk.bf16.mxu0 %vm2794_vm0, %v2793_v11 }
 0x15f   : > { %2386 = vmatmul.mubr.msk.bf16.gmra.mrb[16].mxu1 %vm492_vm1, %v953_v4 }
 0x160   : > { %2520 = vmatmul.mubr.msk.bf16.vlgmr.msra.gmra.mrb[0].mxu0 %vm492_vm1, %v1704_v5  ;;  %2389 = vmatprep.mubr.msk.bf16.mxu1 %vm2794_vm0, %v2793_v11 }
 0x161   : > { %2523 = vmatprep.mubr.msk.bf16.mxu0 %vm2794_vm0, %v2793_v11 }
 0x167   : > { %2390 = vmatmul.mubr.msk.bf16.gmra.mrb[20].mxu1 %vm492_vm1, %v954_v7 }
 0x168   : > { %2524 = vmatmul.mubr.msk.bf16.gmra.mrb[4].mxu0 %vm492_vm1, %v1705_v9  ;;  %2393 = vmatprep.mubr.msk.bf16.mxu1 %vm2794_vm0, %v2793_v11 }
 0x169   : > { %2527 = vmatprep.mubr.msk.bf16.mxu0 %vm2794_vm0, %v2793_v11 }
 0x16f   : > { %2394 = vmatmul.mubr.msk.bf16.gmra.mrb[24].mxu1 %vm492_vm1, %v955_v14 }
 0x170   : > { %2528 = vmatmul.mubr.msk.bf16.gmra.mrb[8].mxu0 %vm492_vm1, %v1706_v16  ;;  %2415 = vmatprep.mubr.msk.bf16.mxu1 %vm2794_vm0, %v2793_v11 }
 0x171   : > { %2531 = vmatprep.mubr.msk.bf16.mxu0 %vm2794_vm0, %v2793_v11 }
 0x177   : > { %2416 = vmatmul.mubr.msk.bf16.vlgmr.msra.gmra.mrb[16].mxu1 %vm492_vm1, %v1104_v20 }
 0x178   : > { %2532 = vmatmul.mubr.msk.bf16.gmra.mrb[12].mxu0 %vm492_vm1, %v1707_v23  ;;  %2419 = vmatprep.mubr.msk.bf16.mxu1 %vm2794_vm0, %v2793_v11 }
 0x179   : > { %2535 = vmatprep.mubr.msk.bf16.mxu0 %vm2794_vm0, %v2793_v11 }
 0x17f   : > { %2420 = vmatmul.mubr.msk.bf16.gmra.mrb[20].mxu1 %vm492_vm1, %v1105_v28 }
 0x180   : > { %2536 = vmatmul.mubr.msk.bf16.gmra.mrb[16].mxu0 %vm492_vm1, %v1708_v30  ;;  %2423 = vmatprep.mubr.msk.bf16.mxu1 %vm2794_vm0, %v2793_v11 }
 0x181   : > { %2539 = vmatprep.mubr.msk.bf16.mxu0 %vm2794_vm0, %v2793_v11 }
 0x187   : > { %2424 = vmatmul.mubr.msk.bf16.gmra.mrb[24].mxu1 %vm492_vm1, %v1106_v33 }
 0x188   : > { %2540 = vmatmul.mubr.msk.bf16.gmra.mrb[20].mxu0 %vm492_vm1, %v1709_v35 }
 0x189   : > { %2543 = vmatprep.mubr.msk.bf16.mxu0 %vm2794_vm0, %v2793_v11 }
 0x190   : > { %2544 = vmatmul.mubr.msk.bf16.gmra.mrb[24].mxu0 %vm492_vm1, %v1710_v37 }
 0x212   : > { %v1020_v38 = vpop.f32.mrb[0].mxu1 }
 0x213   : > { %v2371_v39 = vpop.f32.mrb[1].mxu1 }
 0x214   : > { %v1023_v40 = vpop.f32.mrb[2].mxu1 }
 0x215   : > { %v2372_v41 = vpop.f32.mrb[3].mxu1 }
 0x21a   : > { %v1028_v42 = vpop.f32.mrb[4].mxu1 }
 0x21b   : > { %v2375_v43 = vpop.f32.mrb[5].mxu1 }
 0x21c   : > { %v1031_v44 = vpop.f32.mrb[6].mxu1 }
 0x21d   : > { %v2376_v45 = vpop.f32.mrb[7].mxu1 }
 0x222   : > { %v1036_v46 = vpop.f32.mrb[8].mxu1 }
 0x223   : > { %v2379_v47 = vpop.f32.mrb[9].mxu1 }
 0x224   : > { %v1039_v48 = vpop.f32.mrb[10].mxu1 }
 0x225   : > { %v2380_v49 = vpop.f32.mrb[11].mxu1 }
 0x22a   : > { %v1044_v50 = vpop.f32.mrb[12].mxu1 }
 0x22b   : > { %v2383_v51 = vpop.f32.mrb[13].mxu1 }
 0x22c   : > { %v1047_v11 = vpop.f32.mrb[14].mxu1 }
 0x22d   : > { %v2384_v52 = vpop.f32.mrb[15].mxu1 }
 0x233   : > { %v1775_v53 = vpop.f32.mrb[0].mxu0 }
 0x234   : > { %v3280_v21 = vadd.f32 %v1775_v53, %v1020_v38  ;;  %v2521_v54 = vpop.f32.mrb[1].mxu0 }
 0x235   : > { %v1778_v55 = vpop.f32.mrb[2].mxu0 }
 0x236   : > { %1843 = vst.msk [vmem:[%s3278_s10] sm:$0xff] %vm1842_vm3, %v3280_v21  ;;  %v3285_v56 = vadd.f32 %v1778_v55, %v1023_v40  ;;  %v2522_v57 = vpop.f32.mrb[3].mxu0 }
 0x238   : > { %1844 = vst.msk [vmem:[%s3278_s10 + $0x8] sm:$0xff] %vm1842_vm3, %v3285_v56 }
 0x23b   : > { %v1783_v58 = vpop.f32.mrb[4].mxu0 }
 0x23c   : > { %v3290_v59 = vadd.f32 %v1783_v58, %v1028_v42  ;;  %v2525_v60 = vpop.f32.mrb[5].mxu0 }
 0x23d   : > { %v1786_v61 = vpop.f32.mrb[6].mxu0 }
 0x23e   : > { %1845 = vst.msk [vmem:[%s3278_s10 + $0x10] sm:$0xff] %vm1842_vm3, %v3290_v59  ;;  %v3295_v62 = vadd.f32 %v1786_v61, %v1031_v44  ;;  %v2526_v12 = vpop.f32.mrb[7].mxu0  ;;  %v2795_v44 = vmov (!%p2201_p4), 0.0  }
 0x23f   : > { %1861 = vst.msk [vmem:[%s3454_s7] sm:$0x1] (!%p2201_p4), %vm1860_vm4, %v2795_v44  ;;  %1862 = vst.msk [vmem:[%s3455_s8] sm:$0x1] (!%p2201_p4), %vm1860_vm4, %v2795_v44 }
 0x240   : > { %1846 = vst.msk [vmem:[%s3278_s10 + $0x18] sm:$0xff] %vm1842_vm3, %v3295_v62 }
 0x243   : > { %v1791_v63 = vpop.f32.mrb[8].mxu0 }
 0x244   : > { %v3300_v0 = vadd.f32 %v1791_v63, %v1036_v46  ;;  %v2529_v1 = vpop.f32.mrb[9].mxu0 }
 0x245   : > { %v1794_v3 = vpop.f32.mrb[10].mxu0 }
 0x246   : > { %1847 = vst.msk [vmem:[%s3278_s10 + $0x20] sm:$0xff] %vm1842_vm3, %v3300_v0  ;;  %v3305_v4 = vadd.f32 %v1794_v3, %v1039_v48  ;;  %v2530_v26 = vpop.f32.mrb[11].mxu0 }
 0x248   : > { %1848 = vst.msk [vmem:[%s3278_s10 + $0x28] sm:$0xff] %vm1842_vm3, %v3305_v4 }
 0x24a   : > { %v1203_v5 = vpop.f32.mrb[16].mxu1 }
 0x24b   : > { %v1799_v6 = vpop.f32.mrb[12].mxu0  ;;  %v2417_v7 = vpop.f32.mrb[17].mxu1 }
 0x24c   : > { %v3310_v8 = vadd.f32 %v1799_v6, %v1044_v50  ;;  %v2533_v9 = vpop.f32.mrb[13].mxu0  ;;  %v1206_v10 = vpop.f32.mrb[18].mxu1 }
 0x24d   : > { %v1802_v13 = vpop.f32.mrb[14].mxu0  ;;  %v2418_v14 = vpop.f32.mrb[19].mxu1 }
 0x24e   : > { %1849 = vst.msk [vmem:[%s3278_s10 + $0x30] sm:$0xff] %vm1842_vm3, %v3310_v8  ;;  %v3315_v15 = vadd.f32 %v1802_v13, %v1047_v11  ;;  %v2534_v16 = vpop.f32.mrb[15].mxu0 }
 0x250   : > { %1850 = vst.msk [vmem:[%s3278_s10 + $0x38] sm:$0xff] %vm1842_vm3, %v3315_v15 }
 0x252   : > { %v1211_v17 = vpop.f32.mrb[20].mxu1 }
 0x253   : > { %v1807_v18 = vpop.f32.mrb[16].mxu0  ;;  %v2421_v19 = vpop.f32.mrb[21].mxu1 }
 0x254   : > { %v3320_v20 = vadd.f32 %v1807_v18, %v1203_v5  ;;  %v2537_v22 = vpop.f32.mrb[17].mxu0  ;;  %v1214_v23 = vpop.f32.mrb[22].mxu1 }
 0x255   : > { %v1810_v24 = vpop.f32.mrb[18].mxu0  ;;  %v2422_v25 = vpop.f32.mrb[23].mxu1 }
 0x256   : > { %1851 = vst.msk [vmem:[%s3278_s10 + $0x40] sm:$0xff] %vm1842_vm3, %v3320_v20  ;;  %v3325_v27 = vadd.f32 %v1810_v24, %v1206_v10  ;;  %v2538_v28 = vpop.f32.mrb[19].mxu0 }
 0x258   : > { %1852 = vst.msk [vmem:[%s3278_s10 + $0x48] sm:$0xff] %vm1842_vm3, %v3325_v27 }
 0x25a   : > { %v1219_v29 = vpop.f32.mrb[24].mxu1 }
 0x25b   : > { %v1815_v30 = vpop.f32.mrb[20].mxu0  ;;  %v2425_v31 = vpop.f32.mrb[25].mxu1 }
 0x25c   : > { %v3330_v32 = vadd.f32 %v1815_v30, %v1211_v17  ;;  %v2541_v33 = vpop.f32.mrb[21].mxu0  ;;  %v1222_v34 = vpop.f32.mrb[26].mxu1 }
 0x25d   : > { %v1818_v35 = vpop.f32.mrb[22].mxu0  ;;  %v2426_v36 = vpop.f32.mrb[27].mxu1 }
 0x25e   : > { %1853 = vst.msk [vmem:[%s3278_s10 + $0x50] sm:$0xff] %vm1842_vm3, %v3330_v32  ;;  %v3335_v37 = vadd.f32 %v1818_v35, %v1214_v23  ;;  %v2542_v38 = vpop.f32.mrb[23].mxu0 }
 0x260   : > { %1854 = vst.msk [vmem:[%s3278_s10 + $0x58] sm:$0xff] %vm1842_vm3, %v3335_v37  ;;  %1859 = sbr.rel (%p2201_p4) target bundleno = 615 (0x267), region = 48 }
 0x263   : > { %v1823_v39 = vpop.f32.mrb[24].mxu0 }
 0x264   : > { %v3340_v40 = vadd.f32 %v1823_v39, %v1219_v29  ;;  %v2545_v41 = vpop.f32.mrb[25].mxu0 }
 0x265   : > { %v1826_v42 = vpop.f32.mrb[26].mxu0 }
 0x266   : > { %1855 = vst.msk [vmem:[%s3278_s10 + $0x60] sm:$0xff] %vm1842_vm3, %v3340_v40  ;;  %v2546_v43 = vpop.f32.mrb[27].mxu0 }
 0x267 PF: > { %2783 = vset.pattern.permute.xlu1 %v2792_v2  ;;  %2782 = vset.pattern.permute.xlu0 %v2792_v2  ;;  %v1865_v45 = vld [vmem:[%s3452_s5 + $0x10] sm:$0xff]  ;;  %v1863_v46 = vld [vmem:[%s3452_s5] sm:$0xff]  ;;  %v1866_v47 = vld [vmem:[%s3452_s5 + $0x18] sm:$0xff]  ;;  %vm1987_vm5 = vcmask 57344  }
 0x268   : > { %1888 = vperm.xlu1 %2783, %v1865_v45   ;;  %1878 = vperm.xlu0 %2782, %v1863_v46   ;;  %v1864_v48 = vld [vmem:[%s3452_s5 + $0x8] sm:$0xff]  ;;  %v1867_v49 = vld [vmem:[%s3452_s5 + $0x20] sm:$0xff]  ;;  %v1870_v50 = vld [vmem:[%s3452_s5 + $0x38] sm:$0xff] }
 0x269   : > { %v1868_v2 = vld [vmem:[%s3452_s5 + $0x28] sm:$0xff]  ;;  %v1869_v51 = vld [vmem:[%s3452_s5 + $0x30] sm:$0xff]  ;;  %v1871_v52 = vld [vmem:[%s3452_s5 + $0x40] sm:$0xff] }
 0x26a   : > { %v1872_v11 = vld [vmem:[%s3452_s5 + $0x48] sm:$0xff]  ;;  %v1874_v53 = vld [vmem:[%s3452_s5 + $0x58] sm:$0xff]  ;;  %v1873_v54 = vld [vmem:[%s3452_s5 + $0x50] sm:$0xff] }
 0x26b   : > { %v1875_v55 = vld [vmem:[%s3452_s5 + $0x60] sm:$0xff] }
 0x26c   : > { %1893 = vperm.xlu1 %2783, %v1866_v47   ;;  %1883 = vperm.xlu0 %2782, %v1864_v48  }
 0x270   : > { %1903 = vperm.xlu1 %2783, %v1868_v2   ;;  %1898 = vperm.xlu0 %2782, %v1867_v49  }
 0x274   : > { %1913 = vperm.xlu1 %2783, %v1870_v50   ;;  %1908 = vperm.xlu0 %2782, %v1869_v51  }
 0x278   : > { %1923 = vperm.xlu1 %2783, %v1872_v11   ;;  %1918 = vperm.xlu0 %2782, %v1871_v52  }
 0x27c   : > { %1933 = vperm.xlu1 %2783, %v1874_v53   ;;  %1928 = vperm.xlu0 %2782, %v1873_v54  }
 0x280   : > { %1938 = vperm.xlu0 %2782, %v1875_v55  }
 0x2e7   : > { %v1889_v57 = vpop.permute.xlu1 %1888  ;;  %v1879_v58 = vpop.permute.xlu0 %1878 }
 0x2e8   : > { %v1941_v60 = vmul.f32 %v3280_v21, %v1879_v58  ;;  %v1943_v61 = vmul.f32 %v3290_v59, %v1889_v57 }
 0x2ea   : > { %v1990_v1 = vmul.f32 %v1941_v60, %v1941_v60  ;;  %v1992_v5 = vmul.f32 %v1943_v61, %v1943_v61  ;;  %v1955_v6 = vsel %vm1842_vm3, %v1941_v60, 0.0  ;;  %v1958_v10 = vsel %vm1842_vm3, %v1943_v61, 0.0 }
 0x2eb   : > { %v1894_v12 = vpop.permute.xlu1 %1893  ;;  %v1884_v63 = vpop.permute.xlu0 %1883 }
 0x2ec   : > { %v1944_v3 = vmul.f32 %v3295_v62, %v1894_v12  ;;  %v1942_v26 = vmul.f32 %v3285_v56, %v1884_v63  ;;  %v2003_v59 = vsel %vm1842_vm3, %v1990_v1, 0.0  ;;  %v2006_v22 = vsel %vm1842_vm3, %v1992_v5, 0.0 }
 0x2ee   : > { %v1956_v7 = vsel %vm1842_vm3, %v1942_v26, 0.0  ;;  %v1991_v9 = vmul.f32 %v1942_v26, %v1942_v26  ;;  %v1993_v13 = vmul.f32 %v1944_v3, %v1944_v3  ;;  %v1960_v23 = vsel %vm1842_vm3, %v1944_v3, 0.0 }
 0x2ef   : > { %v1957_v14 = vadd.f32 %v1956_v7, %v1955_v6  ;;  %v1904_v21 = vpop.permute.xlu1 %1903  ;;  %v1899_v16 = vpop.permute.xlu0 %1898 }
 0x2f0   : > { %v2004_v17 = vsel %vm1842_vm3, %v1991_v9, 0.0  ;;  %v1946_v62 = vmul.f32 %v3305_v4, %v1904_v21  ;;  %v1945_v56 = vmul.f32 %v3300_v0, %v1899_v16  ;;  %v2008_v25 = vsel %vm1842_vm3, %v1993_v13, 0.0 }
 0x2f1   : > { %v1959_v18 = vadd.f32 %v1958_v10, %v1957_v14  ;;  %v2005_v19 = vadd.f32 %v2004_v17, %v2003_v59 }
 0x2f2   : > { %v1994_v24 = vmul.f32 %v1945_v56, %v1945_v56  ;;  %v1995_v33 = vmul.f32 %v1946_v62, %v1946_v62  ;;  %v1962_v34 = vsel %vm1842_vm3, %v1945_v56, 0.0  ;;  %v1964_v38 = vsel %vm1842_vm3, %v1946_v62, 0.0 }
 0x2f3   : > { %v2007_v28 = vadd.f32 %v2006_v22, %v2005_v19  ;;  %v1961_v29 = vadd.f32 %v1960_v23, %v1959_v18  ;;  %v1914_v30 = vpop.permute.xlu1 %1913  ;;  %v1909_v31 = vpop.permute.xlu0 %1908 }
 0x2f4   : > { %v1948_v4 = vmul.f32 %v3315_v15, %v1914_v30  ;;  %v1947_v0 = vmul.f32 %v3310_v8, %v1909_v31  ;;  %v2010_v39 = vsel %vm1842_vm3, %v1994_v24, 0.0  ;;  %v2012_v47 = vsel %vm1842_vm3, %v1995_v33, 0.0 }
 0x2f5   : > { %v2009_v35 = vadd.f32 %v2008_v25, %v2007_v28  ;;  %v1963_v36 = vadd.f32 %v1962_v34, %v1961_v29 }
 0x2f6   : > { %v1996_v41 = vmul.f32 %v1947_v0, %v1947_v0  ;;  %v1997_v43 = vmul.f32 %v1948_v4, %v1948_v4  ;;  %v1966_v48 = vsel %vm1842_vm3, %v1947_v0, 0.0  ;;  %v1968_v50 = vsel %vm1842_vm3, %v1948_v4, 0.0  ;;  %v1954_v4 = vld [vmem:[%s3454_s7] sm:$0x1] }
 0x2f7   : > { %v2011_v42 = vadd.f32 %v2010_v39, %v2009_v35  ;;  %v1965_v44 = vadd.f32 %v1964_v38, %v1963_v36  ;;  %v1924_v45 = vpop.permute.xlu1 %1923  ;;  %v1919_v46 = vpop.permute.xlu0 %1918  ;;  %v1989_v36 = vld [vmem:[%s3455_s8] sm:$0x1] }
 0x2f8   : > { %v1950_v15 = vmul.f32 %v3325_v27, %v1924_v45  ;;  %v1949_v8 = vmul.f32 %v3320_v20, %v1919_v46  ;;  %v2014_v51 = vsel %vm1842_vm3, %v1996_v41, 0.0  ;;  %v2016_v52 = vsel %vm1842_vm3, %v1997_v43, 0.0 }
 0x2f9   : > { %v2013_v2 = vadd.f32 %v2012_v47, %v2011_v42  ;;  %v1967_v49 = vadd.f32 %v1966_v48, %v1965_v44 }
 0x2fa   : > { %v1998_v11 = vmul.f32 %v1949_v8, %v1949_v8  ;;  %v1999_v58 = vmul.f32 %v1950_v15, %v1950_v15  ;;  %v1970_v60 = vsel %vm1842_vm3, %v1949_v8, 0.0  ;;  %v1972_v63 = vsel %vm1842_vm3, %v1950_v15, 0.0 }
 0x2fb   : > { %v2015_v53 = vadd.f32 %v2014_v51, %v2013_v2  ;;  %v1969_v54 = vadd.f32 %v1968_v50, %v1967_v49  ;;  %v1934_v55 = vpop.permute.xlu1 %1933  ;;  %v1929_v57 = vpop.permute.xlu0 %1928 }
 0x2fc   : > { %v1952_v27 = vmul.f32 %v3335_v37, %v1934_v55  ;;  %v1951_v20 = vmul.f32 %v3330_v32, %v1929_v57  ;;  %v2018_v1 = vsel %vm1842_vm3, %v1998_v11, 0.0  ;;  %v2020_v7 = vsel %vm1842_vm3, %v1999_v58, 0.0 }
 0x2fd   : > { %v2017_v61 = vadd.f32 %v2016_v52, %v2015_v53  ;;  %v1971_v12 = vadd.f32 %v1970_v60, %v1969_v54 }
 0x2fe   : > { %v2000_v3 = vmul.f32 %v1951_v20, %v1951_v20  ;;  %v2001_v9 = vmul.f32 %v1952_v27, %v1952_v27  ;;  %v1974_v10 = vsel %vm1842_vm3, %v1951_v20, 0.0  ;;  %v1976_v32 = vsel %vm1842_vm3, %v1952_v27, 0.0 }
 0x2ff   : > { %v2019_v26 = vadd.f32 %v2018_v1, %v2017_v61  ;;  %v1973_v5 = vadd.f32 %v1972_v63, %v1971_v12  ;;  %v1939_v6 = vpop.permute.xlu0 %1938 }
 0x300   : > { %v1953_v13 = vmul.f32 %v3340_v40, %v1939_v6  ;;  %v2022_v21 = vsel %vm1842_vm3, %v2000_v3, 0.0  ;;  %v2024_v62 = vsel %vm1842_vm3, %v2001_v9, 0.0 }
 0x301   : > { %v2021_v37 = vadd.f32 %v2020_v7, %v2019_v26  ;;  %v1975_v14 = vadd.f32 %v1974_v10, %v1973_v5 }
 0x302   : > { %v2002_v16 = vmul.f32 %v1953_v13, %v1953_v13  ;;  %v1978_v56 = vsel %vm1842_vm3, %v1953_v13, 0.0 }
 0x303   : > { %v2023_v59 = vadd.f32 %v2022_v21, %v2021_v37  ;;  %v1977_v17 = vadd.f32 %v1976_v32, %v1975_v14 }
 0x304   : > { %v2026_v22 = vsel %vm1842_vm3, %v2002_v16, 0.0 }
 0x305   : > { %v2025_v18 = vadd.f32 %v2024_v62, %v2023_v59  ;;  %v1979_v19 = vadd.f32 %v1978_v56, %v1977_v17 }
 0x307   : > { %v1980_v23 = vrot.slane %v1979_v19, 4  ;;  %v2027_v24 = vadd.f32 %v2026_v22, %v2025_v18 }
 0x309   : > { %v1981_v40 = vadd.f32 %v1980_v23, %v1979_v19  ;;  %v2028_v25 = vrot.slane %v2027_v24, 4 }
 0x30b   : > { %v1982_v28 = vrot.slane %v1981_v40, 2  ;;  %v2029_v29 = vadd.f32 %v2028_v25, %v2027_v24 }
 0x30d   : > { %v1983_v30 = vadd.f32 %v1982_v28, %v1981_v40  ;;  %v2030_v31 = vrot.slane %v2029_v29, 2 }
 0x30f   : > { %v1984_v33 = vrot.slane %v1983_v30, 1  ;;  %v2031_v34 = vadd.f32 %v2030_v31, %v2029_v29 }
 0x311   : > { %v1985_v0 = vadd.f32 %v1984_v33, %v1983_v30  ;;  %v2032_v35 = vrot.slane %v2031_v34, 1 }
 0x313   : > { %v1986_v38 = vadd.f32 %v1985_v0, %v1954_v4  ;;  %v2033_v39 = vadd.f32 %v2032_v35, %v2031_v34 }
 0x315   : > { %1988 = vst.msk [vmem:[%s3454_s7] sm:$0x1] %vm1987_vm5, %v1986_v38  ;;  %v2034_v41 = vadd.f32 %v2033_v39, %v1989_v36 }
 0x317   : > { %2035 = vst.msk [vmem:[%s3455_s8] sm:$0x1] %vm1987_vm5, %v2034_v41 }
 0x318 PF: > { %s19_s27 = sadd.s32 1, %s2790_s27  }
 0x319   : > { %p16_p5 = scmp.ge.s32.totalorder %s19_s27, 4  }
 0x31b   :  { %18 = sbr.rel (!%p16_p5) target bundleno = 1 (0x1), region = 102 }

// kernel: densenet_forward.20
= control target key start
LH: loop header
LB: loop body
LE: loop exit
PB: predicated region body
PF: predicated region fallthrough
CT: control target
= control target key end

     0   :  { %s767_s24 = smov 0   ;;  %s769_s25 = smov 0   ;;  %s866_s0 = inlined_call_operand.vmem [shape: f32[2,8,8,32], index: 0, kind: input, shape index: {}]   ;;  %s867_s1 = inlined_call_operand.vmem [shape: f32[1,32], index: 1, kind: input, shape index: {}]   ;;  %s868_s2 = inlined_call_operand.vmem [shape: f32[1,32], index: 2, kind: input, shape index: {}]   ;;  %s869_s3 = inlined_call_operand.vmem [shape: f32[4,8], index: 3, kind: input, shape index: {}]   ;;  %s870_s4 = inlined_call_operand.vmem [shape: bf16[32,16], index: 4, kind: input, shape index: {}]   ;;  %s871_s5 = inlined_call_operand.vmem [shape: f32[2,4,4,16], index: 5, kind: output, shape index: {0}]   ;;  %s872_s6 = inlined_call_operand.vmem [shape: f32[1,16], index: 6, kind: output, shape index: {1}]   ;;  %s873_s7 = inlined_call_operand.vmem [shape: f32[1,16], index: 7, kind: output, shape index: {2}]  }
   0x1   :  { %s771_s26 = smov 0   ;;  %s773_s27 = smov 0  }
   0x2   :  { %s775_s28 = smov 0  }
   0x3 LB: > { %s27_s29 = sadd.s32 1, %s714_s26  ;;  %s30_s30 = sadd.s32 1, %s718_s27  ;;  %s722_s28 = sphi %s775_s28, %s18_s28   ;;  %s718_s27 = sphi %s773_s27, %s877_s27   ;;  %s714_s26 = sphi %s771_s26, %s876_s26   ;;  %s710_s25 = sphi %s769_s25, %s875_s25   ;;  %s706_s24 = sphi %s767_s24, %s874_s24  }
   0x4   : > { %p28_p0 = scmp.ge.s32.totalorder %s27_s29, 4  ;;  %p606_p1 = scmp.ge.s32.totalorder %s722_s28, 1 }
   0x5   : > { %p253_p2 = scmp.lt.s32.totalorder %s722_s28, 9 }
   0x6   : > { %s879_s29 = smov (%p28_p0, %s27_s29), 0  ;;  %s881_s30 = smov (!%p28_p0, %s30_s30), %s718_s27 }
   0x7   : > { %p254_p3 = pnand %p606_p1, %p253_p2  ;;  %p32_p4 = scmp.ge.s32.totalorder %s881_s30, 2 }
   0x8   : > { %s607_s8 = sshll.u32 (!%p254_p3), %s706_s24, 1  ;;  %p293_p5 = scmp.lt.s32.totalorder (!%p254_p3), %s710_s25, 1  ;;  %v724_v0 = vmov (!%p254_p3), 0.0   ;;  %vm725_vm0 = vmmov (!%p254_p3), 0   ;;  %v682_v1 = vld [vmem:[%s870_s4] sm:$0xff] (!%p254_p3)   ;;  %vm336_vm1 = vcmask (!%p254_p3), 64512  }
   0x9   : > { %s883_s30 = smov (%p32_p4, %s881_s30), 0  ;;  %257 = sbr.rel (%p254_p3) target bundleno = 479 (0x1df), region = 40 }
   0xa   : > { %626 = vmatprep.subr.mxu0 (!%p254_p3), %v724_v0  ;;  %p295_p6 = scmp.lt.s32.totalorder (!%p254_p3), %s607_s8, 7  ;;  %628 = vmatprep.mubr.msk.f32.mxu0 (!%p254_p3), %vm725_vm0, %v724_v0  ;;  %v612_v2 = vld [vmem:[%s867_s1] ss:$0 sm:$0xff] (!%p254_p3)  ;;  %v683_v14 = vld [vmem:[%s870_s4 + $0x8] sm:$0xff] (!%p254_p3)   ;;  %vm427_vm2 = vcmask (!%p254_p3), 261120   ;;  %p473_p7 = scmp.eq.s32.totalorder (!%p254_p3), %s710_s25, 0 }
   0xb   : > { %631 = vmatprep.subr.bf16.mxu1 (!%p254_p3), %v724_v0  ;;  %635 = vmatprep.mubr.msk.bf16.mxu1 (!%p254_p3), %vm725_vm0, %v724_v0  ;;  %v613_v4 = vld [vmem:[%s868_s2] ss:$0 sm:$0xff] (!%p254_p3)  ;;  %p474_p8 = scmp.eq.s32.totalorder (!%p254_p3), %s706_s24, 0  ;;  %p304_p10 = scmp.lt.s32.totalorder (!%p254_p3), %s706_s24, 3  ;;  %vm471_vm3 = vcmask (!%p254_p3), 125952  }
   0xc   : > { %632 = vmatpush3.bf16.msra.mxu1 (!%p254_p3), %v682_v1  ;;  %v334_v13 = vld [vmem:[%s869_s3] sm:$0xf] (!%p254_p3) }
   0xd   : > { %633 = vmatprep.subr.bf16.mxu1 (!%p254_p3), %v724_v0  ;;  %p475_p9 = pnand (!%p254_p3), %p474_p8, %p473_p7 }
  0x10   : > { %s804_s9 = scalar_select %p293_p5, %s710_s25, 1  ;;  %634 = vmatpush3.bf16.msra.mxu1 %v683_v14 }
  0x11   : > { %s885_s8 = smov (!%p295_p6, %s607_s8), 7  ;;  %s887_s24 = smov (!%p304_p10, %s706_s24), 3 }
  0x12   : > { %s608_s12 = sshll.u32 %s804_s9, 3  ;;  %s610_s11 = sshll.u32 %s804_s9, 2  ;;  %vm479_vm4 = vcmask (!%p475_p9), 122880   ;;  %v726_v22 = vmov (!%p475_p9), 0.0  }
  0x13   : > { %s298_s13 = sadd.s32 %s608_s12, %s885_s8  ;;  %s307_s12 = sadd.s32 %s610_s11, %s887_s24  ;;  %480 = vst.msk [vmem:[%s872_s6] sm:$0x1] (!%p475_p9), %vm479_vm4, %v726_v22  ;;  %481 = vst.msk [vmem:[%s873_s7] sm:$0x1] (!%p475_p9), %vm479_vm4, %v726_v22 }
  0x14   : > { %s609_s14 = sshll.u32 %s298_s13, 3  ;;  %s611_s13 = sshll.u32 %s307_s12, 2 }
  0x15   : > { %s300_s19 = scalar_lea.vmem %s866_s0, %s609_s14  ;;  %s309_s16 = scalar_lea.vmem %s871_s5, %s611_s13 }
  0x16   : > { %v311_v3 = vld [vmem:[%s300_s19] sm:$0xff]  ;;  %v614_v5 = vld [vmem:[%s300_s19 + $0x8] sm:$0xff] }
  0x17   : > { %v319_v6 = vmul.f32 %v612_v2, %v311_v3  ;;  %v331_v7 = vmul.f32 %v614_v5, %v612_v2 }
  0x19   : > { %v327_v8 = vadd.f32 %v613_v4, %v319_v6  ;;  %v332_v9 = vadd.f32 %v613_v4, %v331_v7 }
  0x1b   : > { %v328_v10 = vmax.f32 %v327_v8, 0.0  ;;  %v333_v11 = vmax.f32 %v332_v9, 0.0 }
  0x1d   : > { %v335_v12 = vadd.f32 %v333_v11, %v328_v10 }
  0x1f   : > { %627 = vmatpush3.msra.mxu0 %v335_v12 }
  0x20   : > { %629 = vmatmul.mubr.msk.f32.vlgmr.msra.gmra.mrb[0].mxu0 %vm336_vm1, %v334_v13 }
  0xf3   : > { %v406_v15 = vpop.f32.mrb[0].mxu0 }
  0xf4   : > { %v410_v16 = vpack.c.bf16 %v406_v15, %v406_v15  ;;  %v630_v17 = vpop.f32.mrb[1].mxu0 }
  0xf6   : > { %636 = vmatmul.mubr.msk.bf16.vlgmr.msra.gmra.mrb[0].mxu1 %vm427_vm2, %v410_v16 }
 0x1c6   : > { %478 = sbr.rel (%p475_p9) target bundleno = 461 (0x1cd), region = 44 }
 0x1c9   : > { %v465_v18 = vpop.f32.mrb[0].mxu1 }
 0x1ca   : > { %472 = vst.msk [vmem:[%s309_s16] sm:$0xf] %vm471_vm3, %v465_v18  ;;  %v637_v19 = vpop.f32.mrb[1].mxu1 }
 0x1cb   : > { %v468_v20 = vpop.f32.mrb[2].mxu1 }
 0x1cc   : > { %v638_v21 = vpop.f32.mrb[3].mxu1 }
 0x1cd PF: > { %v483_v23 = vsel %vm471_vm3, %v465_v18, 0.0  ;;  %v494_v24 = vmul.f32 %v465_v18, %v465_v18  ;;  %v482_v35 = vld [vmem:[%s872_s6] sm:$0x1]  ;;  %vm491_vm5 = vcmask 122880  }
 0x1ce   : > { %v484_v25 = vrot.slane %v483_v23, 4  ;;  %v493_v38 = vld [vmem:[%s873_s7] sm:$0x1] }
 0x1cf   : > { %v495_v26 = vsel %vm471_vm3, %v494_v24, 0.0 }
 0x1d0   : > { %v485_v27 = vadd.f32 %v484_v25, %v483_v23  ;;  %v496_v28 = vrot.slane %v495_v26, 4 }
 0x1d2   : > { %v486_v29 = vrot.slane %v485_v27, 2  ;;  %v497_v30 = vadd.f32 %v496_v28, %v495_v26 }
 0x1d4   : > { %v487_v31 = vadd.f32 %v486_v29, %v485_v27  ;;  %v498_v32 = vrot.slane %v497_v30, 2 }
 0x1d6   : > { %v488_v33 = vrot.slane %v487_v31, 1  ;;  %v499_v34 = vadd.f32 %v498_v32, %v497_v30 }
 0x1d8   : > { %v489_v36 = vadd.f32 %v488_v33, %v487_v31  ;;  %v500_v37 = vrot.slane %v499_v34, 1 }
 0x1da   : > { %v490_v39 = vadd.f32 %v489_v36, %v482_v35  ;;  %v501_v40 = vadd.f32 %v500_v37, %v499_v34 }
 0x1dc   : > { %492 = vst.msk [vmem:[%s872_s6] sm:$0x1] %vm491_vm5, %v490_v39  ;;  %v502_v41 = vadd.f32 %v501_v40, %v493_v38 }
 0x1de   : > { %503 = vst.msk [vmem:[%s873_s7] sm:$0x1] %vm491_vm5, %v502_v41 }
 0x1df PF: > { %s18_s28 = sadd.s32 1, %s722_s28   ;;  %s874_s24 = smov %s714_s26 }
 0x1e0   : > { %p15_p11 = scmp.ge.s32.totalorder %s18_s28, 10   ;;  %s875_s25 = smov %s718_s27 }
 0x1e1   : > { %s876_s26 = smov %s879_s29  ;;  %s877_s27 = smov %s883_s30 }
 0x1e2   :  { %17 = sbr.rel (!%p15_p11) target bundleno = 3 (0x3), region = 91 }

// kernel: densenet_forward.21
= control target key start
LH: loop header
LB: loop body
LE: loop exit
PB: predicated region body
PF: predicated region fallthrough
CT: control target
= control target key end

     0   :  { %v241_v1 = vmov 0   ;;  %vm72_vm0 = vcmask 261120   ;;  %vm137_vm1 = vcmask 122880   ;;  %v242_v27 = vmov 0.0   ;;  %s365_s3 = inlined_call_operand.vmem [shape: bf16[32,16], index: 3, kind: input, shape index: {}]   ;;  %s366_s0 = inlined_call_operand.vmem [shape: f32[32,32], index: 0, kind: input, shape index: {}]   ;;  %s367_s1 = inlined_call_operand.vmem [shape: f32[1,32], index: 1, kind: input, shape index: {}]   ;;  %s368_s2 = inlined_call_operand.vmem [shape: f32[1,32], index: 2, kind: input, shape index: {}]   ;;  %s369_s4 = inlined_call_operand.vmem [shape: f32[32,1], index: 4, kind: input, shape index: {}]   ;;  %s370_s6 = inlined_call_operand.vmem [shape: f32[1,16], index: 6, kind: output, shape index: {1}]   ;;  %s371_s7 = inlined_call_operand.vmem [shape: f32[1,16], index: 7, kind: output, shape index: {2}]   ;;  %s372_s5 = inlined_call_operand.vmem [shape: f32[32,16], index: 5, kind: output, shape index: {0}]  }
   0x1   :  { %v239_v0 = vld [vmem:[%s365_s3] sm:$0xff]   ;;  %237 = vset.pattern.permute.xlu0 %v241_v1  ;;  %238 = vset.pattern.permute.xlu1 %v241_v1  ;;  %v240_v2 = vld [vmem:[%s365_s3 + $0x8] sm:$0xff]   ;;  %v26_v9 = vld [vmem:[%s366_s0 + $0x10] sm:$0xff]  ;;  %138 = vst.msk [vmem:[%s370_s6] sm:$0x1] %vm137_vm1, %v242_v27  ;;  %vm128_vm2 = vcmask 130048  }
   0x2   :  { %227 = vmatprep.subr.bf16.mxu0 %v239_v0  ;;  %v24_v3 = vld [vmem:[%s366_s0] sm:$0xff]  ;;  %v25_v4 = vld [vmem:[%s366_s0 + $0x8] sm:$0xff]  ;;  %v27_v10 = vld [vmem:[%s366_s0 + $0x18] sm:$0xff]  ;;  %139 = vst.msk [vmem:[%s371_s7] sm:$0x1] %vm137_vm1, %v242_v27 }
   0x3   :  { %v217_v5 = vld [vmem:[%s367_s1] ss:$0 sm:$0xff]  ;;  %228 = vmatpush3.bf16.msra.mxu0 %v239_v0  ;;  %v142_v14 = vld [vmem:[%s369_s4 + $0x10] sm:$0xff]  ;;  %v141_v19 = vld [vmem:[%s369_s4 + $0x8] sm:$0xff] }
   0x4   :  { %v35_v6 = vmul.f32 %v217_v5, %v24_v3  ;;  %v36_v7 = vmul.f32 %v217_v5, %v25_v4  ;;  %v218_v8 = vld [vmem:[%s368_s2] ss:$0 sm:$0xff]  ;;  %229 = vmatprep.subr.bf16.mxu0 %v240_v2  ;;  %v37_v11 = vmul.f32 %v217_v5, %v26_v9  ;;  %v38_v12 = vmul.f32 %v217_v5, %v27_v10  ;;  %v143_v20 = vld [vmem:[%s369_s4 + $0x18] sm:$0xff] }
   0x5   :  { %v140_v13 = vld [vmem:[%s369_s4] sm:$0xff]  ;;  %156 = vperm.xlu1 %238, %v142_v14  }
   0x6   :  { %v46_v15 = vadd.f32 %v218_v8, %v35_v6  ;;  %v47_v16 = vadd.f32 %v218_v8, %v36_v7  ;;  %146 = vperm.xlu0 %237, %v140_v13   ;;  %v48_v17 = vadd.f32 %v218_v8, %v37_v11  ;;  %v49_v18 = vadd.f32 %v218_v8, %v38_v12 }
   0x7   :  { %230 = vmatpush3.bf16.msra.mxu0 %v240_v2 }
   0x8   :  { %v50_v21 = vmax.f32 %v46_v15, 0.0  ;;  %v51_v22 = vmax.f32 %v47_v16, 0.0  ;;  %v52_v23 = vmax.f32 %v48_v17, 0.0  ;;  %v53_v24 = vmax.f32 %v49_v18, 0.0  ;;  %v168_v3 = vld [vmem:[%s370_s6] sm:$0x1] }
   0x9   :  { %161 = vperm.xlu1 %238, %v143_v20   ;;  %v185_v6 = vld [vmem:[%s371_s7] sm:$0x1] }
   0xa   :  { %v54_v25 = vpack.c.bf16 %v51_v22, %v50_v21  ;;  %151 = vperm.xlu0 %237, %v141_v19   ;;  %v55_v26 = vpack.c.bf16 %v53_v24, %v52_v23 }
   0xc   :  { %231 = vmatprep.mubr.msk.bf16.mxu0 %vm72_vm0, %v54_v25 }
   0xd   :  { %232 = vmatmul.mubr.msk.bf16.vlgmr.msra.gmra.mrb[0].mxu0 %vm72_vm0, %v55_v26 }
  0x84   :  { %v157_v28 = vpop.permute.xlu1 %156 }
  0x85   :  { %v147_v29 = vpop.permute.xlu0 %146 }
  0x88   :  { %v162_v32 = vpop.permute.xlu1 %161 }
  0x89   :  { %v152_v36 = vpop.permute.xlu0 %151 }
  0xe0   :  { %v233_v30 = vpop.f32.mrb[0].mxu0 }
  0xe1   :  { %131 = vst.msk [vmem:[%s372_s5 + $0x10] sm:$0xff] %vm128_vm2, %v233_v30  ;;  %v113_v31 = vpop.f32.mrb[1].mxu0  ;;  %v166_v33 = vmul.f32 %v233_v30, %v157_v28 }
  0xe2   :  { %129 = vst.msk [vmem:[%s372_s5] sm:$0xff] %vm128_vm2, %v113_v31  ;;  %v164_v34 = vmul.f32 %v147_v29, %v113_v31  ;;  %v234_v35 = vpop.f32.mrb[2].mxu0 }
  0xe3   :  { %132 = vst.msk [vmem:[%s372_s5 + $0x18] sm:$0xff] %vm128_vm2, %v234_v35  ;;  %v116_v37 = vpop.f32.mrb[3].mxu0  ;;  %v167_v39 = vmul.f32 %v234_v35, %v162_v32  ;;  %v188_v41 = vmul.f32 %v166_v33, %v166_v33  ;;  %v172_v46 = vsel %vm128_vm2, %v166_v33, 0.0 }
  0xe4   :  { %v186_v38 = vmul.f32 %v164_v34, %v164_v34  ;;  %130 = vst.msk [vmem:[%s372_s5 + $0x8] sm:$0xff] %vm128_vm2, %v116_v37  ;;  %v165_v40 = vmul.f32 %v152_v36, %v116_v37  ;;  %v169_v42 = vsel %vm128_vm2, %v164_v34, 0.0 }
  0xe5   :  { %v189_v48 = vmul.f32 %v167_v39, %v167_v39  ;;  %v193_v52 = vsel %vm128_vm2, %v188_v41, 0.0  ;;  %v174_v53 = vsel %vm128_vm2, %v167_v39, 0.0 }
  0xe6   :  { %v170_v43 = vsel %vm128_vm2, %v165_v40, 0.0  ;;  %v187_v44 = vmul.f32 %v165_v40, %v165_v40  ;;  %v190_v47 = vsel %vm128_vm2, %v186_v38, 0.0 }
  0xe7   :  { %v171_v45 = vadd.f32 %v170_v43, %v169_v42  ;;  %v195_v56 = vsel %vm128_vm2, %v189_v48, 0.0 }
  0xe8   :  { %v191_v49 = vsel %vm128_vm2, %v187_v44, 0.0 }
  0xe9   :  { %v173_v50 = vadd.f32 %v172_v46, %v171_v45  ;;  %v192_v51 = vadd.f32 %v191_v49, %v190_v47 }
  0xeb   :  { %v175_v54 = vadd.f32 %v174_v53, %v173_v50  ;;  %v194_v55 = vadd.f32 %v193_v52, %v192_v51 }
  0xed   :  { %v176_v57 = vrot.slane %v175_v54, 4  ;;  %v196_v58 = vadd.f32 %v195_v56, %v194_v55 }
  0xef   :  { %v177_v59 = vadd.f32 %v176_v57, %v175_v54  ;;  %v197_v60 = vrot.slane %v196_v58, 4 }
  0xf1   :  { %v178_v61 = vrot.slane %v177_v59, 2  ;;  %v198_v62 = vadd.f32 %v197_v60, %v196_v58 }
  0xf3   :  { %v179_v63 = vadd.f32 %v178_v61, %v177_v59  ;;  %v199_v0 = vrot.slane %v198_v62, 2 }
  0xf5   :  { %v180_v1 = vrot.slane %v179_v63, 1  ;;  %v200_v2 = vadd.f32 %v199_v0, %v198_v62 }
  0xf7   :  { %v181_v4 = vadd.f32 %v180_v1, %v179_v63  ;;  %v201_v5 = vrot.slane %v200_v2, 1 }
  0xf9   :  { %v182_v7 = vadd.f32 %v181_v4, %v168_v3  ;;  %v202_v8 = vadd.f32 %v201_v5, %v200_v2 }
  0xfb   :  { %184 = vst.msk [vmem:[%s370_s6] sm:$0x1] %vm137_vm1, %v182_v7  ;;  %v203_v9 = vadd.f32 %v202_v8, %v185_v6 }
  0xfd   :  { %204 = vst.msk [vmem:[%s371_s7] sm:$0x1] %vm137_vm1, %v203_v9 }

// kernel: densenet_forward.22
= control target key start
LH: loop header
LB: loop body
LE: loop exit
PB: predicated region body
PF: predicated region fallthrough
CT: control target
= control target key end

     0   :  { %s1732_s27 = smov 0   ;;  %s1965_s0 = inlined_call_operand.vmem [shape: f32[2,54,16], index: 0, kind: input, shape index: {}]   ;;  %s1966_s1 = inlined_call_operand.vmem [shape: f32[1,16], index: 1, kind: input, shape index: {}]   ;;  %s1967_s2 = inlined_call_operand.vmem [shape: f32[1,16], index: 2, kind: input, shape index: {}]   ;;  %s1968_s3 = inlined_call_operand.vmem [shape: bf16[9,16,8], index: 3, kind: input, shape index: {}]   ;;  %s1969_s4 = inlined_call_operand.vmem [shape: f32[54,1], index: 4, kind: input, shape index: {}]   ;;  %s1970_s5 = inlined_call_operand.vmem [shape: f32[40,1], index: 5, kind: input, shape index: {}]   ;;  %s1971_s6 = inlined_call_operand.vmem [shape: f32[2,40,8], index: 6, kind: output, shape index: {0}]   ;;  %s1972_s7 = inlined_call_operand.vmem [shape: f32[1,8], index: 7, kind: output, shape index: {1}]   ;;  %s1973_s8 = inlined_call_operand.vmem [shape: f32[1,8], index: 8, kind: output, shape index: {2}]  }
   0x1 LB: > { %s1738_s28 = sadd.s32 4294967295, %s1681_s27   ;;  %p1335_p0 = scmp.ge.s32.totalorder %s1681_s27, 1  ;;  %s1681_s27 = sphi %s1732_s27, %s19_s27  }
   0x2   : > { %p257_p1 = scmp.lt.s32.totalorder %s1681_s27, 3 }
   0x4   : > { %p258_p2 = pnand %p1335_p0, %p257_p1 }
   0x5   : > { %v346_v0 = vld [vmem:[%s1969_s4 + $0x10] sm:$0xff] (!%p258_p2)  ;;  %v344_v1 = vld [vmem:[%s1969_s4] sm:$0xff] (!%p258_p2)  ;;  %v1683_v2 = vmov (!%p258_p2), 0   ;;  %v347_v3 = vld [vmem:[%s1969_s4 + $0x18] sm:$0xff] (!%p258_p2)  ;;  %v1684_v8 = vmov (!%p258_p2), 0.0   ;;  %vm1685_vm0 = vmmov (!%p258_p2), 0  }
   0x6   : > { %261 = sbr.rel (%p258_p2) target bundleno = 631 (0x277), region = 44  ;;  %1663 = vset.pattern.permute.xlu1 (!%p258_p2), %v1683_v2  ;;  %1662 = vset.pattern.permute.xlu0 (!%p258_p2), %v1683_v2  ;;  %v345_v4 = vld [vmem:[%s1969_s4 + $0x8] sm:$0xff] (!%p258_p2)  ;;  %v348_v6 = vld [vmem:[%s1969_s4 + $0x20] sm:$0xff] (!%p258_p2)  ;;  %v350_v7 = vld [vmem:[%s1969_s4 + $0x30] sm:$0x3f] (!%p258_p2)  ;;  %p291_p3 = scmp.lt.s32.totalorder (!%p258_p2), %s1738_s28, 1 }
   0x7   : > { %363 = vperm.xlu1 (!%p258_p2), %1663, %v346_v0   ;;  %353 = vperm.xlu0 (!%p258_p2), %1662, %v344_v1   ;;  %v349_v5 = vld [vmem:[%s1969_s4 + $0x28] sm:$0xff] (!%p258_p2)  ;;  %v1773_v10 = vld [vmem:[%s1968_s3 + $0x20] sm:$0xff] (!%p258_p2)   ;;  %vm393_vm1 = vcmask (!%p258_p2), 130048   ;;  %vm400_vm2 = vcmask (!%p258_p2), 128000   ;;  %vm1174_vm3 = vcmask (!%p258_p2), 64512   ;;  %p1392_p4 = scmp.ne.s32.totalorder (!%p258_p2), %s1738_s28, 0 }
   0x8   : > { %1431 = vmatprep.subr.bf16.mxu1 (!%p258_p2), %v1684_v8  ;;  %v1664_v9 = vld [vmem:[%s1968_s3 + $0x8] sm:$0xff] (!%p258_p2)   ;;  %1487 = vmatprep.subr.bf16.mxu0 (!%p258_p2), %v1684_v8  ;;  %v1338_v12 = vld [vmem:[%s1966_s1] ss:$0 sm:$0xff] (!%p258_p2) }
   0x9   : > { %1432 = vmatpush3.bf16.msra.mxu1 (!%p258_p2), %v1664_v9  ;;  %1488 = vmatpush3.bf16.msra.mxu0 (!%p258_p2), %v1773_v10  ;;  %v1339_v16 = vld [vmem:[%s1967_s2] ss:$0 sm:$0xff] (!%p258_p2)  ;;  %v1667_v61 = vld [vmem:[%s1968_s3 + $0x28] sm:$0xff] (!%p258_p2)  }
   0xa   : > { %1445 = vmatprep.subr.bf16.mxu1 (!%p258_p2), %v1684_v8  ;;  %1501 = vmatprep.subr.bf16.mxu0 (!%p258_p2), %v1684_v8  ;;  %v1666_v55 = vld [vmem:[%s1968_s3] sm:$0xff] (!%p258_p2)  }
   0xb   : > { %368 = vperm.xlu1 (!%p258_p2), %1663, %v347_v3   ;;  %358 = vperm.xlu0 (!%p258_p2), %1662, %v345_v4  }
   0xc   : > { %1433 = vmatprep.mubr.msk.bf16.mxu1 (!%p258_p2), %vm1685_vm0, %v1684_v8  ;;  %1489 = vmatprep.mubr.msk.bf16.mxu0 (!%p258_p2), %vm1685_vm0, %v1684_v8 }
   0xd   : > { %s1784_s25 = scalar_select %p291_p3, %s1738_s28, 1 }
   0xe   : > { %vm1184_vm4 = vcmask (!%p1392_p4), 57344  }
   0xf   : > { %378 = vperm.xlu1 %1663, %v349_v5   ;;  %373 = vperm.xlu0 %1662, %v348_v6   ;;  %s1648_s26 = smul.u32 56, %s1784_s25  ;;  %v1668_v5 = vld [vmem:[%s1968_s3 + $0x30] sm:$0xff]  }
  0x11   : > { %s295_s9 = scalar_lea.vmem %s1965_s0, %s1648_s26 }
  0x12   : > { %v304_v11 = vld [vmem:[%s295_s9 + $0x10] sm:$0xff]  ;;  %v302_v13 = vld [vmem:[%s295_s9] sm:$0xff]  ;;  %v305_v17 = vld [vmem:[%s295_s9 + $0x18] sm:$0xff] }
  0x13   : > { %383 = vperm.xlu0 %1662, %v350_v7   ;;  %v318_v14 = vmul.f32 %v1338_v12, %v304_v11  ;;  %v316_v15 = vmul.f32 %v1338_v12, %v302_v13  ;;  %v303_v18 = vld [vmem:[%s295_s9 + $0x8] sm:$0xff]  ;;  %v319_v21 = vmul.f32 %v1338_v12, %v305_v17  ;;  %v306_v24 = vld [vmem:[%s295_s9 + $0x20] sm:$0xff]  ;;  %v308_v31 = vld [vmem:[%s295_s9 + $0x30] sm:$0x3f] }
  0x14   : > { %v317_v22 = vmul.f32 %v1338_v12, %v303_v18  ;;  %v307_v23 = vld [vmem:[%s295_s9 + $0x28] sm:$0xff]  ;;  %v320_v26 = vmul.f32 %v1338_v12, %v306_v24  ;;  %v322_v36 = vmul.f32 %v1338_v12, %v308_v31  ;;  %s1649_s9 = smul.u32 40, %s1784_s25 }
  0x15   : > { %v332_v19 = vadd.f32 %v1339_v16, %v318_v14  ;;  %v330_v20 = vadd.f32 %v1339_v16, %v316_v15  ;;  %v321_v25 = vmul.f32 %v1338_v12, %v307_v23  ;;  %v333_v29 = vadd.f32 %v1339_v16, %v319_v21  ;;  %v1669_v15 = vld [vmem:[%s1968_s3 + $0x10] sm:$0xff]  }
  0x16   : > { %v331_v30 = vadd.f32 %v1339_v16, %v317_v22  ;;  %v334_v35 = vadd.f32 %v1339_v16, %v320_v26  ;;  %v336_v47 = vadd.f32 %v1339_v16, %v322_v36  ;;  %v1670_v22 = vld [vmem:[%s1968_s3 + $0x38] sm:$0xff]   ;;  %s300_s12 = scalar_lea.vmem %s1971_s6, %s1649_s9 }
  0x17   : > { %v339_v27 = vmax.f32 %v332_v19, 0.0  ;;  %v337_v28 = vmax.f32 %v330_v20, 0.0  ;;  %v335_v34 = vadd.f32 %v1339_v16, %v321_v25  ;;  %v340_v39 = vmax.f32 %v333_v29, 0.0 }
  0x18   : > { %v338_v40 = vmax.f32 %v331_v30, 0.0  ;;  %v341_v46 = vmax.f32 %v334_v35, 0.0  ;;  %v343_v52 = vmax.f32 %v336_v47, 0.0  ;;  %v1671_v30 = vld [vmem:[%s1968_s3 + $0x18] sm:$0xff]  }
  0x19   : > { %v342_v43 = vmax.f32 %v335_v34, 0.0 }
  0x86   : > { %v364_v32 = vpop.permute.xlu1 %363  ;;  %v354_v33 = vpop.permute.xlu0 %353 }
  0x87   : > { %v388_v37 = vmul.f32 %v364_v32, %v339_v27  ;;  %v386_v38 = vmul.f32 %v354_v33, %v337_v28 }
  0x89   : > { %396 = vst.msk [vmem:[#allocation2 + $0x10] sm:$0xff] %vm393_vm1, %v388_v37  ;;  %394 = vst.msk [vmem:[#allocation2] sm:$0xff] %vm393_vm1, %v386_v38 }
  0x8a   : > { %v369_v41 = vpop.permute.xlu1 %368  ;;  %v359_v42 = vpop.permute.xlu0 %358 }
  0x8b   : > { %v389_v44 = vmul.f32 %v369_v41, %v340_v39  ;;  %v387_v45 = vmul.f32 %v359_v42, %v338_v40  ;;  %v1672_v39 = vld [vmem:[%s1968_s3 + $0x40] sm:$0xff]  }
  0x8d   : > { %397 = vst.msk [vmem:[#allocation2 + $0x18] sm:$0xff] %vm393_vm1, %v389_v44  ;;  %395 = vst.msk [vmem:[#allocation2 + $0x8] sm:$0xff] %vm393_vm1, %v387_v45 }
  0x8e   : > { %v379_v48 = vpop.permute.xlu1 %378  ;;  %v374_v49 = vpop.permute.xlu0 %373 }
  0x8f   : > { %v391_v50 = vmul.f32 %v379_v48, %v342_v43  ;;  %v390_v51 = vmul.f32 %v374_v49, %v341_v46 }
  0x90   : > { %v827_v4 = vld [vmem:[#allocation2 + $0x10] sm:$0xff]  ;;  %v402_v14 = vld [vmem:[#allocation2] sm:$0xff] }
  0x91   : > { %399 = vst.msk [vmem:[#allocation2 + $0x28] sm:$0xff] %vm393_vm1, %v391_v50  ;;  %398 = vst.msk [vmem:[#allocation2 + $0x20] sm:$0xff] %vm393_vm1, %v390_v51 }
  0x92   : > { %v384_v53 = vpop.permute.xlu0 %383 }
  0x93   : > { %v392_v54 = vmul.f32 %v384_v53, %v343_v52 }
  0x94   : > { %v412_v56 = vld [vmem:[#allocation2 + $0x1] sm:$0xff]  ;;  %v413_v57 = vld [vmem:[#allocation2 + $0x9] sm:$0xff]  ;;  %v414_v0 = vld [vmem:[#allocation2 + $0x11] sm:$0xff] }
  0x95   : > { %v739_v58 = vld [vmem:[#allocation2 + $0x7] sm:$0xff]  ;;  %401 = vst.msk [vmem:[#allocation2 + $0x30] sm:$0x3f] %vm400_vm2, %v392_v54  ;;  %v417_v59 = vpack.c.bf16 %v413_v57, %v412_v56  ;;  %v740_v60 = vld [vmem:[#allocation2 + $0xf] sm:$0xff]  ;;  %v828_v12 = vld [vmem:[#allocation2 + $0x18] sm:$0xff] }
  0x96   : > { %v744_v62 = vpack.c.bf16 %v740_v60, %v739_v58  ;;  %v826_v3 = vld [vmem:[#allocation2 + $0x8] sm:$0xff]  ;;  %v408_v19 = vpack.c.bf16 %v828_v12, %v827_v4  ;;  %v914_v21 = vld [vmem:[#allocation2 + $0x14] sm:$0xff] }
  0x97   : > { %1434 = vmatmul.mubr.msk.bf16.vlgmr.msra.gmra.mrb[0].mxu1 %vm393_vm1, %v417_v59  ;;  %v831_v6 = vpack.c.bf16 %v827_v4, %v826_v3  ;;  %v407_v16 = vpack.c.bf16 %v826_v3, %v402_v14  ;;  %v913_v20 = vld [vmem:[#allocation2 + $0xc] sm:$0xff]  ;;  %v565_v28 = vld [vmem:[#allocation2 + $0x2] sm:$0xff]  ;;  %v1001_v38 = vld [vmem:[#allocation2 + $0x15] sm:$0xff] }
  0x98   : > { %1446 = vmatpush3.bf16.msra.mxu1 %v1666_v55  ;;  %1490 = vmatmul.mubr.msk.bf16.vlgmr.msra.gmra.mrb[0].mxu0 %vm393_vm1, %v744_v62  ;;  %v415_v63 = vld [vmem:[#allocation2 + $0x19] sm:$0xff]  ;;  %v416_v7 = vld [vmem:[#allocation2 + $0x21] sm:$0xff]  ;;  %v918_v23 = vpack.c.bf16 %v914_v21, %v913_v20  ;;  %v566_v29 = vld [vmem:[#allocation2 + $0xa] sm:$0xff] }
  0x99   : > { %1502 = vmatpush3.bf16.msra.mxu0 %v1667_v61  ;;  %1437 = vmatprep.mubr.msk.bf16.mxu1 %vm1685_vm0, %v1684_v8  ;;  %v418_v1 = vpack.c.bf16 %v415_v63, %v414_v0  ;;  %v419_v9 = vpack.c.bf16 %v416_v7, %v416_v7  ;;  %v829_v11 = vld [vmem:[#allocation2 + $0x20] sm:$0xff]  ;;  %v830_v17 = vld [vmem:[#allocation2 + $0x28] sm:$0xff]  ;;  %v570_v31 = vpack.c.bf16 %v566_v29, %v565_v28  ;;  %v567_v35 = vld [vmem:[#allocation2 + $0x12] sm:$0xff] }
  0x9a   : > { %1503 = vmatprep.mubr.msk.bf16.mxu0 %vm1685_vm0, %v1684_v8  ;;  %1515 = vmatprep.subr.bf16.mxu0 %v1684_v8  ;;  %v832_v13 = vpack.c.bf16 %v829_v11, %v828_v12  ;;  %v833_v18 = vpack.c.bf16 %v830_v17, %v830_v17  ;;  %v409_v24 = vpack.c.bf16 %v829_v11, %v829_v11  ;;  %v915_v25 = vld [vmem:[#allocation2 + $0x1c] sm:$0xff]  ;;  %v916_v26 = vld [vmem:[#allocation2 + $0x24] sm:$0xff]  ;;  %v1000_v37 = vld [vmem:[#allocation2 + $0xd] sm:$0xff] }
  0x9b   : > { %1459 = vmatprep.subr.bf16.mxu1 %v1684_v8  ;;  %v919_v27 = vpack.c.bf16 %v916_v26, %v915_v25  ;;  %v568_v34 = vld [vmem:[#allocation2 + $0x1a] sm:$0xff]  ;;  %v1005_v40 = vpack.c.bf16 %v1001_v38, %v1000_v37  ;;  %v569_v41 = vld [vmem:[#allocation2 + $0x22] sm:$0xff]  ;;  %v653_v47 = vld [vmem:[#allocation2 + $0xe] sm:$0xff] }
  0x9c   : > { %v917_v32 = vld [vmem:[#allocation2 + $0x2c] sm:$0xff]  ;;  %v571_v36 = vpack.c.bf16 %v568_v34, %v567_v35  ;;  %v572_v42 = vpack.c.bf16 %v569_v41, %v569_v41  ;;  %v1002_v43 = vld [vmem:[#allocation2 + $0x1d] sm:$0xff] }
  0x9d   : > { %v920_v33 = vpack.c.bf16 %v917_v32, %v917_v32  ;;  %v1003_v44 = vld [vmem:[#allocation2 + $0x25] sm:$0xff]  ;;  %v1004_v49 = vld [vmem:[#allocation2 + $0x2d] sm:$0xff]  ;;  %v654_v52 = vld [vmem:[#allocation2 + $0x16] sm:$0xff] }
  0x9e   : > { %v1006_v45 = vpack.c.bf16 %v1003_v44, %v1002_v43  ;;  %v652_v46 = vld [vmem:[#allocation2 + $0x6] sm:$0xff]  ;;  %v1007_v50 = vpack.c.bf16 %v1004_v49, %v1004_v49  ;;  %v655_v51 = vld [vmem:[#allocation2 + $0x1e] sm:$0xff]  ;;  %v1092_v54 = vpack.c.bf16 %v654_v52, %v653_v47  ;;  %v1091_v60 = vld [vmem:[#allocation2 + $0x2e] sm:$0xff] }
  0x9f   : > { %1438 = vmatmul.mubr.msk.bf16.gmra.mrb[4].mxu1 %vm393_vm1, %v418_v1  ;;  %v657_v48 = vpack.c.bf16 %v653_v47, %v652_v46  ;;  %v658_v53 = vpack.c.bf16 %v655_v51, %v654_v52  ;;  %v656_v55 = vld [vmem:[#allocation2 + $0x26] sm:$0xff]  ;;  %v741_v58 = vld [vmem:[#allocation2 + $0x17] sm:$0xff]  ;;  %v1094_v61 = vpack.c.bf16 %v1091_v60, %v1091_v60 }
  0xa0   : > { %1441 = vmatprep.mubr.msk.bf16.mxu1 %vm1685_vm0, %v1684_v8  ;;  %v1093_v56 = vpack.c.bf16 %v656_v55, %v655_v51  ;;  %v742_v57 = vld [vmem:[#allocation2 + $0x1f] sm:$0xff]  ;;  %v743_v62 = vld [vmem:[#allocation2 + $0x27] sm:$0xff] }
  0xa1   : > { %v745_v59 = vpack.c.bf16 %v742_v57, %v741_v58  ;;  %v746_v63 = vpack.c.bf16 %v743_v62, %v743_v62 }
  0xa4   : > { %1504 = vmatmul.mubr.msk.bf16.vlgmr.msra.gmra.mrb[0].mxu0 %vm393_vm1, %v831_v6 }
  0xa5   : > { %1516 = vmatpush3.bf16.msra.mxu0 %v1668_v5  ;;  %1507 = vmatprep.mubr.msk.bf16.mxu0 %vm1685_vm0, %v1684_v8 }
  0xa6   : > { %1529 = vmatprep.subr.bf16.mxu0 %v1684_v8 }
  0xa7   : > { %1442 = vmatmul.mubr.msk.bf16.gmra.mrb[8].mxu1 %vm393_vm1, %v419_v9 }
  0xa8   : > { %1447 = vmatprep.mubr.msk.bf16.mxu1 %vm1685_vm0, %v1684_v8 }
  0xac   : > { %1508 = vmatmul.mubr.msk.bf16.gmra.mrb[4].mxu0 %vm393_vm1, %v832_v13 }
  0xad   : > { %1511 = vmatprep.mubr.msk.bf16.mxu0 %vm1685_vm0, %v1684_v8 }
  0xaf   : > { %1448 = vmatmul.mubr.msk.bf16.vlgmr.msra.gmra.mrb[0].mxu1 %vm393_vm1, %v407_v16 }
  0xb0   : > { %1460 = vmatpush3.bf16.msra.mxu1 %v1669_v15  ;;  %1451 = vmatprep.mubr.msk.bf16.mxu1 %vm1685_vm0, %v1684_v8 }
  0xb1   : > { %1473 = vmatprep.subr.bf16.mxu1 %v1684_v8 }
  0xb4   : > { %1512 = vmatmul.mubr.msk.bf16.gmra.mrb[8].mxu0 %vm393_vm1, %v833_v18 }
  0xb5   : > { %1517 = vmatprep.mubr.msk.bf16.mxu0 %vm1685_vm0, %v1684_v8 }
  0xb7   : > { %1452 = vmatmul.mubr.msk.bf16.gmra.mrb[4].mxu1 %vm393_vm1, %v408_v19 }
  0xb8   : > { %1455 = vmatprep.mubr.msk.bf16.mxu1 %vm1685_vm0, %v1684_v8 }
  0xbc   : > { %1518 = vmatmul.mubr.msk.bf16.vlgmr.msra.gmra.mrb[0].mxu0 %vm393_vm1, %v918_v23 }
  0xbd   : > { %1530 = vmatpush3.bf16.msra.mxu0 %v1670_v22  ;;  %1521 = vmatprep.mubr.msk.bf16.mxu0 %vm1685_vm0, %v1684_v8 }
  0xbe   : > { %1543 = vmatprep.subr.bf16.mxu0 %v1684_v8 }
  0xbf   : > { %1456 = vmatmul.mubr.msk.bf16.gmra.mrb[8].mxu1 %vm393_vm1, %v409_v24 }
  0xc0   : > { %1461 = vmatprep.mubr.msk.bf16.mxu1 %vm1685_vm0, %v1684_v8 }
  0xc4   : > { %1522 = vmatmul.mubr.msk.bf16.gmra.mrb[4].mxu0 %vm393_vm1, %v919_v27 }
  0xc5   : > { %1525 = vmatprep.mubr.msk.bf16.mxu0 %vm1685_vm0, %v1684_v8 }
  0xc7   : > { %1462 = vmatmul.mubr.msk.bf16.vlgmr.msra.gmra.mrb[0].mxu1 %vm393_vm1, %v570_v31  ;;  %v1686_v31 = vmov (!%p1392_p4), 0.0  }
  0xc8   : > { %1474 = vmatpush3.bf16.msra.mxu1 %v1671_v30  ;;  %1465 = vmatprep.mubr.msk.bf16.mxu1 %vm1685_vm0, %v1684_v8  ;;  %1185 = vst.msk [vmem:[%s1972_s7] sm:$0x1] (!%p1392_p4), %vm1184_vm4, %v1686_v31  ;;  %1186 = vst.msk [vmem:[%s1973_s8] sm:$0x1] (!%p1392_p4), %vm1184_vm4, %v1686_v31 }
  0xc9   : > { %1557 = vmatprep.subr.bf16.mxu1 %v1684_v8 }
  0xcc   : > { %1526 = vmatmul.mubr.msk.bf16.gmra.mrb[8].mxu0 %vm393_vm1, %v920_v33 }
  0xcd   : > { %1531 = vmatprep.mubr.msk.bf16.mxu0 %vm1685_vm0, %v1684_v8 }
  0xcf   : > { %1466 = vmatmul.mubr.msk.bf16.gmra.mrb[4].mxu1 %vm393_vm1, %v571_v36 }
  0xd0   : > { %1469 = vmatprep.mubr.msk.bf16.mxu1 %vm1685_vm0, %v1684_v8 }
  0xd4   : > { %1532 = vmatmul.mubr.msk.bf16.vlgmr.msra.gmra.mrb[0].mxu0 %vm393_vm1, %v1005_v40 }
  0xd5   : > { %1544 = vmatpush3.bf16.msra.mxu0 %v1672_v39  ;;  %1535 = vmatprep.mubr.msk.bf16.mxu0 %vm1685_vm0, %v1684_v8 }
  0xd7   : > { %1470 = vmatmul.mubr.msk.bf16.gmra.mrb[8].mxu1 %vm393_vm1, %v572_v42 }
  0xd8   : > { %1475 = vmatprep.mubr.msk.bf16.mxu1 %vm1685_vm0, %v1684_v8 }
  0xdc   : > { %1536 = vmatmul.mubr.msk.bf16.gmra.mrb[4].mxu0 %vm393_vm1, %v1006_v45 }
  0xdd   : > { %1539 = vmatprep.mubr.msk.bf16.mxu0 %vm1685_vm0, %v1684_v8 }
  0xdf   : > { %1476 = vmatmul.mubr.msk.bf16.vlgmr.msra.gmra.mrb[0].mxu1 %vm393_vm1, %v657_v48 }
  0xe0   : > { %1558 = vmatpush3.bf16.msra.mxu1 %v1773_v10  ;;  %1479 = vmatprep.mubr.msk.bf16.mxu1 %vm1685_vm0, %v1684_v8  ;;  %v659_v10 = vpack.c.bf16 %v656_v55, %v656_v55 }
  0xe4   : > { %1540 = vmatmul.mubr.msk.bf16.gmra.mrb[8].mxu0 %vm393_vm1, %v1007_v50 }
  0xe5   : > { %1545 = vmatprep.mubr.msk.bf16.mxu0 %vm1685_vm0, %v1684_v8 }
  0xe7   : > { %1480 = vmatmul.mubr.msk.bf16.gmra.mrb[4].mxu1 %vm393_vm1, %v658_v53 }
  0xe8   : > { %1483 = vmatprep.mubr.msk.bf16.mxu1 %vm1685_vm0, %v1684_v8 }
  0xec   : > { %1546 = vmatmul.mubr.msk.bf16.vlgmr.msra.gmra.mrb[0].mxu0 %vm393_vm1, %v1092_v54 }
  0xed   : > { %1549 = vmatprep.mubr.msk.bf16.mxu0 %vm1685_vm0, %v1684_v8 }
  0xef   : > { %1484 = vmatmul.mubr.msk.bf16.gmra.mrb[8].mxu1 %vm393_vm1, %v659_v10 }
  0xf0   : > { %1493 = vmatprep.mubr.msk.bf16.mxu1 %vm1685_vm0, %v1684_v8 }
  0xf4   : > { %1550 = vmatmul.mubr.msk.bf16.gmra.mrb[4].mxu0 %vm393_vm1, %v1093_v56 }
  0xf5   : > { %1553 = vmatprep.mubr.msk.bf16.mxu0 %vm1685_vm0, %v1684_v8 }
  0xf7   : > { %1494 = vmatmul.mubr.msk.bf16.vlgmr.msra.gmra.mrb[4].mxu1 %vm393_vm1, %v745_v59 }
  0xf8   : > { %1497 = vmatprep.mubr.msk.bf16.mxu1 %vm1685_vm0, %v1684_v8 }
  0xfc   : > { %1554 = vmatmul.mubr.msk.bf16.gmra.mrb[8].mxu0 %vm393_vm1, %v1094_v61 }
  0xff   : > { %1498 = vmatmul.mubr.msk.bf16.gmra.mrb[8].mxu1 %vm393_vm1, %v746_v63 }
 0x1b2   : > { %v712_v0 = vpop.f32.mrb[0].mxu1 }
 0x1b3   : > { %v1477_v1 = vpop.f32.mrb[1].mxu1 }
 0x1b4   : > { %v715_v3 = vpop.f32.mrb[2].mxu1 }
 0x1b5   : > { %v1478_v4 = vpop.f32.mrb[3].mxu1 }
 0x1bf   : > { %v1147_v5 = vpop.f32.mrb[0].mxu0 }
 0x1c0   : > { %v1559_v6 = vadd.f32 %v1147_v5, %v712_v0  ;;  %v1547_v8 = vpop.f32.mrb[1].mxu0 }
 0x1c1   : > { %v1150_v7 = vpop.f32.mrb[2].mxu0 }
 0x1c2   : > { %1175 = vst.msk [vmem:[%s300_s12] sm:$0xff] %vm1174_vm3, %v1559_v6  ;;  %v1560_v9 = vadd.f32 %v1150_v7, %v715_v3  ;;  %v1548_v11 = vpop.f32.mrb[3].mxu0 }
 0x1c4   : > { %1176 = vst.msk [vmem:[%s300_s12 + $0x8] sm:$0xff] %vm1174_vm3, %v1560_v9 }
 0x1c7   : > { %v1155_v12 = vpop.f32.mrb[4].mxu0 }
 0x1c8   : > { %v1551_v13 = vpop.f32.mrb[5].mxu0 }
 0x1c9   : > { %v1158_v14 = vpop.f32.mrb[6].mxu0 }
 0x1ca   : > { %v1552_v15 = vpop.f32.mrb[7].mxu0  ;;  %v807_v16 = vpop.f32.mrb[4].mxu1 }
 0x1cb   : > { %v1561_v17 = vadd.f32 %v1155_v12, %v807_v16  ;;  %v1495_v18 = vpop.f32.mrb[5].mxu1 }
 0x1cc   : > { %v810_v19 = vpop.f32.mrb[6].mxu1 }
 0x1cd   : > { %1177 = vst.msk [vmem:[%s300_s12 + $0x10] sm:$0xff] %vm1174_vm3, %v1561_v17  ;;  %v1562_v20 = vadd.f32 %v1158_v14, %v810_v19  ;;  %v1496_v21 = vpop.f32.mrb[7].mxu1 }
 0x1cf   : > { %1178 = vst.msk [vmem:[%s300_s12 + $0x18] sm:$0xff] %vm1174_vm3, %v1562_v20  ;;  %v1163_v22 = vpop.f32.mrb[8].mxu0  ;;  %1183 = sbr.rel (%p1392_p4) target bundleno = 470 (0x1d6), region = 48 }
 0x1d0   : > { %v1555_v23 = vpop.f32.mrb[9].mxu0 }
 0x1d1   : > { %v1166_v24 = vpop.f32.mrb[10].mxu0 }
 0x1d2   : > { %v1556_v25 = vpop.f32.mrb[11].mxu0  ;;  %v815_v26 = vpop.f32.mrb[8].mxu1 }
 0x1d3   : > { %v1563_v27 = vadd.f32 %v1163_v22, %v815_v26  ;;  %v1499_v28 = vpop.f32.mrb[9].mxu1 }
 0x1d4   : > { %v818_v29 = vpop.f32.mrb[10].mxu1 }
 0x1d5   : > { %1179 = vst.msk [vmem:[%s300_s12 + $0x20] sm:$0xff] %vm1174_vm3, %v1563_v27  ;;  %v1500_v30 = vpop.f32.mrb[11].mxu1 }
 0x1d6 PF: > { %1674 = vset.pattern.permute.xlu1 %v1683_v2  ;;  %1673 = vset.pattern.permute.xlu0 %v1683_v2  ;;  %v1189_v32 = vld [vmem:[%s1970_s5 + $0x10] sm:$0xff]  ;;  %v1187_v33 = vld [vmem:[%s1970_s5] sm:$0xff]  ;;  %v1190_v34 = vld [vmem:[%s1970_s5 + $0x18] sm:$0xff]  ;;  %vm1239_vm5 = vcmask 57344  }
 0x1d7   : > { %1204 = vperm.xlu1 %1674, %v1189_v32   ;;  %1194 = vperm.xlu0 %1673, %v1187_v33   ;;  %v1188_v35 = vld [vmem:[%s1970_s5 + $0x8] sm:$0xff]  ;;  %v1191_v2 = vld [vmem:[%s1970_s5 + $0x20] sm:$0xff] }
 0x1d8   : > { %v1222_v15 = vld [vmem:[%s1972_s7] sm:$0x1] }
 0x1d9   : > { %v1241_v18 = vld [vmem:[%s1973_s8] sm:$0x1] }
 0x1db   : > { %1209 = vperm.xlu1 %1674, %v1190_v34   ;;  %1199 = vperm.xlu0 %1673, %v1188_v35  }
 0x1df   : > { %1214 = vperm.xlu0 %1673, %v1191_v2  }
 0x256   : > { %v1205_v36 = vpop.permute.xlu1 %1204  ;;  %v1195_v37 = vpop.permute.xlu0 %1194 }
 0x257   : > { %v1217_v38 = vmul.f32 %v1559_v6, %v1195_v37  ;;  %v1219_v39 = vmul.f32 %v1561_v17, %v1205_v36 }
 0x259   : > { %v1242_v42 = vmul.f32 %v1217_v38, %v1217_v38  ;;  %v1244_v45 = vmul.f32 %v1219_v39, %v1219_v39  ;;  %v1223_v46 = vsel %vm1174_vm3, %v1217_v38, 0.0  ;;  %v1226_v49 = vsel %vm1174_vm3, %v1219_v39, 0.0 }
 0x25a   : > { %v1210_v40 = vpop.permute.xlu1 %1209  ;;  %v1200_v41 = vpop.permute.xlu0 %1199 }
 0x25b   : > { %v1220_v43 = vmul.f32 %v1562_v20, %v1210_v40  ;;  %v1218_v44 = vmul.f32 %v1560_v9, %v1200_v41  ;;  %v1247_v52 = vsel %vm1174_vm3, %v1242_v42, 0.0  ;;  %v1250_v57 = vsel %vm1174_vm3, %v1244_v45, 0.0 }
 0x25d   : > { %v1224_v47 = vsel %vm1174_vm3, %v1218_v44, 0.0  ;;  %v1243_v48 = vmul.f32 %v1218_v44, %v1218_v44  ;;  %v1245_v53 = vmul.f32 %v1220_v43, %v1220_v43  ;;  %v1228_v58 = vsel %vm1174_vm3, %v1220_v43, 0.0 }
 0x25e   : > { %v1225_v50 = vadd.f32 %v1224_v47, %v1223_v46  ;;  %v1215_v51 = vpop.permute.xlu0 %1214 }
 0x25f   : > { %v1248_v54 = vsel %vm1174_vm3, %v1243_v48, 0.0  ;;  %v1221_v55 = vmul.f32 %v1563_v27, %v1215_v51  ;;  %v1252_v62 = vsel %vm1174_vm3, %v1245_v53, 0.0 }
 0x260   : > { %v1227_v10 = vadd.f32 %v1226_v49, %v1225_v50  ;;  %v1249_v56 = vadd.f32 %v1248_v54, %v1247_v52 }
 0x261   : > { %v1246_v59 = vmul.f32 %v1221_v55, %v1221_v55  ;;  %v1230_v63 = vsel %vm1174_vm3, %v1221_v55, 0.0 }
 0x262   : > { %v1251_v60 = vadd.f32 %v1250_v57, %v1249_v56  ;;  %v1229_v61 = vadd.f32 %v1228_v58, %v1227_v10 }
 0x263   : > { %v1254_v3 = vsel %vm1174_vm3, %v1246_v59, 0.0 }
 0x264   : > { %v1253_v0 = vadd.f32 %v1252_v62, %v1251_v60  ;;  %v1231_v1 = vadd.f32 %v1230_v63, %v1229_v61 }
 0x266   : > { %v1232_v4 = vrot.slane %v1231_v1, 4  ;;  %v1255_v5 = vadd.f32 %v1254_v3, %v1253_v0 }
 0x268   : > { %v1233_v6 = vadd.f32 %v1232_v4, %v1231_v1  ;;  %v1256_v8 = vrot.slane %v1255_v5, 4 }
 0x26a   : > { %v1234_v7 = vrot.slane %v1233_v6, 2  ;;  %v1257_v9 = vadd.f32 %v1256_v8, %v1255_v5 }
 0x26c   : > { %v1235_v11 = vadd.f32 %v1234_v7, %v1233_v6  ;;  %v1258_v12 = vrot.slane %v1257_v9, 2 }
 0x26e   : > { %v1236_v13 = vrot.slane %v1235_v11, 1  ;;  %v1259_v14 = vadd.f32 %v1258_v12, %v1257_v9 }
 0x270   : > { %v1237_v16 = vadd.f32 %v1236_v13, %v1235_v11  ;;  %v1260_v17 = vrot.slane %v1259_v14, 1 }
 0x272   : > { %v1238_v19 = vadd.f32 %v1237_v16, %v1222_v15  ;;  %v1261_v20 = vadd.f32 %v1260_v17, %v1259_v14 }
 0x274   : > { %1240 = vst.msk [vmem:[%s1972_s7] sm:$0x1] %vm1239_vm5, %v1238_v19  ;;  %v1262_v21 = vadd.f32 %v1261_v20, %v1241_v18 }
 0x276   : > { %1263 = vst.msk [vmem:[%s1973_s8] sm:$0x1] %vm1239_vm5, %v1262_v21 }
 0x277 PF: > { %s19_s27 = sadd.s32 1, %s1681_s27  }
 0x278   : > { %p16_p5 = scmp.ge.s32.totalorder %s19_s27, 4  }
 0x27a   :  { %18 = sbr.rel (!%p16_p5) target bundleno = 1 (0x1), region = 102 }

// kernel: densenet_forward.25
= control target key start
LH: loop header
LB: loop body
LE: loop exit
PB: predicated region body
PF: predicated region fallthrough
CT: control target
= control target key end

     0   :  { %v211_v1 = vmov 0.0   ;;  %vm212_vm0 = vmmov 0   ;;  %s288_s0 = inlined_call_operand.vmem [shape: f32[2,16,32], index: 0, kind: input, shape index: {}]   ;;  %s289_s1 = inlined_call_operand.vmem [shape: f32[1,32], index: 1, kind: input, shape index: {}]   ;;  %s290_s2 = inlined_call_operand.vmem [shape: f32[1,32], index: 2, kind: input, shape index: {}]   ;;  %s291_s3 = inlined_call_operand.vmem [shape: bf16[32,10], index: 3, kind: input, shape index: {}]   ;;  %s292_s4 = inlined_call_operand.vmem [shape: f32[1,10], index: 4, kind: input, shape index: {}]   ;;  %s293_s5 = inlined_call_operand.hbm [shape: f32[2,10], index: 5, kind: output, shape index: {}]  }
   0x1   :  { %v185_v0 = vld [vmem:[%s291_s3] sm:$0xff]   ;;  %174 = vmatprep.subr.bf16.mxu0 %v211_v1  ;;  %v186_v2 = vld [vmem:[%s291_s3 + $0x8] sm:$0xff]   ;;  %178 = vmatprep.mubr.msk.bf16.mxu0 %vm212_vm0, %v211_v1  ;;  %v24_v5 = vld [vmem:[%s288_s0 + $0x10] sm:$0xff] }
   0x2   :  { %175 = vmatpush3.bf16.msra.mxu0 %v185_v0  ;;  %v22_v3 = vld [vmem:[%s288_s0] sm:$0xff]  ;;  %v23_v4 = vld [vmem:[%s288_s0 + $0x8] sm:$0xff]  ;;  %v25_v6 = vld [vmem:[%s288_s0 + $0x18] sm:$0xff] }
   0x3   :  { %176 = vmatprep.subr.bf16.mxu0 %v211_v1  ;;  %v165_v7 = vld [vmem:[%s289_s1] ss:$0 sm:$0xff] }
   0x4   :  { %v166_v8 = vld [vmem:[%s290_s2] ss:$0 sm:$0xff]  ;;  %v33_v9 = vmul.f32 %v165_v7, %v22_v3  ;;  %v34_v10 = vmul.f32 %v165_v7, %v23_v4  ;;  %v35_v11 = vmul.f32 %v165_v7, %v24_v5  ;;  %v36_v12 = vmul.f32 %v165_v7, %v25_v6 }
   0x5   :  { %10 = vsyncpa [#allocation3], 0  ;;  %vm52_vm1 = vcmask 261120   ;;  %vm91_vm2 = vcmask 1041409   ;;  %v167_v47 = vld [vmem:[%s292_s4] ss:$0 sm:$0xff] }
   0x6   :  { %177 = vmatpush3.bf16.msra.mxu0 %v186_v2  ;;  %v44_v13 = vadd.f32 %v166_v8, %v33_v9  ;;  %v45_v14 = vadd.f32 %v166_v8, %v34_v10  ;;  %v46_v15 = vadd.f32 %v166_v8, %v35_v11  ;;  %v47_v16 = vadd.f32 %v166_v8, %v36_v12  ;;  %s213_s2 = smov [#allocation2]  }
   0x7   :  { %s157_s8 = sshll.u32 %s213_s2, 4  ;;  %vm149_vm3 = vcmask 74752   ;;  %s158_s8 = int_to_ptr.vmem [resolvable:$true] %s157_s8 }
   0x8   :  { %v48_v17 = vmax.f32 %v44_v13, 0.0  ;;  %v49_v18 = vmax.f32 %v45_v14, 0.0  ;;  %v50_v19 = vmax.f32 %v46_v15, 0.0  ;;  %v51_v20 = vmax.f32 %v47_v16, 0.0  ;;  %s187_s9 = scalar_lea.vmem %s158_s8, 32  ;;  %p192_p1 = scmp.lt.s32.totalorder %s158_s8, %s158_s8 }
   0x9   :  { %p188_p0 = scmp.ne.s32.totalorder %s158_s8, %s187_s9  ;;  %p193_p2 = scmp.lt.s32.totalorder %s187_s9, %s187_s9 }
   0xa   :  { %v53_v21 = vsel %vm52_vm1, %v48_v17, 0.0  ;;  %v54_v22 = vsel %vm52_vm1, %v49_v18, 0.0  ;;  %v62_v23 = vsel %vm52_vm1, %v50_v19, 0.0  ;;  %v63_v24 = vsel %vm52_vm1, %v51_v20, 0.0 }
   0xb   :  { %v55_v25 = vadd.f32 %v54_v22, %v53_v21  ;;  %v64_v26 = vadd.f32 %v63_v24, %v62_v23  ;;  %p194_p3 = por %p193_p2, %p192_p1 }
   0xd   :  { %v56_v27 = vrot.slane %v55_v25, 4  ;;  %v65_v28 = vrot.slane %v64_v26, 4  ;;  %p195_p4 = pnand %p194_p3, %p188_p0 }
   0xf   :  { %v57_v29 = vadd.f32 %v56_v27, %v55_v25  ;;  %v66_v30 = vadd.f32 %v65_v28, %v64_v26 }
  0x11   :  { %v58_v31 = vrot.slane %v57_v29, 2  ;;  %v67_v32 = vrot.slane %v66_v30, 2 }
  0x13   :  { %v59_v33 = vadd.f32 %v58_v31, %v57_v29  ;;  %v68_v34 = vadd.f32 %v67_v32, %v66_v30 }
  0x15   :  { %v60_v35 = vrot.slane %v59_v33, 1  ;;  %v69_v36 = vrot.slane %v68_v34, 1 }
  0x17   :  { %v61_v37 = vadd.f32 %v60_v35, %v59_v33  ;;  %v70_v38 = vadd.f32 %v69_v36, %v68_v34 }
  0x19   :  { %v72_v39 = vmul.f32 0.0625, %v61_v37  ;;  %v73_v40 = vmul.f32 0.0625, %v70_v38 }
  0x1b   :  { %v74_v41 = vpack.c.bf16 %v72_v39, %v72_v39  ;;  %v75_v42 = vpack.c.bf16 %v73_v40, %v73_v40 }
  0x1d   :  { %v89_v43 = vunpack.c.l.b16 %v74_v41  ;;  %v90_v44 = vunpack.c.l.b16 %v75_v42 }
  0x1f   :  { %v92_v45 = vsel %vm91_vm2, %v90_v44, %v89_v43 }
  0x20   :  { %v93_v46 = vpack.c.b16 %v92_v45, %v92_v45 }
  0x22   :  { %179 = vmatmul.mubr.msk.bf16.vlgmr.msra.gmra.mrb[0].mxu0 %vm52_vm1, %v93_v46 }
  0xf5   :  { %v143_v48 = vpop.f32.mrb[0].mxu0 }
  0xf6   :  { %v144_v49 = vadd.f32 %v167_v47, %v143_v48  ;;  %v180_v50 = vpop.f32.mrb[1].mxu0 }
  0xf7   :  { %v146_v51 = vpop.f32.mrb[2].mxu0 }
  0xf8   :  { %v181_v52 = vpop.f32.mrb[3].mxu0  ;;  %150 = vst.msk [vmem:[#allocation2] sm:$0x3] %vm149_vm3, %v144_v49 }
  0xf9   :  { %198 = shalt.err (!%p195_p4)
}
  0xfa   :  { %s199_s4 = scalar_lea.hbm %s293_s5, 32 }
  0xfb   :  { %p200_p5 = scmp.ne.s32.totalorder %s293_s5, %s199_s4  ;;  %p203_p6 = scmp.lt.u32.totalorder %s199_s4, %s293_s5 }
  0xfd   :  { %p205_p7 = pnand %p203_p6, %p200_p5 }
  0xff   :  { %208 = shalt.err (!%p205_p7)
}
 0x100   :  { %160 = dma.vmem_to_hbm [thread:$0]  %s158_s8, 32, %s293_s5, [#allocation3]  }
 0x101   :  { %209 = dma.done.wait [#allocation3], 32  }
 0x102   :  { %210 = vsyncadd [#allocation3], 4294967264 }
 0x103   :  { %164 = vsyncpa [#allocation3], 1 }

</bundles_post_ra>
